<compile_context>
chip_gen: v7x
topology: tpu7x:2x2x1
jax: 0.10.0
libtpu: 0.0.40
codegen_flags: <defaults>
</compile_context>

<pallas_src>
from functools import partial

import numpy as np
import jax
import jax.numpy as jnp
from jax.experimental import pallas as pl
from jax.experimental.pallas import tpu as pltpu


def _pick_row_tile(h, cap=64):
    """Largest divisor of h that is <= cap (falls back to h)."""
    if h <= cap:
        return h
    for t in range(cap, 0, -1):
        if h % t == 0:
            return t
    return h


# ----------------------- fused conv3x3 + BatchNorm + ReLU -----------------------

def _conv3x3_bn_act_kernel(x_ref, w_ref, s_ref, b_ref, o_ref, *, th, W, C, Cout, relu):
    """One (batch, row-tile) step of a 3x3 'same' convolution with fused epilogue.

    x_ref : (1, 1, th+2, W+2, C)  zero-padded input rows incl. 1-row halo (bf16)
    w_ref : (9, C, Cout)          filter taps, tap index = ky*3 + kx (bf16)
    s_ref : (1, Cout)             folded BatchNorm scale (f32)
    b_ref : (1, Cout)             folded BatchNorm bias  (f32)
    o_ref : (1, 1, th*W, Cout)    output rows (f32)
    """
    x = x_ref[0, 0]                                         # (th+2, W+2, C)
    acc = jnp.zeros((th * W, Cout), jnp.float32)
    for ky in range(3):
        for kx in range(3):
            patch = x[ky:ky + th, kx:kx + W, :].reshape(th * W, C)
            acc = acc + jnp.dot(patch, w_ref[ky * 3 + kx],
                                preferred_element_type=jnp.float32)
    y = acc * s_ref[...] + b_ref[...]                       # fused BN epilogue
    if relu:
        y = jnp.maximum(y, 0.0)
    o_ref[0, 0] = y.astype(o_ref.dtype)


def conv3x3_bn_relu(x, w, scale, bias, *, relu=True,
                    compute_dtype=jnp.bfloat16, max_tile_rows=64):
    """relu(conv3x3(x, pad=1, bias=False) * scale + bias) on NHWC activations."""
    B, H, W, C = x.shape
    KH, KW, C2, Cout = w.shape
    assert (KH, KW) == (3, 3) and C2 == C

    th = _pick_row_tile(H, max_tile_rows)
    n_h = H // th

    xp = jnp.pad(x, ((0, 0), (1, 1), (1, 1), (0, 0)))
    if n_h == 1:
        x_t = xp[:, None]                                   # (B, 1, H+2, W+2, C)
    else:
        rows = jnp.arange(n_h)[:, None] * th + jnp.arange(th + 2)[None, :]
        x_t = xp[:, rows]                                   # (B, n_h, th+2, W+2, C)
    x_t = x_t.astype(compute_dtype)

    w_r = w.reshape(9, C, Cout).astype(compute_dtype)
    s_r = scale.reshape(1, Cout).astype(jnp.float32)
    b_r = bias.reshape(1, Cout).astype(jnp.float32)

    out = pl.pallas_call(
        partial(_conv3x3_bn_act_kernel, th=th, W=W, C=C, Cout=Cout, relu=relu),
        out_shape=jax.ShapeDtypeStruct((B, n_h, th * W, Cout), jnp.float32),
        grid_spec=pltpu.PrefetchScalarGridSpec(
            num_scalar_prefetch=0,
            grid=(B, n_h),
            in_specs=[
                pl.BlockSpec((1, 1, th + 2, W + 2, C), lambda b, i: (b, i, 0, 0, 0)),
                pl.BlockSpec((9, C, Cout), lambda b, i: (0, 0, 0)),
                pl.BlockSpec((1, Cout), lambda b, i: (0, 0)),
                pl.BlockSpec((1, Cout), lambda b, i: (0, 0)),
            ],
            out_specs=pl.BlockSpec((1, 1, th * W, Cout), lambda b, i: (b, i, 0, 0)),
        ),
        compiler_params=pltpu.CompilerParams(
            dimension_semantics=("parallel", "parallel")),
    )(x_t, w_r, s_r, b_r)
    return out.reshape(B, H, W, Cout)


# --------------------- bilinear x2 upsample (align_corners=False) ---------------------

def _upsample2x_kernel(x_ref, o_ref, *, th, W):
    """One (batch, row-tile) step of a 2x bilinear upsample (half-pixel centers).

    x_ref : (1, 1, th+2, W, C)      input rows with 1-row edge-clamped halo
    o_ref : (1, 1, th, 2, W, 2*C)   dim 3 = output-row parity,
                                    channel block (j // C) = output-col parity
    """
    x = x_ref[0, 0].astype(jnp.float32)                     # (th+2, W, C)
    xm, xc, xp_ = x[0:th], x[1:th + 1], x[2:th + 2]
    rows_even = 0.25 * xm + 0.75 * xc                       # output rows 2k
    rows_odd = 0.75 * xc + 0.25 * xp_                       # output rows 2k+1

    def cols(t):
        tm = jnp.concatenate([t[:, :1], t[:, :-1]], axis=1)     # col w-1 (clamped)
        tp = jnp.concatenate([t[:, 1:], t[:, -1:]], axis=1)     # col w+1 (clamped)
        even = 0.25 * tm + 0.75 * t                             # output col 2w
        odd = 0.75 * t + 0.25 * tp                              # output col 2w+1
        return jnp.concatenate([even, odd], axis=-1)            # (th, W, 2C)

    o_ref[0, 0, :, 0, :, :] = cols(rows_even)
    o_ref[0, 0, :, 1, :, :] = cols(rows_odd)


def upsample2x_bilinear(x, *, max_tile_rows=64):
    """NHWC equivalent of F.interpolate(scale_factor=2, mode='bilinear',
    align_corners=False)."""
    B, H, W, C = x.shape
    th = _pick_row_tile(H, max_tile_rows)
    n_h = H // th

    rows = jnp.clip(jnp.arange(n_h)[:, None] * th + jnp.arange(-1, th + 1)[None, :],
                    0, H - 1)
    x_t = x[:, rows]                                        # (B, n_h, th+2, W, C)

    out = pl.pallas_call(
        partial(_upsample2x_kernel, th=th, W=W),
        out_shape=jax.ShapeDtypeStruct((B, n_h, th, 2, W, 2 * C), jnp.float32),
        grid_spec=pltpu.PrefetchScalarGridSpec(
            num_scalar_prefetch=0,
            grid=(B, n_h),
            in_specs=[pl.BlockSpec((1, 1, th + 2, W, C),
                                   lambda b, i: (b, i, 0, 0, 0))],
            out_specs=pl.BlockSpec((1, 1, th, 2, W, 2 * C),
                                   lambda b, i: (b, i, 0, 0, 0, 0)),
        ),
        compiler_params=pltpu.CompilerParams(
            dimension_semantics=("parallel", "parallel")),
    )(x_t)
    # (B, n_h, th, 2, W, 2C) -> (B, 2H, 2W, C) is a contiguous (free) reshape.
    return out.reshape(B, 2 * H, 2 * W, C)


# ----------------------------------- UnetBlock -----------------------------------

def _fold_bn(bn, eps=1e-5):
    """Fold eval-mode BatchNorm into a per-channel affine (scale, bias)."""
    scale = bn["gamma"] / jnp.sqrt(bn["var"] + eps)
    bias = bn["beta"] - bn["mean"] * scale
    return scale, bias


def unet_block_forward(x_nchw, params, *, upsample=False):
    """UnetBlock.forward: relu(bn1(conv1(x))) -> [bilinear x2] -> relu(bn2(conv2(.)))."""
    # TODO(synk): BatchNorm is evaluated in inference mode (folded running
    # statistics); training-mode batch statistics are not implemented.
    x = jnp.transpose(x_nchw, (0, 2, 3, 1)).astype(jnp.float32)   # NCHW -> NHWC
    s1, b1 = _fold_bn(params["bn1"])
    out = conv3x3_bn_relu(x, params["conv1_w"], s1, b1, relu=True)
    if upsample:
        out = upsample2x_bilinear(out)
    s2, b2 = _fold_bn(params["bn2"])
    out = conv3x3_bn_relu(out, params["conv2_w"], s2, b2, relu=True)
    return jnp.transpose(out, (0, 3, 1, 2))                       # NHWC -> NCHW


def init_params(key, ni, nf):
    """Random parameters. Conv weights are stored as (KH, KW, Cin, Cout); a
    PyTorch weight (Cout, Cin, KH, KW) maps via w.transpose(2, 3, 1, 0)."""
    k1, k2, kg1, kb1, kg2, kb2 = jax.random.split(key, 6)

    def bn(kg, kb, c):
        return {"gamma": 1.0 + 0.1 * jax.random.normal(kg, (c,), jnp.float32),
                "beta": 0.1 * jax.random.normal(kb, (c,), jnp.float32),
                "mean": jnp.zeros((c,), jnp.float32),
                "var": jnp.ones((c,), jnp.float32)}

    return {
        "conv1_w": jax.random.normal(k1, (3, 3, ni, ni), jnp.float32) / np.sqrt(9 * ni),
        "bn1": bn(kg1, kb1, ni),
        "conv2_w": jax.random.normal(k2, (3, 3, ni, nf), jnp.float32) / np.sqrt(9 * ni),
        "bn2": bn(kg2, kb2, nf),
    }


if __name__ == "__main__":
    B, NI, NF, H, W = 2, 32, 32, 16, 16
    key = jax.random.PRNGKey(0)
    kx, kp = jax.random.split(key)
    x = jax.random.normal(kx, (B, NI, H, W), jnp.float32)   # NCHW (PyTorch layout)
    params = init_params(kp, NI, NF)

    fwd = jax.jit(partial(unet_block_forward, upsample=True))
    out = jax.block_until_ready(fwd(x, params))

    assert out.shape == (B, NF, 2 * H, 2 * W), out.shape
    assert bool(jnp.all(jnp.isfinite(out)))
    print("KERNEL_OK")
</pallas_src>

<mosaic_0001>
module attributes {stable_mosaic.version = 11 : i64} {
  func.func @_conv3x3_bn_act_kernel(%arg0: i32, %arg1: i32, %arg2: memref<1x1x18x18x32xbf16, #tpu.memory_space<vmem>>, %arg3: memref<9x32x32xbf16, #tpu.memory_space<vmem>>, %arg4: memref<1x32xf32, #tpu.memory_space<vmem>>, %arg5: memref<1x32xf32, #tpu.memory_space<vmem>>, %arg6: memref<1x1x256x32xf32, #tpu.memory_space<vmem>>) attributes {dimension_semantics = [#tpu.dimension_semantics<parallel>, #tpu.dimension_semantics<parallel>], iteration_bounds = array<i64: 2, 1>, scalar_prefetch = 0 : i64, scratch_operands = 0 : i64, tpu.core_type = #tpu.core_type<tc>, window_params = [{transform_indices = @transform_0, window_bounds = array<i64: 1, 1, 18, 18, 32>}, {pipeline_mode = #tpu.pipeline_mode<synchronous>, transform_indices = @transform_1, window_bounds = array<i64: 9, 32, 32>}, {pipeline_mode = #tpu.pipeline_mode<synchronous>, transform_indices = @transform_2, window_bounds = array<i64: 1, 32>}, {pipeline_mode = #tpu.pipeline_mode<synchronous>, transform_indices = @transform_3, window_bounds = array<i64: 1, 32>}, {transform_indices = @transform_4, window_bounds = array<i64: 1, 1, 256, 32>}]} {
    %c0 = arith.constant 0 : index
    %c0_0 = arith.constant 0 : index
    %c0_1 = arith.constant 0 : index
    %c0_2 = arith.constant 0 : index
    %c0_3 = arith.constant 0 : index
    %0 = vector.load %arg2[%c0, %c0_0, %c0_1, %c0_2, %c0_3] : memref<1x1x18x18x32xbf16, #tpu.memory_space<vmem>>, vector<1x1x18x18x32xbf16>
    %1 = vector.shape_cast %0 : vector<1x1x18x18x32xbf16> to vector<18x18x32xbf16>
    %cst = arith.constant 0.000000e+00 : f32
    %2 = vector.broadcast %cst : f32 to vector<256x32xf32>
    %3 = vector.extract_strided_slice %1 {offsets = [0, 0, 0], sizes = [16, 16, 32], strides = [1, 1, 1]} : vector<18x18x32xbf16> to vector<16x16x32xbf16>
    %4 = vector.shape_cast %3 : vector<16x16x32xbf16> to vector<256x32xbf16>
    %c0_4 = arith.constant 0 : index
    %c0_5 = arith.constant 0 : index
    %c0_6 = arith.constant 0 : index
    %5 = vector.load %arg3[%c0_4, %c0_5, %c0_6] : memref<9x32x32xbf16, #tpu.memory_space<vmem>>, vector<1x32x32xbf16>
    %6 = vector.shape_cast %5 : vector<1x32x32xbf16> to vector<32x32xbf16>
    %cst_7 = arith.constant dense<0.000000e+00> : vector<256x32xf32>
    %7 = tpu.matmul %4, %6, %cst_7 {dimension_numbers = #tpu.dot_dimension_numbers<[1], [0], [0], [1], [0, 0, 1, 1], [], []>} : vector<256x32xbf16>, vector<32x32xbf16>, vector<256x32xf32> -> vector<256x32xf32>
    %8 = arith.addf %2, %7 : vector<256x32xf32>
    %9 = vector.extract_strided_slice %1 {offsets = [0, 1, 0], sizes = [16, 16, 32], strides = [1, 1, 1]} : vector<18x18x32xbf16> to vector<16x16x32xbf16>
    %10 = vector.shape_cast %9 : vector<16x16x32xbf16> to vector<256x32xbf16>
    %c1 = arith.constant 1 : index
    %c0_8 = arith.constant 0 : index
    %c0_9 = arith.constant 0 : index
    %11 = vector.load %arg3[%c1, %c0_8, %c0_9] : memref<9x32x32xbf16, #tpu.memory_space<vmem>>, vector<1x32x32xbf16>
    %12 = vector.shape_cast %11 : vector<1x32x32xbf16> to vector<32x32xbf16>
    %cst_10 = arith.constant dense<0.000000e+00> : vector<256x32xf32>
    %13 = tpu.matmul %10, %12, %cst_10 {dimension_numbers = #tpu.dot_dimension_numbers<[1], [0], [0], [1], [0, 0, 1, 1], [], []>} : vector<256x32xbf16>, vector<32x32xbf16>, vector<256x32xf32> -> vector<256x32xf32>
    %14 = arith.addf %8, %13 : vector<256x32xf32>
    %15 = vector.extract_strided_slice %1 {offsets = [0, 2, 0], sizes = [16, 16, 32], strides = [1, 1, 1]} : vector<18x18x32xbf16> to vector<16x16x32xbf16>
    %16 = vector.shape_cast %15 : vector<16x16x32xbf16> to vector<256x32xbf16>
    %c2 = arith.constant 2 : index
    %c0_11 = arith.constant 0 : index
    %c0_12 = arith.constant 0 : index
    %17 = vector.load %arg3[%c2, %c0_11, %c0_12] : memref<9x32x32xbf16, #tpu.memory_space<vmem>>, vector<1x32x32xbf16>
    %18 = vector.shape_cast %17 : vector<1x32x32xbf16> to vector<32x32xbf16>
    %cst_13 = arith.constant dense<0.000000e+00> : vector<256x32xf32>
    %19 = tpu.matmul %16, %18, %cst_13 {dimension_numbers = #tpu.dot_dimension_numbers<[1], [0], [0], [1], [0, 0, 1, 1], [], []>} : vector<256x32xbf16>, vector<32x32xbf16>, vector<256x32xf32> -> vector<256x32xf32>
    %20 = arith.addf %14, %19 : vector<256x32xf32>
    %21 = vector.extract_strided_slice %1 {offsets = [1, 0, 0], sizes = [16, 16, 32], strides = [1, 1, 1]} : vector<18x18x32xbf16> to vector<16x16x32xbf16>
    %22 = vector.shape_cast %21 : vector<16x16x32xbf16> to vector<256x32xbf16>
    %c3 = arith.constant 3 : index
    %c0_14 = arith.constant 0 : index
    %c0_15 = arith.constant 0 : index
    %23 = vector.load %arg3[%c3, %c0_14, %c0_15] : memref<9x32x32xbf16, #tpu.memory_space<vmem>>, vector<1x32x32xbf16>
    %24 = vector.shape_cast %23 : vector<1x32x32xbf16> to vector<32x32xbf16>
    %cst_16 = arith.constant dense<0.000000e+00> : vector<256x32xf32>
    %25 = tpu.matmul %22, %24, %cst_16 {dimension_numbers = #tpu.dot_dimension_numbers<[1], [0], [0], [1], [0, 0, 1, 1], [], []>} : vector<256x32xbf16>, vector<32x32xbf16>, vector<256x32xf32> -> vector<256x32xf32>
    %26 = arith.addf %20, %25 : vector<256x32xf32>
    %27 = vector.extract_strided_slice %1 {offsets = [1, 1, 0], sizes = [16, 16, 32], strides = [1, 1, 1]} : vector<18x18x32xbf16> to vector<16x16x32xbf16>
    %28 = vector.shape_cast %27 : vector<16x16x32xbf16> to vector<256x32xbf16>
    %c4 = arith.constant 4 : index
    %c0_17 = arith.constant 0 : index
    %c0_18 = arith.constant 0 : index
    %29 = vector.load %arg3[%c4, %c0_17, %c0_18] : memref<9x32x32xbf16, #tpu.memory_space<vmem>>, vector<1x32x32xbf16>
    %30 = vector.shape_cast %29 : vector<1x32x32xbf16> to vector<32x32xbf16>
    %cst_19 = arith.constant dense<0.000000e+00> : vector<256x32xf32>
    %31 = tpu.matmul %28, %30, %cst_19 {dimension_numbers = #tpu.dot_dimension_numbers<[1], [0], [0], [1], [0, 0, 1, 1], [], []>} : vector<256x32xbf16>, vector<32x32xbf16>, vector<256x32xf32> -> vector<256x32xf32>
    %32 = arith.addf %26, %31 : vector<256x32xf32>
    %33 = vector.extract_strided_slice %1 {offsets = [1, 2, 0], sizes = [16, 16, 32], strides = [1, 1, 1]} : vector<18x18x32xbf16> to vector<16x16x32xbf16>
    %34 = vector.shape_cast %33 : vector<16x16x32xbf16> to vector<256x32xbf16>
    %c5 = arith.constant 5 : index
    %c0_20 = arith.constant 0 : index
    %c0_21 = arith.constant 0 : index
    %35 = vector.load %arg3[%c5, %c0_20, %c0_21] : memref<9x32x32xbf16, #tpu.memory_space<vmem>>, vector<1x32x32xbf16>
    %36 = vector.shape_cast %35 : vector<1x32x32xbf16> to vector<32x32xbf16>
    %cst_22 = arith.constant dense<0.000000e+00> : vector<256x32xf32>
    %37 = tpu.matmul %34, %36, %cst_22 {dimension_numbers = #tpu.dot_dimension_numbers<[1], [0], [0], [1], [0, 0, 1, 1], [], []>} : vector<256x32xbf16>, vector<32x32xbf16>, vector<256x32xf32> -> vector<256x32xf32>
    %38 = arith.addf %32, %37 : vector<256x32xf32>
    %39 = vector.extract_strided_slice %1 {offsets = [2, 0, 0], sizes = [16, 16, 32], strides = [1, 1, 1]} : vector<18x18x32xbf16> to vector<16x16x32xbf16>
    %40 = vector.shape_cast %39 : vector<16x16x32xbf16> to vector<256x32xbf16>
    %c6 = arith.constant 6 : index
    %c0_23 = arith.constant 0 : index
    %c0_24 = arith.constant 0 : index
    %41 = vector.load %arg3[%c6, %c0_23, %c0_24] : memref<9x32x32xbf16, #tpu.memory_space<vmem>>, vector<1x32x32xbf16>
    %42 = vector.shape_cast %41 : vector<1x32x32xbf16> to vector<32x32xbf16>
    %cst_25 = arith.constant dense<0.000000e+00> : vector<256x32xf32>
    %43 = tpu.matmul %40, %42, %cst_25 {dimension_numbers = #tpu.dot_dimension_numbers<[1], [0], [0], [1], [0, 0, 1, 1], [], []>} : vector<256x32xbf16>, vector<32x32xbf16>, vector<256x32xf32> -> vector<256x32xf32>
    %44 = arith.addf %38, %43 : vector<256x32xf32>
    %45 = vector.extract_strided_slice %1 {offsets = [2, 1, 0], sizes = [16, 16, 32], strides = [1, 1, 1]} : vector<18x18x32xbf16> to vector<16x16x32xbf16>
    %46 = vector.shape_cast %45 : vector<16x16x32xbf16> to vector<256x32xbf16>
    %c7 = arith.constant 7 : index
    %c0_26 = arith.constant 0 : index
    %c0_27 = arith.constant 0 : index
    %47 = vector.load %arg3[%c7, %c0_26, %c0_27] : memref<9x32x32xbf16, #tpu.memory_space<vmem>>, vector<1x32x32xbf16>
    %48 = vector.shape_cast %47 : vector<1x32x32xbf16> to vector<32x32xbf16>
    %cst_28 = arith.constant dense<0.000000e+00> : vector<256x32xf32>
    %49 = tpu.matmul %46, %48, %cst_28 {dimension_numbers = #tpu.dot_dimension_numbers<[1], [0], [0], [1], [0, 0, 1, 1], [], []>} : vector<256x32xbf16>, vector<32x32xbf16>, vector<256x32xf32> -> vector<256x32xf32>
    %50 = arith.addf %44, %49 : vector<256x32xf32>
    %51 = vector.extract_strided_slice %1 {offsets = [2, 2, 0], sizes = [16, 16, 32], strides = [1, 1, 1]} : vector<18x18x32xbf16> to vector<16x16x32xbf16>
    %52 = vector.shape_cast %51 : vector<16x16x32xbf16> to vector<256x32xbf16>
    %c8 = arith.constant 8 : index
    %c0_29 = arith.constant 0 : index
    %c0_30 = arith.constant 0 : index
    %53 = vector.load %arg3[%c8, %c0_29, %c0_30] : memref<9x32x32xbf16, #tpu.memory_space<vmem>>, vector<1x32x32xbf16>
    %54 = vector.shape_cast %53 : vector<1x32x32xbf16> to vector<32x32xbf16>
    %cst_31 = arith.constant dense<0.000000e+00> : vector<256x32xf32>
    %55 = tpu.matmul %52, %54, %cst_31 {dimension_numbers = #tpu.dot_dimension_numbers<[1], [0], [0], [1], [0, 0, 1, 1], [], []>} : vector<256x32xbf16>, vector<32x32xbf16>, vector<256x32xf32> -> vector<256x32xf32>
    %56 = arith.addf %50, %55 : vector<256x32xf32>
    %c0_32 = arith.constant 0 : index
    %c0_33 = arith.constant 0 : index
    %57 = vector.load %arg4[%c0_32, %c0_33] : memref<1x32xf32, #tpu.memory_space<vmem>>, vector<1x32xf32>
    %58 = vector.broadcast %57 : vector<1x32xf32> to vector<256x32xf32>
    %59 = arith.mulf %56, %58 : vector<256x32xf32>
    %c0_34 = arith.constant 0 : index
    %c0_35 = arith.constant 0 : index
    %60 = vector.load %arg5[%c0_34, %c0_35] : memref<1x32xf32, #tpu.memory_space<vmem>>, vector<1x32xf32>
    %61 = vector.broadcast %60 : vector<1x32xf32> to vector<256x32xf32>
    %62 = arith.addf %59, %61 : vector<256x32xf32>
    %cst_36 = arith.constant 0.000000e+00 : f32
    %63 = vector.broadcast %cst_36 : f32 to vector<256x32xf32>
    %64 = arith.maximumf %62, %63 : vector<256x32xf32>
    %c0_37 = arith.constant 0 : index
    %c0_38 = arith.constant 0 : index
    %c0_39 = arith.constant 0 : index
    %c0_40 = arith.constant 0 : index
    %65 = vector.load %arg6[%c0_37, %c0_38, %c0_39, %c0_40] : memref<1x1x256x32xf32, #tpu.memory_space<vmem>>, vector<1x1x256x32xf32>
    %66 = vector.shape_cast %65 : vector<1x1x256x32xf32> to vector<256x32xf32>
    %67 = vector.shape_cast %64 : vector<256x32xf32> to vector<1x1x256x32xf32>
    tpu.vector_store %arg6[%c0_37, %c0_38, %c0_39, %c0_40], %67 {strides = array<i32>} : memref<1x1x256x32xf32, #tpu.memory_space<vmem>>, vector<1x1x256x32xf32>,
    return
  }
  func.func @transform_0(%arg0: i32, %arg1: i32) -> (i32, i32, i32, i32, i32) {
    %c0_i32 = arith.constant 0 : i32
    %c0_i32_0 = arith.constant 0 : i32
    %c0_i32_1 = arith.constant 0 : i32
    %c0_i32_2 = arith.constant 0 : i32
    return %arg0, %arg1, %c0_i32, %c0_i32_0, %c0_i32_1 : i32, i32, i32, i32, i32
  }
  func.func @transform_1(%arg0: i32, %arg1: i32) -> (i32, i32, i32) {
    %c0_i32 = arith.constant 0 : i32
    %c0_i32_0 = arith.constant 0 : i32
    %c0_i32_1 = arith.constant 0 : i32
    %c0_i32_2 = arith.constant 0 : i32
    return %c0_i32, %c0_i32_0, %c0_i32_1 : i32, i32, i32
  }
  func.func @transform_2(%arg0: i32, %arg1: i32) -> (i32, i32) {
    %c0_i32 = arith.constant 0 : i32
    %c0_i32_0 = arith.constant 0 : i32
    %c0_i32_1 = arith.constant 0 : i32
    return %c0_i32, %c0_i32_0 : i32, i32
  }
  func.func @transform_3(%arg0: i32, %arg1: i32) -> (i32, i32) {
    %c0_i32 = arith.constant 0 : i32
    %c0_i32_0 = arith.constant 0 : i32
    %c0_i32_1 = arith.constant 0 : i32
    return %c0_i32, %c0_i32_0 : i32, i32
  }
  func.func @transform_4(%arg0: i32, %arg1: i32) -> (i32, i32, i32, i32) {
    %c0_i32 = arith.constant 0 : i32
    %c0_i32_0 = arith.constant 0 : i32
    %c0_i32_1 = arith.constant 0 : i32
    return %arg0, %arg1, %c0_i32, %c0_i32_0 : i32, i32, i32, i32
  }
}

module attributes {stable_mosaic.version = 11 : i64} {
  func.func @_upsample2x_kernel(%arg0: i32, %arg1: i32, %arg2: memref<1x1x18x16x32xf32, #tpu.memory_space<vmem>>, %arg3: memref<1x1x16x2x16x64xf32, #tpu.memory_space<vmem>>) attributes {dimension_semantics = [#tpu.dimension_semantics<parallel>, #tpu.dimension_semantics<parallel>], iteration_bounds = array<i64: 2, 1>, scalar_prefetch = 0 : i64, scratch_operands = 0 : i64, tpu.core_type = #tpu.core_type<tc>, window_params = [{transform_indices = @transform_0, window_bounds = array<i64: 1, 1, 18, 16, 32>}, {transform_indices = @transform_1, window_bounds = array<i64: 1, 1, 16, 2, 16, 64>}]} {
    %c0 = arith.constant 0 : index
    %c0_0 = arith.constant 0 : index
    %c0_1 = arith.constant 0 : index
    %c0_2 = arith.constant 0 : index
    %c0_3 = arith.constant 0 : index
    %0 = vector.load %arg2[%c0, %c0_0, %c0_1, %c0_2, %c0_3] : memref<1x1x18x16x32xf32, #tpu.memory_space<vmem>>, vector<1x1x18x16x32xf32>
    %1 = vector.shape_cast %0 : vector<1x1x18x16x32xf32> to vector<18x16x32xf32>
    %2 = vector.extract_strided_slice %1 {offsets = [0, 0, 0], sizes = [16, 16, 32], strides = [1, 1, 1]} : vector<18x16x32xf32> to vector<16x16x32xf32>
    %3 = vector.extract_strided_slice %1 {offsets = [1, 0, 0], sizes = [16, 16, 32], strides = [1, 1, 1]} : vector<18x16x32xf32> to vector<16x16x32xf32>
    %4 = vector.extract_strided_slice %1 {offsets = [2, 0, 0], sizes = [16, 16, 32], strides = [1, 1, 1]} : vector<18x16x32xf32> to vector<16x16x32xf32>
    %cst = arith.constant 2.500000e-01 : f32
    %5 = vector.broadcast %cst : f32 to vector<16x16x32xf32>
    %6 = arith.mulf %5, %2 : vector<16x16x32xf32>
    %cst_4 = arith.constant 7.500000e-01 : f32
    %7 = vector.broadcast %cst_4 : f32 to vector<16x16x32xf32>
    %8 = arith.mulf %7, %3 : vector<16x16x32xf32>
    %9 = arith.addf %6, %8 : vector<16x16x32xf32>
    %cst_5 = arith.constant 7.500000e-01 : f32
    %10 = vector.broadcast %cst_5 : f32 to vector<16x16x32xf32>
    %11 = arith.mulf %10, %3 : vector<16x16x32xf32>
    %cst_6 = arith.constant 2.500000e-01 : f32
    %12 = vector.broadcast %cst_6 : f32 to vector<16x16x32xf32>
    %13 = arith.mulf %12, %4 : vector<16x16x32xf32>
    %14 = arith.addf %11, %13 : vector<16x16x32xf32>
    %15 = vector.extract_strided_slice %9 {offsets = [0, 0, 0], sizes = [16, 1, 32], strides = [1, 1, 1]} : vector<16x16x32xf32> to vector<16x1x32xf32>
    %16 = vector.extract_strided_slice %9 {offsets = [0, 0, 0], sizes = [16, 15, 32], strides = [1, 1, 1]} : vector<16x16x32xf32> to vector<16x15x32xf32>
    %17 = tpu.concatenate %15, %16 in 1 : vector<16x1x32xf32>, vector<16x15x32xf32> -> vector<16x16x32xf32>
    %18 = vector.extract_strided_slice %9 {offsets = [0, 1, 0], sizes = [16, 15, 32], strides = [1, 1, 1]} : vector<16x16x32xf32> to vector<16x15x32xf32>
    %19 = vector.extract_strided_slice %9 {offsets = [0, 15, 0], sizes = [16, 1, 32], strides = [1, 1, 1]} : vector<16x16x32xf32> to vector<16x1x32xf32>
    %20 = tpu.concatenate %18, %19 in 1 : vector<16x15x32xf32>, vector<16x1x32xf32> -> vector<16x16x32xf32>
    %cst_7 = arith.constant 2.500000e-01 : f32
    %21 = vector.broadcast %cst_7 : f32 to vector<16x16x32xf32>
    %22 = arith.mulf %21, %17 : vector<16x16x32xf32>
    %cst_8 = arith.constant 7.500000e-01 : f32
    %23 = vector.broadcast %cst_8 : f32 to vector<16x16x32xf32>
    %24 = arith.mulf %23, %9 : vector<16x16x32xf32>
    %25 = arith.addf %22, %24 : vector<16x16x32xf32>
    %cst_9 = arith.constant 7.500000e-01 : f32
    %26 = vector.broadcast %cst_9 : f32 to vector<16x16x32xf32>
    %27 = arith.mulf %26, %9 : vector<16x16x32xf32>
    %cst_10 = arith.constant 2.500000e-01 : f32
    %28 = vector.broadcast %cst_10 : f32 to vector<16x16x32xf32>
    %29 = arith.mulf %28, %20 : vector<16x16x32xf32>
    %30 = arith.addf %27, %29 : vector<16x16x32xf32>
    %31 = tpu.concatenate %25, %30 in 2 : vector<16x16x32xf32>, vector<16x16x32xf32> -> vector<16x16x64xf32>
    %c0_11 = arith.constant 0 : index
    %c0_12 = arith.constant 0 : index
    %c0_13 = arith.constant 0 : index
    %c0_14 = arith.constant 0 : index
    %c0_15 = arith.constant 0 : index
    %c0_16 = arith.constant 0 : index
    %32 = vector.load %arg3[%c0_11, %c0_12, %c0_13, %c0_14, %c0_15, %c0_16] : memref<1x1x16x2x16x64xf32, #tpu.memory_space<vmem>>, vector<1x1x16x1x16x64xf32>
    %33 = vector.shape_cast %32 : vector<1x1x16x1x16x64xf32> to vector<16x16x64xf32>
    %34 = vector.shape_cast %31 : vector<16x16x64xf32> to vector<1x1x16x1x16x64xf32>
    tpu.vector_store %arg3[%c0_11, %c0_12, %c0_13, %c0_14, %c0_15, %c0_16], %34 {strides = array<i32>} : memref<1x1x16x2x16x64xf32, #tpu.memory_space<vmem>>, vector<1x1x16x1x16x64xf32>,
    %35 = vector.extract_strided_slice %14 {offsets = [0, 0, 0], sizes = [16, 1, 32], strides = [1, 1, 1]} : vector<16x16x32xf32> to vector<16x1x32xf32>
    %36 = vector.extract_strided_slice %14 {offsets = [0, 0, 0], sizes = [16, 15, 32], strides = [1, 1, 1]} : vector<16x16x32xf32> to vector<16x15x32xf32>
    %37 = tpu.concatenate %35, %36 in 1 : vector<16x1x32xf32>, vector<16x15x32xf32> -> vector<16x16x32xf32>
    %38 = vector.extract_strided_slice %14 {offsets = [0, 1, 0], sizes = [16, 15, 32], strides = [1, 1, 1]} : vector<16x16x32xf32> to vector<16x15x32xf32>
    %39 = vector.extract_strided_slice %14 {offsets = [0, 15, 0], sizes = [16, 1, 32], strides = [1, 1, 1]} : vector<16x16x32xf32> to vector<16x1x32xf32>
    %40 = tpu.concatenate %38, %39 in 1 : vector<16x15x32xf32>, vector<16x1x32xf32> -> vector<16x16x32xf32>
    %cst_17 = arith.constant 2.500000e-01 : f32
    %41 = vector.broadcast %cst_17 : f32 to vector<16x16x32xf32>
    %42 = arith.mulf %41, %37 : vector<16x16x32xf32>
    %cst_18 = arith.constant 7.500000e-01 : f32
    %43 = vector.broadcast %cst_18 : f32 to vector<16x16x32xf32>
    %44 = arith.mulf %43, %14 : vector<16x16x32xf32>
    %45 = arith.addf %42, %44 : vector<16x16x32xf32>
    %cst_19 = arith.constant 7.500000e-01 : f32
    %46 = vector.broadcast %cst_19 : f32 to vector<16x16x32xf32>
    %47 = arith.mulf %46, %14 : vector<16x16x32xf32>
    %cst_20 = arith.constant 2.500000e-01 : f32
    %48 = vector.broadcast %cst_20 : f32 to vector<16x16x32xf32>
    %49 = arith.mulf %48, %40 : vector<16x16x32xf32>
    %50 = arith.addf %47, %49 : vector<16x16x32xf32>
    %51 = tpu.concatenate %45, %50 in 2 : vector<16x16x32xf32>, vector<16x16x32xf32> -> vector<16x16x64xf32>
    %c0_21 = arith.constant 0 : index
    %c0_22 = arith.constant 0 : index
    %c0_23 = arith.constant 0 : index
    %c1 = arith.constant 1 : index
    %c0_24 = arith.constant 0 : index
    %c0_25 = arith.constant 0 : index
    %52 = vector.load %arg3[%c0_21, %c0_22, %c0_23, %c1, %c0_24, %c0_25] : memref<1x1x16x2x16x64xf32, #tpu.memory_space<vmem>>, vector<1x1x16x1x16x64xf32>
    %53 = vector.shape_cast %52 : vector<1x1x16x1x16x64xf32> to vector<16x16x64xf32>
    %54 = vector.shape_cast %51 : vector<16x16x64xf32> to vector<1x1x16x1x16x64xf32>
    tpu.vector_store %arg3[%c0_21, %c0_22, %c0_23, %c1, %c0_24, %c0_25], %54 {strides = array<i32>} : memref<1x1x16x2x16x64xf32, #tpu.memory_space<vmem>>, vector<1x1x16x1x16x64xf32>,
    return
  }
  func.func @transform_0(%arg0: i32, %arg1: i32) -> (i32, i32, i32, i32, i32) {
    %c0_i32 = arith.constant 0 : i32
    %c0_i32_0 = arith.constant 0 : i32
    %c0_i32_1 = arith.constant 0 : i32
    %c0_i32_2 = arith.constant 0 : i32
    return %arg0, %arg1, %c0_i32, %c0_i32_0, %c0_i32_1 : i32, i32, i32, i32, i32
  }
  func.func @transform_1(%arg0: i32, %arg1: i32) -> (i32, i32, i32, i32, i32, i32) {
    %c0_i32 = arith.constant 0 : i32
    %c0_i32_0 = arith.constant 0 : i32
    %c0_i32_1 = arith.constant 0 : i32
    %c0_i32_2 = arith.constant 0 : i32
    %c0_i32_3 = arith.constant 0 : i32
    return %arg0, %arg1, %c0_i32, %c0_i32_0, %c0_i32_1, %c0_i32_2 : i32, i32, i32, i32, i32, i32
  }
}

module attributes {stable_mosaic.version = 11 : i64} {
  func.func @_conv3x3_bn_act_kernel(%arg0: i32, %arg1: i32, %arg2: memref<1x1x34x34x32xbf16, #tpu.memory_space<vmem>>, %arg3: memref<9x32x32xbf16, #tpu.memory_space<vmem>>, %arg4: memref<1x32xf32, #tpu.memory_space<vmem>>, %arg5: memref<1x32xf32, #tpu.memory_space<vmem>>, %arg6: memref<1x1x1024x32xf32, #tpu.memory_space<vmem>>) attributes {dimension_semantics = [#tpu.dimension_semantics<parallel>, #tpu.dimension_semantics<parallel>], iteration_bounds = array<i64: 2, 1>, scalar_prefetch = 0 : i64, scratch_operands = 0 : i64, tpu.core_type = #tpu.core_type<tc>, window_params = [{transform_indices = @transform_0, window_bounds = array<i64: 1, 1, 34, 34, 32>}, {pipeline_mode = #tpu.pipeline_mode<synchronous>, transform_indices = @transform_1, window_bounds = array<i64: 9, 32, 32>}, {pipeline_mode = #tpu.pipeline_mode<synchronous>, transform_indices = @transform_2, window_bounds = array<i64: 1, 32>}, {pipeline_mode = #tpu.pipeline_mode<synchronous>, transform_indices = @transform_3, window_bounds = array<i64: 1, 32>}, {transform_indices = @transform_4, window_bounds = array<i64: 1, 1, 1024, 32>}]} {
    %c0 = arith.constant 0 : index
    %c0_0 = arith.constant 0 : index
    %c0_1 = arith.constant 0 : index
    %c0_2 = arith.constant 0 : index
    %c0_3 = arith.constant 0 : index
    %0 = vector.load %arg2[%c0, %c0_0, %c0_1, %c0_2, %c0_3] : memref<1x1x34x34x32xbf16, #tpu.memory_space<vmem>>, vector<1x1x34x34x32xbf16>
    %1 = vector.shape_cast %0 : vector<1x1x34x34x32xbf16> to vector<34x34x32xbf16>
    %cst = arith.constant 0.000000e+00 : f32
    %2 = vector.broadcast %cst : f32 to vector<1024x32xf32>
    %3 = vector.extract_strided_slice %1 {offsets = [0, 0, 0], sizes = [32, 32, 32], strides = [1, 1, 1]} : vector<34x34x32xbf16> to vector<32x32x32xbf16>
    %4 = vector.shape_cast %3 : vector<32x32x32xbf16> to vector<1024x32xbf16>
    %c0_4 = arith.constant 0 : index
    %c0_5 = arith.constant 0 : index
    %c0_6 = arith.constant 0 : index
    %5 = vector.load %arg3[%c0_4, %c0_5, %c0_6] : memref<9x32x32xbf16, #tpu.memory_space<vmem>>, vector<1x32x32xbf16>
    %6 = vector.shape_cast %5 : vector<1x32x32xbf16> to vector<32x32xbf16>
    %cst_7 = arith.constant dense<0.000000e+00> : vector<1024x32xf32>
    %7 = tpu.matmul %4, %6, %cst_7 {dimension_numbers = #tpu.dot_dimension_numbers<[1], [0], [0], [1], [0, 0, 1, 1], [], []>} : vector<1024x32xbf16>, vector<32x32xbf16>, vector<1024x32xf32> -> vector<1024x32xf32>
    %8 = arith.addf %2, %7 : vector<1024x32xf32>
    %9 = vector.extract_strided_slice %1 {offsets = [0, 1, 0], sizes = [32, 32, 32], strides = [1, 1, 1]} : vector<34x34x32xbf16> to vector<32x32x32xbf16>
    %10 = vector.shape_cast %9 : vector<32x32x32xbf16> to vector<1024x32xbf16>
    %c1 = arith.constant 1 : index
    %c0_8 = arith.constant 0 : index
    %c0_9 = arith.constant 0 : index
    %11 = vector.load %arg3[%c1, %c0_8, %c0_9] : memref<9x32x32xbf16, #tpu.memory_space<vmem>>, vector<1x32x32xbf16>
    %12 = vector.shape_cast %11 : vector<1x32x32xbf16> to vector<32x32xbf16>
    %cst_10 = arith.constant dense<0.000000e+00> : vector<1024x32xf32>
    %13 = tpu.matmul %10, %12, %cst_10 {dimension_numbers = #tpu.dot_dimension_numbers<[1], [0], [0], [1], [0, 0, 1, 1], [], []>} : vector<1024x32xbf16>, vector<32x32xbf16>, vector<1024x32xf32> -> vector<1024x32xf32>
    %14 = arith.addf %8, %13 : vector<1024x32xf32>
    %15 = vector.extract_strided_slice %1 {offsets = [0, 2, 0], sizes = [32, 32, 32], strides = [1, 1, 1]} : vector<34x34x32xbf16> to vector<32x32x32xbf16>
    %16 = vector.shape_cast %15 : vector<32x32x32xbf16> to vector<1024x32xbf16>
    %c2 = arith.constant 2 : index
    %c0_11 = arith.constant 0 : index
    %c0_12 = arith.constant 0 : index
    %17 = vector.load %arg3[%c2, %c0_11, %c0_12] : memref<9x32x32xbf16, #tpu.memory_space<vmem>>, vector<1x32x32xbf16>
    %18 = vector.shape_cast %17 : vector<1x32x32xbf16> to vector<32x32xbf16>
    %cst_13 = arith.constant dense<0.000000e+00> : vector<1024x32xf32>
    %19 = tpu.matmul %16, %18, %cst_13 {dimension_numbers = #tpu.dot_dimension_numbers<[1], [0], [0], [1], [0, 0, 1, 1], [], []>} : vector<1024x32xbf16>, vector<32x32xbf16>, vector<1024x32xf32> -> vector<1024x32xf32>
    %20 = arith.addf %14, %19 : vector<1024x32xf32>
    %21 = vector.extract_strided_slice %1 {offsets = [1, 0, 0], sizes = [32, 32, 32], strides = [1, 1, 1]} : vector<34x34x32xbf16> to vector<32x32x32xbf16>
    %22 = vector.shape_cast %21 : vector<32x32x32xbf16> to vector<1024x32xbf16>
    %c3 = arith.constant 3 : index
    %c0_14 = arith.constant 0 : index
    %c0_15 = arith.constant 0 : index
    %23 = vector.load %arg3[%c3, %c0_14, %c0_15] : memref<9x32x32xbf16, #tpu.memory_space<vmem>>, vector<1x32x32xbf16>
    %24 = vector.shape_cast %23 : vector<1x32x32xbf16> to vector<32x32xbf16>
    %cst_16 = arith.constant dense<0.000000e+00> : vector<1024x32xf32>
    %25 = tpu.matmul %22, %24, %cst_16 {dimension_numbers = #tpu.dot_dimension_numbers<[1], [0], [0], [1], [0, 0, 1, 1], [], []>} : vector<1024x32xbf16>, vector<32x32xbf16>, vector<1024x32xf32> -> vector<1024x32xf32>
    %26 = arith.addf %20, %25 : vector<1024x32xf32>
    %27 = vector.extract_strided_slice %1 {offsets = [1, 1, 0], sizes = [32, 32, 32], strides = [1, 1, 1]} : vector<34x34x32xbf16> to vector<32x32x32xbf16>
    %28 = vector.shape_cast %27 : vector<32x32x32xbf16> to vector<1024x32xbf16>
    %c4 = arith.constant 4 : index
    %c0_17 = arith.constant 0 : index
    %c0_18 = arith.constant 0 : index
    %29 = vector.load %arg3[%c4, %c0_17, %c0_18] : memref<9x32x32xbf16, #tpu.memory_space<vmem>>, vector<1x32x32xbf16>
    %30 = vector.shape_cast %29 : vector<1x32x32xbf16> to vector<32x32xbf16>
    %cst_19 = arith.constant dense<0.000000e+00> : vector<1024x32xf32>
    %31 = tpu.matmul %28, %30, %cst_19 {dimension_numbers = #tpu.dot_dimension_numbers<[1], [0], [0], [1], [0, 0, 1, 1], [], []>} : vector<1024x32xbf16>, vector<32x32xbf16>, vector<1024x32xf32> -> vector<1024x32xf32>
    %32 = arith.addf %26, %31 : vector<1024x32xf32>
    %33 = vector.extract_strided_slice %1 {offsets = [1, 2, 0], sizes = [32, 32, 32], strides = [1, 1, 1]} : vector<34x34x32xbf16> to vector<32x32x32xbf16>
    %34 = vector.shape_cast %33 : vector<32x32x32xbf16> to vector<1024x32xbf16>
    %c5 = arith.constant 5 : index
    %c0_20 = arith.constant 0 : index
    %c0_21 = arith.constant 0 : index
    %35 = vector.load %arg3[%c5, %c0_20, %c0_21] : memref<9x32x32xbf16, #tpu.memory_space<vmem>>, vector<1x32x32xbf16>
    %36 = vector.shape_cast %35 : vector<1x32x32xbf16> to vector<32x32xbf16>
    %cst_22 = arith.constant dense<0.000000e+00> : vector<1024x32xf32>
    %37 = tpu.matmul %34, %36, %cst_22 {dimension_numbers = #tpu.dot_dimension_numbers<[1], [0], [0], [1], [0, 0, 1, 1], [], []>} : vector<1024x32xbf16>, vector<32x32xbf16>, vector<1024x32xf32> -> vector<1024x32xf32>
    %38 = arith.addf %32, %37 : vector<1024x32xf32>
    %39 = vector.extract_strided_slice %1 {offsets = [2, 0, 0], sizes = [32, 32, 32], strides = [1, 1, 1]} : vector<34x34x32xbf16> to vector<32x32x32xbf16>
    %40 = vector.shape_cast %39 : vector<32x32x32xbf16> to vector<1024x32xbf16>
    %c6 = arith.constant 6 : index
    %c0_23 = arith.constant 0 : index
    %c0_24 = arith.constant 0 : index
    %41 = vector.load %arg3[%c6, %c0_23, %c0_24] : memref<9x32x32xbf16, #tpu.memory_space<vmem>>, vector<1x32x32xbf16>
    %42 = vector.shape_cast %41 : vector<1x32x32xbf16> to vector<32x32xbf16>
    %cst_25 = arith.constant dense<0.000000e+00> : vector<1024x32xf32>
    %43 = tpu.matmul %40, %42, %cst_25 {dimension_numbers = #tpu.dot_dimension_numbers<[1], [0], [0], [1], [0, 0, 1, 1], [], []>} : vector<1024x32xbf16>, vector<32x32xbf16>, vector<1024x32xf32> -> vector<1024x32xf32>
    %44 = arith.addf %38, %43 : vector<1024x32xf32>
    %45 = vector.extract_strided_slice %1 {offsets = [2, 1, 0], sizes = [32, 32, 32], strides = [1, 1, 1]} : vector<34x34x32xbf16> to vector<32x32x32xbf16>
    %46 = vector.shape_cast %45 : vector<32x32x32xbf16> to vector<1024x32xbf16>
    %c7 = arith.constant 7 : index
    %c0_26 = arith.constant 0 : index
    %c0_27 = arith.constant 0 : index
    %47 = vector.load %arg3[%c7, %c0_26, %c0_27] : memref<9x32x32xbf16, #tpu.memory_space<vmem>>, vector<1x32x32xbf16>
    %48 = vector.shape_cast %47 : vector<1x32x32xbf16> to vector<32x32xbf16>
    %cst_28 = arith.constant dense<0.000000e+00> : vector<1024x32xf32>
    %49 = tpu.matmul %46, %48, %cst_28 {dimension_numbers = #tpu.dot_dimension_numbers<[1], [0], [0], [1], [0, 0, 1, 1], [], []>} : vector<1024x32xbf16>, vector<32x32xbf16>, vector<1024x32xf32> -> vector<1024x32xf32>
    %50 = arith.addf %44, %49 : vector<1024x32xf32>
    %51 = vector.extract_strided_slice %1 {offsets = [2, 2, 0], sizes = [32, 32, 32], strides = [1, 1, 1]} : vector<34x34x32xbf16> to vector<32x32x32xbf16>
    %52 = vector.shape_cast %51 : vector<32x32x32xbf16> to vector<1024x32xbf16>
    %c8 = arith.constant 8 : index
    %c0_29 = arith.constant 0 : index
    %c0_30 = arith.constant 0 : index
    %53 = vector.load %arg3[%c8, %c0_29, %c0_30] : memref<9x32x32xbf16, #tpu.memory_space<vmem>>, vector<1x32x32xbf16>
    %54 = vector.shape_cast %53 : vector<1x32x32xbf16> to vector<32x32xbf16>
    %cst_31 = arith.constant dense<0.000000e+00> : vector<1024x32xf32>
    %55 = tpu.matmul %52, %54, %cst_31 {dimension_numbers = #tpu.dot_dimension_numbers<[1], [0], [0], [1], [0, 0, 1, 1], [], []>} : vector<1024x32xbf16>, vector<32x32xbf16>, vector<1024x32xf32> -> vector<1024x32xf32>
    %56 = arith.addf %50, %55 : vector<1024x32xf32>
    %c0_32 = arith.constant 0 : index
    %c0_33 = arith.constant 0 : index
    %57 = vector.load %arg4[%c0_32, %c0_33] : memref<1x32xf32, #tpu.memory_space<vmem>>, vector<1x32xf32>
    %58 = vector.broadcast %57 : vector<1x32xf32> to vector<1024x32xf32>
    %59 = arith.mulf %56, %58 : vector<1024x32xf32>
    %c0_34 = arith.constant 0 : index
    %c0_35 = arith.constant 0 : index
    %60 = vector.load %arg5[%c0_34, %c0_35] : memref<1x32xf32, #tpu.memory_space<vmem>>, vector<1x32xf32>
    %61 = vector.broadcast %60 : vector<1x32xf32> to vector<1024x32xf32>
    %62 = arith.addf %59, %61 : vector<1024x32xf32>
    %cst_36 = arith.constant 0.000000e+00 : f32
    %63 = vector.broadcast %cst_36 : f32 to vector<1024x32xf32>
    %64 = arith.maximumf %62, %63 : vector<1024x32xf32>
    %c0_37 = arith.constant 0 : index
    %c0_38 = arith.constant 0 : index
    %c0_39 = arith.constant 0 : index
    %c0_40 = arith.constant 0 : index
    %65 = vector.load %arg6[%c0_37, %c0_38, %c0_39, %c0_40] : memref<1x1x1024x32xf32, #tpu.memory_space<vmem>>, vector<1x1x1024x32xf32>
    %66 = vector.shape_cast %65 : vector<1x1x1024x32xf32> to vector<1024x32xf32>
    %67 = vector.shape_cast %64 : vector<1024x32xf32> to vector<1x1x1024x32xf32>
    tpu.vector_store %arg6[%c0_37, %c0_38, %c0_39, %c0_40], %67 {strides = array<i32>} : memref<1x1x1024x32xf32, #tpu.memory_space<vmem>>, vector<1x1x1024x32xf32>,
    return
  }
  func.func @transform_0(%arg0: i32, %arg1: i32) -> (i32, i32, i32, i32, i32) {
    %c0_i32 = arith.constant 0 : i32
    %c0_i32_0 = arith.constant 0 : i32
    %c0_i32_1 = arith.constant 0 : i32
    %c0_i32_2 = arith.constant 0 : i32
    return %arg0, %arg1, %c0_i32, %c0_i32_0, %c0_i32_1 : i32, i32, i32, i32, i32
  }
  func.func @transform_1(%arg0: i32, %arg1: i32) -> (i32, i32, i32) {
    %c0_i32 = arith.constant 0 : i32
    %c0_i32_0 = arith.constant 0 : i32
    %c0_i32_1 = arith.constant 0 : i32
    %c0_i32_2 = arith.constant 0 : i32
    return %c0_i32, %c0_i32_0, %c0_i32_1 : i32, i32, i32
  }
  func.func @transform_2(%arg0: i32, %arg1: i32) -> (i32, i32) {
    %c0_i32 = arith.constant 0 : i32
    %c0_i32_0 = arith.constant 0 : i32
    %c0_i32_1 = arith.constant 0 : i32
    return %c0_i32, %c0_i32_0 : i32, i32
  }
  func.func @transform_3(%arg0: i32, %arg1: i32) -> (i32, i32) {
    %c0_i32 = arith.constant 0 : i32
    %c0_i32_0 = arith.constant 0 : i32
    %c0_i32_1 = arith.constant 0 : i32
    return %c0_i32, %c0_i32_0 : i32, i32
  }
  func.func @transform_4(%arg0: i32, %arg1: i32) -> (i32, i32, i32, i32) {
    %c0_i32 = arith.constant 0 : i32
    %c0_i32_0 = arith.constant 0 : i32
    %c0_i32_1 = arith.constant 0 : i32
    return %arg0, %arg1, %c0_i32, %c0_i32_0 : i32, i32, i32, i32
  }
}

</mosaic_0001>

<bundles_post_ra>
// kernel: unet_block_forward.4
= control target key start
LH: loop header
LB: loop body
LE: loop exit
PB: predicated region body
PF: predicated region fallthrough
CT: control target
= control target key end

     0   :  { %s1674_s6 = smov 0   ;;  %s1676_s7 = smov 0   ;;  %s3036_s0 = inlined_call_operand.vmem [shape: f32[2,1,18,16,32], index: 0, kind: input, shape index: {}]   ;;  %s3037_s1 = inlined_call_operand.vmem [shape: f32[2,1,16,2,16,64], index: 1, kind: output, shape index: {}]  }
   0x1   :  { %s1678_s8 = smov 0  }
   0x2 LB: > { %s23_s9 = sadd.s32 1, %s1657_s7  ;;  %p1574_p0 = scmp.ge.s32.totalorder %s1661_s8, 1  ;;  %s1661_s8 = sphi %s1678_s8, %s11_s8   ;;  %s1657_s7 = sphi %s1676_s7, %s3376_s7   ;;  %s1653_s6 = sphi %s1674_s6, %s3375_s6  }
   0x3   : > { %p25_p1 = scmp.ge.s32.totalorder %s23_s9, 2  ;;  %p107_p2 = scmp.lt.s32.totalorder %s1661_s8, 3 }
   0x5   : > { %s3378_s9 = smov (%p25_p1, %s23_s9), 0  ;;  %p108_p3 = pnand %p1574_p0, %p107_p2 }
   0x7   : > { %111 = sbr.rel (%p108_p3) target bundleno = 275 (0x113), region = 24 }
   0xe   : > { %p135_p4 = scmp.lt.s32.totalorder %s1653_s6, 1  ;;  %vm353_vm0 = vcmask 1040384   ;;  %vm450_vm1 = vcmask 1046528   ;;  %s1663_s14 = smov 32   ;;  %vm835_vm2 = vcmask 261120   ;;  %vm868_vm3 = vcmask 523264  }
  0x10   : > { %s3380_s6 = smov (!%p135_p4, %s1653_s6), 1 }
  0x11   : > { %s1613_s10 = smul.u32 288, %s3380_s6  ;;  %s1612_s15 = sshll.u32 %s3380_s6, 9 }
  0x12   : > { %s2597_s18 = scalar_lea.vmem %s3037_s1, %s1612_s15 }
  0x13   : > { %s1698_s13 = scalar_lea.vmem %s3036_s0, %s1613_s10 }
  0x14   : > { %v155_v0 = vld [vmem:[%s1698_s13 + $0x10] sm:$0xff]  ;;  %v156_v1 = vld [vmem:[%s1698_s13 + $0x18] sm:$0xff]  ;;  %v157_v2 = vld [vmem:[%s1698_s13 + $0x20] sm:$0xff] }
  0x15   : > { %v158_v3 = vld [vmem:[%s1698_s13 + $0x28] sm:$0xff]  ;;  %v191_v4 = vmul.f32 0.25, %v155_v0  ;;  %v192_v5 = vmul.f32 0.25, %v156_v1  ;;  %v1704_v6 = vmul.f32 0.25, %v157_v2  ;;  %v1706_v7 = vmul.f32 0.75, %v157_v2  ;;  %v153_v8 = vld [vmem:[%s1698_s13] sm:$0xff] }
  0x16   : > { %v1709_v9 = vmul.f32 0.75, %v158_v3  ;;  %v154_v10 = vld [vmem:[%s1698_s13 + $0x8] sm:$0xff]  ;;  %v189_v11 = vmul.f32 0.25, %v153_v8  ;;  %v1712_v12 = vmul.f32 0.75, %v155_v0  ;;  %v1714_v13 = vmul.f32 0.75, %v156_v1  ;;  %v160_v14 = vld [vmem:[%s1698_s13 + $0x38] sm:$0xff] }
  0x17   : > { %v1718_v15 = vadd.f32 %v1706_v7, %v191_v4  ;;  %v190_v16 = vmul.f32 0.25, %v154_v10  ;;  %v1720_v17 = vmul.f32 0.25, %v158_v3  ;;  %v1722_v18 = vmul.f32 0.75, %v160_v14  ;;  %v159_v19 = vld [vmem:[%s1698_s13 + $0x30] sm:$0xff]  ;;  %v162_v48 = vld [vmem:[%s1698_s13 + $0x48] sm:$0xff]  ;;  %v161_v49 = vld [vmem:[%s1698_s13 + $0x40] sm:$0xff] }
  0x18   : > { %v1726_v20 = vadd.f32 %v1709_v9, %v192_v5  ;;  %v1729_v21 = vadd.f32 %v1712_v12, %v189_v11  ;;  %v1731_v22 = vmul.f32 0.75, %v159_v19  ;;  %v1733_v23 = vmul.f32 0.25, %v160_v14  ;;  %v164_v58 = vld [vmem:[%s1698_s13 + $0x58] sm:$0xff]  ;;  %v163_v63 = vld [vmem:[%s1698_s13 + $0x50] sm:$0xff] }
  0x19   : > { %3161 = vst [vmem:[#allocation2_spill] sm:$0xff] %v1718_v15  ;;  %v454_v24 = vrot.slane %v1718_v15, 1  ;;  %v581_v25 = vmul.f32 0.75, %v1718_v15  ;;  %v3039_v26 = vrot.slane %v1718_v15, 7  ;;  %v1739_v27 = vadd.f32 %v1714_v13, %v190_v16 }
  0x1a   : > { %3162 = vst [vmem:[#allocation3_spill] sm:$0xff] %v1726_v20  ;;  %3163 = vst [vmem:[#allocation4_spill] sm:$0xff] %v1729_v21  ;;  %v455_v28 = vrot.slane %v1726_v20, 1  ;;  %v451_v29 = vrot.slane %v1729_v21, 1  ;;  %v579_v30 = vmul.f32 0.75, %v1729_v21  ;;  %v3038_v31 = vrot.slane %v1729_v21, 7 }
  0x1b   : > { %3164 = vst [vmem:[#allocation5_spill] sm:$0xff] %v1739_v27  ;;  %v435_v32 = vsel %vm353_vm0, %v1718_v15, %v3039_v26  ;;  %v452_v33 = vrot.slane %v1739_v27, 1  ;;  %v1751_v34 = vmul.f32 0.75, %v1726_v20  ;;  %v1754_v35 = vmul.f32 0.75, %v1739_v27 }
  0x1c   : > { %v456_v36 = vsel %vm450_vm1, %v454_v24, %v455_v28  ;;  %v549_v37 = vmul.f32 0.25, %v435_v32  ;;  %v434_v38 = vsel %vm353_vm0, %v1729_v21, %v3038_v31  ;;  %v532_v39 = vsel %vm450_vm1, %v455_v28, %v1726_v20 }
  0x1d   : > { %3165 = vst [vmem:[#allocation6_spill] sm:$0xff] %v1751_v34  ;;  %3166 = vst [vmem:[#allocation7_spill] sm:$0xff] %v1754_v35  ;;  %v645_v40 = vmul.f32 0.25, %v456_v36  ;;  %v453_v41 = vsel %vm450_vm1, %v451_v29, %v452_v33  ;;  %v547_v42 = vmul.f32 0.25, %v434_v38  ;;  %v646_v43 = vmul.f32 0.25, %v532_v39 }
  0x1e   : > { %v1764_v44 = vadd.f32 %v581_v25, %v549_v37  ;;  %v643_v45 = vmul.f32 0.25, %v453_v41  ;;  %v531_v46 = vsel %vm450_vm1, %v452_v33, %v1739_v27  ;;  %v1770_v47 = vadd.f32 %v1722_v18, %v1720_v17  ;;  %v165_v41 = vld [vmem:[%s1698_s13 + $0x60] sm:$0xff] }
  0x1f   : > { %v677_v50 = vadd.f32 %v645_v40, %v581_v25  ;;  %v1774_v51 = vadd.f32 %v579_v30, %v547_v42  ;;  %v678_v52 = vadd.f32 %v646_v43, %v1751_v34  ;;  %v644_v53 = vmul.f32 0.25, %v531_v46 }
  0x20   : > { %3167 = vst [vmem:[#allocation8_spill] sm:$0xff] %v1764_v44  ;;  %3168 = vst [vmem:[#allocation9_spill] sm:$0xff] %v1770_v47  ;;  %v675_v54 = vadd.f32 %v643_v45, %v579_v30  ;;  %v458_v55 = vrot.slane %v1770_v47, 1  ;;  %v1779_v56 = vmul.f32 0.75, %v1770_v47  ;;  %v1783_v57 = vadd.f32 %v1731_v22, %v1704_v6 }
  0x21   : > { %3169 = vst [vmem:[#allocation10_spill] sm:$0xff] %v1774_v51  ;;  %743 = vrot.lane.b32.xlu1 %v677_v50, %s1663_s14  ;;  %v676_v59 = vadd.f32 %v644_v53, %v1754_v35  ;;  %v1788_v60 = vmul.f32 0.75, %v162_v48  ;;  %v1790_v61 = vmul.f32 0.25, %v159_v19  ;;  %v1792_v62 = vmul.f32 0.75, %v161_v49  ;;  %v166_v19 = vld [vmem:[%s1698_s13 + $0x68] sm:$0xff] }
  0x22   : > { %3170 = vst [vmem:[#allocation11_spill] sm:$0xff] %v1779_v56  ;;  %3171 = vst [vmem:[#allocation12_spill] sm:$0xff] %v1783_v57  ;;  %739 = vrot.lane.b32.xlu0 %v675_v54, %s1663_s14  ;;  %v533_v0 = vsel %vm450_vm1, %v458_v55, %v1770_v47  ;;  %v457_v1 = vrot.slane %v1783_v57, 1  ;;  %v1800_v2 = vmul.f32 0.75, %v1783_v57  ;;  %v1802_v3 = vmul.f32 0.25, %v162_v48  ;;  %v168_v54 = vld [vmem:[%s1698_s13 + $0x78] sm:$0xff] }
  0x23   : > { %v648_v4 = vmul.f32 0.25, %v533_v0  ;;  %v1806_v5 = vadd.f32 %v1788_v60, %v1733_v23  ;;  %v1810_v8 = vadd.f32 %v1792_v62, %v1790_v61  ;;  %v1812_v10 = vmul.f32 0.75, %v164_v58  ;;  %v167_v0 = vld [vmem:[%s1698_s13 + $0x70] sm:$0xff] }
  0x24   : > { %3172 = vst [vmem:[#allocation13_spill] sm:$0xff] %v1800_v2  ;;  %v459_v11 = vsel %vm450_vm1, %v457_v1, %v458_v55  ;;  %v1815_v14 = vmul.f32 0.25, %v161_v49  ;;  %v1817_v16 = vmul.f32 0.75, %v163_v63  ;;  %v1820_v24 = vmul.f32 0.25, %v164_v58 }
  0x25   : > { %3173 = vst [vmem:[#allocation14_spill] sm:$0xff] %v1806_v5  ;;  %3174 = vst [vmem:[#allocation15_spill] sm:$0xff] %v1810_v8  ;;  %745 = vrot.lane.b32.xlu1 %v678_v52, %s1663_s14  ;;  %v680_v25 = vadd.f32 %v648_v4, %v1779_v56  ;;  %v647_v28 = vmul.f32 0.25, %v459_v11  ;;  %v461_v29 = vrot.slane %v1806_v5, 1  ;;  %v1826_v30 = vmul.f32 0.75, %v1806_v5 }
  0x26   : > { %741 = vrot.lane.b32.xlu0 %v676_v59, %s1663_s14  ;;  %v460_v32 = vrot.slane %v1810_v8, 1  ;;  %v1831_v33 = vmul.f32 0.75, %v1810_v8  ;;  %v1835_v36 = vadd.f32 %v1812_v10, %v1802_v3  ;;  %v1839_v37 = vadd.f32 %v1817_v16, %v1815_v14 }
  0x27   : > { %3175 = vst [vmem:[#allocation16_spill] sm:$0xff] %v1826_v30  ;;  %v679_v38 = vadd.f32 %v647_v28, %v1800_v2  ;;  %v534_v39 = vsel %vm450_vm1, %v461_v29, %v1806_v5  ;;  %v1844_v40 = vmul.f32 0.75, %v166_v19  ;;  %v1847_v42 = vmul.f32 0.25, %v163_v63 }
  0x28   : > { %3176 = vst [vmem:[#allocation17_spill] sm:$0xff] %v1831_v33  ;;  %3177 = vst [vmem:[#allocation18_spill] sm:$0xff] %v1835_v36  ;;  %v650_v43 = vmul.f32 0.25, %v534_v39  ;;  %v462_v45 = vsel %vm450_vm1, %v460_v32, %v461_v29  ;;  %v464_v46 = vrot.slane %v1835_v36, 1  ;;  %v1852_v48 = vmul.f32 0.75, %v1835_v36 }
  0x29   : > { %3178 = vst [vmem:[#allocation19_spill] sm:$0xff] %v1839_v37  ;;  %749 = vrot.lane.b32.xlu1 %v680_v25, %s1663_s14  ;;  %v649_v49 = vmul.f32 0.25, %v462_v45  ;;  %v463_v50 = vrot.slane %v1839_v37, 1  ;;  %v1857_v52 = vmul.f32 0.75, %v1839_v37  ;;  %v1861_v53 = vadd.f32 %v1844_v40, %v1820_v24 }
  0x2a   : > { %3179 = vst [vmem:[#allocation20_spill] sm:$0xff] %v1852_v48  ;;  %747 = vrot.lane.b32.xlu0 %v679_v38, %s1663_s14  ;;  %v682_v55 = vadd.f32 %v650_v43, %v1826_v30  ;;  %v535_v58 = vsel %vm450_vm1, %v464_v46, %v1835_v36  ;;  %v1868_v59 = vmul.f32 0.75, %v165_v41  ;;  %v1870_v63 = vmul.f32 0.25, %v166_v19  ;;  %v170_v19 = vld [vmem:[%s1698_s13 + $0x88] sm:$0xff] }
  0x2b   : > { %3180 = vst [vmem:[#allocation21_spill] sm:$0xff] %v1857_v52  ;;  %3181 = vst [vmem:[#allocation22_spill] sm:$0xff] %v1861_v53  ;;  %v681_v1 = vadd.f32 %v649_v49, %v1831_v33  ;;  %v652_v4 = vmul.f32 0.25, %v535_v58  ;;  %v465_v11 = vsel %vm450_vm1, %v463_v50, %v464_v46  ;;  %v467_v25 = vrot.slane %v1861_v53, 1  ;;  %v169_v49 = vld [vmem:[%s1698_s13 + $0x80] sm:$0xff] }
  0x2c   : > { %v651_v28 = vmul.f32 0.25, %v465_v11  ;;  %v1877_v29 = vmul.f32 0.75, %v1861_v53  ;;  %v1881_v32 = vadd.f32 %v1868_v59, %v1847_v42  ;;  %v1883_v38 = vmul.f32 0.75, %v168_v54 }
  0x2d   : > { %753 = vrot.lane.b32.xlu1 %v682_v55, %s1663_s14  ;;  %v684_v39 = vadd.f32 %v652_v4, %v1852_v48  ;;  %v536_v43 = vsel %vm450_vm1, %v467_v25, %v1861_v53  ;;  %v1890_v45 = vmul.f32 0.25, %v165_v41  ;;  %v1892_v46 = vmul.f32 0.75, %v167_v0  ;;  %v172_v48 = vld [vmem:[%s1698_s13 + $0x98] sm:$0xff] }
  0x2e   : > { %3182 = vst [vmem:[#allocation23_spill] sm:$0xff] %v1877_v29  ;;  %3183 = vst [vmem:[#allocation24_spill] sm:$0xff] %v1881_v32  ;;  %751 = vrot.lane.b32.xlu0 %v681_v1, %s1663_s14  ;;  %v683_v50 = vadd.f32 %v651_v28, %v1857_v52  ;;  %v654_v58 = vmul.f32 0.25, %v536_v43  ;;  %v466_v11 = vrot.slane %v1881_v32, 1  ;;  %v1899_v55 = vmul.f32 0.75, %v1881_v32 }
  0x2f   : > { %v1903_v4 = vadd.f32 %v1883_v38, %v1870_v63  ;;  %v1907_v41 = vadd.f32 %v1892_v46, %v1890_v45  ;;  %v1909_v31 = vmul.f32 0.25, %v168_v54  ;;  %v1911_v26 = vmul.f32 0.75, %v170_v19 }
  0x30   : > { %3184 = vst [vmem:[#allocation25_spill] sm:$0xff] %v1899_v55  ;;  %v686_v1 = vadd.f32 %v654_v58, %v1877_v29  ;;  %v468_v28 = vsel %vm450_vm1, %v466_v11, %v467_v25  ;;  %v1915_v43 = vmul.f32 0.25, %v167_v0  ;;  %v1917_v52 = vmul.f32 0.75, %v169_v49 }
  0x31   : > { %3185 = vst [vmem:[#allocation26_spill] sm:$0xff] %v1903_v4  ;;  %3186 = vst [vmem:[#allocation27_spill] sm:$0xff] %v1907_v41  ;;  %757 = vrot.lane.b32.xlu1 %v684_v39, %s1663_s14  ;;  %v653_v33 = vmul.f32 0.25, %v468_v28  ;;  %v470_v30 = vrot.slane %v1903_v4, 1  ;;  %v1923_v54 = vmul.f32 0.75, %v1903_v4  ;;  %v469_v53 = vrot.slane %v1907_v41, 1 }
  0x32   : > { %755 = vrot.lane.b32.xlu0 %v683_v50, %s1663_s14  ;;  %v1928_v25 = vmul.f32 0.75, %v1907_v41  ;;  %v1932_v0 = vadd.f32 %v1911_v26, %v1909_v31  ;;  %v1936_v39 = vadd.f32 %v1917_v52, %v1915_v43  ;;  %v1938_v58 = vmul.f32 0.25, %v170_v19  ;;  %v171_v41 = vld [vmem:[%s1698_s13 + $0x90] sm:$0xff] }
  0x33   : > { %3187 = vst [vmem:[#allocation28_spill] sm:$0xff] %v1923_v54  ;;  %v685_v11 = vadd.f32 %v653_v33, %v1899_v55  ;;  %v537_v28 = vsel %vm450_vm1, %v470_v30, %v1903_v4  ;;  %v471_v50 = vsel %vm450_vm1, %v469_v53, %v470_v30  ;;  %v1944_v29 = vmul.f32 0.75, %v172_v48 }
  0x34   : > { %3188 = vst [vmem:[#allocation29_spill] sm:$0xff] %v1928_v25  ;;  %3189 = vst [vmem:[#allocation30_spill] sm:$0xff] %v1932_v0  ;;  %v656_v32 = vmul.f32 0.25, %v537_v28  ;;  %v655_v2 = vmul.f32 0.25, %v471_v50  ;;  %v473_v56 = vrot.slane %v1932_v0, 1  ;;  %v1949_v35 = vmul.f32 0.75, %v1932_v0 }
  0x35   : > { %3190 = vst [vmem:[#allocation31_spill] sm:$0xff] %v1936_v39  ;;  %761 = vrot.lane.b32.xlu1 %v686_v1, %s1663_s14  ;;  %v472_v33 = vrot.slane %v1936_v39, 1  ;;  %v1954_v19 = vmul.f32 0.75, %v1936_v39  ;;  %v1958_v30 = vadd.f32 %v1944_v29, %v1938_v58  ;;  %v1960_v53 = vmul.f32 0.25, %v169_v49  ;;  %v174_v28 = vld [vmem:[%s1698_s13 + $0xa8] sm:$0xff]  ;;  %v173_v39 = vld [vmem:[%s1698_s13 + $0xa0] sm:$0xff] }
  0x36   : > { %3191 = vst [vmem:[#allocation32_spill] sm:$0xff] %v1949_v35  ;;  %759 = vrot.lane.b32.xlu0 %v685_v11, %s1663_s14  ;;  %v688_v50 = vadd.f32 %v656_v32, %v1923_v54  ;;  %v687_v55 = vadd.f32 %v655_v2, %v1928_v25  ;;  %v538_v1 = vsel %vm450_vm1, %v473_v56, %v1932_v0  ;;  %v1968_v4 = vmul.f32 0.75, %v171_v41  ;;  %v176_v54 = vld [vmem:[%s1698_s13 + $0xb8] sm:$0xff]  ;;  %v175_v0 = vld [vmem:[%s1698_s13 + $0xb0] sm:$0xff] }
  0x37   : > { %3192 = vst [vmem:[#allocation33_spill] sm:$0xff] %v1954_v19  ;;  %3193 = vst [vmem:[#allocation34_spill] sm:$0xff] %v1958_v30  ;;  %v658_v51 = vmul.f32 0.25, %v538_v1  ;;  %v474_v36 = vsel %vm450_vm1, %v472_v33, %v473_v56  ;;  %v476_v49 = vrot.slane %v1958_v30, 1  ;;  %v1974_v37 = vmul.f32 0.75, %v1958_v30 }
  0x38   : > { %v657_v11 = vmul.f32 0.25, %v474_v36  ;;  %v1978_v32 = vadd.f32 %v1968_v4, %v1960_v53  ;;  %v1980_v2 = vmul.f32 0.25, %v172_v48  ;;  %v1982_v25 = vmul.f32 0.75, %v174_v28 }
  0x39   : > { %3194 = vst [vmem:[#allocation35_spill] sm:$0xff] %v1974_v37  ;;  %765 = vrot.lane.b32.xlu1 %v688_v50, %s1663_s14  ;;  %v690_v1 = vadd.f32 %v658_v51, %v1949_v35  ;;  %v539_v56 = vsel %vm450_vm1, %v476_v49, %v1958_v30  ;;  %v1989_v33 = vmul.f32 0.25, %v171_v41  ;;  %v1991_v36 = vmul.f32 0.75, %v173_v39 }
  0x3a   : > { %3195 = vst [vmem:[#allocation36_spill] sm:$0xff] %v1978_v32  ;;  %763 = vrot.lane.b32.xlu0 %v687_v55, %s1663_s14  ;;  %v689_v48 = vadd.f32 %v657_v11, %v1954_v19  ;;  %v660_v44 = vmul.f32 0.25, %v539_v56  ;;  %v475_v34 = vrot.slane %v1978_v32, 1  ;;  %v1998_v50 = vmul.f32 0.75, %v1978_v32  ;;  %v178_v32 = vld [vmem:[%s1698_s13 + $0xc8] sm:$0xff] }
  0x3b   : > { %v2002_v51 = vadd.f32 %v1982_v25, %v1980_v2  ;;  %v2006_v41 = vadd.f32 %v1991_v36, %v1989_v33  ;;  %v2008_v35 = vmul.f32 0.25, %v174_v28  ;;  %v2010_v30 = vmul.f32 0.75, %v176_v54 }
  0x3c   : > { %3196 = vst [vmem:[#allocation37_spill] sm:$0xff] %v1998_v50  ;;  %v692_v55 = vadd.f32 %v660_v44, %v1974_v37  ;;  %v477_v11 = vsel %vm450_vm1, %v475_v34, %v476_v49  ;;  %v2014_v56 = vmul.f32 0.25, %v173_v39  ;;  %v2016_v19 = vmul.f32 0.75, %v175_v0 }
  0x3d   : > { %3197 = vst [vmem:[#allocation38_spill] sm:$0xff] %v2002_v51  ;;  %3198 = vst [vmem:[#allocation39_spill] sm:$0xff] %v2006_v41  ;;  %769 = vrot.lane.b32.xlu1 %v690_v1, %s1663_s14  ;;  %v659_v5 = vmul.f32 0.25, %v477_v11  ;;  %v479_v8 = vrot.slane %v2002_v51, 1  ;;  %v2022_v28 = vmul.f32 0.75, %v2002_v51  ;;  %v478_v21 = vrot.slane %v2006_v41, 1 }
  0x3e   : > { %3199 = vst [vmem:[#allocation40_spill] sm:$0xff] %v2010_v30  ;;  %3200 = vst [vmem:[#allocation41_spill] sm:$0xff] %v2016_v19  ;;  %767 = vrot.lane.b32.xlu0 %v689_v48, %s1663_s14  ;;  %v2027_v34 = vmul.f32 0.75, %v2006_v41  ;;  %v2031_v44 = vadd.f32 %v2010_v30, %v2008_v35  ;;  %v2035_v39 = vadd.f32 %v2016_v19, %v2014_v56  ;;  %v2037_v49 = vmul.f32 0.25, %v176_v54  ;;  %v177_v41 = vld [vmem:[%s1698_s13 + $0xc0] sm:$0xff] }
  0x3f   : > { %3201 = vst [vmem:[#allocation42_spill] sm:$0xff] %v2022_v28  ;;  %v691_v1 = vadd.f32 %v659_v5, %v1998_v50  ;;  %v540_v11 = vsel %vm450_vm1, %v479_v8, %v2002_v51  ;;  %v480_v48 = vsel %vm450_vm1, %v478_v21, %v479_v8  ;;  %v2043_v37 = vmul.f32 0.75, %v178_v32 }
  0x40   : > { %3202 = vst [vmem:[#allocation43_spill] sm:$0xff] %v2027_v34  ;;  %3203 = vst [vmem:[#allocation44_spill] sm:$0xff] %v2031_v44  ;;  %v662_v47 = vmul.f32 0.25, %v540_v11  ;;  %v661_v57 = vmul.f32 0.25, %v480_v48  ;;  %v482_v15 = vrot.slane %v2031_v44, 1  ;;  %v2048_v27 = vmul.f32 0.75, %v2031_v44 }
  0x41   : > { %3204 = vst [vmem:[#allocation45_spill] sm:$0xff] %v2035_v39  ;;  %3205 = vst [vmem:[#allocation46_spill] sm:$0xff] %v2043_v37  ;;  %773 = vrot.lane.b32.xlu1 %v692_v55, %s1663_s14  ;;  %v481_v5 = vrot.slane %v2035_v39, 1  ;;  %v2053_v54 = vmul.f32 0.75, %v2035_v39  ;;  %v2057_v21 = vadd.f32 %v2043_v37, %v2037_v49  ;;  %v2059_v8 = vmul.f32 0.25, %v175_v0  ;;  %v180_v11 = vld [vmem:[%s1698_s13 + $0xd8] sm:$0xff] }
  0x42   : > { %3206 = vst [vmem:[#allocation47_spill] sm:$0xff] %v2048_v27  ;;  %771 = vrot.lane.b32.xlu0 %v691_v1, %s1663_s14  ;;  %v694_v48 = vadd.f32 %v662_v47, %v2022_v28  ;;  %v693_v50 = vadd.f32 %v661_v57, %v2027_v34  ;;  %v541_v55 = vsel %vm450_vm1, %v482_v15, %v2031_v44  ;;  %v2067_v51 = vmul.f32 0.75, %v177_v41  ;;  %v179_v39 = vld [vmem:[%s1698_s13 + $0xd0] sm:$0xff]  ;;  %v182_v28 = vld [vmem:[%s1698_s13 + $0xe8] sm:$0xff]  ;;  %v181_v44 = vld [vmem:[%s1698_s13 + $0xe0] sm:$0xff] }
  0x43   : > { %3207 = vst [vmem:[#allocation48_spill] sm:$0xff] %v2053_v54  ;;  %3208 = vst [vmem:[#allocation49_spill] sm:$0xff] %v2057_v21  ;;  %v664_v20 = vmul.f32 0.25, %v541_v55  ;;  %v483_v37 = vsel %vm450_vm1, %v481_v5, %v482_v15  ;;  %v485_v0 = vrot.slane %v2057_v21, 1  ;;  %v2073_v19 = vmul.f32 0.75, %v2057_v21 }
  0x44   : > { %3209 = vst [vmem:[#allocation50_spill] sm:$0xff] %v2067_v51  ;;  %v663_v1 = vmul.f32 0.25, %v483_v37  ;;  %v2077_v47 = vadd.f32 %v2067_v51, %v2059_v8  ;;  %v2079_v57 = vmul.f32 0.25, %v178_v32  ;;  %v2081_v34 = vmul.f32 0.75, %v180_v11 }
  0x45   : > { %3210 = vst [vmem:[#allocation51_spill] sm:$0xff] %v2073_v19  ;;  %777 = vrot.lane.b32.xlu1 %v694_v48, %s1663_s14  ;;  %v696_v55 = vadd.f32 %v664_v20, %v2048_v27  ;;  %v542_v15 = vsel %vm450_vm1, %v485_v0, %v2057_v21  ;;  %v2088_v5 = vmul.f32 0.25, %v177_v41  ;;  %v2090_v37 = vmul.f32 0.75, %v179_v39 }
  0x46   : > { %3211 = vst [vmem:[#allocation52_spill] sm:$0xff] %v2077_v47  ;;  %3212 = vst [vmem:[#allocation53_spill] sm:$0xff] %v2079_v57  ;;  %775 = vrot.lane.b32.xlu0 %v693_v50, %s1663_s14  ;;  %v695_v32 = vadd.f32 %v663_v1, %v2053_v54  ;;  %v666_v51 = vmul.f32 0.25, %v542_v15  ;;  %v484_v30 = vrot.slane %v2077_v47, 1  ;;  %v2097_v48 = vmul.f32 0.75, %v2077_v47  ;;  %v184_v47 = vld [vmem:[%s1698_s13 + $0xf8] sm:$0xff] }
  0x47   : > { %3213 = vst [vmem:[#allocation54_spill] sm:$0xff] %v2081_v34  ;;  %3214 = vst [vmem:[#allocation55_spill] sm:$0xff] %v2088_v5  ;;  %v2101_v20 = vadd.f32 %v2081_v34, %v2079_v57  ;;  %v2105_v41 = vadd.f32 %v2090_v37, %v2088_v5  ;;  %v2107_v27 = vmul.f32 0.25, %v180_v11  ;;  %v2109_v21 = vmul.f32 0.75, %v182_v28 }
  0x48   : > { %3215 = vst [vmem:[#allocation56_spill] sm:$0xff] %v2090_v37  ;;  %3216 = vst [vmem:[#allocation57_spill] sm:$0xff] %v2097_v48  ;;  %v698_v50 = vadd.f32 %v666_v51, %v2073_v19  ;;  %v486_v1 = vsel %vm450_vm1, %v484_v30, %v485_v0  ;;  %v2113_v15 = vmul.f32 0.25, %v179_v39  ;;  %v2115_v54 = vmul.f32 0.75, %v181_v44 }
  0x49   : > { %3217 = vst [vmem:[#allocation58_spill] sm:$0xff] %v2101_v20  ;;  %3218 = vst [vmem:[#allocation59_spill] sm:$0xff] %v2105_v41  ;;  %781 = vrot.lane.b32.xlu1 %v696_v55, %s1663_s14  ;;  %v665_v34 = vmul.f32 0.25, %v486_v1  ;;  %v488_v37 = vrot.slane %v2101_v20, 1  ;;  %v2121_v11 = vmul.f32 0.75, %v2101_v20  ;;  %v487_v5 = vrot.slane %v2105_v41, 1 }
  0x4a   : > { %3219 = vst [vmem:[#allocation60_spill] sm:$0xff] %v2107_v27  ;;  %3220 = vst [vmem:[#allocation61_spill] sm:$0xff] %v2109_v21  ;;  %779 = vrot.lane.b32.xlu0 %v695_v32, %s1663_s14  ;;  %v2126_v30 = vmul.f32 0.75, %v2105_v41  ;;  %v2130_v51 = vadd.f32 %v2109_v21, %v2107_v27  ;;  %v2134_v39 = vadd.f32 %v2115_v54, %v2113_v15  ;;  %v2136_v0 = vmul.f32 0.25, %v182_v28  ;;  %v183_v41 = vld [vmem:[%s1698_s13 + $0xf0] sm:$0xff] }
  0x4b   : > { %3221 = vst [vmem:[#allocation62_spill] sm:$0xff] %v2113_v15  ;;  %3222 = vst [vmem:[#allocation63_spill] sm:$0xff] %v2115_v54  ;;  %v697_v55 = vadd.f32 %v665_v34, %v2097_v48  ;;  %v543_v1 = vsel %vm450_vm1, %v488_v37, %v2101_v20  ;;  %v489_v32 = vsel %vm450_vm1, %v487_v5, %v488_v37  ;;  %v2142_v19 = vmul.f32 0.75, %v184_v47 }
  0x4c   : > { %3223 = vst [vmem:[#allocation64_spill] sm:$0xff] %v2121_v11  ;;  %3224 = vst [vmem:[#allocation65_spill] sm:$0xff] %v2126_v30  ;;  %v668_v21 = vmul.f32 0.25, %v543_v1  ;;  %v667_v27 = vmul.f32 0.25, %v489_v32  ;;  %v491_v57 = vrot.slane %v2130_v51, 1  ;;  %v2147_v54 = vmul.f32 0.75, %v2130_v51 }
  0x4d   : > { %3225 = vst [vmem:[#allocation66_spill] sm:$0xff] %v2130_v51  ;;  %3226 = vst [vmem:[#allocation67_spill] sm:$0xff] %v2134_v39  ;;  %785 = vrot.lane.b32.xlu1 %v698_v50, %s1663_s14  ;;  %v490_v28 = vrot.slane %v2134_v39, 1  ;;  %v2152_v34 = vmul.f32 0.75, %v2134_v39  ;;  %v2156_v5 = vadd.f32 %v2142_v19, %v2136_v0  ;;  %v2158_v37 = vmul.f32 0.25, %v181_v44  ;;  %v2161_v1 = vld [vmem:[%s1698_s13 + $0x108] sm:$0xff] }
  0x4e   : > { %3227 = vst [vmem:[#allocation68_spill] sm:$0xff] %v2136_v0  ;;  %3228 = vst [vmem:[#allocation69_spill] sm:$0xff] %v2142_v19  ;;  %783 = vrot.lane.b32.xlu0 %v697_v55, %s1663_s14  ;;  %v700_v32 = vadd.f32 %v668_v21, %v2121_v11  ;;  %v699_v48 = vadd.f32 %v667_v27, %v2126_v30  ;;  %v544_v50 = vsel %vm450_vm1, %v491_v57, %v2130_v51  ;;  %v2171_v39 = vld [vmem:[%s1698_s13 + $0x100] sm:$0xff] }
  0x4f   : > { %3229 = vst [vmem:[#allocation70_spill] sm:$0xff] %v2147_v54  ;;  %3230 = vst [vmem:[#allocation71_spill] sm:$0xff] %v2152_v34  ;;  %v2168_v20 = vmul.f32 0.75, %v183_v41  ;;  %v670_v15 = vmul.f32 0.25, %v544_v50  ;;  %v492_v19 = vsel %vm450_vm1, %v490_v28, %v491_v57  ;;  %v494_v44 = vrot.slane %v2156_v5, 1 }
  0x50   : > { %3231 = vst [vmem:[#allocation72_spill] sm:$0xff] %v2156_v5  ;;  %v2176_v0 = vmul.f32 0.75, %v2156_v5  ;;  %v669_v55 = vmul.f32 0.25, %v492_v19  ;;  %v2182_v27 = vmul.f32 0.25, %v184_v47  ;;  %v2185_v30 = vmul.f32 0.75, %v2161_v1 }
  0x51   : > { %3232 = vst [vmem:[#allocation73_spill] sm:$0xff] %v2168_v20  ;;  %v2180_v21 = vadd.f32 %v2168_v20, %v2158_v37  ;;  %789 = vrot.lane.b32.xlu1 %v700_v32, %s1663_s14  ;;  %v702_v50 = vadd.f32 %v670_v15, %v2147_v54  ;;  %v545_v57 = vsel %vm450_vm1, %v494_v44, %v2156_v5  ;;  %v2191_v28 = vmul.f32 0.25, %v183_v41 }
  0x52   : > { %3233 = vst [vmem:[#allocation74_spill] sm:$0xff] %v2176_v0  ;;  %v2194_v19 = vmul.f32 0.75, %v2171_v39  ;;  %787 = vrot.lane.b32.xlu0 %v699_v48, %s1663_s14  ;;  %v701_v47 = vadd.f32 %v669_v55, %v2152_v34  ;;  %v672_v11 = vmul.f32 0.25, %v545_v57  ;;  %v2204_v15 = vadd.f32 %v2185_v30, %v2182_v27 }
  0x53   : > { %v493_v51 = vrot.slane %v2180_v21, 1  ;;  %v2200_v20 = vmul.f32 0.75, %v2180_v21  ;;  %v2212_v32 = vadd.f32 %v1714_v13, %v1720_v17  ;;  %v2216_v48 = vadd.f32 %v1712_v12, %v1704_v6 }
  0x54   : > { %v2208_v41 = vadd.f32 %v2194_v19, %v2191_v28  ;;  %v704_v55 = vadd.f32 %v672_v11, %v2176_v0  ;;  %v2222_v34 = vadd.f32 %v1709_v9, %v1733_v23  ;;  %v497_v5 = vrot.slane %v2204_v15, 1 }
  0x55   : > { %3234 = vst [vmem:[#allocation75_spill] sm:$0xff] %v2200_v20  ;;  %v495_v57 = vsel %vm450_vm1, %v493_v51, %v494_v44  ;;  %793 = vrot.lane.b32.xlu1 %v702_v50, %s1663_s14  ;;  %v2229_v17 = vadd.f32 %v1706_v7, %v1790_v61  ;;  %v2233_v6 = vmul.f32 0.75, %v2204_v15  ;;  %v1030_v9 = vrot.slane %v2212_v32, 1 }
  0x56   : > { %v671_v54 = vmul.f32 0.25, %v495_v57  ;;  %v496_v13 = vrot.slane %v2208_v41, 1  ;;  %791 = vrot.lane.b32.xlu0 %v701_v47, %s1663_s14  ;;  %v2236_v12 = vmul.f32 0.75, %v2208_v41  ;;  %v1029_v23 = vrot.slane %v2216_v48, 1 }
  0x57   : > { %v546_v51 = vsel %vm450_vm1, %v497_v5, %v2204_v15  ;;  %v1109_v50 = vsel %vm450_vm1, %v1030_v9, %v2212_v32  ;;  %v2249_v57 = vmul.f32 0.75, %v2212_v32 }
  0x58   : > { %3235 = vst [vmem:[#allocation76_spill] sm:$0xff] %v2236_v12  ;;  %v703_v11 = vadd.f32 %v671_v54, %v2200_v20  ;;  %v498_v7 = vsel %vm450_vm1, %v496_v13, %v497_v5  ;;  %v674_v61 = vmul.f32 0.25, %v546_v51  ;;  %v1031_v47 = vsel %vm450_vm1, %v1029_v23, %v1030_v9 }
  0x59   : > { %v673_v44 = vmul.f32 0.25, %v498_v7  ;;  %797 = vrot.lane.b32.xlu1 %v704_v55, %s1663_s14  ;;  %v1222_v0 = vmul.f32 0.25, %v1109_v50  ;;  %v2252_v54 = vmul.f32 0.75, %v2216_v48  ;;  %v1033_v20 = vrot.slane %v2222_v34, 1 }
  0x5a   : > { %795 = vrot.lane.b32.xlu0 %v703_v11, %s1663_s14  ;;  %v706_v5 = vadd.f32 %v674_v61, %v2233_v6  ;;  %v1221_v51 = vmul.f32 0.25, %v1031_v47  ;;  %v1032_v9 = vrot.slane %v2229_v17, 1  ;;  %v2262_v23 = vmul.f32 0.75, %v2222_v34 }
  0x5b   : > { %v705_v13 = vadd.f32 %v673_v44, %v2236_v12  ;;  %v1110_v55 = vsel %vm450_vm1, %v1033_v20, %v2222_v34  ;;  %v2266_v7 = vadd.f32 %v1722_v18, %v1802_v3  ;;  %v2270_v11 = vmul.f32 0.75, %v2229_v17 }
  0x5c   : > { %v1034_v50 = vsel %vm450_vm1, %v1032_v9, %v1033_v20  ;;  %v2274_v61 = vadd.f32 %v1731_v22, %v1815_v14  ;;  %v2278_v44 = vadd.f32 %v1788_v60, %v1820_v24  ;;  %v1254_v47 = vadd.f32 %v1222_v0, %v2249_v57 }
  0x5d   : > { %801 = vrot.lane.b32.xlu1 %v706_v5, %s1663_s14  ;;  %v1224_v12 = vmul.f32 0.25, %v1110_v55  ;;  %v1036_v18 = vrot.slane %v2266_v7, 1  ;;  %v2285_v3 = vadd.f32 %v1792_v62, %v1847_v42  ;;  %v1253_v22 = vadd.f32 %v1221_v51, %v2252_v54 }
  0x5e   : > { %799 = vrot.lane.b32.xlu0 %v705_v13, %s1663_s14  ;;  %v1223_v14 = vmul.f32 0.25, %v1034_v50  ;;  %v1035_v20 = vrot.slane %v2274_v61, 1  ;;  %v1039_v60 = vrot.slane %v2278_v44, 1  ;;  %v2295_v5 = vmul.f32 0.75, %v2266_v7 }
  0x5f   : > { %v1111_v24 = vsel %vm450_vm1, %v1036_v18, %v2266_v7  ;;  %v1038_v0 = vrot.slane %v2285_v3, 1  ;;  %v1256_v42 = vadd.f32 %v1224_v12, %v2262_v23  ;;  %v2301_v13 = vmul.f32 0.75, %v2274_v61 }
  0x60   : > { %v1226_v9 = vmul.f32 0.25, %v1111_v24  ;;  %v1037_v62 = vsel %vm450_vm1, %v1035_v20, %v1036_v18  ;;  %v1112_v51 = vsel %vm450_vm1, %v1039_v60, %v2278_v44  ;;  %v2307_v55 = vadd.f32 %v1812_v10, %v1870_v63 }
  0x61   : > { %1319 = vrot.lane.b32.xlu1 %v1254_v47, %s1663_s14  ;;  %v1255_v50 = vadd.f32 %v1223_v14, %v2270_v11  ;;  %v1225_v24 = vmul.f32 0.25, %v1037_v62  ;;  %v2313_v47 = vadd.f32 %v1817_v16, %v1890_v45  ;;  %v2317_v12 = vadd.f32 %v1844_v40, %v1909_v31 }
  0x62   : > { %1317 = vrot.lane.b32.xlu0 %v1253_v22, %s1663_s14  ;;  %v2320_v18 = vmul.f32 0.75, %v2278_v44  ;;  %v1040_v20 = vsel %vm450_vm1, %v1038_v0, %v1039_v60  ;;  %v1042_v10 = vrot.slane %v2307_v55, 1  ;;  %v1258_v63 = vadd.f32 %v1226_v9, %v2295_v5 }
  0x63   : > { %v1228_v22 = vmul.f32 0.25, %v1112_v51  ;;  %v2326_v14 = vmul.f32 0.75, %v2285_v3  ;;  %v1041_v16 = vrot.slane %v2313_v47, 1  ;;  %v1045_v40 = vrot.slane %v2317_v12, 1 }
  0x64   : > { %v1113_v31 = vsel %vm450_vm1, %v1042_v10, %v2307_v55  ;;  %v2335_v45 = vadd.f32 %v1868_v59, %v1915_v43  ;;  %v2339_v60 = vadd.f32 %v1883_v38, %v1938_v58  ;;  %v1257_v0 = vadd.f32 %v1225_v24, %v2301_v13 }
  0x65   : > { %1323 = vrot.lane.b32.xlu1 %v1256_v42, %s1663_s14  ;;  %v1227_v9 = vmul.f32 0.25, %v1040_v20  ;;  %v1043_v62 = vsel %vm450_vm1, %v1041_v16, %v1042_v10  ;;  %v2346_v42 = vadd.f32 %v1892_v46, %v1960_v53  ;;  %v1260_v59 = vadd.f32 %v1228_v22, %v2320_v18 }
  0x66   : > { %1321 = vrot.lane.b32.xlu0 %v1255_v50, %s1663_s14  ;;  %v1044_v51 = vrot.slane %v2335_v45, 1  ;;  %v2351_v43 = vmul.f32 0.75, %v2307_v55  ;;  %v1230_v38 = vmul.f32 0.25, %v1113_v31  ;;  %v2355_v58 = vmul.f32 0.75, %v2313_v47 }
  0x67   : > { %v1229_v50 = vmul.f32 0.25, %v1043_v62  ;;  %v1114_v24 = vsel %vm450_vm1, %v1045_v40, %v2317_v12  ;;  %v1048_v46 = vrot.slane %v2339_v60, 1  ;;  %v1259_v53 = vadd.f32 %v1227_v9, %v2326_v14 }
  0x68   : > { %v1046_v20 = vsel %vm450_vm1, %v1044_v51, %v1045_v40  ;;  %v1047_v10 = vrot.slane %v2346_v42, 1  ;;  %v2370_v22 = vadd.f32 %v1917_v52, %v1989_v33  ;;  %v1262_v16 = vadd.f32 %v1230_v38, %v2351_v43 }
  0x69   : > { %1327 = vrot.lane.b32.xlu1 %v1258_v63, %s1663_s14  ;;  %v2366_v63 = vadd.f32 %v1911_v26, %v1980_v2  ;;  %v2374_v31 = vmul.f32 0.75, %v2317_v12  ;;  %v2377_v9 = vmul.f32 0.75, %v2335_v45  ;;  %v1261_v40 = vadd.f32 %v1229_v50, %v2355_v58 }
  0x6a   : > { %1325 = vrot.lane.b32.xlu0 %v1257_v0, %s1663_s14  ;;  %v1232_v0 = vmul.f32 0.25, %v1114_v24  ;;  %v1231_v62 = vmul.f32 0.25, %v1046_v20  ;;  %v1115_v26 = vsel %vm450_vm1, %v1048_v46, %v2339_v60  ;;  %v1049_v2 = vsel %vm450_vm1, %v1047_v10, %v1048_v46 }
  0x6b   : > { %3236 = vst [vmem:[#allocation77_spill] sm:$0xff] %v2374_v31  ;;  %3237 = vst [vmem:[#allocation78_spill] sm:$0xff] %v2377_v9  ;;  %v1051_v52 = vrot.slane %v2366_v63, 1  ;;  %v1050_v33 = vrot.slane %v2370_v22, 1  ;;  %v2389_v51 = vadd.f32 %v1944_v29, %v2008_v35  ;;  %v2397_v50 = vmul.f32 0.75, %v2339_v60 }
  0x6c   : > { %v1264_v38 = vadd.f32 %v1232_v0, %v2374_v31  ;;  %v1234_v24 = vmul.f32 0.25, %v1115_v26  ;;  %v1263_v46 = vadd.f32 %v1231_v62, %v2377_v9  ;;  %v1233_v20 = vmul.f32 0.25, %v1049_v2  ;;  %v3253_v9 = vld [vmem:[#allocation46_spill] sm:$0xff] }
  0x6d   : > { %1331 = vrot.lane.b32.xlu1 %v1260_v59, %s1663_s14  ;;  %3238 = vst [vmem:[#allocation79_spill] sm:$0xff] %v2389_v51  ;;  %v2393_v59 = vadd.f32 %v1968_v4, %v2014_v56  ;;  %3240 = vst [vmem:[#allocation81_spill] sm:$0xff] %v2397_v50  ;;  %v1116_v35 = vsel %vm450_vm1, %v1051_v52, %v2366_v63  ;;  %v2408_v29 = vadd.f32 %v1982_v25, %v2037_v49 }
  0x6e   : > { %1329 = vrot.lane.b32.xlu0 %v1259_v53, %s1663_s14  ;;  %v2400_v53 = vmul.f32 0.75, %v2346_v42  ;;  %v1052_v4 = vsel %vm450_vm1, %v1050_v33, %v1051_v52  ;;  %v1054_v56 = vrot.slane %v2389_v51, 1  ;;  %v1266_v0 = vadd.f32 %v1234_v24, %v2397_v50  ;;  %v3245_v33 = vld [vmem:[#allocation53_spill] sm:$0xff]  ;;  %v3246_v24 = vld [vmem:[#allocation40_spill] sm:$0xff] }
  0x6f   : > { %3239 = vst [vmem:[#allocation80_spill] sm:$0xff] %v2393_v59  ;;  %3242 = vst [vmem:[#allocation83_spill] sm:$0xff] %v2408_v29  ;;  %v1053_v10 = vrot.slane %v2393_v59, 1  ;;  %v2420_v62 = vmul.f32 0.75, %v2366_v63  ;;  %v1236_v26 = vmul.f32 0.25, %v1116_v35  ;;  %v2425_v49 = vmul.f32 0.75, %v2370_v22 }
  0x70   : > { %3241 = vst [vmem:[#allocation82_spill] sm:$0xff] %v2400_v53  ;;  %v1265_v25 = vadd.f32 %v1233_v20, %v2400_v53  ;;  %v1057_v52 = vrot.slane %v2408_v29, 1  ;;  %v3248_v20 = vld [vmem:[#allocation55_spill] sm:$0xff]  ;;  %v3249_v35 = vld [vmem:[#allocation41_spill] sm:$0xff]  ;;  %v2443_v50 = vmul.f32 0.75, %v2389_v51 }
  0x71   : > { %1335 = vrot.lane.b32.xlu1 %v1262_v16, %s1663_s14  ;;  %v2416_v16 = vadd.f32 %v1991_v36, %v2059_v8  ;;  %3243 = vst [vmem:[#allocation84_spill] sm:$0xff] %v2420_v62  ;;  %3244 = vst [vmem:[#allocation85_spill] sm:$0xff] %v2425_v49  ;;  %v1117_v36 = vsel %vm450_vm1, %v1054_v56, %v2389_v51  ;;  %v1055_v8 = vsel %vm450_vm1, %v1053_v10, %v1054_v56  ;;  %v3256_v51 = vld [vmem:[#allocation50_spill] sm:$0xff] }
  0x72   : > { %1333 = vrot.lane.b32.xlu0 %v1261_v40, %s1663_s14  ;;  %v1235_v40 = vmul.f32 0.25, %v1052_v4  ;;  %v2439_v53 = vadd.f32 %v3249_v35, %v3248_v20  ;;  %v1268_v4 = vadd.f32 %v1236_v26, %v2420_v62  ;;  %3250 = vst [vmem:[#allocation40_spill] sm:$0xff] %v2443_v50  ;;  %v1238_v56 = vmul.f32 0.25, %v1117_v36  ;;  %v3255_v62 = vld [vmem:[#allocation62_spill] sm:$0xff] }
  0x73   : > { %v1056_v2 = vrot.slane %v2416_v16, 1  ;;  %v1237_v10 = vmul.f32 0.25, %v1055_v8  ;;  %v2465_v8 = vmul.f32 0.75, %v2408_v29 }
  0x74   : > { %v1267_v26 = vadd.f32 %v1235_v40, %v2425_v49  ;;  %v1059_v36 = vrot.slane %v2439_v53, 1 }
  0x75   : > { %1339 = vrot.lane.b32.xlu1 %v1264_v38, %s1663_s14  ;;  %v2435_v38 = vadd.f32 %v3246_v24, %v3245_v33  ;;  %v1118_v33 = vsel %vm450_vm1, %v1057_v52, %v2408_v29  ;;  %v3252_v24 = vld [vmem:[#allocation60_spill] sm:$0xff]  ;;  %v1058_v20 = vsel %vm450_vm1, %v1056_v2, %v1057_v52  ;;  %3258 = vst [vmem:[#allocation46_spill] sm:$0xff] %v2465_v8  ;;  %v188_v29 = vld [vmem:[%s1698_s13 + $0x118] sm:$0xff] }
  0x76   : > { %1337 = vrot.lane.b32.xlu0 %v1263_v46, %s1663_s14  ;;  %v2446_v46 = vmul.f32 0.75, %v2393_v59  ;;  %v2453_v31 = vadd.f32 %v3253_v9, %v3252_v24  ;;  %v1240_v59 = vmul.f32 0.25, %v1118_v33  ;;  %v1270_v9 = vadd.f32 %v1238_v56, %v2443_v50  ;;  %v3260_v33 = vld [vmem:[#allocation68_spill] sm:$0xff]  ;;  %v3261_v24 = vld [vmem:[#allocation54_spill] sm:$0xff] }
  0x77   : > { %3247 = vst [vmem:[#allocation53_spill] sm:$0xff] %v2435_v38  ;;  %v1060_v35 = vrot.slane %v2435_v38, 1  ;;  %v1239_v40 = vmul.f32 0.25, %v1058_v20  ;;  %v3263_v50 = vld [vmem:[#allocation56_spill] sm:$0xff] }
  0x78   : > { %3251 = vst [vmem:[#allocation55_spill] sm:$0xff] %v2446_v46  ;;  %3254 = vst [vmem:[#allocation41_spill] sm:$0xff] %v2453_v31  ;;  %v1063_v52 = vrot.slane %v2453_v31, 1  ;;  %v2485_v20 = vadd.f32 %v3263_v50, %v2158_v37  ;;  %v1272_v49 = vadd.f32 %v1240_v59, %v2465_v8  ;;  %v187_v8 = vld [vmem:[%s1698_s13 + $0x110] sm:$0xff] }
  0x79   : > { %1343 = vrot.lane.b32.xlu1 %v1266_v0, %s1663_s14  ;;  %v2461_v0 = vadd.f32 %v3256_v51, %v3255_v62  ;;  %v1269_v51 = vadd.f32 %v1237_v10, %v2446_v46  ;;  %v1119_v62 = vsel %vm450_vm1, %v1060_v35, %v2435_v38  ;;  %v1061_v56 = vsel %vm450_vm1, %v1059_v36, %v1060_v35  ;;  %v3266_v10 = vld [vmem:[#allocation61_spill] sm:$0xff] }
  0x7a   : > { %1341 = vrot.lane.b32.xlu0 %v1265_v25, %s1663_s14  ;;  %v2470_v25 = vmul.f32 0.75, %v2416_v16  ;;  %3264 = vst [vmem:[#allocation68_spill] sm:$0xff] %v2485_v20  ;;  %v2493_v46 = vadd.f32 %v3266_v10, %v2182_v27  ;;  %v1242_v35 = vmul.f32 0.25, %v1119_v62  ;;  %v2499_v36 = vmul.f32 0.75, %v2439_v53 }
  0x7b   : > { %3257 = vst [vmem:[#allocation60_spill] sm:$0xff] %v2461_v0  ;;  %v1062_v2 = vrot.slane %v2461_v0, 1  ;;  %v1120_v37 = vsel %vm450_vm1, %v1063_v52, %v2453_v31  ;;  %v1241_v59 = vmul.f32 0.25, %v1061_v56  ;;  %v285_v10 = vmul.f32 0.25, %v2171_v39 }
  0x7c   : > { %3259 = vst [vmem:[#allocation62_spill] sm:$0xff] %v2470_v25  ;;  %3267 = vst [vmem:[#allocation56_spill] sm:$0xff] %v2493_v46 }
  0x7d   : > { %1347 = vrot.lane.b32.xlu1 %v1268_v4, %s1663_s14  ;;  %v2480_v4 = vadd.f32 %v3261_v24, %v3260_v33  ;;  %v1271_v33 = vadd.f32 %v1239_v40, %v2470_v25  ;;  %3268 = vst [vmem:[#allocation61_spill] sm:$0xff] %v2499_v36  ;;  %v1064_v50 = vsel %vm450_vm1, %v1062_v2, %v1063_v52  ;;  %v286_v24 = vmul.f32 0.25, %v2161_v1  ;;  %v3269_v40 = vld [vmem:[#allocation63_spill] sm:$0xff] }
  0x7e   : > { %1345 = vrot.lane.b32.xlu0 %v1267_v26, %s1663_s14  ;;  %v2489_v26 = vmul.f32 0.75, %v2435_v38  ;;  %v2510_v62 = vadd.f32 %v3269_v40, %v2191_v28  ;;  %v288_v25 = vmul.f32 0.25, %v188_v29  ;;  %v2515_v38 = vmul.f32 0.75, %v2453_v31  ;;  %v3276_v31 = vld [vmem:[#allocation3_spill] sm:$0xff] }
  0x7f   : > { %3262 = vst [vmem:[#allocation50_spill] sm:$0xff] %v2480_v4  ;;  %v1066_v27 = vrot.slane %v2480_v4, 1  ;;  %v1069_v52 = vrot.slane %v2493_v46, 1  ;;  %v2521_v2 = vmul.f32 0.75, %v2461_v0  ;;  %v1243_v56 = vmul.f32 0.25, %v1064_v50  ;;  %v3277_v0 = vld [vmem:[#allocation73_spill] sm:$0xff] }
  0x80   : > { %3265 = vst [vmem:[#allocation54_spill] sm:$0xff] %v2489_v26  ;;  %3270 = vst [vmem:[#allocation63_spill] sm:$0xff] %v2510_v62  ;;  %v1274_v1 = vadd.f32 %v1242_v35, %v2489_v26  ;;  %v2524_v28 = vadd.f32 %v288_v25, %v2185_v30  ;;  %v1273_v39 = vadd.f32 %v1241_v59, %v2499_v36  ;;  %v1068_v26 = vrot.slane %v2510_v62, 1 }
  0x81   : > { %1351 = vrot.lane.b32.xlu1 %v1270_v9, %s1663_s14  ;;  %v1065_v9 = vrot.slane %v2485_v20, 1  ;;  %3271 = vst [vmem:[#allocation86_spill] sm:$0xff] %v2515_v38  ;;  %3272 = vst [vmem:[#allocation87_spill] sm:$0xff] %v2521_v2  ;;  %v1121_v29 = vsel %vm450_vm1, %v1066_v27, %v2480_v4  ;;  %v358_v50 = vrot.slane %v3276_v31, 7  ;;  %v2537_v30 = vadd.f32 %v285_v10, %v3277_v0  ;;  %v3280_v31 = vld [vmem:[#allocation5_spill] sm:$0xff] }
  0x82   : > { %1349 = vrot.lane.b32.xlu0 %v1269_v51, %s1663_s14  ;;  %v1244_v51 = vmul.f32 0.25, %v1120_v37  ;;  %3273 = vst [vmem:[#allocation88_spill] sm:$0xff] %v2524_v28  ;;  %v3274_v37 = vld [vmem:[#allocation69_spill] sm:$0xff]  ;;  %v2553_v0 = vmul.f32 0.75, %v2485_v20 }
  0x83   : > { %v2531_v40 = vadd.f32 %v286_v24, %v3274_v37  ;;  %v1067_v35 = vsel %vm450_vm1, %v1065_v9, %v1066_v27  ;;  %3278 = vst [vmem:[#allocation3_spill] sm:$0xff] %v2537_v30  ;;  %v2548_v27 = vmul.f32 0.75, %v2480_v4  ;;  %v1246_v24 = vmul.f32 0.25, %v1121_v29  ;;  %v3283_v37 = vld [vmem:[#allocation2_spill] sm:$0xff] }
  0x84   : > { %v1276_v25 = vadd.f32 %v1244_v51, %v2515_v38  ;;  %v355_v9 = vrot.slane %v3280_v31, 7  ;;  %3281 = vst [vmem:[#allocation5_spill] sm:$0xff] %v2553_v0  ;;  %v1245_v10 = vmul.f32 0.25, %v1067_v35  ;;  %v2556_v51 = vmul.f32 0.75, %v2493_v46  ;;  %v3286_v38 = vld [vmem:[#allocation9_spill] sm:$0xff] }
  0x85   : > { %1355 = vrot.lane.b32.xlu1 %v1272_v49, %s1663_s14  ;;  %3275 = vst [vmem:[#allocation69_spill] sm:$0xff] %v2531_v40  ;;  %v287_v49 = vmul.f32 0.25, %v187_v8  ;;  %v1275_v8 = vadd.f32 %v1243_v56, %v2521_v2  ;;  %3279 = vst [vmem:[#allocation73_spill] sm:$0xff] %v2548_v27  ;;  %v1070_v56 = vsel %vm450_vm1, %v1068_v26, %v1069_v52  ;;  %v1071_v31 = vrot.slane %v2537_v30, 1  ;;  %v3288_v26 = vld [vmem:[#allocation4_spill] sm:$0xff] }
  0x86   : > { %1353 = vrot.lane.b32.xlu0 %v1271_v33, %s1663_s14  ;;  %v1122_v33 = vsel %vm450_vm1, %v1069_v52, %v2493_v46  ;;  %3282 = vst [vmem:[#allocation89_spill] sm:$0xff] %v2556_v51  ;;  %v361_v35 = vrot.slane %v3286_v38, 7  ;;  %v1278_v46 = vadd.f32 %v1246_v24, %v2548_v27  ;;  %v3289_v52 = vrot.slane %v3288_v26, 7 }
  0x87   : > { %v2543_v59 = vadd.f32 %v287_v49, %v2194_v19  ;;  %v1072_v19 = vrot.slane %v2531_v40, 1  ;;  %v3284_v49 = vrot.slane %v3283_v37, 7  ;;  %v1247_v36 = vmul.f32 0.25, %v1070_v56 }
  0x88   : > { %v356_v37 = vsel %vm353_vm0, %v3289_v52, %v355_v9  ;;  %v2584_v52 = vmul.f32 0.75, %v2531_v40  ;;  %v2606_v27 = vmul.f32 0.75, %v2524_v28 }
  0x89   : > { %1359 = vrot.lane.b32.xlu1 %v1274_v1, %s1663_s14  ;;  %v1248_v1 = vmul.f32 0.25, %v1122_v33  ;;  %v359_v29 = vsel %vm353_vm0, %v3284_v49, %v358_v50  ;;  %v2569_v33 = vmul.f32 0.75, %v2510_v62  ;;  %v1075_v50 = vrot.slane %v2524_v28, 1  ;;  %v3293_v62 = vld [vmem:[#allocation8_spill] sm:$0xff] }
  0x8a   : > { %1357 = vrot.lane.b32.xlu0 %v1273_v39, %s1663_s14  ;;  %v3285_v39 = vld [vmem:[#allocation12_spill] sm:$0xff]  ;;  %v1277_v49 = vadd.f32 %v1245_v10, %v2553_v0  ;;  %v550_v4 = vmul.f32 0.25, %v359_v29  ;;  %v1123_v38 = vsel %vm450_vm1, %v1072_v19, %v2531_v40  ;;  %v1073_v24 = vsel %vm450_vm1, %v1071_v31, %v1072_v19  ;;  %v3291_v19 = vld [vmem:[#allocation14_spill] sm:$0xff] }
  0x8b   : > { %v360_v2 = vrot.slane %v3285_v39, 7  ;;  %3287 = vst [vmem:[#allocation2_spill] sm:$0xff] %v2569_v33  ;;  %v1074_v26 = vrot.slane %v2543_v59, 1  ;;  %v548_v9 = vmul.f32 0.25, %v356_v37  ;;  %v1250_v56 = vmul.f32 0.25, %v1123_v38 }
  0x8c   : > { %v1124_v29 = vsel %vm450_vm1, %v1075_v50, %v2524_v28  ;;  %v364_v31 = vrot.slane %v3291_v19, 7  ;;  %v1249_v37 = vmul.f32 0.25, %v1073_v24  ;;  %v3296_v24 = vld [vmem:[#allocation10_spill] sm:$0xff] }
  0x8d   : > { %1363 = vrot.lane.b32.xlu1 %v1276_v25, %s1663_s14  ;;  %v1280_v25 = vadd.f32 %v1248_v1, %v2556_v51  ;;  %v436_v10 = vsel %vm353_vm0, %v3285_v39, %v360_v2  ;;  %v3290_v1 = vld [vmem:[#allocation15_spill] sm:$0xff]  ;;  %v3292_v39 = vld [vmem:[#allocation6_spill] sm:$0xff]  ;;  %v1076_v40 = vsel %vm450_vm1, %v1074_v26, %v1075_v50  ;;  %v1282_v50 = vadd.f32 %v1250_v56, %v2584_v52 }
  0x8e   : > { %1361 = vrot.lane.b32.xlu0 %v1275_v8, %s1663_s14  ;;  %v362_v8 = vsel %vm353_vm0, %v360_v2, %v361_v35  ;;  %v363_v51 = vrot.slane %v3290_v1, 7  ;;  %v1279_v2 = vadd.f32 %v1247_v36, %v2569_v33  ;;  %v2603_v35 = vmul.f32 0.75, %v2537_v30  ;;  %v3294_v33 = vld [vmem:[#allocation19_spill] sm:$0xff] }
  0x8f   : > { %v552_v0 = vmul.f32 0.25, %v362_v8  ;;  %v551_v19 = vmul.f32 0.25, %v436_v10  ;;  %v1252_v36 = vmul.f32 0.25, %v1124_v29  ;;  %v3297_v10 = vld [vmem:[#allocation7_spill] sm:$0xff]  ;;  %v2626_v29 = vmul.f32 0.75, %v2543_v59 }
  0x90   : > { %v612_v28 = vadd.f32 %v3297_v10, %v548_v9  ;;  %v1281_v26 = vadd.f32 %v1249_v37, %v2603_v35  ;;  %v3298_v9 = vld [vmem:[#allocation11_spill] sm:$0xff]  ;;  %v3301_v10 = vld [vmem:[#allocation22_spill] sm:$0xff] }
  0x91   : > { %1367 = vrot.lane.b32.xlu1 %v1278_v46, %s1663_s14  ;;  %v614_v46 = vadd.f32 %v3292_v39, %v550_v4  ;;  %v366_v4 = vrot.slane %v3294_v33, 7  ;;  %v3295_v39 = vld [vmem:[#allocation18_spill] sm:$0xff]  ;;  %v616_v56 = vadd.f32 %v3298_v9, %v552_v0  ;;  %v3303_v9 = vld [vmem:[#allocation27_spill] sm:$0xff] }
  0x92   : > { %1365 = vrot.lane.b32.xlu0 %v1277_v49, %s1663_s14  ;;  %v367_v30 = vrot.slane %v3295_v39, 7 }
  0x93   : > { %v744_v38 = vpop.permute.xlu1 %743 }
  0x94   : > { %v838_v49 = vsel %vm835_vm2, %v3293_v62, %v744_v38  ;;  %v740_v20 = vpop.permute.xlu0 %739  ;;  %v365_v62 = vsel %vm353_vm0, %v363_v51, %v364_v31  ;;  %v1251_v38 = vmul.f32 0.25, %v1076_v40  ;;  %v368_v37 = vsel %vm353_vm0, %v366_v4, %v367_v30 }
  0x95   : > { %871 = vst.msk [vmem:[%s2597_s18 + $0x20] sm:$0xff] %vm868_vm3, %v838_v49  ;;  %v836_v8 = vsel %vm835_vm2, %v3296_v24, %v740_v20  ;;  %1371 = vrot.lane.b32.xlu1 %v1280_v25, %s1663_s14  ;;  %v437_v20 = vsel %vm353_vm0, %v3290_v1, %v363_v51  ;;  %v3299_v49 = vld [vmem:[#allocation13_spill] sm:$0xff]  ;;  %v3300_v1 = vld [vmem:[#allocation24_spill] sm:$0xff]  ;;  %v438_v30 = vsel %vm353_vm0, %v3294_v33, %v366_v4 }
  0x96   : > { %869 = vst.msk [vmem:[%s2597_s18] sm:$0xff] %vm868_vm3, %v836_v8  ;;  %1369 = vrot.lane.b32.xlu0 %v1279_v2, %s1663_s14  ;;  %v615_v39 = vadd.f32 %v3299_v49, %v551_v19  ;;  %v1284_v2 = vadd.f32 %v1252_v36, %v2606_v27  ;;  %v554_v8 = vmul.f32 0.25, %v365_v62  ;;  %v553_v51 = vmul.f32 0.25, %v437_v20  ;;  %v3302_v20 = vld [vmem:[#allocation16_spill] sm:$0xff] }
  0x97   : > { %v746_v25 = vpop.permute.xlu1 %745  ;;  %v369_v0 = vrot.slane %v3300_v1, 7  ;;  %v370_v19 = vrot.slane %v3301_v10, 7  ;;  %v372_v49 = vrot.slane %v3303_v9, 7  ;;  %v555_v4 = vmul.f32 0.25, %v438_v30 }
  0x98   : > { %v839_v31 = vsel %vm835_vm2, %v614_v46, %v746_v25  ;;  %v742_v24 = vpop.permute.xlu0 %741  ;;  %v1283_v46 = vadd.f32 %v1251_v38, %v2626_v29  ;;  %v618_v25 = vadd.f32 %v3302_v20, %v554_v8  ;;  %v3305_v38 = vld [vmem:[#allocation17_spill] sm:$0xff] }
  0x99   : > { %872 = vst.msk [vmem:[%s2597_s18 + $0x28] sm:$0xff] %vm868_vm3, %v839_v31  ;;  %v837_v40 = vsel %vm835_vm2, %v612_v28, %v742_v24  ;;  %1375 = vrot.lane.b32.xlu1 %v1282_v50, %s1663_s14  ;;  %v556_v28 = vmul.f32 0.25, %v368_v37  ;;  %v3304_v31 = vld [vmem:[#allocation26_spill] sm:$0xff]  ;;  %v617_v33 = vadd.f32 %v3305_v38, %v553_v51  ;;  %v371_v37 = vsel %vm353_vm0, %v369_v0, %v370_v19  ;;  %v3309_v20 = vld [vmem:[#allocation21_spill] sm:$0xff] }
  0x9a   : > { %870 = vst.msk [vmem:[%s2597_s18 + $0x8] sm:$0xff] %vm868_vm3, %v837_v40  ;;  %1373 = vrot.lane.b32.xlu0 %v1281_v26, %s1663_s14  ;;  %v373_v24 = vrot.slane %v3304_v31, 7  ;;  %v3306_v40 = vld [vmem:[#allocation20_spill] sm:$0xff]  ;;  %v558_v51 = vmul.f32 0.25, %v371_v37  ;;  %v3308_v19 = vld [vmem:[#allocation30_spill] sm:$0xff] }
  0x9b   : > { %v750_v36 = vpop.permute.xlu1 %749  ;;  %v620_v10 = vadd.f32 %v3306_v40, %v556_v28  ;;  %v440_v28 = vsel %vm353_vm0, %v3303_v9, %v372_v49 }
  0x9c   : > { %v841_v62 = vsel %vm835_vm2, %v616_v56, %v750_v36  ;;  %v748_v50 = vpop.permute.xlu0 %747  ;;  %v439_v56 = vsel %vm353_vm0, %v3300_v1, %v369_v0  ;;  %v374_v30 = vsel %vm353_vm0, %v372_v49, %v373_v24  ;;  %v619_v1 = vadd.f32 %v3309_v20, %v555_v4 }
  0x9d   : > { %874 = vst.msk [vmem:[%s2597_s18 + $0x48] sm:$0xff] %vm868_vm3, %v841_v62  ;;  %v840_v26 = vsel %vm835_vm2, %v615_v39, %v748_v50  ;;  %1379 = vrot.lane.b32.xlu1 %v1284_v2, %s1663_s14  ;;  %v3307_v39 = vld [vmem:[#allocation31_spill] sm:$0xff]  ;;  %v376_v50 = vrot.slane %v3308_v19, 7  ;;  %v557_v0 = vmul.f32 0.25, %v439_v56  ;;  %v560_v31 = vmul.f32 0.25, %v374_v30 }
  0x9e   : > { %873 = vst.msk [vmem:[%s2597_s18 + $0x40] sm:$0xff] %vm868_vm3, %v840_v26  ;;  %1377 = vrot.lane.b32.xlu0 %v1283_v46, %s1663_s14  ;;  %v375_v36 = vrot.slane %v3307_v39, 7  ;;  %v3310_v26 = vld [vmem:[#allocation36_spill] sm:$0xff]  ;;  %v559_v49 = vmul.f32 0.25, %v440_v28 }
  0x9f   : > { %v754_v8 = vpop.permute.xlu1 %753  ;;  %v378_v24 = vrot.slane %v3310_v26, 7 }
  0xa0   : > { %v843_v2 = vsel %vm835_vm2, %v618_v25, %v754_v8  ;;  %v752_v62 = vpop.permute.xlu0 %751  ;;  %v3311_v8 = vld [vmem:[#allocation23_spill] sm:$0xff] }
  0xa1   : > { %876 = vst.msk [vmem:[%s2597_s18 + $0x68] sm:$0xff] %vm868_vm3, %v843_v2  ;;  %v842_v46 = vsel %vm835_vm2, %v617_v33, %v752_v62  ;;  %v622_v40 = vadd.f32 %v3311_v8, %v558_v51  ;;  %v377_v33 = vsel %vm353_vm0, %v375_v36, %v376_v50  ;;  %v3312_v2 = vld [vmem:[#allocation34_spill] sm:$0xff]  ;;  %v3313_v62 = vld [vmem:[#allocation25_spill] sm:$0xff]  ;;  %v3314_v51 = vld [vmem:[#allocation28_spill] sm:$0xff] }
  0xa2   : > { %875 = vst.msk [vmem:[%s2597_s18 + $0x60] sm:$0xff] %vm868_vm3, %v842_v46  ;;  %v379_v4 = vrot.slane %v3312_v2, 7  ;;  %v621_v9 = vadd.f32 %v3313_v62, %v557_v0  ;;  %v624_v19 = vadd.f32 %v3314_v51, %v560_v31  ;;  %v562_v50 = vmul.f32 0.25, %v377_v33  ;;  %v3317_v8 = vld [vmem:[#allocation29_spill] sm:$0xff] }
  0xa3   : > { %v758_v25 = vpop.permute.xlu1 %757  ;;  %v442_v31 = vsel %vm353_vm0, %v3310_v26, %v378_v24  ;;  %v3318_v2 = vld [vmem:[#allocation45_spill] sm:$0xff] }
  0xa4   : > { %v845_v38 = vsel %vm835_vm2, %v620_v10, %v758_v25  ;;  %v756_v37 = vpop.permute.xlu0 %755  ;;  %v441_v10 = vsel %vm353_vm0, %v3307_v39, %v375_v36  ;;  %v380_v25 = vsel %vm353_vm0, %v378_v24, %v379_v4  ;;  %v623_v39 = vadd.f32 %v3317_v8, %v559_v49 }
  0xa5   : > { %878 = vst.msk [vmem:[%s2597_s18 + $0x88] sm:$0xff] %vm868_vm3, %v845_v38  ;;  %v844_v56 = vsel %vm835_vm2, %v619_v1, %v756_v37  ;;  %v3315_v38 = vld [vmem:[#allocation39_spill] sm:$0xff]  ;;  %v3316_v37 = vld [vmem:[#allocation38_spill] sm:$0xff]  ;;  %v561_v36 = vmul.f32 0.25, %v441_v10  ;;  %v564_v33 = vmul.f32 0.25, %v380_v25  ;;  %v384_v4 = vrot.slane %v3318_v2, 7 }
  0xa6   : > { %877 = vst.msk [vmem:[%s2597_s18 + $0x80] sm:$0xff] %vm868_vm3, %v844_v56  ;;  %v381_v1 = vrot.slane %v3315_v38, 7  ;;  %v382_v0 = vrot.slane %v3316_v37, 7  ;;  %v563_v24 = vmul.f32 0.25, %v442_v31 }
  0xa7   : > { %v762_v30 = vpop.permute.xlu1 %761 }
  0xa8   : > { %v847_v46 = vsel %vm835_vm2, %v622_v40, %v762_v30  ;;  %v760_v20 = vpop.permute.xlu0 %759  ;;  %v3319_v30 = vld [vmem:[#allocation32_spill] sm:$0xff] }
  0xa9   : > { %880 = vst.msk [vmem:[%s2597_s18 + $0xa8] sm:$0xff] %vm868_vm3, %v847_v46  ;;  %v846_v28 = vsel %vm835_vm2, %v621_v9, %v760_v20  ;;  %v626_v51 = vadd.f32 %v3319_v30, %v562_v50  ;;  %v383_v9 = vsel %vm353_vm0, %v381_v1, %v382_v0  ;;  %v3320_v46 = vld [vmem:[#allocation44_spill] sm:$0xff]  ;;  %v3321_v20 = vld [vmem:[#allocation33_spill] sm:$0xff]  ;;  %v3322_v50 = vld [vmem:[#allocation35_spill] sm:$0xff] }
  0xaa   : > { %879 = vst.msk [vmem:[%s2597_s18 + $0xa0] sm:$0xff] %vm868_vm3, %v846_v28  ;;  %v385_v49 = vrot.slane %v3320_v46, 7  ;;  %v625_v26 = vadd.f32 %v3321_v20, %v561_v36  ;;  %v628_v37 = vadd.f32 %v3322_v50, %v564_v33  ;;  %v566_v0 = vmul.f32 0.25, %v383_v9  ;;  %v3325_v30 = vld [vmem:[#allocation37_spill] sm:$0xff]  ;;  %v3326_v9 = vld [vmem:[#allocation42_spill] sm:$0xff]  ;;  %v3327_v50 = vld [vmem:[#allocation59_spill] sm:$0xff] }
  0xab   : > { %v766_v40 = vpop.permute.xlu1 %765  ;;  %v444_v33 = vsel %vm353_vm0, %v3318_v2, %v384_v4 }
  0xac   : > { %v849_v56 = vsel %vm835_vm2, %v624_v19, %v766_v40  ;;  %v764_v62 = vpop.permute.xlu0 %763  ;;  %v443_v19 = vsel %vm353_vm0, %v3315_v38, %v381_v1  ;;  %v386_v40 = vsel %vm353_vm0, %v384_v4, %v385_v49  ;;  %v627_v38 = vadd.f32 %v3325_v30, %v563_v24 }
  0xad   : > { %882 = vst.msk [vmem:[%s2597_s18 + $0xc8] sm:$0xff] %vm868_vm3, %v849_v56  ;;  %v848_v10 = vsel %vm835_vm2, %v623_v39, %v764_v62  ;;  %v3323_v56 = vld [vmem:[#allocation52_spill] sm:$0xff]  ;;  %v3324_v62 = vld [vmem:[#allocation49_spill] sm:$0xff]  ;;  %v565_v1 = vmul.f32 0.25, %v443_v19  ;;  %v630_v46 = vadd.f32 %v3326_v9, %v566_v0  ;;  %v568_v49 = vmul.f32 0.25, %v386_v40  ;;  %v3330_v40 = vld [vmem:[#allocation47_spill] sm:$0xff] }
  0xae   : > { %881 = vst.msk [vmem:[%s2597_s18 + $0xc0] sm:$0xff] %vm868_vm3, %v848_v10  ;;  %v387_v39 = vrot.slane %v3323_v56, 7  ;;  %v388_v36 = vrot.slane %v3324_v62, 7  ;;  %v567_v4 = vmul.f32 0.25, %v444_v33  ;;  %v3331_v9 = vld [vmem:[#allocation67_spill] sm:$0xff] }
  0xaf   : > { %v770_v25 = vpop.permute.xlu1 %769  ;;  %v632_v62 = vadd.f32 %v3330_v40, %v568_v49  ;;  %v3335_v40 = vld [vmem:[#allocation72_spill] sm:$0xff] }
  0xb0   : > { %v851_v28 = vsel %vm835_vm2, %v626_v51, %v770_v25  ;;  %v768_v8 = vpop.permute.xlu0 %767  ;;  %v389_v25 = vsel %vm353_vm0, %v387_v39, %v388_v36 }
  0xb1   : > { %884 = vst.msk [vmem:[%s2597_s18 + $0xe8] sm:$0xff] %vm868_vm3, %v851_v28  ;;  %v850_v31 = vsel %vm835_vm2, %v625_v26, %v768_v8  ;;  %v390_v26 = vrot.slane %v3327_v50, 7  ;;  %v3328_v28 = vld [vmem:[#allocation58_spill] sm:$0xff]  ;;  %v3329_v8 = vld [vmem:[#allocation43_spill] sm:$0xff]  ;;  %v570_v36 = vmul.f32 0.25, %v389_v25 }
  0xb2   : > { %883 = vst.msk [vmem:[%s2597_s18 + $0xe0] sm:$0xff] %vm868_vm3, %v850_v31  ;;  %v391_v24 = vrot.slane %v3328_v28, 7  ;;  %v629_v2 = vadd.f32 %v3329_v8, %v565_v1  ;;  %v3334_v25 = vld [vmem:[#allocation51_spill] sm:$0xff] }
  0xb3   : > { %v774_v51 = vpop.permute.xlu1 %773  ;;  %v634_v28 = vadd.f32 %v3334_v25, %v570_v36 }
  0xb4   : > { %v853_v10 = vsel %vm835_vm2, %v628_v37, %v774_v51  ;;  %v772_v20 = vpop.permute.xlu0 %771  ;;  %v445_v37 = vsel %vm353_vm0, %v3323_v56, %v387_v39  ;;  %v392_v51 = vsel %vm353_vm0, %v390_v26, %v391_v24 }
  0xb5   : > { %886 = vst.msk [vmem:[%s2597_s18 + $0x108] sm:$0xff] %vm868_vm3, %v853_v10  ;;  %v852_v19 = vsel %vm835_vm2, %v627_v38, %v772_v20  ;;  %v393_v38 = vrot.slane %v3331_v9, 7  ;;  %v3332_v10 = vld [vmem:[#allocation66_spill] sm:$0xff]  ;;  %v3333_v20 = vld [vmem:[#allocation48_spill] sm:$0xff]  ;;  %v569_v39 = vmul.f32 0.25, %v445_v37  ;;  %v572_v24 = vmul.f32 0.25, %v392_v51 }
  0xb6   : > { %885 = vst.msk [vmem:[%s2597_s18 + $0x100] sm:$0xff] %vm868_vm3, %v852_v19  ;;  %v394_v1 = vrot.slane %v3332_v10, 7  ;;  %v631_v56 = vadd.f32 %v3333_v20, %v567_v4  ;;  %v397_v4 = vrot.slane %v3335_v40, 7 }
  0xb7   : > { %v778_v0 = vpop.permute.xlu1 %777 }
  0xb8   : > { %v855_v31 = vsel %vm835_vm2, %v630_v46, %v778_v0  ;;  %v776_v30 = vpop.permute.xlu0 %775  ;;  %v446_v46 = vsel %vm353_vm0, %v3327_v50, %v390_v26  ;;  %v395_v0 = vsel %vm353_vm0, %v393_v38, %v394_v1 }
  0xb9   : > { %888 = vst.msk [vmem:[%s2597_s18 + $0x128] sm:$0xff] %vm868_vm3, %v855_v31  ;;  %v854_v33 = vsel %vm835_vm2, %v629_v2, %v776_v30  ;;  %v396_v2 = vrot.slane %v2180_v21, 7  ;;  %v3336_v31 = vld [vmem:[#allocation57_spill] sm:$0xff]  ;;  %v571_v26 = vmul.f32 0.25, %v446_v46  ;;  %v3337_v30 = vld [vmem:[#allocation64_spill] sm:$0xff]  ;;  %v574_v10 = vmul.f32 0.25, %v395_v0 }
  0xba   : > { %887 = vst.msk [vmem:[%s2597_s18 + $0x120] sm:$0xff] %vm868_vm3, %v854_v33  ;;  %v633_v50 = vadd.f32 %v3336_v31, %v569_v39  ;;  %v636_v51 = vadd.f32 %v3337_v30, %v572_v24  ;;  %v400_v39 = vrot.slane %v2204_v15, 7  ;;  %v3339_v24 = vld [vmem:[#allocation70_spill] sm:$0xff] }
  0xbb   : > { %v782_v49 = vpop.permute.xlu1 %781  ;;  %v398_v20 = vsel %vm353_vm0, %v396_v2, %v397_v4  ;;  %v448_v25 = vsel %vm353_vm0, %v2180_v21, %v396_v2  ;;  %v933_v4 = vrot.slane %v2216_v48, 7 }
  0xbc   : > { %v857_v19 = vsel %vm835_vm2, %v632_v62, %v782_v49  ;;  %v780_v8 = vpop.permute.xlu0 %779  ;;  %v447_v62 = vsel %vm353_vm0, %v3331_v9, %v393_v38  ;;  %v3338_v49 = vld [vmem:[#allocation65_spill] sm:$0xff]  ;;  %v575_v2 = vmul.f32 0.25, %v448_v25 }
  0xbd   : > { %890 = vst.msk [vmem:[%s2597_s18 + $0x148] sm:$0xff] %vm868_vm3, %v857_v19  ;;  %v856_v37 = vsel %vm835_vm2, %v631_v56, %v780_v8  ;;  %v399_v56 = vrot.slane %v2208_v41, 7  ;;  %v635_v9 = vadd.f32 %v3338_v49, %v571_v26  ;;  %v573_v38 = vmul.f32 0.25, %v447_v62 }
  0xbe   : > { %889 = vst.msk [vmem:[%s2597_s18 + $0x140] sm:$0xff] %vm868_vm3, %v856_v37  ;;  %v638_v19 = vadd.f32 %v3339_v24, %v574_v10  ;;  %v576_v8 = vmul.f32 0.25, %v398_v20  ;;  %v934_v37 = vrot.slane %v2212_v32, 7  ;;  %v978_v32 = vrot.slane %v2543_v59, 7 }
  0xbf   : > { %v786_v36 = vpop.permute.xlu1 %785  ;;  %v401_v40 = vsel %vm353_vm0, %v399_v56, %v400_v39  ;;  %v449_v26 = vsel %vm353_vm0, %v2208_v41, %v399_v56  ;;  %v936_v20 = vrot.slane %v2229_v17, 7  ;;  %v937_v39 = vrot.slane %v2222_v34, 7  ;;  %v3342_v56 = vld [vmem:[#allocation75_spill] sm:$0xff] }
  0xc0   : > { %v859_v1 = vsel %vm835_vm2, %v634_v28, %v786_v36  ;;  %v784_v33 = vpop.permute.xlu0 %783  ;;  %v3341_v36 = vld [vmem:[#allocation74_spill] sm:$0xff]  ;;  %v577_v49 = vmul.f32 0.25, %v449_v26 }
  0xc1   : > { %892 = vst.msk [vmem:[%s2597_s18 + $0x168] sm:$0xff] %vm868_vm3, %v859_v1  ;;  %v858_v46 = vsel %vm835_vm2, %v633_v50, %v784_v33  ;;  %v3340_v50 = vld [vmem:[#allocation71_spill] sm:$0xff]  ;;  %v640_v30 = vadd.f32 %v3341_v36, %v576_v8  ;;  %v935_v33 = vsel %vm353_vm0, %v933_v4, %v934_v37 }
  0xc2   : > { %891 = vst.msk [vmem:[%s2597_s18 + $0x160] sm:$0xff] %vm868_vm3, %v858_v46  ;;  %v637_v21 = vadd.f32 %v3340_v50, %v573_v38  ;;  %v639_v46 = vadd.f32 %v3342_v56, %v575_v2  ;;  %v1028_v38 = vsel %vm353_vm0, %v2543_v59, %v978_v32  ;;  %v1014_v50 = vsel %vm353_vm0, %v2229_v17, %v936_v20 }
  0xc3   : > { %v790_v28 = vpop.permute.xlu1 %789  ;;  %v1155_v24 = vmul.f32 0.25, %v1028_v38  ;;  %v945_v56 = vrot.slane %v2313_v47, 7 }
  0xc4   : > { %v861_v0 = vsel %vm835_vm2, %v636_v51, %v790_v28  ;;  %v788_v15 = vpop.permute.xlu0 %787  ;;  %v578_v51 = vmul.f32 0.25, %v401_v40  ;;  %v1126_v28 = vmul.f32 0.25, %v935_v33 }
  0xc5   : > { %894 = vst.msk [vmem:[%s2597_s18 + $0x188] sm:$0xff] %vm868_vm3, %v861_v0  ;;  %v860_v31 = vsel %vm835_vm2, %v635_v9, %v788_v15  ;;  %v1013_v9 = vsel %vm353_vm0, %v2216_v48, %v933_v4  ;;  %v938_v0 = vsel %vm353_vm0, %v936_v20, %v937_v39  ;;  %v939_v15 = vrot.slane %v2274_v61, 7  ;;  %v3343_v4 = vld [vmem:[#allocation76_spill] sm:$0xff] }
  0xc6   : > { %893 = vst.msk [vmem:[%s2597_s18 + $0x180] sm:$0xff] %vm868_vm3, %v860_v31  ;;  %v642_v25 = vadd.f32 %v2233_v6, %v578_v51  ;;  %v940_v48 = vrot.slane %v2266_v7, 7  ;;  %v641_v37 = vadd.f32 %v3343_v4, %v577_v49  ;;  %v1125_v31 = vmul.f32 0.25, %v1013_v9 }
  0xc7   : > { %v794_v62 = vpop.permute.xlu1 %793  ;;  %v2820_v6 = vadd.f32 %v2626_v29, %v1155_v24  ;;  %v1190_v7 = vadd.f32 %v2249_v57, %v1126_v28  ;;  %v1128_v2 = vmul.f32 0.25, %v938_v0  ;;  %v943_v29 = vrot.slane %v2278_v44, 7 }
  0xc8   : > { %v863_v10 = vsel %vm835_vm2, %v638_v19, %v794_v62  ;;  %v792_v1 = vpop.permute.xlu0 %791  ;;  %v941_v36 = vsel %vm353_vm0, %v939_v15, %v940_v48  ;;  %v1189_v17 = vadd.f32 %v2252_v54, %v1125_v31  ;;  %v1015_v57 = vsel %vm353_vm0, %v2274_v61, %v939_v15 }
  0xc9   : > { %896 = vst.msk [vmem:[%s2597_s18 + $0x1a8] sm:$0xff] %vm868_vm3, %v863_v10  ;;  %v862_v41 = vsel %vm835_vm2, %v637_v21, %v792_v1  ;;  %v1127_v10 = vmul.f32 0.25, %v1014_v50  ;;  %v1192_v33 = vadd.f32 %v2262_v23, %v1128_v2  ;;  %v1130_v20 = vmul.f32 0.25, %v941_v36 }
  0xca   : > { %895 = vst.msk [vmem:[%s2597_s18 + $0x1a0] sm:$0xff] %vm868_vm3, %v862_v41  ;;  %v946_v54 = vrot.slane %v2307_v55, 7  ;;  %v1129_v49 = vmul.f32 0.25, %v1015_v57  ;;  %v948_v24 = vrot.slane %v2335_v45, 7  ;;  %v954_v36 = vrot.slane %v2370_v22, 7 }
  0xcb   : > { %v798_v34 = vpop.permute.xlu1 %797  ;;  %v1191_v61 = vadd.f32 %v2270_v11, %v1127_v10  ;;  %v1194_v38 = vadd.f32 %v2295_v5, %v1130_v20  ;;  %v949_v11 = vrot.slane %v2317_v12, 7  ;;  %v1017_v5 = vsel %vm353_vm0, %v2313_v47, %v945_v56  ;;  %v3345_v20 = vld [vmem:[#allocation80_spill] sm:$0xff] }
  0xcc   : > { %v865_v19 = vsel %vm835_vm2, %v640_v30, %v798_v34  ;;  %v796_v8 = vpop.permute.xlu0 %795  ;;  %v942_v30 = vrot.slane %v2285_v3, 7  ;;  %v947_v28 = vsel %vm353_vm0, %v945_v56, %v946_v54  ;;  %v1133_v50 = vmul.f32 0.25, %v1017_v5  ;;  %v3347_v56 = vld [vmem:[#allocation78_spill] sm:$0xff] }
  0xcd   : > { %898 = vst.msk [vmem:[%s2597_s18 + $0x1c8] sm:$0xff] %vm868_vm3, %v865_v19  ;;  %v864_v40 = vsel %vm835_vm2, %v639_v46, %v796_v8  ;;  %v1134_v48 = vmul.f32 0.25, %v947_v28  ;;  %v950_v4 = vsel %vm353_vm0, %v948_v24, %v949_v11  ;;  %v3349_v28 = vld [vmem:[#allocation83_spill] sm:$0xff] }
  0xce   : > { %897 = vst.msk [vmem:[%s2597_s18 + $0x1c0] sm:$0xff] %vm868_vm3, %v864_v40  ;;  %v944_v41 = vsel %vm353_vm0, %v942_v30, %v943_v29  ;;  %v1016_v23 = vsel %vm353_vm0, %v2285_v3, %v942_v30  ;;  %v1193_v3 = vadd.f32 %v2301_v13, %v1129_v49  ;;  %v952_v13 = vrot.slane %v2339_v60, 7  ;;  %v3348_v49 = vld [vmem:[#allocation81_spill] sm:$0xff] }
  0xcf   : > { %v802_v21 = vpop.permute.xlu1 %801  ;;  %v1132_v34 = vmul.f32 0.25, %v944_v41  ;;  %v1131_v8 = vmul.f32 0.25, %v1016_v23  ;;  %v1136_v2 = vmul.f32 0.25, %v950_v4 }
  0xd0   : > { %v867_v26 = vsel %vm835_vm2, %v642_v25, %v802_v21  ;;  %v800_v62 = vpop.permute.xlu0 %799 }
  0xd1   : > { %900 = vst.msk [vmem:[%s2597_s18 + $0x1e8] sm:$0xff] %vm868_vm3, %v867_v26  ;;  %v866_v51 = vsel %vm835_vm2, %v641_v37, %v800_v62  ;;  %v1196_v15 = vadd.f32 %v2320_v18, %v1132_v34  ;;  %v951_v37 = vrot.slane %v2346_v42, 7  ;;  %v1195_v47 = vadd.f32 %v2326_v14, %v1131_v8 }
  0xd2   : > { %899 = vst.msk [vmem:[%s2597_s18 + $0x1e0] sm:$0xff] %vm868_vm3, %v866_v51  ;;  %v1018_v18 = vsel %vm353_vm0, %v2335_v45, %v948_v24  ;;  %v955_v14 = vrot.slane %v2366_v63, 7  ;;  %v1197_v45 = vadd.f32 %v2355_v58, %v1133_v50  ;;  %v961_v24 = vrot.slane %v3349_v28, 7  ;;  %v3353_v50 = vld [vmem:[#allocation85_spill] sm:$0xff] }
  0xd3   : > { %v1320_v1 = vpop.permute.xlu1 %1319  ;;  %v953_v62 = vsel %vm353_vm0, %v951_v37, %v952_v13  ;;  %v1135_v29 = vmul.f32 0.25, %v1018_v18  ;;  %v3352_v13 = vld [vmem:[#allocation53_spill] sm:$0xff] }
  0xd4   : > { %v1414_v39 = vsel %vm835_vm2, %v1190_v7, %v1320_v1  ;;  %v1318_v44 = vpop.permute.xlu0 %1317  ;;  %v1198_v7 = vadd.f32 %v2351_v43, %v1134_v48  ;;  %v1019_v43 = vsel %vm353_vm0, %v2346_v42, %v951_v37  ;;  %v1138_v57 = vmul.f32 0.25, %v953_v62 }
  0xd5   : > { %1579 = vst.msk [vmem:[%s2597_s18 + $0x18] sm:$0xff] %vm868_vm3, %v1414_v39  ;;  %v1413_v46 = vsel %vm835_vm2, %v1189_v17, %v1318_v44  ;;  %v3344_v17 = vld [vmem:[#allocation77_spill] sm:$0xff]  ;;  %v957_v39 = vrot.slane %v3345_v20, 7  ;;  %v3346_v44 = vld [vmem:[#allocation79_spill] sm:$0xff]  ;;  %v1199_v42 = vadd.f32 %v3347_v56, %v1135_v29  ;;  %v1137_v54 = vmul.f32 0.25, %v1019_v43 }
  0xd6   : > { %1578 = vst.msk [vmem:[%s2597_s18 + $0x10] sm:$0xff] %vm868_vm3, %v1413_v46  ;;  %v1200_v10 = vadd.f32 %v3344_v17, %v1136_v2  ;;  %v958_v58 = vrot.slane %v3346_v44, 7  ;;  %v1020_v46 = vsel %vm353_vm0, %v2370_v22, %v954_v36  ;;  %v1202_v23 = vadd.f32 %v3348_v49, %v1138_v57  ;;  %v3356_v43 = vld [vmem:[#allocation41_spill] sm:$0xff] }
  0xd7   : > { %v1324_v9 = vpop.permute.xlu1 %1323  ;;  %v1021_v8 = vsel %vm353_vm0, %v3345_v20, %v957_v39  ;;  %v963_v37 = vrot.slane %v2439_v53, 7 }
  0xd8   : > { %v1416_v25 = vsel %vm835_vm2, %v1192_v33, %v1324_v9  ;;  %v1322_v55 = vpop.permute.xlu0 %1321  ;;  %v956_v33 = vsel %vm353_vm0, %v954_v36, %v955_v14 }
  0xd9   : > { %1581 = vst.msk [vmem:[%s2597_s18 + $0x38] sm:$0xff] %vm868_vm3, %v1416_v25  ;;  %v1415_v19 = vsel %vm835_vm2, %v1191_v61, %v1322_v55  ;;  %v1140_v9 = vmul.f32 0.25, %v956_v33  ;;  %v959_v25 = vsel %vm353_vm0, %v957_v39, %v958_v58  ;;  %v960_v55 = vrot.slane %v2416_v16, 7  ;;  %v3358_v33 = vld [vmem:[#allocation46_spill] sm:$0xff] }
  0xda   : > { %1580 = vst.msk [vmem:[%s2597_s18 + $0x30] sm:$0xff] %vm868_vm3, %v1415_v19  ;;  %v3350_v19 = vld [vmem:[#allocation82_spill] sm:$0xff]  ;;  %v1142_v48 = vmul.f32 0.25, %v959_v25 }
  0xdb   : > { %v1328_v0 = vpop.permute.xlu1 %1327  ;;  %v1201_v22 = vadd.f32 %v3350_v19, %v1137_v54  ;;  %v962_v4 = vsel %vm353_vm0, %v960_v55, %v961_v24  ;;  %v3359_v54 = vld [vmem:[#allocation62_spill] sm:$0xff]  ;;  %v3363_v19 = vld [vmem:[#allocation61_spill] sm:$0xff] }
  0xdc   : > { %v1418_v40 = vsel %vm835_vm2, %v1194_v38, %v1328_v0  ;;  %v1326_v12 = vpop.permute.xlu0 %1325  ;;  %v3351_v0 = vld [vmem:[#allocation84_spill] sm:$0xff]  ;;  %v1144_v62 = vmul.f32 0.25, %v962_v4  ;;  %v3362_v24 = vld [vmem:[#allocation54_spill] sm:$0xff] }
  0xdd   : > { %1583 = vst.msk [vmem:[%s2597_s18 + $0x58] sm:$0xff] %vm868_vm3, %v1418_v40  ;;  %v1417_v31 = vsel %vm835_vm2, %v1193_v3, %v1326_v12  ;;  %v1139_v3 = vmul.f32 0.25, %v1020_v46  ;;  %v3366_v4 = vld [vmem:[#allocation86_spill] sm:$0xff] }
  0xde   : > { %1582 = vst.msk [vmem:[%s2597_s18 + $0x50] sm:$0xff] %vm868_vm3, %v1417_v31  ;;  %v964_v31 = vrot.slane %v3352_v13, 7  ;;  %v1208_v20 = vadd.f32 %v3358_v33, %v1144_v62  ;;  %v3367_v13 = vld [vmem:[#allocation87_spill] sm:$0xff]  ;;  %v3372_v33 = vld [vmem:[#allocation88_spill] sm:$0xff] }
  0xdf   : > { %v1332_v21 = vpop.permute.xlu1 %1331  ;;  %v1203_v18 = vadd.f32 %v3353_v50, %v1139_v3  ;;  %v3364_v3 = vld [vmem:[#allocation63_spill] sm:$0xff] }
  0xe0   : > { %v1420_v26 = vsel %vm835_vm2, %v1196_v15, %v1332_v21  ;;  %v1330_v60 = vpop.permute.xlu0 %1329  ;;  %v1204_v15 = vadd.f32 %v3351_v0, %v1140_v9  ;;  %v1141_v21 = vmul.f32 0.25, %v1021_v8  ;;  %v972_v8 = vrot.slane %v3364_v3, 7 }
  0xe1   : > { %1585 = vst.msk [vmem:[%s2597_s18 + $0x78] sm:$0xff] %vm868_vm3, %v1420_v26  ;;  %v1419_v30 = vsel %vm835_vm2, %v1195_v47, %v1330_v60  ;;  %v3354_v26 = vld [vmem:[#allocation40_spill] sm:$0xff] }
  0xe2   : > { %1584 = vst.msk [vmem:[%s2597_s18 + $0x70] sm:$0xff] %vm868_vm3, %v1419_v30  ;;  %v1206_v60 = vadd.f32 %v3354_v26, %v1142_v48  ;;  %v965_v30 = vsel %vm353_vm0, %v963_v37, %v964_v31  ;;  %v3365_v48 = vld [vmem:[#allocation56_spill] sm:$0xff] }
  0xe3   : > { %v1336_v51 = vpop.permute.xlu1 %1335  ;;  %v1146_v39 = vmul.f32 0.25, %v965_v30 }
  0xe4   : > { %v1422_v1 = vsel %vm835_vm2, %v1198_v7, %v1336_v51  ;;  %v1334_v63 = vpop.permute.xlu0 %1333  ;;  %v1022_v7 = vsel %vm353_vm0, %v2416_v16, %v960_v55  ;;  %v967_v51 = vrot.slane %v3356_v43, 7  ;;  %v3370_v43 = vld [vmem:[#allocation73_spill] sm:$0xff] }
  0xe5   : > { %1587 = vst.msk [vmem:[%s2597_s18 + $0x98] sm:$0xff] %vm868_vm3, %v1422_v1  ;;  %v1421_v41 = vsel %vm835_vm2, %v1197_v45, %v1334_v63  ;;  %v3355_v45 = vld [vmem:[#allocation60_spill] sm:$0xff]  ;;  %v1143_v57 = vmul.f32 0.25, %v1022_v7  ;;  %v1023_v1 = vsel %vm353_vm0, %v2439_v53, %v963_v37  ;;  %v1026_v7 = vsel %vm353_vm0, %v3364_v3, %v972_v8 }
  0xe6   : > { %1586 = vst.msk [vmem:[%s2597_s18 + $0x90] sm:$0xff] %vm868_vm3, %v1421_v41  ;;  %v966_v29 = vrot.slane %v3355_v45, 7  ;;  %v1145_v41 = vmul.f32 0.25, %v1023_v1 }
  0xe7   : > { %v1340_v61 = vpop.permute.xlu1 %1339  ;;  %v1207_v46 = vadd.f32 %v3359_v54, %v1143_v57  ;;  %v3371_v57 = vld [vmem:[#allocation5_spill] sm:$0xff] }
  0xe8   : > { %v1424_v38 = vsel %vm835_vm2, %v1200_v10, %v1340_v61  ;;  %v1338_v34 = vpop.permute.xlu0 %1337  ;;  %v3357_v10 = vld [vmem:[#allocation55_spill] sm:$0xff]  ;;  %v968_v56 = vsel %vm353_vm0, %v966_v29, %v967_v51  ;;  %v3360_v61 = vld [vmem:[#allocation68_spill] sm:$0xff] }
  0xe9   : > { %1589 = vst.msk [vmem:[%s2597_s18 + $0xb8] sm:$0xff] %vm868_vm3, %v1424_v38  ;;  %v1423_v11 = vsel %vm835_vm2, %v1199_v42, %v1338_v34  ;;  %v1205_v16 = vadd.f32 %v3357_v10, %v1141_v21  ;;  %v1024_v42 = vsel %vm353_vm0, %v3355_v45, %v966_v29  ;;  %v969_v49 = vrot.slane %v3360_v61, 7 }
  0xea   : > { %1588 = vst.msk [vmem:[%s2597_s18 + $0xb0] sm:$0xff] %vm868_vm3, %v1423_v11  ;;  %v1148_v34 = vmul.f32 0.25, %v968_v56  ;;  %v1147_v25 = vmul.f32 0.25, %v1024_v42  ;;  %v1210_v11 = vadd.f32 %v3362_v24, %v1146_v39  ;;  %v1151_v10 = vmul.f32 0.25, %v1026_v7  ;;  %v3373_v56 = vld [vmem:[#allocation89_spill] sm:$0xff] }
  0xeb   : > { %v1344_v5 = vpop.permute.xlu1 %1343 }
  0xec   : > { %v1426_v40 = vsel %vm835_vm2, %v1202_v23, %v1344_v5  ;;  %v1342_v12 = vpop.permute.xlu0 %1341  ;;  %v3361_v23 = vld [vmem:[#allocation50_spill] sm:$0xff]  ;;  %v1212_v37 = vadd.f32 %v3366_v4, %v1148_v34  ;;  %v1211_v31 = vadd.f32 %v3367_v13, %v1147_v25 }
  0xed   : > { %1591 = vst.msk [vmem:[%s2597_s18 + $0xd8] sm:$0xff] %vm868_vm3, %v1426_v40  ;;  %v1425_v47 = vsel %vm835_vm2, %v1201_v22, %v1342_v12  ;;  %v970_v9 = vrot.slane %v3361_v23, 7  ;;  %v1209_v22 = vadd.f32 %v3363_v19, %v1145_v41  ;;  %v973_v40 = vrot.slane %v3365_v48, 7 }
  0xee   : > { %1590 = vst.msk [vmem:[%s2597_s18 + $0xd0] sm:$0xff] %vm868_vm3, %v1425_v47 }
  0xef   : > { %v1348_v2 = vpop.permute.xlu1 %1347  ;;  %v971_v0 = vsel %vm353_vm0, %v969_v49, %v970_v9  ;;  %v974_v26 = vsel %vm353_vm0, %v972_v8, %v973_v40 }
  0xf0   : > { %v1428_v36 = vsel %vm835_vm2, %v1204_v15, %v1348_v2  ;;  %v1346_v14 = vpop.permute.xlu0 %1345  ;;  %v1025_v15 = vsel %vm353_vm0, %v3360_v61, %v969_v49 }
  0xf1   : > { %1593 = vst.msk [vmem:[%s2597_s18 + $0xf8] sm:$0xff] %vm868_vm3, %v1428_v36  ;;  %v1427_v17 = vsel %vm835_vm2, %v1203_v18, %v1346_v14  ;;  %v1150_v18 = vmul.f32 0.25, %v971_v0  ;;  %v1149_v21 = vmul.f32 0.25, %v1025_v15  ;;  %v3369_v36 = vld [vmem:[#allocation69_spill] sm:$0xff] }
  0xf2   : > { %1592 = vst.msk [vmem:[%s2597_s18 + $0xf0] sm:$0xff] %vm868_vm3, %v1427_v17  ;;  %v976_v14 = vrot.slane %v3369_v36, 7  ;;  %v1152_v17 = vmul.f32 0.25, %v974_v26 }
  0xf3   : > { %v1352_v63 = vpop.permute.xlu1 %1351  ;;  %v1214_v51 = vadd.f32 %v3370_v43, %v1150_v18  ;;  %v1213_v1 = vadd.f32 %v3371_v57, %v1149_v21 }
  0xf4   : > { %v1430_v44 = vsel %vm835_vm2, %v1206_v60, %v1352_v63  ;;  %v1350_v58 = vpop.permute.xlu0 %1349  ;;  %v3368_v60 = vld [vmem:[#allocation3_spill] sm:$0xff]  ;;  %v1216_v42 = vadd.f32 %v3373_v56, %v1152_v17 }
  0xf5   : > { %1595 = vst.msk [vmem:[%s2597_s18 + $0x118] sm:$0xff] %vm868_vm3, %v1430_v44  ;;  %v1429_v53 = vsel %vm835_vm2, %v1205_v16, %v1350_v58  ;;  %v975_v62 = vrot.slane %v3368_v60, 7 }
  0xf6   : > { %1594 = vst.msk [vmem:[%s2597_s18 + $0x110] sm:$0xff] %vm868_vm3, %v1429_v53 }
  0xf7   : > { %v1356_v38 = vpop.permute.xlu1 %1355  ;;  %v977_v63 = vsel %vm353_vm0, %v975_v62, %v976_v14  ;;  %v1027_v39 = vsel %vm353_vm0, %v3368_v60, %v975_v62 }
  0xf8   : > { %v1432_v55 = vsel %vm835_vm2, %v1208_v20, %v1356_v38  ;;  %v1354_v28 = vpop.permute.xlu0 %1353  ;;  %v979_v20 = vrot.slane %v3372_v33, 7  ;;  %v1154_v53 = vmul.f32 0.25, %v977_v63  ;;  %v1153_v49 = vmul.f32 0.25, %v1027_v39 }
  0xf9   : > { %1597 = vst.msk [vmem:[%s2597_s18 + $0x138] sm:$0xff] %vm868_vm3, %v1432_v55  ;;  %v1431_v5 = vsel %vm835_vm2, %v1207_v46, %v1354_v28  ;;  %v3374_v46 = vld [vmem:[#allocation2_spill] sm:$0xff] }
  0xfa   : > { %1596 = vst.msk [vmem:[%s2597_s18 + $0x130] sm:$0xff] %vm868_vm3, %v1431_v5  ;;  %v1215_v61 = vadd.f32 %v3374_v46, %v1151_v10  ;;  %v980_v23 = vsel %vm353_vm0, %v978_v32, %v979_v20  ;;  %v1218_v25 = vadd.f32 %v2584_v52, %v1154_v53  ;;  %v1217_v59 = vadd.f32 %v2603_v35, %v1153_v49 }
  0xfb   : > { %v1360_v12 = vpop.permute.xlu1 %1359  ;;  %v1156_v55 = vmul.f32 0.25, %v980_v23 }
  0xfc   : > { %v1434_v47 = vsel %vm835_vm2, %v1210_v11, %v1360_v12  ;;  %v1358_v50 = vpop.permute.xlu0 %1357 }
  0xfd   : > { %1599 = vst.msk [vmem:[%s2597_s18 + $0x158] sm:$0xff] %vm868_vm3, %v1434_v47  ;;  %v1433_v2 = vsel %vm835_vm2, %v1209_v22, %v1358_v50  ;;  %v1220_v19 = vadd.f32 %v2606_v27, %v1156_v55 }
  0xfe   : > { %1598 = vst.msk [vmem:[%s2597_s18 + $0x150] sm:$0xff] %vm868_vm3, %v1433_v2 }
  0xff   : > { %v1364_v30 = vpop.permute.xlu1 %1363 }
 0x100   : > { %v1436_v45 = vsel %vm835_vm2, %v1212_v37, %v1364_v30  ;;  %v1362_v29 = vpop.permute.xlu0 %1361 }
 0x101   : > { %1601 = vst.msk [vmem:[%s2597_s18 + $0x178] sm:$0xff] %vm868_vm3, %v1436_v45  ;;  %v1435_v16 = vsel %vm835_vm2, %v1211_v31, %v1362_v29 }
 0x102   : > { %1600 = vst.msk [vmem:[%s2597_s18 + $0x170] sm:$0xff] %vm868_vm3, %v1435_v16 }
 0x103   : > { %v1368_v44 = vpop.permute.xlu1 %1367 }
 0x104   : > { %v1438_v58 = vsel %vm835_vm2, %v1214_v51, %v1368_v44  ;;  %v1366_v41 = vpop.permute.xlu0 %1365 }
 0x105   : > { %1603 = vst.msk [vmem:[%s2597_s18 + $0x198] sm:$0xff] %vm868_vm3, %v1438_v58  ;;  %v1437_v54 = vsel %vm835_vm2, %v1213_v1, %v1366_v41 }
 0x106   : > { %1602 = vst.msk [vmem:[%s2597_s18 + $0x190] sm:$0xff] %vm868_vm3, %v1437_v54 }
 0x107   : > { %v1372_v9 = vpop.permute.xlu1 %1371 }
 0x108   : > { %v1440_v38 = vsel %vm835_vm2, %v1216_v42, %v1372_v9  ;;  %v1370_v34 = vpop.permute.xlu0 %1369 }
 0x109   : > { %1605 = vst.msk [vmem:[%s2597_s18 + $0x1b8] sm:$0xff] %vm868_vm3, %v1440_v38  ;;  %v1439_v28 = vsel %vm835_vm2, %v1215_v61, %v1370_v34 }
 0x10a   : > { %1604 = vst.msk [vmem:[%s2597_s18 + $0x1b0] sm:$0xff] %vm868_vm3, %v1439_v28 }
 0x10b   : > { %v1376_v32 = vpop.permute.xlu1 %1375 }
 0x10c   : > { %v1442_v24 = vsel %vm835_vm2, %v1218_v25, %v1376_v32  ;;  %v1374_v11 = vpop.permute.xlu0 %1373 }
 0x10d   : > { %1607 = vst.msk [vmem:[%s2597_s18 + $0x1d8] sm:$0xff] %vm868_vm3, %v1442_v24  ;;  %v1441_v52 = vsel %vm835_vm2, %v1217_v59, %v1374_v11 }
 0x10e   : > { %1606 = vst.msk [vmem:[%s2597_s18 + $0x1d0] sm:$0xff] %vm868_vm3, %v1441_v52 }
 0x10f   : > { %v1380_v22 = vpop.permute.xlu1 %1379 }
 0x110   : > { %v1444_v3 = vsel %vm835_vm2, %v1220_v19, %v1380_v22  ;;  %v1378_v8 = vpop.permute.xlu0 %1377 }
 0x111   : > { %1609 = vst.msk [vmem:[%s2597_s18 + $0x1f8] sm:$0xff] %vm868_vm3, %v1444_v3  ;;  %v1443_v35 = vsel %vm835_vm2, %v2820_v6, %v1378_v8 }
 0x112   : > { %1608 = vst.msk [vmem:[%s2597_s18 + $0x1f0] sm:$0xff] %vm868_vm3, %v1443_v35 }
 0x113 PF: > { %s11_s8 = sadd.s32 1, %s1661_s8   ;;  %s3375_s6 = smov %s1657_s7 }
 0x114   : > { %p8_p5 = scmp.ge.s32.totalorder %s11_s8, 4   ;;  %s3376_s7 = smov %s3378_s9 }
 0x116   :  { %10 = sbr.rel (!%p8_p5) target bundleno = 2 (0x2), region = 55 }

// kernel: unet_block_forward.3
= control target key start
LH: loop header
LB: loop body
LE: loop exit
PB: predicated region body
PF: predicated region fallthrough
CT: control target
= control target key end

     0   :  { %s4431_s15 = smov 0   ;;  %s4433_s16 = smov 0   ;;  %s5581_s0 = inlined_call_operand.vmem [shape: bf16[2,1,18,18,32], index: 0, kind: input, shape index: {}]   ;;  %s5582_s1 = inlined_call_operand.vmem [shape: bf16[9,32,32], index: 1, kind: input, shape index: {}]   ;;  %s5583_s2 = inlined_call_operand.vmem [shape: f32[1,32], index: 2, kind: input, shape index: {}]   ;;  %s5584_s3 = inlined_call_operand.vmem [shape: f32[1,32], index: 3, kind: input, shape index: {}]   ;;  %s5585_s4 = inlined_call_operand.vmem [shape: f32[2,1,256,32], index: 4, kind: output, shape index: {}]  }
   0x1   :  { %s4435_s17 = smov 0  }
   0x2 LB: > { %s26_s18 = sadd.s32 1, %s4400_s16  ;;  %p3295_p0 = scmp.ge.s32.totalorder %s4404_s17, 1  ;;  %s4404_s17 = sphi %s4435_s17, %s14_s17   ;;  %s4400_s16 = sphi %s4433_s16, %s5661_s16   ;;  %s4396_s15 = sphi %s4431_s15, %s5660_s15  }
   0x3   : > { %p28_p1 = scmp.ge.s32.totalorder %s26_s18, 2  ;;  %p182_p2 = scmp.lt.s32.totalorder %s4404_s17, 3 }
   0x5   : > { %s5663_s18 = smov (%p28_p1, %s26_s18), 0  ;;  %p183_p3 = pnand %p3295_p0, %p182_p2 }
   0x7   : > { %186 = sbr.rel (%p183_p3) target bundleno = 556 (0x22c), region = 36 }
   0xe   : > { %v4341_v0 = vld [vmem:[%s5582_s1 + $0x10] sm:$0xff]   ;;  %p216_p4 = scmp.lt.s32.totalorder %s4396_s15, 1  ;;  %v4342_v1 = vld [vmem:[%s5582_s1 + $0x40] sm:$0xff]   ;;  %v4343_v2 = vld [vmem:[%s5582_s1 + $0x18] sm:$0xff]   ;;  %vm293_vm0 = vsmask.f32 3328 }
   0xf   : > { %3732 = vmatprep.subr.bf16.mxu1 %v4341_v0  ;;  %3876 = vmatprep.subr.bf16.mxu0 %v4342_v1  ;;  %v4344_v3 = vld [vmem:[%s5582_s1 + $0x48] sm:$0xff]   ;;  %v4467_v4 = vld [vmem:[%s5582_s1] sm:$0xff]   ;;  %vm294_vm1 = vsmask.f32 7440  ;;  %v4477_v5 = vld [vmem:[%s5582_s1 + $0x50] sm:$0xff]   ;;  %vm745_vm2 = vcmask 261120  }
  0x10   : > { %s5665_s15 = smov (!%p216_p4, %s4396_s15), 1  ;;  %3733 = vmatpush3.bf16.msra.mxu1 %v4341_v0  ;;  %3877 = vmatpush3.bf16.msra.mxu0 %v4342_v1  ;;  %vm4511_vm3 = vmor %vm293_vm0, %vm294_vm1  ;;  %vm1272_vm4 = vcmask 1042432   ;;  %vm1273_vm5 = vcmask 1046532  }
  0x11   : > { %3734 = vmatprep.subr.bf16.mxu1 %v4343_v2  ;;  %s4316_s27 = smul.u32 216, %s5665_s15  ;;  %3878 = vmatprep.subr.bf16.mxu0 %v4344_v3  ;;  %vm4701_vm6 = vmor %vm1272_vm4, %vm1273_vm5  ;;  %s3569_s23 = sshll.u32 %s5665_s15, 8 }
  0x12   : > { %s5440_s26 = scalar_lea.vmem %s5585_s4, %s3569_s23 }
  0x13   : > { %s4472_s6 = scalar_lea.vmem %s5581_s0, %s4316_s27 }
  0x14   : > { %3735 = vmatpush3.bf16.msra.mxu1 %v4343_v2  ;;  %v4480_v6 = vld [vmem:[%s4472_s6] sm:$0xf]  ;;  %v4483_v7 = vld [vmem:[%s4472_s6 + $0x4] sm:$0xf]  ;;  %v237_v8 = vld [vmem:[%s4472_s6 + $0x8] sm:$0x1]  ;;  %3879 = vmatpush3.bf16.msra.mxu0 %v4344_v3 }
  0x15   : > { %v297_v9 = vshrl.u32 %v4480_v6, 16  ;;  %v300_v10 = vshll.u32 %v4480_v6, 16  ;;  %v306_v11 = vshll.u32 %v4483_v7, 16  ;;  %v310_v12 = vshrl.u32 %v4483_v7, 16  ;;  %3768 = vmatprep.subr.bf16.mxu1 %v4467_v4  ;;  %v4492_v13 = vld [vmem:[%s4472_s6 + $0xc] sm:$0xf]  ;;  %3912 = vmatprep.subr.bf16.mxu0 %v4477_v5 }
  0x16   : > { %v316_v14 = vshll.u32 %v237_v8, 16  ;;  %v4495_v15 = vld [vmem:[%s4472_s6 + $0x10] sm:$0xf]  ;;  %v4498_v16 = vld [vmem:[%s4472_s6 + $0x14] sm:$0x1]  ;;  %v321_v22 = vshrl.u32 %v4492_v13, 16 }
  0x17   : > { %v299_v17 = vrot.slane %v297_v9, 4  ;;  %v302_v18 = vrot.slane %v300_v10, 5  ;;  %v308_v19 = vrot.slane %v306_v11, 5  ;;  %v312_v20 = vrot.slane %v310_v12, 4  ;;  %v4507_v29 = vld [vmem:[%s4472_s6 + $0x18] sm:$0xf] }
  0x18   : > { %v318_v21 = vrot.slane %v316_v14, 5  ;;  %v324_v23 = vshll.u32 %v4492_v13, 16  ;;  %v330_v24 = vshll.u32 %v4495_v15, 16  ;;  %v334_v27 = vshrl.u32 %v4495_v15, 16  ;;  %v4520_v35 = vld [vmem:[%s4472_s6 + $0x1c] sm:$0xf] }
  0x19   : > { %v303_v25 = vor.u32 %v302_v18, %v299_v17  ;;  %v313_v26 = vor.u32 %v312_v20, %v308_v19  ;;  %v340_v28 = vshll.u32 %v4498_v16, 16  ;;  %v323_v31 = vrot.slane %v321_v22, 4  ;;  %v4524_v42 = vld [vmem:[%s4472_s6 + $0x20] sm:$0x1]  ;;  %v4534_v49 = vld [vmem:[%s4472_s6 + $0x24] sm:$0xf] }
  0x1a   : > { %v326_v32 = vrot.slane %v324_v23, 5  ;;  %v332_v33 = vrot.slane %v330_v24, 5  ;;  %v4517_v34 = vcombine.low %v4492_v13, %v4495_v15  ;;  %v336_v38 = vrot.slane %v334_v27, 4  ;;  %v4537_v54 = vld [vmem:[%s4472_s6 + $0x28] sm:$0xf] }
  0x1b   : > { %v304_v36 = vrot.slane %v303_v25, 4  ;;  %v314_v37 = vrot.slane %v313_v26, 4  ;;  %v342_v39 = vrot.slane %v340_v28, 5  ;;  %v1287_v41 = vrot.slane %v4498_v16, 5  ;;  %v4542_v59 = vld [vmem:[%s4472_s6 + $0x2c] sm:$0x1] }
  0x1c   : > { %v327_v40 = vor.u32 %v326_v32, %v323_v31  ;;  %v345_v43 = vshrl.u32 %v4507_v29, 16  ;;  %v348_v44 = vshll.u32 %v4507_v29, 16  ;;  %v337_v47 = vor.u32 %v336_v38, %v332_v33  ;;  %v4550_v0 = vld [vmem:[%s4472_s6 + $0x30] sm:$0xf]  ;;  %v4349_v14 = vld [vmem:[%s5582_s1 + $0x8] sm:$0xff]  }
  0x1d   : > { %v309_v45 = vsel %vm4511_vm3, %v304_v36, %v308_v19  ;;  %v319_v46 = vsel %vm4511_vm3, %v314_v37, %v318_v21  ;;  %v354_v48 = vshll.u32 %v4520_v35, 16  ;;  %v358_v57 = vshrl.u32 %v4520_v35, 16  ;;  %v4563_v21 = vld [vmem:[%s4472_s6 + $0x34] sm:$0xf]  ;;  %v4570_v25 = vld [vmem:[%s4472_s6 + $0x38] sm:$0x1] }
  0x1e   : > { %v3303_v50 = vcombine.low %v309_v45, %v319_v46  ;;  %v328_v51 = vrot.slane %v327_v40, 4  ;;  %v347_v52 = vrot.slane %v345_v43, 4  ;;  %v350_v53 = vrot.slane %v348_v44, 5  ;;  %v4584_v45 = vld [vmem:[%s4472_s6 + $0x40] sm:$0xf] }
  0x1f   : > { %v338_v55 = vrot.slane %v337_v47, 4  ;;  %v356_v56 = vrot.slane %v354_v48, 5  ;;  %v364_v58 = vshll.u32 %v4524_v42, 16  ;;  %v1291_v62 = vrot.slane %v4520_v35, 5  ;;  %v4589_v46 = vld [vmem:[%s5582_s1 + $0x20] sm:$0xff]  }
  0x20   : > { %3736 = vmatprep.mubr.msk.bf16.mxu1 %vm745_vm2, %v3303_v50  ;;  %v333_v60 = vsel %vm4511_vm3, %v328_v51, %v332_v33  ;;  %v351_v61 = vor.u32 %v350_v53, %v347_v52  ;;  %v1294_v63 = vrot.slane %v4524_v42, 5  ;;  %v360_v2 = vrot.slane %v358_v57, 4  ;;  %v4594_v52 = vld [vmem:[%s4472_s6 + $0x44] sm:$0x1]  ;;  %v4348_v53 = vld [vmem:[%s5582_s1 + $0x58] sm:$0xff]  }
  0x21   : > { %v343_v1 = vsel %vm4511_vm3, %v338_v55, %v342_v39  ;;  %v366_v3 = vrot.slane %v364_v58, 5  ;;  %v369_v8 = vshrl.u32 %v4534_v49, 16  ;;  %v372_v11 = vshll.u32 %v4534_v49, 16  ;;  %v4578_v39 = vld [vmem:[%s4472_s6 + $0x3c] sm:$0xf] }
  0x22   : > { %v3304_v9 = vcombine.low %v333_v60, %v343_v1  ;;  %v352_v10 = vrot.slane %v351_v61, 4  ;;  %v378_v12 = vshll.u32 %v4537_v54, 16  ;;  %v361_v17 = vor.u32 %v360_v2, %v356_v56  ;;  %v4600_v55 = vld [vmem:[%s4472_s6 + $0x48] sm:$0xf]  ;;  %v4604_v61 = vld [vmem:[%s4472_s6 + $0x4c] sm:$0xf] }
  0x23   : > { %v371_v18 = vrot.slane %v369_v8, 4  ;;  %v382_v19 = vshrl.u32 %v4537_v54, 16  ;;  %v388_v20 = vshll.u32 %v4542_v59, 16  ;;  %v374_v23 = vrot.slane %v372_v11, 5 }
  0x24   : > { %3880 = vmatprep.mubr.msk.bf16.mxu0 %vm745_vm2, %v3304_v9  ;;  %3737 = vmatmul.mubr.msk.bf16.vlgmr.msra.gmra.mrb[0].mxu1 %vm745_vm2, %v3304_v9  ;;  %v357_v22 = vsel %vm4511_vm3, %v352_v10, %v356_v56  ;;  %v380_v24 = vrot.slane %v378_v12, 5  ;;  %v393_v26 = vshrl.u32 %v4550_v0, 16  ;;  %v362_v27 = vrot.slane %v361_v17, 4 }
  0x25   : > { %3769 = vmatpush3.bf16.msra.mxu1 %v4467_v4  ;;  %v384_v28 = vrot.slane %v382_v19, 4  ;;  %v390_v31 = vrot.slane %v388_v20, 5  ;;  %v396_v32 = vshll.u32 %v4550_v0, 16  ;;  %v375_v33 = vor.u32 %v374_v23, %v371_v18 }
  0x26   : > { %v395_v36 = vrot.slane %v393_v26, 4  ;;  %v402_v37 = vshll.u32 %v4563_v21, 16  ;;  %v406_v38 = vshrl.u32 %v4563_v21, 16  ;;  %3770 = vmatprep.subr.bf16.mxu1 %v4349_v14  ;;  %v367_v40 = vsel %vm4511_vm3, %v362_v27, %v366_v3 }
  0x27   : > { %v385_v4 = vor.u32 %v384_v28, %v380_v24  ;;  %v398_v43 = vrot.slane %v396_v32, 5  ;;  %v412_v44 = vshll.u32 %v4570_v25, 16  ;;  %v4591_v47 = vcombine.low %v357_v22, %v367_v40  ;;  %v4637_v28 = vld [vmem:[%s4472_s6 + $0x50] sm:$0x1] }
  0x28   : > { %v376_v48 = vrot.slane %v375_v33, 4  ;;  %v404_v50 = vrot.slane %v402_v37, 5  ;;  %v408_v51 = vrot.slane %v406_v38, 4  ;;  %v417_v60 = vshrl.u32 %v4578_v39, 16  ;;  %v4642_v33 = vld [vmem:[%s4472_s6 + $0x54] sm:$0xf] }
  0x29   : > { %5618 = vst [vmem:[#allocation2_spill] sm:$0xff] %v4591_v47  ;;  %v386_v56 = vrot.slane %v385_v4, 4  ;;  %v399_v57 = vor.u32 %v398_v43, %v395_v36  ;;  %v414_v58 = vrot.slane %v412_v44, 5  ;;  %3771 = vmatpush3.bf16.msra.mxu1 %v4349_v14  ;;  %3881 = vmatmul.mubr.msk.bf16.vlgmr.msra.gmra.mrb[0].mxu0 %vm745_vm2, %v4591_v47  ;;  %v420_v3 = vshll.u32 %v4578_v39, 16  ;;  %5620 = vst [vmem:[#allocation4_spill] sm:$0xff] %v4642_v33 }
  0x2a   : > { %3740 = vmatprep.mubr.msk.bf16.mxu1 %vm745_vm2, %v4591_v47  ;;  %v381_v1 = vsel %vm4511_vm3, %v376_v48, %v380_v24  ;;  %v409_v2 = vor.u32 %v408_v51, %v404_v50  ;;  %v426_v8 = vshll.u32 %v4584_v45, 16  ;;  %3913 = vmatpush3.bf16.msra.mxu0 %v4477_v5  ;;  %v419_v11 = vrot.slane %v417_v60, 4  ;;  %v4624_v5 = vld [vmem:[%s5582_s1 + $0x60] sm:$0xff]   ;;  %v4647_v4 = vld [vmem:[%s4472_s6 + $0x58] sm:$0xf] }
  0x2b   : > { %v391_v9 = vsel %vm4511_vm3, %v386_v56, %v390_v31  ;;  %v400_v10 = vrot.slane %v399_v57, 4  ;;  %v430_v12 = vshrl.u32 %v4584_v45, 16  ;;  %3804 = vmatprep.subr.bf16.mxu1 %v4589_v46  ;;  %v422_v18 = vrot.slane %v420_v3, 5  ;;  %3914 = vmatprep.subr.bf16.mxu0 %v4348_v53 }
  0x2c   : > { %v4619_v14 = vcombine.low %v381_v1, %v391_v9  ;;  %v410_v17 = vrot.slane %v409_v2, 4  ;;  %v428_v19 = vrot.slane %v426_v8, 5  ;;  %v436_v23 = vshll.u32 %v4594_v52, 16  ;;  %v4661_v2 = vld [vmem:[%s4472_s6 + $0x5c] sm:$0x1] }
  0x2d   : > { %v405_v20 = vsel %vm4511_vm3, %v400_v10, %v404_v50  ;;  %v432_v22 = vrot.slane %v430_v12, 4  ;;  %v441_v24 = vshrl.u32 %v4600_v55, 16  ;;  %v423_v27 = vor.u32 %v422_v18, %v419_v11  ;;  %v4665_v8 = vld [vmem:[%s4472_s6 + $0x60] sm:$0xf] }
  0x2e   : > { %5619 = vst [vmem:[#allocation3_spill] sm:$0xff] %v4619_v14  ;;  %3884 = vmatprep.mubr.msk.bf16.mxu0 %vm745_vm2, %v4619_v14  ;;  %3741 = vmatmul.mubr.msk.bf16.gmra.mrb[4].mxu1 %vm745_vm2, %v4619_v14  ;;  %v415_v26 = vsel %vm4511_vm3, %v410_v17, %v414_v58  ;;  %v444_v31 = vshll.u32 %v4600_v55, 16  ;;  %v450_v32 = vshll.u32 %v4604_v61, 16  ;;  %v438_v38 = vrot.slane %v436_v23, 5  ;;  %v4670_v17 = vld [vmem:[%s4472_s6 + $0x64] sm:$0xf] }
  0x2f   : > { %v4644_v36 = vcombine.low %v405_v20, %v415_v26  ;;  %v433_v37 = vor.u32 %v432_v22, %v428_v19  ;;  %v443_v40 = vrot.slane %v441_v24, 4  ;;  %3915 = vmatpush3.bf16.msra.mxu0 %v4348_v53  ;;  %v424_v43 = vrot.slane %v423_v27, 4  ;;  %v4884_v14 = vld [vmem:[%s4472_s6 + $0xa8] sm:$0xf] }
  0x30   : > { %v446_v44 = vrot.slane %v444_v31, 5  ;;  %v452_v48 = vrot.slane %v450_v32, 5  ;;  %v454_v50 = vshrl.u32 %v4604_v61, 16  ;;  %3948 = vmatprep.subr.bf16.mxu0 %v4624_v5  ;;  %v460_v56 = vshll.u32 %v4637_v28, 16 }
  0x31   : > { %5621 = vst [vmem:[#allocation5_spill] sm:$0xff] %v4644_v36  ;;  %3744 = vmatprep.mubr.msk.bf16.mxu1 %vm745_vm2, %v4644_v36  ;;  %v434_v51 = vrot.slane %v433_v37, 4  ;;  %v465_v53 = vshrl.u32 %v4642_v33, 16  ;;  %v468_v57 = vshll.u32 %v4642_v33, 16  ;;  %3885 = vmatmul.mubr.msk.bf16.gmra.mrb[4].mxu0 %vm745_vm2, %v4644_v36  ;;  %v429_v58 = vsel %vm4511_vm3, %v424_v43, %v428_v19  ;;  %v4684_v37 = vld [vmem:[%s4472_s6 + $0x68] sm:$0x1] }
  0x32   : > { %v447_v60 = vor.u32 %v446_v44, %v443_v40  ;;  %v456_v1 = vrot.slane %v454_v50, 4  ;;  %v474_v3 = vshll.u32 %v4647_v4, 16  ;;  %v462_v10 = vrot.slane %v460_v56, 5  ;;  %v4860_v36 = vld [vmem:[%s4472_s6 + $0xa0] sm:$0xf] }
  0x33   : > { %v439_v9 = vsel %vm4511_vm3, %v434_v51, %v438_v38  ;;  %v467_v11 = vrot.slane %v465_v53, 4  ;;  %v470_v12 = vrot.slane %v468_v57, 5  ;;  %v478_v24 = vshrl.u32 %v4647_v4, 16 }
  0x34   : > { %v4672_v18 = vcombine.low %v429_v58, %v439_v9  ;;  %v448_v19 = vrot.slane %v447_v60, 4  ;;  %v457_v20 = vor.u32 %v456_v1, %v452_v48  ;;  %v476_v22 = vrot.slane %v474_v3, 5 }
  0x35   : > { %v471_v23 = vor.u32 %v470_v12, %v467_v11  ;;  %v484_v26 = vshll.u32 %v4661_v2, 16  ;;  %v489_v27 = vshrl.u32 %v4665_v8, 16  ;;  %v492_v38 = vshll.u32 %v4665_v8, 16 }
  0x36   : > { %5622 = vst [vmem:[#allocation6_spill] sm:$0xff] %v4672_v18  ;;  %3888 = vmatprep.mubr.msk.bf16.mxu0 %vm745_vm2, %v4672_v18  ;;  %3745 = vmatmul.mubr.msk.bf16.gmra.mrb[8].mxu1 %vm745_vm2, %v4672_v18  ;;  %v453_v31 = vsel %vm4511_vm3, %v448_v19, %v452_v48  ;;  %v458_v32 = vrot.slane %v457_v20, 4  ;;  %v498_v40 = vshll.u32 %v4670_v17, 16  ;;  %v480_v44 = vrot.slane %v478_v24, 4  ;;  %v4692_v48 = vld [vmem:[%s4472_s6 + $0x6c] sm:$0xf] }
  0x37   : > { %v472_v43 = vrot.slane %v471_v23, 4  ;;  %v486_v50 = vrot.slane %v484_v26, 5  ;;  %v491_v51 = vrot.slane %v489_v27, 4  ;;  %v494_v53 = vrot.slane %v492_v38, 5  ;;  %v4708_v23 = vld [vmem:[%s4472_s6 + $0x70] sm:$0xf] }
  0x38   : > { %v463_v56 = vsel %vm4511_vm3, %v458_v32, %v462_v10  ;;  %v500_v57 = vrot.slane %v498_v40, 5  ;;  %v502_v58 = vshrl.u32 %v4670_v17, 16  ;;  %v481_v3 = vor.u32 %v480_v44, %v476_v22  ;;  %v4715_v26 = vld [vmem:[%s4472_s6 + $0x74] sm:$0x1]  ;;  %v4722_v40 = vld [vmem:[%s4472_s6 + $0x78] sm:$0xf] }
  0x39   : > { %v4694_v60 = vcombine.low %v453_v31, %v463_v56  ;;  %v477_v1 = vsel %vm4511_vm3, %v472_v43, %v476_v22  ;;  %v508_v9 = vshll.u32 %v4684_v37, 16  ;;  %v495_v10 = vor.u32 %v494_v53, %v491_v51 }
  0x3a   : > { %v504_v12 = vrot.slane %v502_v58, 4  ;;  %v3372_v19 = vrot.slane %v4492_v13, 9  ;;  %v1284_v20 = vrot.slane %v4495_v15, 5  ;;  %v482_v22 = vrot.slane %v481_v3, 4 }
  0x3b   : > { %5623 = vst [vmem:[#allocation7_spill] sm:$0xff] %v4694_v60  ;;  %3889 = vmatmul.mubr.msk.bf16.gmra.mrb[8].mxu0 %vm745_vm2, %v4694_v60  ;;  %3748 = vmatprep.mubr.msk.bf16.mxu1 %vm745_vm2, %v4694_v60  ;;  %v510_v24 = vrot.slane %v508_v9, 5  ;;  %v513_v27 = vshrl.u32 %v4692_v48, 16  ;;  %v516_v31 = vshll.u32 %v4692_v48, 16  ;;  %v496_v32 = vrot.slane %v495_v10, 4 }
  0x3c   : > { %v505_v13 = vor.u32 %v504_v12, %v500_v57  ;;  %v1285_v15 = vsel %vm4701_vm6, %v3372_v19, %v1284_v20  ;;  %v1286_v38 = vrot.slane %v1284_v20, 4  ;;  %v487_v43 = vsel %vm4511_vm3, %v482_v22, %v486_v50  ;;  %v4739_v20 = vld [vmem:[%s4472_s6 + $0x7c] sm:$0xf]  ;;  %v4752_v22 = vld [vmem:[%s4472_s6 + $0x80] sm:$0x1] }
  0x3d   : > { %v515_v44 = vrot.slane %v513_v27, 4  ;;  %v518_v51 = vrot.slane %v516_v31, 5  ;;  %v522_v56 = vshll.u32 %v4708_v23, 16  ;;  %v4727_v53 = vcombine.low %v477_v1, %v487_v43  ;;  %v4853_v60 = vld [vmem:[%s4472_s6 + $0x9c] sm:$0xf] }
  0x3e   : > { %v501_v58 = vsel %vm4511_vm3, %v496_v32, %v500_v57  ;;  %v506_v3 = vrot.slane %v505_v13, 4  ;;  %v1288_v9 = vsel %vm4701_vm6, %v1286_v38, %v1287_v41  ;;  %v526_v19 = vshrl.u32 %v4708_v23, 16 }
  0x3f   : > { %5626 = vst [vmem:[#allocation8_spill] sm:$0xff] %v4727_v53  ;;  %v4735_v10 = vcombine.low %v1285_v15, %v1288_v9  ;;  %v519_v12 = vor.u32 %v518_v51, %v515_v44  ;;  %v524_v50 = vrot.slane %v522_v56, 5  ;;  %3892 = vmatprep.mubr.msk.bf16.mxu0 %vm745_vm2, %v4727_v53  ;;  %3749 = vmatmul.mubr.msk.bf16.gmra.mrb[12].mxu1 %vm745_vm2, %v4727_v53  ;;  %v532_v41 = vshll.u32 %v4715_v26, 16  ;;  %v4767_v44 = vld [vmem:[%s4472_s6 + $0x84] sm:$0xf] }
  0x40   : > { %v511_v16 = vsel %vm4511_vm3, %v506_v3, %v510_v24  ;;  %v3373_v57 = vrot.slane %v4507_v29, 9  ;;  %v1293_v1 = vrot.slane %v1291_v62, 4  ;;  %v528_v32 = vrot.slane %v526_v19, 4 }
  0x41   : > { %5627 = vst [vmem:[#allocation9_spill] sm:$0xff] %v4735_v10  ;;  %v4754_v27 = vcombine.low %v501_v58, %v511_v16  ;;  %v520_v31 = vrot.slane %v519_v12, 4  ;;  %v537_v13 = vshrl.u32 %v4722_v40, 16  ;;  %v534_v15 = vrot.slane %v532_v41, 5  ;;  %v4783_v12 = vld [vmem:[%s4472_s6 + $0x88] sm:$0xf] }
  0x42   : > { %v1292_v24 = vsel %vm4701_vm6, %v3373_v57, %v1291_v62  ;;  %v1295_v38 = vsel %vm4701_vm6, %v1293_v1, %v1294_v63  ;;  %v540_v43 = vshll.u32 %v4722_v40, 16  ;;  %v529_v56 = vor.u32 %v528_v32, %v524_v50 }
  0x43   : > { %5628 = vst [vmem:[#allocation10_spill] sm:$0xff] %v4754_v27  ;;  %3893 = vmatmul.mubr.msk.bf16.gmra.mrb[12].mxu0 %vm745_vm2, %v4754_v27  ;;  %3752 = vmatprep.mubr.msk.bf16.mxu1 %vm745_vm2, %v4754_v27  ;;  %v525_v51 = vsel %vm4511_vm3, %v520_v31, %v524_v50  ;;  %v4775_v62 = vcombine.low %v1292_v24, %v1295_v38  ;;  %v539_v42 = vrot.slane %v537_v13, 4  ;;  %v546_v58 = vshll.u32 %v4739_v20, 16  ;;  %v4789_v13 = vld [vmem:[%s4472_s6 + $0x8c] sm:$0x1] }
  0x44   : > { %3916 = vmatprep.mubr.msk.bf16.mxu0 %vm745_vm2, %v4735_v10  ;;  %v542_v63 = vrot.slane %v540_v43, 5  ;;  %v550_v3 = vshrl.u32 %v4739_v20, 16  ;;  %v556_v9 = vshll.u32 %v4752_v22, 16  ;;  %v530_v19 = vrot.slane %v529_v56, 4 }
  0x45   : > { %5629 = vst [vmem:[#allocation11_spill] sm:$0xff] %v4775_v62  ;;  %v3374_v16 = vrot.slane %v4534_v49, 9  ;;  %v1298_v50 = vrot.slane %v4537_v54, 5  ;;  %v1301_v41 = vrot.slane %v4542_v59, 5  ;;  %v548_v1 = vrot.slane %v546_v58, 5 }
  0x46   : > { %v543_v57 = vor.u32 %v542_v63, %v539_v42  ;;  %v552_v31 = vrot.slane %v550_v3, 4  ;;  %v558_v32 = vrot.slane %v556_v9, 5  ;;  %v535_v24 = vsel %vm4511_vm3, %v530_v19, %v534_v15  ;;  %v4353_v9 = vld [vmem:[%s5582_s1 + $0x68] sm:$0xff]  }
  0x47   : > { %v1299_v38 = vsel %vm4701_vm6, %v3374_v16, %v1298_v50  ;;  %v1300_v43 = vrot.slane %v1298_v50, 4  ;;  %v561_v56 = vshrl.u32 %v4767_v44, 16  ;;  %v4796_v27 = vcombine.low %v525_v51, %v535_v24 }
  0x48   : > { %v544_v53 = vrot.slane %v543_v57, 4  ;;  %v553_v59 = vor.u32 %v552_v31, %v548_v1  ;;  %v564_v42 = vshll.u32 %v4767_v44, 16  ;;  %v570_v3 = vshll.u32 %v4783_v12, 16 }
  0x49   : > { %5630 = vst [vmem:[#allocation12_spill] sm:$0xff] %v4796_v27  ;;  %v1302_v63 = vsel %vm4701_vm6, %v1300_v43, %v1301_v41  ;;  %v563_v58 = vrot.slane %v561_v56, 4  ;;  %v574_v15 = vshrl.u32 %v4783_v12, 16  ;;  %3753 = vmatmul.mubr.msk.bf16.gmra.mrb[16].mxu1 %vm745_vm2, %v4796_v27  ;;  %v4813_v41 = vld [vmem:[%s4472_s6 + $0x90] sm:$0xf]  ;;  %v580_v24 = vshll.u32 %v4789_v13, 16 }
  0x4a   : > { %v549_v51 = vsel %vm4511_vm3, %v544_v53, %v548_v1  ;;  %v554_v19 = vrot.slane %v553_v59, 4  ;;  %v4810_v16 = vcombine.low %v1299_v38, %v1302_v63  ;;  %v566_v50 = vrot.slane %v564_v42, 5  ;;  %v4827_v59 = vld [vmem:[%s4472_s6 + $0x94] sm:$0xf] }
  0x4b   : > { %3917 = vmatmul.mubr.msk.bf16.vlgmr.msra.gmra.mrb[0].mxu0 %vm745_vm2, %v4775_v62  ;;  %v572_v57 = vrot.slane %v570_v3, 5  ;;  %v576_v31 = vrot.slane %v574_v15, 4  ;;  %v3375_v43 = vrot.slane %v4550_v0, 9  ;;  %v1305_v38 = vrot.slane %v4563_v21, 5  ;;  %v4832_v15 = vld [vmem:[%s4472_s6 + $0x98] sm:$0x1] }
  0x4c   : > { %5631 = vst [vmem:[#allocation13_spill] sm:$0xff] %v4810_v16  ;;  %3949 = vmatpush3.bf16.msra.mxu0 %v4624_v5  ;;  %v559_v53 = vsel %vm4511_vm3, %v554_v19, %v558_v32  ;;  %3920 = vmatprep.mubr.msk.bf16.mxu0 %vm745_vm2, %v4810_v16  ;;  %v567_v1 = vor.u32 %v566_v50, %v563_v58  ;;  %v1308_v56 = vrot.slane %v4570_v25, 5  ;;  %v582_v3 = vrot.slane %v580_v24, 5  ;;  %v4838_v32 = vld [vmem:[%s5582_s1 + $0x70] sm:$0xff]  }
  0x4d   : > { %v4829_v42 = vcombine.low %v549_v51, %v559_v53  ;;  %v577_v63 = vor.u32 %v576_v31, %v572_v57  ;;  %v585_v5 = vshrl.u32 %v4813_v41, 16  ;;  %3950 = vmatprep.subr.bf16.mxu0 %v4353_v9  ;;  %5633 = vst [vmem:[#allocation15_spill] sm:$0xff] %v4838_v32  ;;  %v1306_v25 = vsel %vm4701_vm6, %v3375_v43, %v1305_v38 }
  0x4e   : > { %v568_v58 = vrot.slane %v567_v1, 4  ;;  %v1307_v19 = vrot.slane %v1305_v38, 4  ;;  %v588_v51 = vshll.u32 %v4813_v41, 16  ;;  %v594_v24 = vshll.u32 %v4827_v59, 16 }
  0x4f   : > { %5632 = vst [vmem:[#allocation14_spill] sm:$0xff] %v4829_v42  ;;  %3756 = vmatprep.mubr.msk.bf16.mxu1 %vm745_vm2, %v4829_v42  ;;  %v578_v50 = vrot.slane %v577_v63, 4  ;;  %v587_v31 = vrot.slane %v585_v5, 4  ;;  %v598_v53 = vshrl.u32 %v4827_v59, 16  ;;  %v604_v38 = vshll.u32 %v4832_v15, 16 }
  0x50   : > { %v573_v27 = vsel %vm4511_vm3, %v568_v58, %v572_v57  ;;  %v1309_v1 = vsel %vm4701_vm6, %v1307_v19, %v1308_v56  ;;  %v590_v43 = vrot.slane %v588_v51, 5  ;;  %3951 = vmatpush3.bf16.msra.mxu0 %v4353_v9  ;;  %v596_v42 = vrot.slane %v594_v24, 5 }
  0x51   : > { %v583_v63 = vsel %vm4511_vm3, %v578_v50, %v582_v3  ;;  %v4857_v5 = vcombine.low %v1306_v25, %v1309_v1  ;;  %v600_v18 = vrot.slane %v598_v53, 4  ;;  %3984 = vmatprep.subr.bf16.mxu0 %v4838_v32  ;;  %v606_v58 = vrot.slane %v604_v38, 5  ;;  %v4874_v50 = vld [vmem:[%s4472_s6 + $0xa4] sm:$0x1] }
  0x52   : > { %v4863_v57 = vcombine.low %v573_v27, %v583_v63  ;;  %v591_v56 = vor.u32 %v590_v43, %v587_v31  ;;  %v3376_v19 = vrot.slane %v4578_v39, 9  ;;  %v1312_v3 = vrot.slane %v4584_v45, 5 }
  0x53   : > { %5634 = vst [vmem:[#allocation16_spill] sm:$0xff] %v4857_v5  ;;  %3921 = vmatmul.mubr.msk.bf16.gmra.mrb[4].mxu0 %vm745_vm2, %v4857_v5  ;;  %v601_v9 = vor.u32 %v600_v18, %v596_v42  ;;  %v1315_v25 = vrot.slane %v4594_v52, 5  ;;  %v609_v51 = vshrl.u32 %v4853_v60, 16  ;;  %v612_v31 = vshll.u32 %v4853_v60, 16 }
  0x54   : > { %5635 = vst [vmem:[#allocation17_spill] sm:$0xff] %v4863_v57  ;;  %3757 = vmatmul.mubr.msk.bf16.gmra.mrb[20].mxu1 %vm745_vm2, %v4863_v57  ;;  %v592_v27 = vrot.slane %v591_v56, 4  ;;  %v618_v24 = vshll.u32 %v4860_v36, 16  ;;  %v622_v18 = vshrl.u32 %v4860_v36, 16  ;;  %v1313_v52 = vsel %vm4701_vm6, %v3376_v19, %v1312_v3 }
  0x55   : > { %v602_v53 = vrot.slane %v601_v9, 4  ;;  %v1314_v1 = vrot.slane %v1312_v3, 4  ;;  %v611_v43 = vrot.slane %v609_v51, 4  ;;  %v614_v63 = vrot.slane %v612_v31, 5  ;;  %v4893_v3 = vld [vmem:[%s4472_s6 + $0xac] sm:$0xf] }
  0x56   : > { %v597_v38 = vsel %vm4511_vm3, %v592_v27, %v596_v42  ;;  %v620_v56 = vrot.slane %v618_v24, 5  ;;  %v624_v57 = vrot.slane %v622_v18, 4  ;;  %v628_v9 = vshll.u32 %v4874_v50, 16 }
  0x57   : > { %v607_v47 = vsel %vm4511_vm3, %v602_v53, %v606_v58  ;;  %v1316_v5 = vsel %vm4701_vm6, %v1314_v1, %v1315_v25  ;;  %v3377_v19 = vrot.slane %v4600_v55, 9  ;;  %v615_v27 = vor.u32 %v614_v63, %v611_v43 }
  0x58   : > { %v4895_v51 = vcombine.low %v597_v38, %v607_v47  ;;  %v4897_v42 = vcombine.low %v1313_v52, %v1316_v5  ;;  %v625_v31 = vor.u32 %v624_v57, %v620_v56  ;;  %v630_v24 = vrot.slane %v628_v9, 5  ;;  %v4907_v5 = vld [vmem:[%s4472_s6 + $0xb0] sm:$0x1] }
  0x59   : > { %v1319_v18 = vrot.slane %v4604_v61, 5  ;;  %v1322_v58 = vrot.slane %v4637_v28, 5  ;;  %v633_v25 = vshrl.u32 %v4884_v14, 16  ;;  %v616_v47 = vrot.slane %v615_v27, 4 }
  0x5a   : > { %5636 = vst [vmem:[#allocation18_spill] sm:$0xff] %v4895_v51  ;;  %5637 = vst [vmem:[#allocation19_spill] sm:$0xff] %v4897_v42  ;;  %3760 = vmatprep.mubr.msk.bf16.mxu1 %vm745_vm2, %v4895_v51  ;;  %3924 = vmatprep.mubr.msk.bf16.mxu0 %vm745_vm2, %v4897_v42  ;;  %v626_v53 = vrot.slane %v625_v31, 4  ;;  %v636_v57 = vshll.u32 %v4884_v14, 16  ;;  %v642_v52 = vshll.u32 %v4893_v3, 16  ;;  %v646_v38 = vshrl.u32 %v4893_v3, 16 }
  0x5b   : > { %v1320_v28 = vsel %vm4701_vm6, %v3377_v19, %v1319_v18  ;;  %v1321_v1 = vrot.slane %v1319_v18, 4  ;;  %v635_v43 = vrot.slane %v633_v25, 4  ;;  %v621_v63 = vsel %vm4511_vm3, %v616_v47, %v620_v56  ;;  %v4919_v51 = vld [vmem:[%s4472_s6 + $0xb4] sm:$0xf]  ;;  %v4931_v47 = vld [vmem:[%s4472_s6 + $0xb8] sm:$0xf] }
  0x5c   : > { %v631_v9 = vsel %vm4511_vm3, %v626_v53, %v630_v24  ;;  %v638_v27 = vrot.slane %v636_v57, 5  ;;  %v644_v31 = vrot.slane %v642_v52, 5  ;;  %v648_v18 = vrot.slane %v646_v38, 4 }
  0x5d   : > { %v4921_v42 = vcombine.low %v621_v63, %v631_v9  ;;  %v1323_v19 = vsel %vm4701_vm6, %v1321_v1, %v1322_v58  ;;  %v652_v25 = vshll.u32 %v4907_v5, 16  ;;  %v3378_v56 = vrot.slane %v4642_v33, 9  ;;  %v4937_v58 = vld [vmem:[%s4472_s6 + $0xbc] sm:$0x1] }
  0x5e   : > { %v4926_v16 = vcombine.low %v1320_v28, %v1323_v19  ;;  %v639_v62 = vor.u32 %v638_v27, %v635_v43  ;;  %v1326_v24 = vrot.slane %v4647_v4, 5  ;;  %v649_v53 = vor.u32 %v648_v18, %v644_v31 }
  0x5f   : > { %5638 = vst [vmem:[#allocation20_spill] sm:$0xff] %v4921_v42  ;;  %3761 = vmatmul.mubr.msk.bf16.gmra.mrb[24].mxu1 %vm745_vm2, %v4921_v42  ;;  %v654_v57 = vrot.slane %v652_v25, 5  ;;  %v1329_v52 = vrot.slane %v4661_v2, 5  ;;  %v657_v1 = vshrl.u32 %v4919_v51, 16  ;;  %v660_v63 = vshll.u32 %v4919_v51, 16 }
  0x60   : > { %5639 = vst [vmem:[#allocation21_spill] sm:$0xff] %v4926_v16  ;;  %3925 = vmatmul.mubr.msk.bf16.gmra.mrb[8].mxu0 %vm745_vm2, %v4926_v16  ;;  %v640_v28 = vrot.slane %v639_v62, 4  ;;  %v1327_v43 = vsel %vm4701_vm6, %v3378_v56, %v1326_v24  ;;  %v1328_v38 = vrot.slane %v1326_v24, 4  ;;  %v650_v9 = vrot.slane %v649_v53, 4 }
  0x61   : > { %v659_v27 = vrot.slane %v657_v1, 4  ;;  %v666_v19 = vshll.u32 %v4931_v47, 16  ;;  %v670_v2 = vshrl.u32 %v4931_v47, 16  ;;  %v662_v42 = vrot.slane %v660_v63, 5 }
  0x62   : > { %v645_v18 = vsel %vm4511_vm3, %v640_v28, %v644_v31  ;;  %v1330_v25 = vsel %vm4701_vm6, %v1328_v38, %v1329_v52  ;;  %v676_v62 = vshll.u32 %v4937_v58, 16  ;;  %v655_v56 = vsel %vm4511_vm3, %v650_v9, %v654_v57 }
  0x63   : > { %v4954_v24 = vcombine.low %v1327_v43, %v1330_v25  ;;  %v668_v53 = vrot.slane %v666_v19, 5  ;;  %v672_v1 = vrot.slane %v670_v2, 4  ;;  %v4956_v16 = vcombine.low %v645_v18, %v655_v56 }
  0x64   : > { %v663_v10 = vor.u32 %v662_v42, %v659_v27  ;;  %v678_v32 = vrot.slane %v676_v62, 5  ;;  %v3379_v33 = vrot.slane %v4665_v8, 9  ;;  %v1333_v52 = vrot.slane %v4670_v17, 5 }
  0x65   : > { %3928 = vmatprep.mubr.msk.bf16.mxu0 %vm745_vm2, %v4954_v24  ;;  %v673_v31 = vor.u32 %v672_v1, %v668_v53  ;;  %v1336_v28 = vrot.slane %v4684_v37, 5  ;;  %v3380_v57 = vrot.slane %v4692_v48, 9  ;;  %3764 = vmatprep.mubr.msk.bf16.mxu1 %vm745_vm2, %v4956_v16  ;;  %v3337_v42 = vcombine.low %v4480_v6, %v4483_v7 }
  0x66   : > { %v664_v43 = vrot.slane %v663_v10, 4  ;;  %v1340_v38 = vrot.slane %v4708_v23, 5  ;;  %v1343_v63 = vrot.slane %v4715_v26, 5  ;;  %v1334_v27 = vsel %vm4701_vm6, %v3379_v33, %v1333_v52 }
  0x67   : > { %v674_v9 = vrot.slane %v673_v31, 4  ;;  %v1335_v19 = vrot.slane %v1333_v52, 4  ;;  %v1347_v37 = vrot.slane %v4739_v20, 5  ;;  %v3381_v6 = vrot.slane %v4722_v40, 9 }
  0x68   : > { %v669_v2 = vsel %vm4511_vm3, %v664_v43, %v668_v53  ;;  %v1341_v10 = vsel %vm4701_vm6, %v3380_v57, %v1340_v38  ;;  %v1342_v18 = vrot.slane %v1340_v38, 4  ;;  %v1350_v33 = vrot.slane %v4752_v22, 5 }
  0x69   : > { %v679_v7 = vsel %vm4511_vm3, %v674_v9, %v678_v32  ;;  %v1337_v26 = vsel %vm4701_vm6, %v1335_v19, %v1336_v28  ;;  %v1349_v25 = vrot.slane %v1347_v37, 4  ;;  %v3382_v31 = vrot.slane %v4767_v44, 9 }
  0x6a   : > { %v4983_v62 = vcombine.low %v669_v2, %v679_v7  ;;  %v4985_v56 = vcombine.low %v1334_v27, %v1337_v26  ;;  %v1344_v53 = vsel %vm4701_vm6, %v1342_v18, %v1343_v63  ;;  %v1354_v52 = vrot.slane %v4783_v12, 5  ;;  %v4361_v7 = vld [vmem:[%s5582_s1 + $0x28] sm:$0xff]  }
  0x6b   : > { %v4989_v1 = vcombine.low %v1341_v10, %v1344_v53  ;;  %v1357_v22 = vrot.slane %v4789_v13, 5  ;;  %v1348_v32 = vsel %vm4701_vm6, %v3381_v6, %v1347_v37  ;;  %v1351_v28 = vsel %vm4701_vm6, %v1349_v25, %v1350_v33 }
  0x6c   : > { %3765 = vmatmul.mubr.msk.bf16.gmra.mrb[28].mxu1 %vm745_vm2, %v4983_v62  ;;  %3929 = vmatmul.mubr.msk.bf16.gmra.mrb[12].mxu0 %vm745_vm2, %v4985_v56  ;;  %v1356_v57 = vrot.slane %v1354_v52, 4  ;;  %v1361_v43 = vrot.slane %v4827_v59, 5  ;;  %v1368_v38 = vrot.slane %v4860_v36, 5  ;;  %v1355_v63 = vsel %vm4701_vm6, %v3382_v31, %v1354_v52 }
  0x6d   : > { %3772 = vmatprep.mubr.msk.bf16.mxu1 %vm745_vm2, %v3337_v42  ;;  %3932 = vmatprep.mubr.msk.bf16.mxu0 %vm745_vm2, %v4989_v1  ;;  %v5011_v42 = vcombine.low %v1348_v32, %v1351_v28  ;;  %v3383_v9 = vrot.slane %v4813_v41, 9  ;;  %v1364_v19 = vrot.slane %v4832_v15, 5  ;;  %v5017_v37 = vcombine.low %v4507_v29, %v4520_v35 }
  0x6e   : > { %v1358_v13 = vsel %vm4701_vm6, %v1356_v57, %v1357_v22  ;;  %v1363_v27 = vrot.slane %v1361_v43, 4  ;;  %v3384_v2 = vrot.slane %v4853_v60, 9  ;;  %v1370_v18 = vrot.slane %v1368_v38, 4 }
  0x6f   : > { %v5020_v10 = vcombine.low %v1355_v63, %v1358_v13  ;;  %v1371_v6 = vrot.slane %v4874_v50, 5  ;;  %v1375_v26 = vrot.slane %v4893_v3, 5  ;;  %v1362_v29 = vsel %vm4701_vm6, %v3383_v9, %v1361_v43 }
  0x70   : > { %v1365_v35 = vsel %vm4701_vm6, %v1363_v27, %v1364_v19  ;;  %v5040_v15 = vcombine.low %v4534_v49, %v4537_v54  ;;  %v1369_v50 = vsel %vm4701_vm6, %v3384_v2, %v1368_v38  ;;  %v5046_v25 = vcombine.low %v4665_v8, %v4670_v17  ;;  %v5061_v54 = vld [vmem:[%s5582_s1 + $0x30] sm:$0xff]  }
  0x71   : > { %v3385_v33 = vrot.slane %v4884_v14, 9  ;;  %v1382_v53 = vrot.slane %v4931_v47, 5  ;;  %v5056_v49 = vcombine.low %v4692_v48, %v4708_v23  ;;  %v5063_v8 = vcombine.low %v1362_v29, %v1365_v35 }
  0x72   : > { %v1377_v17 = vrot.slane %v1375_v26, 4  ;;  %v1378_v31 = vrot.slane %v4907_v5, 5  ;;  %v5068_v52 = vcombine.low %v4722_v40, %v4739_v20  ;;  %v5072_v22 = vcombine.low %v4767_v44, %v4783_v12  ;;  %v285_v5 = vld [vmem:[%s4472_s6 + $0xc8] sm:$0x1] }
  0x73   : > { %v5076_v48 = vcombine.low %v4813_v41, %v4827_v59  ;;  %v5080_v23 = vcombine.low %v4853_v60, %v4860_v36  ;;  %v5084_v32 = vcombine.low %v4884_v14, %v4893_v3  ;;  %v5088_v40 = vcombine.low %v4550_v0, %v4563_v21  ;;  %v5099_v14 = vld [vmem:[%s4472_s6 + $0xc4] sm:$0xf] }
  0x74   : > { %3773 = vmatmul.mubr.msk.bf16.vlgmr.msra.gmra.mrb[0].mxu1 %vm745_vm2, %v4517_v34  ;;  %3933 = vmatmul.mubr.msk.bf16.gmra.mrb[16].mxu0 %vm745_vm2, %v5011_v42  ;;  %v5094_v44 = vcombine.low %v4919_v51, %v4931_v47  ;;  %v3386_v36 = vrot.slane %v4919_v51, 9  ;;  %v1384_v60 = vrot.slane %v1382_v53, 4  ;;  %v1385_v12 = vrot.slane %v4937_v58, 5  ;;  %v5120_v51 = vld [vmem:[%s4472_s6 + $0xc0] sm:$0xf] }
  0x75   : > { %3805 = vmatpush3.bf16.msra.mxu1 %v4589_v46  ;;  %3776 = vmatprep.mubr.msk.bf16.mxu1 %vm745_vm2, %v5017_v37  ;;  %v1372_v46 = vsel %vm4701_vm6, %v1370_v18, %v1371_v6  ;;  %v1376_v0 = vsel %vm4701_vm6, %v3385_v33, %v1375_v26  ;;  %v1379_v21 = vsel %vm4701_vm6, %v1377_v17, %v1378_v31  ;;  %v2154_v41 = vrot.slane %v5099_v14, 5 }
  0x76   : > { %3936 = vmatprep.mubr.msk.bf16.mxu0 %vm745_vm2, %v5020_v10  ;;  %3806 = vmatprep.subr.bf16.mxu1 %v4361_v7  ;;  %v5090_v20 = vcombine.low %v1369_v50, %v1372_v46  ;;  %v1383_v59 = vsel %vm4701_vm6, %v3386_v36, %v1382_v53  ;;  %v1386_v3 = vsel %vm4701_vm6, %v1384_v60, %v1385_v12  ;;  %v1912_v57 = vshrl.u32 %v5120_v51, 16  ;;  %v5640_v46 = vld [vmem:[#allocation4_spill] sm:$0xff]  ;;  %v5641_v60 = vld [vmem:[#allocation15_spill] sm:$0xff]  ;;  %v4375_v12 = vld [vmem:[%s5582_s1 + $0x80] sm:$0xff]  }
  0x77   : > { %v5125_v47 = vcombine.low %v4578_v39, %v4584_v45  ;;  %v5127_v58 = vcombine.low %v1376_v0, %v1379_v21  ;;  %v5131_v28 = vcombine.low %v4600_v55, %v4604_v61  ;;  %v1915_v43 = vshll.u32 %v5120_v51, 16  ;;  %v4377_v0 = vld [vmem:[%s4472_s6 + $0x4] sm:$0xf] }
  0x78   : > { %v1921_v38 = vshll.u32 %v5099_v14, 16  ;;  %v1925_v63 = vshrl.u32 %v5099_v14, 16  ;;  %v5137_v13 = vcombine.low %v1383_v59, %v1386_v3  ;;  %v3471_v9 = vrot.slane %v5120_v51, 9  ;;  %v4379_v3 = vld [vmem:[%s4472_s6] sm:$0xf] }
  0x79   : > { %3807 = vmatpush3.bf16.msra.mxu1 %v4361_v7  ;;  %v2156_v39 = vrot.slane %v2154_v41, 4  ;;  %v2157_v45 = vrot.slane %v285_v5, 5  ;;  %v1914_v27 = vrot.slane %v1912_v57, 4  ;;  %v1917_v19 = vrot.slane %v1915_v43, 5 }
  0x7a   : > { %3840 = vmatprep.subr.bf16.mxu1 %v5061_v54  ;;  %v1923_v2 = vrot.slane %v1921_v38, 5  ;;  %v1927_v18 = vrot.slane %v1925_v63, 4  ;;  %v1931_v6 = vshll.u32 %v285_v5, 16  ;;  %v2155_v7 = vsel %vm4701_vm6, %v3471_v9, %v2154_v41  ;;  %v4378_v41 = vld [vmem:[%s4472_s6 + $0x8] sm:$0x1]  ;;  %v4374_v9 = vld [vmem:[%s5582_s1 + $0x38] sm:$0xff]  }
  0x7b   : > { %v1918_v55 = vor.u32 %v1917_v19, %v1914_v27  ;;  %v2158_v26 = vsel %vm4701_vm6, %v2156_v39, %v2157_v45  ;;  %v5154_v33 = vcombine.low %v5640_v46, %v4647_v4  ;;  %v4371_v4 = vld [vmem:[%s5582_s1 + $0x78] sm:$0xff]   ;;  %v1277_v21 = vrot.slane %v4377_v0, 5  ;;  %v5643_v45 = vld [vmem:[#allocation11_spill] sm:$0xff]  ;;  %v4380_v27 = vld [vmem:[%s5582_s1 + $0x40] sm:$0xff]  }
  0x7c   : > { %3777 = vmatmul.mubr.msk.bf16.gmra.mrb[4].mxu1 %vm745_vm2, %v5040_v15  ;;  %3937 = vmatmul.mubr.msk.bf16.gmra.mrb[20].mxu0 %vm745_vm2, %v5063_v8  ;;  %v1928_v61 = vor.u32 %v1927_v18, %v1923_v2  ;;  %v1933_v50 = vrot.slane %v1931_v6, 5  ;;  %v5156_v53 = vcombine.low %v2155_v7, %v2158_v26  ;;  %v1280_v59 = vrot.slane %v4378_v41, 5  ;;  %v5642_v39 = vld [vmem:[#allocation9_spill] sm:$0xff]  ;;  %v5646_v18 = vld [vmem:[#allocation19_spill] sm:$0xff]  ;;  %v5256_v6 = vld [vmem:[%s4472_s6 + $0xd0] sm:$0xf] }
  0x7d   : > { %3780 = vmatprep.mubr.msk.bf16.mxu1 %vm745_vm2, %v5088_v40  ;;  %3940 = vmatprep.mubr.msk.bf16.mxu0 %vm745_vm2, %v5090_v20  ;;  %v1919_v29 = vrot.slane %v1918_v55, 4  ;;  %v3371_v5 = vrot.slane %v4379_v3, 9  ;;  %v1279_v57 = vrot.slane %v1277_v21, 4  ;;  %v5644_v19 = vld [vmem:[#allocation13_spill] sm:$0xff]  ;;  %v4376_v7 = vld [vmem:[%s5582_s1 + $0x88] sm:$0xff]   ;;  %v5653_v46 = vld [vmem:[#allocation8_spill] sm:$0xff] }
  0x7e   : > { %v1929_v35 = vrot.slane %v1928_v61, 4  ;;  %v5647_v55 = vld [vmem:[#allocation21_spill] sm:$0xff]  ;;  %v5253_v61 = vld [vmem:[%s4472_s6 + $0xcc] sm:$0xf]  ;;  %v5658_v41 = vld [vmem:[#allocation18_spill] sm:$0xff]  ;;  %v2836_v30 = vrot.slane %v5256_v6, 5 }
  0x7f   : > { %v1924_v17 = vsel %vm4511_vm3, %v1919_v29, %v1923_v2  ;;  %v1278_v43 = vsel %vm4701_vm6, %v3371_v5, %v1277_v21  ;;  %v1281_v38 = vsel %vm4701_vm6, %v1279_v57, %v1280_v59  ;;  %v5242_v2 = vcombine.low %v5120_v51, %v5099_v14  ;;  %v5648_v51 = vld [vmem:[#allocation2_spill] sm:$0xff]  ;;  %v5649_v26 = vld [vmem:[#allocation3_spill] sm:$0xff]  ;;  %v5650_v29 = vld [vmem:[#allocation5_spill] sm:$0xff] }
  0x80   : > { %v1934_v31 = vsel %vm4511_vm3, %v1929_v35, %v1933_v50  ;;  %v3391_v63 = vcombine.low %v1278_v43, %v1281_v38  ;;  %v3499_v14 = vcombine.low %v5253_v61, %v5256_v6  ;;  %v5651_v35 = vld [vmem:[#allocation6_spill] sm:$0xff]  ;;  %v5652_v50 = vld [vmem:[#allocation7_spill] sm:$0xff]  ;;  %v2597_v0 = vshll.u32 %v5253_v61, 16  ;;  %v288_v43 = vld [vmem:[%s4472_s6 + $0xd4] sm:$0x1] }
  0x81   : > { %v5162_v36 = vcombine.low %v1924_v17, %v1934_v31  ;;  %v5654_v17 = vld [vmem:[#allocation10_spill] sm:$0xff]  ;;  %v5655_v31 = vld [vmem:[#allocation12_spill] sm:$0xff]  ;;  %v2607_v21 = vshrl.u32 %v5256_v6, 16 }
  0x82   : > { %v2599_v3 = vrot.slane %v2597_v0, 5 }
  0x83   : > { %v2609_v57 = vrot.slane %v2607_v21, 4 }
  0x84   : > { %3781 = vmatmul.mubr.msk.bf16.gmra.mrb[8].mxu1 %vm745_vm2, %v5125_v47  ;;  %3941 = vmatmul.mubr.msk.bf16.gmra.mrb[24].mxu0 %vm745_vm2, %v5127_v58 }
  0x85   : > { %3784 = vmatprep.mubr.msk.bf16.mxu1 %vm745_vm2, %v5131_v28  ;;  %3944 = vmatprep.mubr.msk.bf16.mxu0 %vm745_vm2, %v5137_v13 }
  0x8c   : > { %3785 = vmatmul.mubr.msk.bf16.gmra.mrb[12].mxu1 %vm745_vm2, %v5154_v33  ;;  %3945 = vmatmul.mubr.msk.bf16.gmra.mrb[28].mxu0 %vm745_vm2, %v5156_v53 }
  0x8d   : > { %3788 = vmatprep.mubr.msk.bf16.mxu1 %vm745_vm2, %v5046_v25  ;;  %3952 = vmatprep.mubr.msk.bf16.mxu0 %vm745_vm2, %v5017_v37 }
  0x94   : > { %3789 = vmatmul.mubr.msk.bf16.gmra.mrb[16].mxu1 %vm745_vm2, %v5056_v49  ;;  %3953 = vmatmul.mubr.msk.bf16.vlgmr.msra.gmra.mrb[0].mxu0 %vm745_vm2, %v5040_v15 }
  0x95   : > { %3985 = vmatpush3.bf16.msra.mxu0 %v5641_v60  ;;  %3792 = vmatprep.mubr.msk.bf16.mxu1 %vm745_vm2, %v5068_v52  ;;  %v5657_v60 = vld [vmem:[#allocation17_spill] sm:$0xff] }
  0x96   : > { %3956 = vmatprep.mubr.msk.bf16.mxu0 %vm745_vm2, %v5088_v40  ;;  %3986 = vmatprep.subr.bf16.mxu0 %v4371_v4 }
  0x99   : > { %3987 = vmatpush3.bf16.msra.mxu0 %v4371_v4  ;;  %v5656_v4 = vld [vmem:[#allocation14_spill] sm:$0xff] }
  0x9a   : > { %4020 = vmatprep.subr.bf16.mxu0 %v4375_v12 }
  0x9c   : > { %3793 = vmatmul.mubr.msk.bf16.gmra.mrb[20].mxu1 %vm745_vm2, %v5072_v22  ;;  %3957 = vmatmul.mubr.msk.bf16.gmra.mrb[4].mxu0 %vm745_vm2, %v5125_v47 }
  0x9d   : > { %3796 = vmatprep.mubr.msk.bf16.mxu1 %vm745_vm2, %v5076_v48  ;;  %3960 = vmatprep.mubr.msk.bf16.mxu0 %vm745_vm2, %v5131_v28 }
  0xa4   : > { %3797 = vmatmul.mubr.msk.bf16.gmra.mrb[24].mxu1 %vm745_vm2, %v5080_v23  ;;  %3961 = vmatmul.mubr.msk.bf16.gmra.mrb[8].mxu0 %vm745_vm2, %v5154_v33 }
  0xa5   : > { %3800 = vmatprep.mubr.msk.bf16.mxu1 %vm745_vm2, %v5084_v32  ;;  %3964 = vmatprep.mubr.msk.bf16.mxu0 %vm745_vm2, %v5046_v25 }
  0xac   : > { %3801 = vmatmul.mubr.msk.bf16.gmra.mrb[28].mxu1 %vm745_vm2, %v5094_v44  ;;  %3965 = vmatmul.mubr.msk.bf16.gmra.mrb[12].mxu0 %vm745_vm2, %v5056_v49 }
  0xad   : > { %3808 = vmatprep.mubr.msk.bf16.mxu1 %vm745_vm2, %v3391_v63  ;;  %3968 = vmatprep.mubr.msk.bf16.mxu0 %vm745_vm2, %v5068_v52 }
  0xb4   : > { %3809 = vmatmul.mubr.msk.bf16.vlgmr.msra.gmra.mrb[0].mxu1 %vm745_vm2, %v5642_v39  ;;  %3969 = vmatmul.mubr.msk.bf16.gmra.mrb[16].mxu0 %vm745_vm2, %v5072_v22 }
  0xb5   : > { %3841 = vmatpush3.bf16.msra.mxu1 %v5061_v54  ;;  %3812 = vmatprep.mubr.msk.bf16.mxu1 %vm745_vm2, %v5643_v45  ;;  %v5645_v54 = vld [vmem:[#allocation16_spill] sm:$0xff] }
  0xb6   : > { %3972 = vmatprep.mubr.msk.bf16.mxu0 %vm745_vm2, %v5076_v48  ;;  %3842 = vmatprep.subr.bf16.mxu1 %v4374_v9 }
  0xb9   : > { %3843 = vmatpush3.bf16.msra.mxu1 %v4374_v9  ;;  %v2613_v9 = vshll.u32 %v288_v43, 16 }
  0xba   : > { %4056 = vmatprep.subr.bf16.mxu1 %v4380_v27 }
  0xbc   : > { %3813 = vmatmul.mubr.msk.bf16.gmra.mrb[4].mxu1 %vm745_vm2, %v5644_v19  ;;  %3973 = vmatmul.mubr.msk.bf16.gmra.mrb[20].mxu0 %vm745_vm2, %v5080_v23 }
  0xbd   : > { %3816 = vmatprep.mubr.msk.bf16.mxu1 %vm745_vm2, %v5645_v54  ;;  %3976 = vmatprep.mubr.msk.bf16.mxu0 %vm745_vm2, %v5084_v32 }
  0xc4   : > { %3817 = vmatmul.mubr.msk.bf16.gmra.mrb[8].mxu1 %vm745_vm2, %v5646_v18  ;;  %3977 = vmatmul.mubr.msk.bf16.gmra.mrb[24].mxu0 %vm745_vm2, %v5094_v44 }
  0xc5   : > { %3820 = vmatprep.mubr.msk.bf16.mxu1 %vm745_vm2, %v5647_v55  ;;  %3980 = vmatprep.mubr.msk.bf16.mxu0 %vm745_vm2, %v5242_v2 }
  0xcc   : > { %3821 = vmatmul.mubr.msk.bf16.gmra.mrb[12].mxu1 %vm745_vm2, %v4954_v24  ;;  %3981 = vmatmul.mubr.msk.bf16.gmra.mrb[28].mxu0 %vm745_vm2, %v3499_v14  ;;  %v2615_v14 = vrot.slane %v2613_v9, 5 }
  0xcd   : > { %3824 = vmatprep.mubr.msk.bf16.mxu1 %vm745_vm2, %v4985_v56  ;;  %3988 = vmatprep.mubr.msk.bf16.mxu0 %vm745_vm2, %v5648_v51 }
  0xd4   : > { %3825 = vmatmul.mubr.msk.bf16.gmra.mrb[16].mxu1 %vm745_vm2, %v4989_v1  ;;  %3989 = vmatmul.mubr.msk.bf16.vlgmr.msra.gmra.mrb[0].mxu0 %vm745_vm2, %v5649_v26 }
  0xd5   : > { %4021 = vmatpush3.bf16.msra.mxu0 %v4375_v12  ;;  %3828 = vmatprep.mubr.msk.bf16.mxu1 %vm745_vm2, %v5011_v42  ;;  %v2594_v12 = vshrl.u32 %v5253_v61, 16 }
  0xd6   : > { %3992 = vmatprep.mubr.msk.bf16.mxu0 %vm745_vm2, %v5650_v29  ;;  %4022 = vmatprep.subr.bf16.mxu0 %v4376_v7 }
  0xd7   : > { %v2596_v59 = vrot.slane %v2594_v12, 4 }
  0xd9   : > { %4023 = vmatpush3.bf16.msra.mxu0 %v4376_v7  ;;  %v2600_v38 = vor.u32 %v2599_v3, %v2596_v59 }
  0xdb   : > { %v2601_v39 = vrot.slane %v2600_v38, 4 }
  0xdc   : > { %3829 = vmatmul.mubr.msk.bf16.gmra.mrb[20].mxu1 %vm745_vm2, %v5020_v10  ;;  %3993 = vmatmul.mubr.msk.bf16.gmra.mrb[4].mxu0 %vm745_vm2, %v5651_v35 }
  0xdd   : > { %3832 = vmatprep.mubr.msk.bf16.mxu1 %vm745_vm2, %v5063_v8  ;;  %3996 = vmatprep.mubr.msk.bf16.mxu0 %vm745_vm2, %v5652_v50 }
  0xe4   : > { %3833 = vmatmul.mubr.msk.bf16.gmra.mrb[24].mxu1 %vm745_vm2, %v5090_v20  ;;  %3997 = vmatmul.mubr.msk.bf16.gmra.mrb[8].mxu0 %vm745_vm2, %v5653_v46 }
  0xe5   : > { %3836 = vmatprep.mubr.msk.bf16.mxu1 %vm745_vm2, %v5127_v58  ;;  %4000 = vmatprep.mubr.msk.bf16.mxu0 %vm745_vm2, %v5654_v17 }
  0xec   : > { %3837 = vmatmul.mubr.msk.bf16.gmra.mrb[28].mxu1 %vm745_vm2, %v5137_v13  ;;  %4001 = vmatmul.mubr.msk.bf16.gmra.mrb[12].mxu0 %vm745_vm2, %v5655_v31 }
  0xed   : > { %3844 = vmatprep.mubr.msk.bf16.mxu1 %vm745_vm2, %v4517_v34  ;;  %4004 = vmatprep.mubr.msk.bf16.mxu0 %vm745_vm2, %v5656_v4  ;;  %v2603_v34 = vshll.u32 %v5256_v6, 16 }
  0xef   : > { %v2605_v5 = vrot.slane %v2603_v34, 5 }
  0xf1   : > { %v2610_v63 = vor.u32 %v2609_v57, %v2605_v5 }
  0xf4   : > { %3845 = vmatmul.mubr.msk.bf16.vlgmr.msra.gmra.mrb[0].mxu1 %vm745_vm2, %v5017_v37  ;;  %4005 = vmatmul.mubr.msk.bf16.gmra.mrb[16].mxu0 %vm745_vm2, %v5657_v60  ;;  %v4381_v37 = vld [vmem:[%s5582_s1 + $0x48] sm:$0xff]  }
  0xf5   : > { %4058 = vmatpush3.bf16.msra.mxu1 %v4380_v27  ;;  %3848 = vmatprep.mubr.msk.bf16.mxu1 %vm745_vm2, %v5040_v15  ;;  %v5659_v15 = vld [vmem:[#allocation20_spill] sm:$0xff]  ;;  %v2611_v27 = vrot.slane %v2610_v63, 4 }
  0xf6   : > { %4008 = vmatprep.mubr.msk.bf16.mxu0 %vm745_vm2, %v5658_v41  ;;  %4057 = vmatprep.subr.bf16.mxu1 %v4381_v37 }
  0xf9   : > { %4059 = vmatpush3.bf16.msra.mxu1 %v4381_v37 }
  0xfc   : > { %3849 = vmatmul.mubr.msk.bf16.gmra.mrb[4].mxu1 %vm745_vm2, %v5088_v40  ;;  %4009 = vmatmul.mubr.msk.bf16.gmra.mrb[20].mxu0 %vm745_vm2, %v5659_v15  ;;  %v2606_v40 = vsel %vm4511_vm3, %v2601_v39, %v2605_v5 }
  0xfd   : > { %3852 = vmatprep.mubr.msk.bf16.mxu1 %vm745_vm2, %v5125_v47  ;;  %4012 = vmatprep.mubr.msk.bf16.mxu0 %vm745_vm2, %v4956_v16  ;;  %v2616_v47 = vsel %vm4511_vm3, %v2611_v27, %v2615_v14 }
  0xfe   : > { %v3522_v51 = vcombine.low %v2606_v40, %v2616_v47 }
 0x104   : > { %3853 = vmatmul.mubr.msk.bf16.gmra.mrb[8].mxu1 %vm745_vm2, %v5131_v28  ;;  %4013 = vmatmul.mubr.msk.bf16.gmra.mrb[24].mxu0 %vm745_vm2, %v4983_v62 }
 0x105   : > { %3856 = vmatprep.mubr.msk.bf16.mxu1 %vm745_vm2, %v5154_v33  ;;  %4016 = vmatprep.mubr.msk.bf16.mxu0 %vm745_vm2, %v5162_v36 }
 0x10c   : > { %3857 = vmatmul.mubr.msk.bf16.gmra.mrb[12].mxu1 %vm745_vm2, %v5046_v25  ;;  %4017 = vmatmul.mubr.msk.bf16.gmra.mrb[28].mxu0 %vm745_vm2, %v3522_v51 }
 0x10d   : > { %3860 = vmatprep.mubr.msk.bf16.mxu1 %vm745_vm2, %v5056_v49  ;;  %4024 = vmatprep.mubr.msk.bf16.mxu0 %vm745_vm2, %v5643_v45 }
 0x114   : > { %3861 = vmatmul.mubr.msk.bf16.gmra.mrb[16].mxu1 %vm745_vm2, %v5068_v52  ;;  %4025 = vmatmul.mubr.msk.bf16.vlgmr.msra.gmra.mrb[0].mxu0 %vm745_vm2, %v5644_v19 }
 0x115   : > { %3864 = vmatprep.mubr.msk.bf16.mxu1 %vm745_vm2, %v5072_v22  ;;  %4028 = vmatprep.mubr.msk.bf16.mxu0 %vm745_vm2, %v5645_v54  ;;  %v5430_v54 = vld [vmem:[%s5584_s3] ss:$0 sm:$0xff] }
 0x11c   : > { %3865 = vmatmul.mubr.msk.bf16.gmra.mrb[20].mxu1 %vm745_vm2, %v5076_v48  ;;  %4029 = vmatmul.mubr.msk.bf16.gmra.mrb[4].mxu0 %vm745_vm2, %v5646_v18 }
 0x11d   : > { %3868 = vmatprep.mubr.msk.bf16.mxu1 %vm745_vm2, %v5080_v23  ;;  %4032 = vmatprep.mubr.msk.bf16.mxu0 %vm745_vm2, %v5647_v55 }
 0x124   : > { %3869 = vmatmul.mubr.msk.bf16.gmra.mrb[24].mxu1 %vm745_vm2, %v5084_v32  ;;  %4033 = vmatmul.mubr.msk.bf16.gmra.mrb[8].mxu0 %vm745_vm2, %v4954_v24  ;;  %v3541_v24 = vrot.slane %v5253_v61, 9 }
 0x125   : > { %3872 = vmatprep.mubr.msk.bf16.mxu1 %vm745_vm2, %v5094_v44  ;;  %4036 = vmatprep.mubr.msk.bf16.mxu0 %vm745_vm2, %v4985_v56  ;;  %v2838_v56 = vrot.slane %v2836_v30, 4 }
 0x12c   : > { %3873 = vmatmul.mubr.msk.bf16.gmra.mrb[28].mxu1 %vm745_vm2, %v5242_v2  ;;  %4037 = vmatmul.mubr.msk.bf16.gmra.mrb[12].mxu0 %vm745_vm2, %v4989_v1  ;;  %v2839_v1 = vrot.slane %v288_v43, 5 }
 0x12d   : > { %3896 = vmatprep.mubr.msk.bf16.mxu1 %vm745_vm2, %v5655_v31  ;;  %4040 = vmatprep.mubr.msk.bf16.mxu0 %vm745_vm2, %v5011_v42  ;;  %v2837_v42 = vsel %vm4701_vm6, %v3541_v24, %v2836_v30 }
 0x134   : > { %3897 = vmatmul.mubr.msk.bf16.vlgmr.msra.gmra.mrb[16].mxu1 %vm745_vm2, %v5656_v4  ;;  %4041 = vmatmul.mubr.msk.bf16.gmra.mrb[16].mxu0 %vm745_vm2, %v5020_v10  ;;  %v2840_v10 = vsel %vm4701_vm6, %v2838_v56, %v2839_v1 }
 0x135   : > { %3900 = vmatprep.mubr.msk.bf16.mxu1 %vm745_vm2, %v5657_v60  ;;  %4044 = vmatprep.mubr.msk.bf16.mxu0 %vm745_vm2, %v5063_v8  ;;  %v3546_v25 = vcombine.low %v2837_v42, %v2840_v10 }
 0x13c   : > { %3901 = vmatmul.mubr.msk.bf16.gmra.mrb[20].mxu1 %vm745_vm2, %v5658_v41  ;;  %4045 = vmatmul.mubr.msk.bf16.gmra.mrb[20].mxu0 %vm745_vm2, %v5090_v20 }
 0x13d   : > { %3904 = vmatprep.mubr.msk.bf16.mxu1 %vm745_vm2, %v5659_v15  ;;  %4048 = vmatprep.mubr.msk.bf16.mxu0 %vm745_vm2, %v5127_v58 }
 0x144   : > { %3905 = vmatmul.mubr.msk.bf16.gmra.mrb[24].mxu1 %vm745_vm2, %v4956_v16  ;;  %4049 = vmatmul.mubr.msk.bf16.gmra.mrb[24].mxu0 %vm745_vm2, %v5137_v13 }
 0x145   : > { %3908 = vmatprep.mubr.msk.bf16.mxu1 %vm745_vm2, %v4983_v62  ;;  %4052 = vmatprep.mubr.msk.bf16.mxu0 %vm745_vm2, %v5156_v53 }
 0x14c   : > { %3909 = vmatmul.mubr.msk.bf16.gmra.mrb[28].mxu1 %vm745_vm2, %v5162_v36  ;;  %4053 = vmatmul.mubr.msk.bf16.gmra.mrb[28].mxu0 %vm745_vm2, %v3546_v25  ;;  %v5425_v36 = vld [vmem:[%s5583_s2] ss:$0 sm:$0xff] }
 0x1c7   : > { %v3846_v16 = vpop.f32.mrb[0].mxu1 }
 0x1c8   : > { %v1752_v49 = vpop.f32.mrb[1].mxu1 }
 0x1c9   : > { %v3847_v8 = vpop.f32.mrb[2].mxu1 }
 0x1ca   : > { %v1755_v52 = vpop.f32.mrb[3].mxu1 }
 0x1cf   : > { %v3850_v62 = vpop.f32.mrb[4].mxu1 }
 0x1d0   : > { %v1768_v22 = vpop.f32.mrb[5].mxu1 }
 0x1d1   : > { %v3851_v48 = vpop.f32.mrb[6].mxu1 }
 0x1d2   : > { %v1771_v23 = vpop.f32.mrb[7].mxu1 }
 0x1d7   : > { %v3854_v32 = vpop.f32.mrb[8].mxu1 }
 0x1d8   : > { %v1784_v20 = vpop.f32.mrb[9].mxu1 }
 0x1d9   : > { %v5410_v44 = vpop.f32.mrb[10].mxu1 }
 0x1da   : > { %v5412_v11 = vpop.f32.mrb[11].mxu1 }
 0x1df   : > { %v5414_v58 = vpop.f32.mrb[12].mxu1 }
 0x1e0   : > { %v5416_v28 = vpop.f32.mrb[13].mxu1 }
 0x1e1   : > { %v5418_v13 = vpop.f32.mrb[14].mxu1 }
 0x1e2   : > { %v5420_v33 = vpop.f32.mrb[15].mxu1 }
 0x1e7   : > { %v4026_v53 = vpop.f32.mrb[0].mxu0 }
 0x1e8   : > { %v4060_v45 = vadd.f32 %v4026_v53, %v3846_v16  ;;  %v2898_v19 = vpop.f32.mrb[1].mxu0 }
 0x1e9   : > { %v4061_v2 = vadd.f32 %v2898_v19, %v1752_v49  ;;  %v4027_v18 = vpop.f32.mrb[2].mxu0 }
 0x1ea   : > { %v3066_v55 = vmul.f32 %v4060_v45, %v5425_v36  ;;  %v4062_v61 = vadd.f32 %v4027_v18, %v3847_v8  ;;  %v2901_v6 = vpop.f32.mrb[3].mxu0 }
 0x1eb   : > { %v3064_v7 = vmul.f32 %v4061_v2, %v5425_v36  ;;  %v4063_v26 = vadd.f32 %v2901_v6, %v1755_v52 }
 0x1ec   : > { %v3105_v29 = vadd.f32 %v5430_v54, %v3066_v55  ;;  %v3067_v35 = vmul.f32 %v4062_v61, %v5425_v36 }
 0x1ed   : > { %v3103_v50 = vadd.f32 %v5430_v54, %v3064_v7  ;;  %v3065_v46 = vmul.f32 %v4063_v26, %v5425_v36 }
 0x1ee   : > { %v3137_v17 = vmax.f32 %v3105_v29, 0.0  ;;  %v3106_v31 = vadd.f32 %v5430_v54, %v3067_v35 }
 0x1ef   : > { %v3135_v4 = vmax.f32 %v3103_v50, 0.0  ;;  %v3104_v60 = vadd.f32 %v5430_v54, %v3065_v46  ;;  %v4030_v12 = vpop.f32.mrb[4].mxu0 }
 0x1f0   : > { %3169 = vst.msk [vmem:[%s5440_s26 + $0x10] sm:$0xff] %vm745_vm2, %v3137_v17  ;;  %v3138_v0 = vmax.f32 %v3106_v31, 0.0  ;;  %v4064_v21 = vadd.f32 %v4030_v12, %v3850_v62  ;;  %v2914_v34 = vpop.f32.mrb[5].mxu0 }
 0x1f1   : > { %3167 = vst.msk [vmem:[%s5440_s26] sm:$0xff] %vm745_vm2, %v3135_v4  ;;  %v3136_v41 = vmax.f32 %v3104_v60, 0.0  ;;  %v4065_v37 = vadd.f32 %v2914_v34, %v1768_v22  ;;  %v4031_v59 = vpop.f32.mrb[6].mxu0 }
 0x1f2   : > { %3170 = vst.msk [vmem:[%s5440_s26 + $0x18] sm:$0xff] %vm745_vm2, %v3138_v0  ;;  %v3070_v3 = vmul.f32 %v4064_v21, %v5425_v36  ;;  %v4066_v5 = vadd.f32 %v4031_v59, %v3851_v48  ;;  %v2917_v57 = vpop.f32.mrb[7].mxu0 }
 0x1f3   : > { %3168 = vst.msk [vmem:[%s5440_s26 + $0x8] sm:$0xff] %vm745_vm2, %v3136_v41  ;;  %v3068_v43 = vmul.f32 %v4065_v37, %v5425_v36  ;;  %v4067_v15 = vadd.f32 %v2917_v57, %v1771_v23 }
 0x1f4   : > { %v3109_v38 = vadd.f32 %v5430_v54, %v3070_v3  ;;  %v3071_v63 = vmul.f32 %v4066_v5, %v5425_v36 }
 0x1f5   : > { %v3107_v9 = vadd.f32 %v5430_v54, %v3068_v43  ;;  %v3069_v39 = vmul.f32 %v4067_v15, %v5425_v36 }
 0x1f6   : > { %v3141_v27 = vmax.f32 %v3109_v38, 0.0  ;;  %v3110_v14 = vadd.f32 %v5430_v54, %v3071_v63 }
 0x1f7   : > { %v3139_v40 = vmax.f32 %v3107_v9, 0.0  ;;  %v3108_v47 = vadd.f32 %v5430_v54, %v3069_v39  ;;  %v4034_v51 = vpop.f32.mrb[8].mxu0 }
 0x1f8   : > { %3173 = vst.msk [vmem:[%s5440_s26 + $0x30] sm:$0xff] %vm745_vm2, %v3141_v27  ;;  %v3142_v30 = vmax.f32 %v3110_v14, 0.0  ;;  %v4068_v24 = vadd.f32 %v4034_v51, %v3854_v32  ;;  %v2930_v56 = vpop.f32.mrb[9].mxu0 }
 0x1f9   : > { %3171 = vst.msk [vmem:[%s5440_s26 + $0x20] sm:$0xff] %vm745_vm2, %v3139_v40  ;;  %v3140_v1 = vmax.f32 %v3108_v47, 0.0  ;;  %v4069_v42 = vadd.f32 %v2930_v56, %v1784_v20  ;;  %v4035_v10 = vpop.f32.mrb[10].mxu0 }
 0x1fa   : > { %3174 = vst.msk [vmem:[%s5440_s26 + $0x38] sm:$0xff] %vm745_vm2, %v3142_v30  ;;  %v3074_v25 = vmul.f32 %v4068_v24, %v5425_v36  ;;  %v4070_v16 = vadd.f32 %v4035_v10, %v5410_v44  ;;  %v2933_v49 = vpop.f32.mrb[11].mxu0 }
 0x1fb   : > { %3172 = vst.msk [vmem:[%s5440_s26 + $0x28] sm:$0xff] %vm745_vm2, %v3140_v1  ;;  %v3072_v8 = vmul.f32 %v4069_v42, %v5425_v36  ;;  %v4071_v52 = vadd.f32 %v2933_v49, %v5412_v11 }
 0x1fc   : > { %v3113_v62 = vadd.f32 %v5430_v54, %v3074_v25  ;;  %v3075_v22 = vmul.f32 %v4070_v16, %v5425_v36 }
 0x1fd   : > { %v3111_v48 = vadd.f32 %v5430_v54, %v3072_v8  ;;  %v3073_v23 = vmul.f32 %v4071_v52, %v5425_v36 }
 0x1fe   : > { %v3145_v32 = vmax.f32 %v3113_v62, 0.0  ;;  %v3114_v20 = vadd.f32 %v5430_v54, %v3075_v22 }
 0x1ff   : > { %v3143_v44 = vmax.f32 %v3111_v48, 0.0  ;;  %v3112_v53 = vadd.f32 %v5430_v54, %v3073_v23  ;;  %v4038_v45 = vpop.f32.mrb[12].mxu0 }
 0x200   : > { %3177 = vst.msk [vmem:[%s5440_s26 + $0x50] sm:$0xff] %vm745_vm2, %v3145_v32  ;;  %v3146_v11 = vmax.f32 %v3114_v20, 0.0  ;;  %v4072_v19 = vadd.f32 %v4038_v45, %v5414_v58  ;;  %v2946_v2 = vpop.f32.mrb[13].mxu0 }
 0x201   : > { %3175 = vst.msk [vmem:[%s5440_s26 + $0x40] sm:$0xff] %vm745_vm2, %v3143_v44  ;;  %v3144_v18 = vmax.f32 %v3112_v53, 0.0  ;;  %v4073_v55 = vadd.f32 %v2946_v2, %v5416_v28  ;;  %v4039_v61 = vpop.f32.mrb[14].mxu0 }
 0x202   : > { %3178 = vst.msk [vmem:[%s5440_s26 + $0x58] sm:$0xff] %vm745_vm2, %v3146_v11  ;;  %v3078_v6 = vmul.f32 %v4072_v19, %v5425_v36  ;;  %v4074_v7 = vadd.f32 %v4039_v61, %v5418_v13  ;;  %v2949_v26 = vpop.f32.mrb[15].mxu0 }
 0x203   : > { %3176 = vst.msk [vmem:[%s5440_s26 + $0x48] sm:$0xff] %vm745_vm2, %v3144_v18  ;;  %v3076_v29 = vmul.f32 %v4073_v55, %v5425_v36  ;;  %v4075_v58 = vadd.f32 %v2949_v26, %v5420_v33 }
 0x204   : > { %v3117_v35 = vadd.f32 %v5430_v54, %v3078_v6  ;;  %v3079_v28 = vmul.f32 %v4074_v7, %v5425_v36 }
 0x205   : > { %v3115_v50 = vadd.f32 %v5430_v54, %v3076_v29  ;;  %v3077_v46 = vmul.f32 %v4075_v58, %v5425_v36 }
 0x206   : > { %v3149_v17 = vmax.f32 %v3117_v35, 0.0  ;;  %v3118_v13 = vadd.f32 %v5430_v54, %v3079_v28 }
 0x207   : > { %v3147_v31 = vmax.f32 %v3115_v50, 0.0  ;;  %v3116_v4 = vadd.f32 %v5430_v54, %v3077_v46  ;;  %v3898_v60 = vpop.f32.mrb[16].mxu1  ;;  %v4042_v12 = vpop.f32.mrb[16].mxu0 }
 0x208   : > { %3181 = vst.msk [vmem:[%s5440_s26 + $0x70] sm:$0xff] %vm745_vm2, %v3149_v17  ;;  %v3150_v33 = vmax.f32 %v3118_v13, 0.0  ;;  %v4076_v0 = vadd.f32 %v4042_v12, %v3898_v60  ;;  %v2056_v21 = vpop.f32.mrb[17].mxu1  ;;  %v2962_v34 = vpop.f32.mrb[17].mxu0 }
 0x209   : > { %3179 = vst.msk [vmem:[%s5440_s26 + $0x60] sm:$0xff] %vm745_vm2, %v3147_v31  ;;  %v3148_v41 = vmax.f32 %v3116_v4, 0.0  ;;  %v4077_v37 = vadd.f32 %v2962_v34, %v2056_v21  ;;  %v3899_v59 = vpop.f32.mrb[18].mxu1  ;;  %v4043_v3 = vpop.f32.mrb[18].mxu0 }
 0x20a   : > { %3182 = vst.msk [vmem:[%s5440_s26 + $0x78] sm:$0xff] %vm745_vm2, %v3150_v33  ;;  %v3082_v5 = vmul.f32 %v4076_v0, %v5425_v36  ;;  %v4078_v57 = vadd.f32 %v4043_v3, %v3899_v59  ;;  %v2059_v43 = vpop.f32.mrb[19].mxu1  ;;  %v2965_v15 = vpop.f32.mrb[19].mxu0 }
 0x20b   : > { %3180 = vst.msk [vmem:[%s5440_s26 + $0x68] sm:$0xff] %vm745_vm2, %v3148_v41  ;;  %v3080_v38 = vmul.f32 %v4077_v37, %v5425_v36  ;;  %v4079_v63 = vadd.f32 %v2965_v15, %v2059_v43 }
 0x20c   : > { %v3121_v9 = vadd.f32 %v5430_v54, %v3082_v5  ;;  %v3083_v39 = vmul.f32 %v4078_v57, %v5425_v36 }
 0x20d   : > { %v3119_v27 = vadd.f32 %v5430_v54, %v3080_v38  ;;  %v3081_v14 = vmul.f32 %v4079_v63, %v5425_v36 }
 0x20e   : > { %v3153_v40 = vmax.f32 %v3121_v9, 0.0  ;;  %v3122_v47 = vadd.f32 %v5430_v54, %v3083_v39 }
 0x20f   : > { %v3151_v51 = vmax.f32 %v3119_v27, 0.0  ;;  %v3120_v30 = vadd.f32 %v5430_v54, %v3081_v14  ;;  %v3902_v24 = vpop.f32.mrb[20].mxu1  ;;  %v4046_v56 = vpop.f32.mrb[20].mxu0 }
 0x210   : > { %3185 = vst.msk [vmem:[%s5440_s26 + $0x90] sm:$0xff] %vm745_vm2, %v3153_v40  ;;  %v3154_v1 = vmax.f32 %v3122_v47, 0.0  ;;  %v4080_v42 = vadd.f32 %v4046_v56, %v3902_v24  ;;  %v2072_v10 = vpop.f32.mrb[21].mxu1  ;;  %v2978_v25 = vpop.f32.mrb[21].mxu0 }
 0x211   : > { %3183 = vst.msk [vmem:[%s5440_s26 + $0x80] sm:$0xff] %vm745_vm2, %v3151_v51  ;;  %v3152_v16 = vmax.f32 %v3120_v30, 0.0  ;;  %v4081_v49 = vadd.f32 %v2978_v25, %v2072_v10  ;;  %v3903_v8 = vpop.f32.mrb[22].mxu1  ;;  %v4047_v52 = vpop.f32.mrb[22].mxu0 }
 0x212   : > { %3186 = vst.msk [vmem:[%s5440_s26 + $0x98] sm:$0xff] %vm745_vm2, %v3154_v1  ;;  %v3086_v62 = vmul.f32 %v4080_v42, %v5425_v36  ;;  %v4082_v22 = vadd.f32 %v4047_v52, %v3903_v8  ;;  %v2075_v48 = vpop.f32.mrb[23].mxu1  ;;  %v2981_v23 = vpop.f32.mrb[23].mxu0 }
 0x213   : > { %3184 = vst.msk [vmem:[%s5440_s26 + $0x88] sm:$0xff] %vm745_vm2, %v3152_v16  ;;  %v3084_v32 = vmul.f32 %v4081_v49, %v5425_v36  ;;  %v4083_v20 = vadd.f32 %v2981_v23, %v2075_v48 }
 0x214   : > { %v3125_v44 = vadd.f32 %v5430_v54, %v3086_v62  ;;  %v3087_v53 = vmul.f32 %v4082_v22, %v5425_v36 }
 0x215   : > { %v3123_v45 = vadd.f32 %v5430_v54, %v3084_v32  ;;  %v3085_v11 = vmul.f32 %v4083_v20, %v5425_v36 }
 0x216   : > { %v3157_v19 = vmax.f32 %v3125_v44, 0.0  ;;  %v3126_v2 = vadd.f32 %v5430_v54, %v3087_v53 }
 0x217   : > { %v3155_v18 = vmax.f32 %v3123_v45, 0.0  ;;  %v3124_v55 = vadd.f32 %v5430_v54, %v3085_v11  ;;  %v3906_v61 = vpop.f32.mrb[24].mxu1  ;;  %v4050_v6 = vpop.f32.mrb[24].mxu0 }
 0x218   : > { %3189 = vst.msk [vmem:[%s5440_s26 + $0xb0] sm:$0xff] %vm745_vm2, %v3157_v19  ;;  %v3158_v7 = vmax.f32 %v3126_v2, 0.0  ;;  %v4084_v26 = vadd.f32 %v4050_v6, %v3906_v61  ;;  %v2088_v29 = vpop.f32.mrb[25].mxu1  ;;  %v2994_v58 = vpop.f32.mrb[25].mxu0 }
 0x219   : > { %3187 = vst.msk [vmem:[%s5440_s26 + $0xa0] sm:$0xff] %vm745_vm2, %v3155_v18  ;;  %v3156_v35 = vmax.f32 %v3124_v55, 0.0  ;;  %v4085_v28 = vadd.f32 %v2994_v58, %v2088_v29  ;;  %v3907_v50 = vpop.f32.mrb[26].mxu1  ;;  %v4051_v46 = vpop.f32.mrb[26].mxu0 }
 0x21a   : > { %3190 = vst.msk [vmem:[%s5440_s26 + $0xb8] sm:$0xff] %vm745_vm2, %v3158_v7  ;;  %v3090_v17 = vmul.f32 %v4084_v26, %v5425_v36  ;;  %v4086_v13 = vadd.f32 %v4051_v46, %v3907_v50  ;;  %v2091_v31 = vpop.f32.mrb[27].mxu1  ;;  %v2997_v4 = vpop.f32.mrb[27].mxu0 }
 0x21b   : > { %3188 = vst.msk [vmem:[%s5440_s26 + $0xa8] sm:$0xff] %vm745_vm2, %v3156_v35  ;;  %v3088_v60 = vmul.f32 %v4085_v28, %v5425_v36  ;;  %v4087_v12 = vadd.f32 %v2997_v4, %v2091_v31 }
 0x21c   : > { %v3129_v33 = vadd.f32 %v5430_v54, %v3090_v17  ;;  %v3091_v0 = vmul.f32 %v4086_v13, %v5425_v36 }
 0x21d   : > { %v3127_v21 = vadd.f32 %v5430_v54, %v3088_v60  ;;  %v3089_v34 = vmul.f32 %v4087_v12, %v5425_v36 }
 0x21e   : > { %v3161_v41 = vmax.f32 %v3129_v33, 0.0  ;;  %v3130_v37 = vadd.f32 %v5430_v54, %v3091_v0 }
 0x21f   : > { %v3159_v59 = vmax.f32 %v3127_v21, 0.0  ;;  %v3128_v3 = vadd.f32 %v5430_v54, %v3089_v34  ;;  %v3910_v5 = vpop.f32.mrb[28].mxu1  ;;  %v4054_v57 = vpop.f32.mrb[28].mxu0 }
 0x220   : > { %3193 = vst.msk [vmem:[%s5440_s26 + $0xd0] sm:$0xff] %vm745_vm2, %v3161_v41  ;;  %v3162_v43 = vmax.f32 %v3130_v37, 0.0  ;;  %v4088_v15 = vadd.f32 %v4054_v57, %v3910_v5  ;;  %v2104_v38 = vpop.f32.mrb[29].mxu1  ;;  %v3010_v63 = vpop.f32.mrb[29].mxu0 }
 0x221   : > { %3191 = vst.msk [vmem:[%s5440_s26 + $0xc0] sm:$0xff] %vm745_vm2, %v3159_v59  ;;  %v3160_v9 = vmax.f32 %v3128_v3, 0.0  ;;  %v4089_v39 = vadd.f32 %v3010_v63, %v2104_v38  ;;  %v3911_v27 = vpop.f32.mrb[30].mxu1  ;;  %v4055_v14 = vpop.f32.mrb[30].mxu0 }
 0x222   : > { %3194 = vst.msk [vmem:[%s5440_s26 + $0xd8] sm:$0xff] %vm745_vm2, %v3162_v43  ;;  %v3094_v40 = vmul.f32 %v4088_v15, %v5425_v36  ;;  %v4090_v47 = vadd.f32 %v4055_v14, %v3911_v27  ;;  %v2107_v51 = vpop.f32.mrb[31].mxu1  ;;  %v3013_v30 = vpop.f32.mrb[31].mxu0 }
 0x223   : > { %3192 = vst.msk [vmem:[%s5440_s26 + $0xc8] sm:$0xff] %vm745_vm2, %v3160_v9  ;;  %v3092_v24 = vmul.f32 %v4089_v39, %v5425_v36  ;;  %v4091_v56 = vadd.f32 %v3013_v30, %v2107_v51 }
 0x224   : > { %v3133_v1 = vadd.f32 %v5430_v54, %v3094_v40  ;;  %v3095_v42 = vmul.f32 %v4090_v47, %v5425_v36 }
 0x225   : > { %v3131_v10 = vadd.f32 %v5430_v54, %v3092_v24  ;;  %v3093_v25 = vmul.f32 %v4091_v56, %v5425_v36 }
 0x226   : > { %v3165_v16 = vmax.f32 %v3133_v1, 0.0  ;;  %v3134_v49 = vadd.f32 %v5430_v54, %v3095_v42 }
 0x227   : > { %v3163_v8 = vmax.f32 %v3131_v10, 0.0  ;;  %v3132_v52 = vadd.f32 %v5430_v54, %v3093_v25 }
 0x228   : > { %3197 = vst.msk [vmem:[%s5440_s26 + $0xf0] sm:$0xff] %vm745_vm2, %v3165_v16  ;;  %v3166_v62 = vmax.f32 %v3134_v49, 0.0 }
 0x229   : > { %3195 = vst.msk [vmem:[%s5440_s26 + $0xe0] sm:$0xff] %vm745_vm2, %v3163_v8  ;;  %v3164_v22 = vmax.f32 %v3132_v52, 0.0 }
 0x22a   : > { %3198 = vst.msk [vmem:[%s5440_s26 + $0xf8] sm:$0xff] %vm745_vm2, %v3166_v62 }
 0x22b   : > { %3196 = vst.msk [vmem:[%s5440_s26 + $0xe8] sm:$0xff] %vm745_vm2, %v3164_v22 }
 0x22c PF: > { %s14_s17 = sadd.s32 1, %s4404_s17   ;;  %s5660_s15 = smov %s4400_s16 }
 0x22d   : > { %p11_p5 = scmp.ge.s32.totalorder %s14_s17, 4   ;;  %s5661_s16 = smov %s5663_s18 }
 0x22f   :  { %13 = sbr.rel (!%p11_p5) target bundleno = 2 (0x2), region = 74 }

// kernel: unet_block_forward.5
= control target key start
LH: loop header
LB: loop body
LE: loop exit
PB: predicated region body
PF: predicated region fallthrough
CT: control target
= control target key end

     0   :  { %s14364_s15 = smov 0   ;;  %s14366_s16 = smov 0   ;;  %s18095_s0 = inlined_call_operand.vmem [shape: bf16[2,1,34,34,32], index: 0, kind: input, shape index: {}]   ;;  %s18096_s1 = inlined_call_operand.vmem [shape: bf16[9,32,32], index: 1, kind: input, shape index: {}]   ;;  %s18097_s2 = inlined_call_operand.vmem [shape: f32[1,32], index: 2, kind: input, shape index: {}]   ;;  %s18098_s3 = inlined_call_operand.vmem [shape: f32[1,32], index: 3, kind: input, shape index: {}]   ;;  %s18099_s4 = inlined_call_operand.vmem [shape: f32[2,1,1024,32], index: 4, kind: output, shape index: {}]  }
   0x1   :  { %s14368_s17 = smov 0  }
   0x2 LB: > { %s26_s18 = sadd.s32 1, %s14333_s16  ;;  %p10319_p0 = scmp.ge.s32.totalorder %s14337_s17, 1  ;;  %s14337_s17 = sphi %s14368_s17, %s14_s17   ;;  %s14333_s16 = sphi %s14366_s16, %s18973_s16   ;;  %s14329_s15 = sphi %s14364_s15, %s18972_s15  }
   0x3   : > { %p28_p1 = scmp.ge.s32.totalorder %s26_s18, 2  ;;  %p182_p2 = scmp.lt.s32.totalorder %s14337_s17, 3 }
   0x5   : > { %s18975_s18 = smov (%p28_p1, %s26_s18), 0  ;;  %p183_p3 = pnand %p10319_p0, %p182_p2 }
   0x7   : > { %186 = sbr.rel (%p183_p3) target bundleno = 1458 (0x5b2), region = 36 }
   0xe   : > { %v14027_v0 = vld [vmem:[%s18096_s1 + $0x10] sm:$0xff]   ;;  %p216_p4 = scmp.lt.s32.totalorder %s14329_s15, 1  ;;  %v14028_v1 = vld [vmem:[%s18096_s1 + $0x40] sm:$0xff]   ;;  %v14029_v2 = vld [vmem:[%s18096_s1 + $0x18] sm:$0xff]   ;;  %vm409_vm0 = vsmask.f32 3328 }
   0xf   : > { %11786 = vmatprep.subr.bf16.mxu1 %v14027_v0  ;;  %12314 = vmatprep.subr.bf16.mxu0 %v14028_v1  ;;  %v14030_v3 = vld [vmem:[%s18096_s1 + $0x48] sm:$0xff]   ;;  %v14400_v4 = vld [vmem:[%s18096_s1] sm:$0xff]   ;;  %vm410_vm1 = vsmask.f32 7440  ;;  %v14410_v5 = vld [vmem:[%s18096_s1 + $0x50] sm:$0xff]   ;;  %vm2029_vm2 = vcmask 261120  }
  0x10   : > { %s18977_s15 = smov (!%p216_p4, %s14329_s15), 1  ;;  %11787 = vmatpush3.bf16.msra.mxu1 %v14027_v0  ;;  %12315 = vmatpush3.bf16.msra.mxu0 %v14028_v1  ;;  %vm14423_vm3 = vmor %vm409_vm0, %vm410_vm1  ;;  %v18412_v31 = vmov 0  ;;  %vm3868_vm4 = vcmask 1042432   ;;  %vm3869_vm5 = vcmask 1046532  }
  0x11   : > { %11788 = vmatprep.subr.bf16.mxu1 %v14029_v2  ;;  %s14002_s27 = smul.u32 680, %s18977_s15  ;;  %12316 = vmatprep.subr.bf16.mxu0 %v14030_v3  ;;  %v18413_v31 = vsel %vm14423_vm3, 4294967295, %v18412_v31  ;;  %vm14826_vm6 = vmor %vm3868_vm4, %vm3869_vm5 }
  0x12   : > { %18414 = vst [vmem:[#allocation2_spill] sm:$0xff] %v18413_v31 }
  0x13   : > { %s14405_s6 = scalar_lea.vmem %s18095_s0, %s14002_s27  ;;  %s11191_s27 = sshll.u32 %s18977_s15, 10 }
  0x14   : > { %11789 = vmatpush3.bf16.msra.mxu1 %v14029_v2  ;;  %v235_v6 = vld [vmem:[%s14405_s6] sm:$0xf]  ;;  %v236_v7 = vld [vmem:[%s14405_s6 + $0x4] sm:$0xf]  ;;  %v237_v8 = vld [vmem:[%s14405_s6 + $0x8] sm:$0xf]  ;;  %12317 = vmatpush3.bf16.msra.mxu0 %v14030_v3  ;;  %s17463_s29 = scalar_lea.vmem %s18099_s4, %s11191_s27 }
  0x15   : > { %v413_v9 = vshrl.u32 %v235_v6, 16  ;;  %v416_v10 = vshll.u32 %v235_v6, 16  ;;  %v422_v11 = vshll.u32 %v236_v7, 16  ;;  %v426_v12 = vshrl.u32 %v236_v7, 16  ;;  %11918 = vmatprep.subr.bf16.mxu1 %v14400_v4  ;;  %v240_v15 = vld [vmem:[%s14405_s6 + $0x14] sm:$0xf]  ;;  %12446 = vmatprep.subr.bf16.mxu0 %v14410_v5 }
  0x16   : > { %v432_v13 = vshll.u32 %v237_v8, 16  ;;  %v436_v14 = vshrl.u32 %v237_v8, 16  ;;  %v241_v16 = vld [vmem:[%s14405_s6 + $0x18] sm:$0xf]  ;;  %v242_v21 = vld [vmem:[%s14405_s6 + $0x1c] sm:$0xf] }
  0x17   : > { %v415_v17 = vrot.slane %v413_v9, 4  ;;  %v418_v18 = vrot.slane %v416_v10, 5  ;;  %v424_v19 = vrot.slane %v422_v11, 5  ;;  %v428_v20 = vrot.slane %v426_v12, 4  ;;  %v238_v30 = vld [vmem:[%s14405_s6 + $0xc] sm:$0xf] }
  0x18   : > { %v434_v22 = vrot.slane %v432_v13, 5  ;;  %v438_v23 = vrot.slane %v436_v14, 4  ;;  %v457_v24 = vshrl.u32 %v240_v15, 16  ;;  %v460_v25 = vshll.u32 %v240_v15, 16  ;;  %v239_v44 = vld [vmem:[%s14405_s6 + $0x10] sm:$0x1] }
  0x19   : > { %v419_v26 = vor.u32 %v418_v18, %v415_v17  ;;  %v429_v27 = vor.u32 %v428_v20, %v424_v19  ;;  %v466_v28 = vshll.u32 %v241_v16, 16  ;;  %v470_v29 = vshrl.u32 %v241_v16, 16  ;;  %v14433_v49 = vld [vmem:[%s14405_s6 + $0x20] sm:$0xf]  ;;  %v14439_v60 = vld [vmem:[%s14405_s6 + $0x24] sm:$0x1] }
  0x1a   : > { %v439_v32 = vor.u32 %v438_v23, %v434_v22  ;;  %v459_v33 = vrot.slane %v457_v24, 4  ;;  %v462_v34 = vrot.slane %v460_v25, 5  ;;  %v476_v35 = vshll.u32 %v242_v21, 16  ;;  %v245_v2 = vld [vmem:[%s14405_s6 + $0x28] sm:$0xf] }
  0x1b   : > { %v420_v36 = vrot.slane %v419_v26, 4  ;;  %v430_v37 = vrot.slane %v429_v27, 4  ;;  %v468_v38 = vrot.slane %v466_v28, 5  ;;  %v472_v39 = vrot.slane %v470_v29, 4  ;;  %v246_v9 = vld [vmem:[%s14405_s6 + $0x2c] sm:$0xf] }
  0x1c   : > { %v440_v40 = vrot.slane %v439_v32, 4  ;;  %v463_v41 = vor.u32 %v462_v34, %v459_v33  ;;  %v478_v42 = vrot.slane %v476_v35, 5  ;;  %v480_v43 = vshrl.u32 %v242_v21, 16  ;;  %v247_v14 = vld [vmem:[%s14405_s6 + $0x30] sm:$0xf]  ;;  %v14035_v34 = vld [vmem:[%s18096_s1 + $0x8] sm:$0xff]  }
  0x1d   : > { %v425_v45 = vsel %vm14423_vm3, %v420_v36, %v424_v19  ;;  %v435_v46 = vsel %vm14423_vm3, %v430_v37, %v434_v22  ;;  %v473_v47 = vor.u32 %v472_v39, %v468_v38  ;;  %v442_v48 = vshll.u32 %v238_v30, 16  ;;  %v248_v23 = vld [vmem:[%s14405_s6 + $0x34] sm:$0xf]  ;;  %v249_v28 = vld [vmem:[%s14405_s6 + $0x38] sm:$0x1] }
  0x1e   : > { %v10327_v50 = vcombine.low %v425_v45, %v435_v46  ;;  %v464_v51 = vrot.slane %v463_v41, 4  ;;  %v482_v52 = vrot.slane %v480_v43, 4  ;;  %v446_v53 = vshrl.u32 %v238_v30, 16  ;;  %v250_v39 = vld [vmem:[%s14405_s6 + $0x3c] sm:$0xf] }
  0x1f   : > { %v474_v54 = vrot.slane %v473_v47, 4  ;;  %v444_v55 = vrot.slane %v442_v48, 5  ;;  %v452_v56 = vshll.u32 %v239_v44, 16  ;;  %v486_v61 = vshll.u32 %v14433_v49, 16  ;;  %v251_v44 = vld [vmem:[%s14405_s6 + $0x40] sm:$0xf] }
  0x20   : > { %11790 = vmatprep.mubr.msk.bf16.mxu1 %vm2029_vm2, %v10327_v50  ;;  %v469_v57 = vsel %vm14423_vm3, %v464_v51, %v468_v38  ;;  %v483_v58 = vor.u32 %v482_v52, %v478_v42  ;;  %v448_v59 = vrot.slane %v446_v53, 4  ;;  %v490_v1 = vshrl.u32 %v14433_v49, 16  ;;  %v14034_v50 = vld [vmem:[%s18096_s1 + $0x58] sm:$0xff]   ;;  %v15693_v31 = vld [vmem:[%s14405_s6 + $0x168] sm:$0xf] }
  0x21   : > { %v479_v62 = vsel %vm14423_vm3, %v474_v54, %v478_v42  ;;  %v445_v63 = vsel %vm14423_vm3, %v440_v40, %v444_v55  ;;  %v454_v0 = vrot.slane %v452_v56, 5  ;;  %v488_v8 = vrot.slane %v486_v61, 5  ;;  %v252_v56 = vld [vmem:[%s14405_s6 + $0x44] sm:$0xf]  ;;  %18519 = vst [vmem:[#allocation105_spill] sm:$0xff] %v15693_v31 }
  0x22   : > { %v484_v3 = vrot.slane %v483_v58, 4  ;;  %v10329_v6 = vcombine.low %v469_v57, %v479_v62  ;;  %v449_v7 = vor.u32 %v448_v59, %v444_v55  ;;  %v492_v10 = vrot.slane %v490_v1, 4 }
  0x23   : > { %v496_v11 = vshll.u32 %v14439_v60, 16  ;;  %v3892_v12 = vrot.slane %v14433_v49, 5  ;;  %v3895_v13 = vrot.slane %v14439_v60, 5  ;;  %v501_v17 = vshrl.u32 %v245_v2, 16  ;;  %v324_v49 = vld [vmem:[%s14405_s6 + $0x164] sm:$0x1] }
  0x24   : > { %12318 = vmatprep.mubr.msk.bf16.mxu0 %vm2029_vm2, %v10329_v6  ;;  %v450_v15 = vrot.slane %v449_v7, 4  ;;  %v489_v16 = vsel %vm14423_vm3, %v484_v3, %v488_v8  ;;  %v504_v18 = vshll.u32 %v245_v2, 16  ;;  %v493_v19 = vor.u32 %v492_v10, %v488_v8  ;;  %v14036_v7 = vld [vmem:[%s18096_s1 + $0x60] sm:$0xff]  }
  0x25   : > { %v498_v20 = vrot.slane %v496_v11, 5  ;;  %v510_v21 = vshll.u32 %v246_v9, 16  ;;  %v514_v22 = vshrl.u32 %v246_v9, 16  ;;  %v503_v25 = vrot.slane %v501_v17, 4 }
  0x26   : > { %v455_v24 = vsel %vm14423_vm3, %v450_v15, %v454_v0  ;;  %v506_v26 = vrot.slane %v504_v18, 5  ;;  %v520_v27 = vshll.u32 %v247_v14, 16  ;;  %v494_v30 = vrot.slane %v493_v19, 4  ;;  %v253_v0 = vld [vmem:[%s14405_s6 + $0x48] sm:$0xf] }
  0x27   : > { %v10328_v29 = vcombine.low %v445_v63, %v455_v24  ;;  %v512_v32 = vrot.slane %v510_v21, 5  ;;  %v516_v33 = vrot.slane %v514_v22, 4  ;;  %v524_v37 = vshrl.u32 %v247_v14, 16  ;;  %v254_v15 = vld [vmem:[%s14405_s6 + $0x4c] sm:$0x1] }
  0x28   : > { %v507_v35 = vor.u32 %v506_v26, %v503_v25  ;;  %v522_v36 = vrot.slane %v520_v27, 5  ;;  %v530_v38 = vshll.u32 %v248_v23, 16  ;;  %v499_v40 = vsel %vm14423_vm3, %v494_v30, %v498_v20  ;;  %v255_v18 = vld [vmem:[%s14405_s6 + $0x50] sm:$0xf] }
  0x29   : > { %11791 = vmatmul.mubr.msk.bf16.vlgmr.msra.gmra.mrb[0].mxu1 %vm2029_vm2, %v10328_v29  ;;  %v517_v41 = vor.u32 %v516_v33, %v512_v32  ;;  %v534_v42 = vshrl.u32 %v248_v23, 16  ;;  %v540_v43 = vshll.u32 %v249_v28, 16  ;;  %v10330_v45 = vcombine.low %v489_v16, %v499_v40  ;;  %v256_v23 = vld [vmem:[%s14405_s6 + $0x54] sm:$0xf] }
  0x2a   : > { %11919 = vmatpush3.bf16.msra.mxu1 %v14400_v4  ;;  %11794 = vmatprep.mubr.msk.bf16.mxu1 %vm2029_vm2, %v10329_v6  ;;  %v508_v46 = vrot.slane %v507_v35, 4  ;;  %v526_v47 = vrot.slane %v524_v37, 4  ;;  %v532_v48 = vrot.slane %v530_v38, 5  ;;  %v545_v54 = vshrl.u32 %v250_v39, 16  ;;  %v257_v35 = vld [vmem:[%s14405_s6 + $0x58] sm:$0xf] }
  0x2b   : > { %v518_v51 = vrot.slane %v517_v41, 4  ;;  %v536_v52 = vrot.slane %v534_v42, 4  ;;  %v542_v53 = vrot.slane %v540_v43, 5  ;;  %11920 = vmatprep.subr.bf16.mxu1 %v14035_v34  ;;  %12319 = vmatmul.mubr.msk.bf16.vlgmr.msra.gmra.mrb[0].mxu0 %vm2029_vm2, %v10330_v45  ;;  %v548_v57 = vshll.u32 %v250_v39, 16  ;;  %v258_v38 = vld [vmem:[%s14405_s6 + $0x5c] sm:$0xf] }
  0x2c   : > { %v513_v4 = vsel %vm14423_vm3, %v508_v46, %v512_v32  ;;  %v527_v55 = vor.u32 %v526_v47, %v522_v36  ;;  %v554_v58 = vshll.u32 %v251_v44, 16  ;;  %12447 = vmatpush3.bf16.msra.mxu0 %v14410_v5  ;;  %v547_v62 = vrot.slane %v545_v54, 4  ;;  %v259_v43 = vld [vmem:[%s14405_s6 + $0x60] sm:$0x1] }
  0x2d   : > { %v523_v59 = vsel %vm14423_vm3, %v518_v51, %v522_v36  ;;  %v537_v61 = vor.u32 %v536_v52, %v532_v48  ;;  %v558_v63 = vshrl.u32 %v251_v44, 16  ;;  %v550_v3 = vrot.slane %v548_v57, 5  ;;  %12448 = vmatprep.subr.bf16.mxu0 %v14034_v50 }
  0x2e   : > { %v14481_v1 = vcombine.low %v513_v4, %v523_v59  ;;  %v528_v2 = vrot.slane %v527_v55, 4  ;;  %v556_v6 = vrot.slane %v554_v58, 5  ;;  %11921 = vmatpush3.bf16.msra.mxu1 %v14035_v34  ;;  %v564_v9 = vshll.u32 %v252_v56, 16 }
  0x2f   : > { %v538_v5 = vrot.slane %v537_v61, 4  ;;  %v560_v8 = vrot.slane %v558_v63, 4  ;;  %v568_v10 = vshrl.u32 %v252_v56, 16  ;;  %v551_v14 = vor.u32 %v550_v3, %v547_v62  ;;  %v260_v56 = vld [vmem:[%s14405_s6 + $0x64] sm:$0xf] }
  0x30   : > { %18415 = vst [vmem:[#allocation3_spill] sm:$0xff] %v14481_v1  ;;  %12322 = vmatprep.mubr.msk.bf16.mxu0 %vm2029_vm2, %v14481_v1  ;;  %v533_v11 = vsel %vm14423_vm3, %v528_v2, %v532_v48  ;;  %v574_v16 = vshll.u32 %v253_v0, 16  ;;  %v578_v17 = vshrl.u32 %v253_v0, 16  ;;  %v566_v21 = vrot.slane %v564_v9, 5  ;;  %12449 = vmatpush3.bf16.msra.mxu0 %v14034_v50  ;;  %v261_v62 = vld [vmem:[%s14405_s6 + $0x68] sm:$0xf] }
  0x31   : > { %11795 = vmatmul.mubr.msk.bf16.gmra.mrb[4].mxu1 %vm2029_vm2, %v10330_v45  ;;  %v543_v19 = vsel %vm14423_vm3, %v538_v5, %v542_v53  ;;  %v561_v20 = vor.u32 %v560_v8, %v556_v6  ;;  %v570_v22 = vrot.slane %v568_v10, 4  ;;  %v552_v25 = vrot.slane %v551_v14, 4  ;;  %12578 = vmatprep.subr.bf16.mxu0 %v14036_v7  ;;  %v262_v5 = vld [vmem:[%s14405_s6 + $0x6c] sm:$0xf] }
  0x32   : > { %v14496_v24 = vcombine.low %v533_v11, %v543_v19  ;;  %11798 = vmatprep.mubr.msk.bf16.mxu1 %vm2029_vm2, %v14481_v1  ;;  %v576_v26 = vrot.slane %v574_v16, 5  ;;  %v580_v27 = vrot.slane %v578_v17, 4  ;;  %v584_v30 = vshll.u32 %v254_v15, 16  ;;  %v14176_v1 = vld [vmem:[%s14405_s6 + $0x114] sm:$0x1] }
  0x33   : > { %v562_v28 = vrot.slane %v561_v20, 4  ;;  %v571_v29 = vor.u32 %v570_v22, %v566_v21  ;;  %v589_v32 = vshrl.u32 %v255_v18, 16  ;;  %v557_v33 = vsel %vm14423_vm3, %v552_v25, %v556_v6  ;;  %v263_v25 = vld [vmem:[%s14405_s6 + $0x70] sm:$0xf] }
  0x34   : > { %18416 = vst [vmem:[#allocation4_spill] sm:$0xff] %v14496_v24  ;;  %12323 = vmatmul.mubr.msk.bf16.gmra.mrb[4].mxu0 %vm2029_vm2, %v14496_v24  ;;  %v581_v34 = vor.u32 %v580_v27, %v576_v26  ;;  %v592_v36 = vshll.u32 %v255_v18, 16  ;;  %v598_v37 = vshll.u32 %v256_v23, 16  ;;  %v586_v41 = vrot.slane %v584_v30, 5 }
  0x35   : > { %v567_v39 = vsel %vm14423_vm3, %v562_v28, %v566_v21  ;;  %v572_v40 = vrot.slane %v571_v29, 4  ;;  %v591_v42 = vrot.slane %v589_v32, 4  ;;  %v602_v50 = vshrl.u32 %v256_v23, 16  ;;  %v264_v29 = vld [vmem:[%s14405_s6 + $0x74] sm:$0x1] }
  0x36   : > { %v14509_v44 = vcombine.low %v557_v33, %v567_v39  ;;  %v582_v45 = vrot.slane %v581_v34, 4  ;;  %v594_v46 = vrot.slane %v592_v36, 5  ;;  %v600_v47 = vrot.slane %v598_v37, 5  ;;  %v265_v32 = vld [vmem:[%s14405_s6 + $0x78] sm:$0xf] }
  0x37   : > { %v577_v48 = vsel %vm14423_vm3, %v572_v40, %v576_v26  ;;  %v608_v51 = vshll.u32 %v257_v35, 16  ;;  %v612_v52 = vshrl.u32 %v257_v35, 16  ;;  %v618_v4 = vshll.u32 %v258_v38, 16 }
  0x38   : > { %18417 = vst [vmem:[#allocation5_spill] sm:$0xff] %v14509_v44  ;;  %12326 = vmatprep.mubr.msk.bf16.mxu0 %vm2029_vm2, %v14509_v44  ;;  %v587_v53 = vsel %vm14423_vm3, %v582_v45, %v586_v41  ;;  %v595_v54 = vor.u32 %v594_v46, %v591_v42  ;;  %v622_v55 = vshrl.u32 %v258_v38, 16  ;;  %v604_v58 = vrot.slane %v602_v50, 4  ;;  %v266_v45 = vld [vmem:[%s14405_s6 + $0x7c] sm:$0xf] }
  0x39   : > { %11799 = vmatmul.mubr.msk.bf16.gmra.mrb[8].mxu1 %vm2029_vm2, %v14496_v24  ;;  %v14520_v57 = vcombine.low %v577_v48, %v587_v53  ;;  %v610_v59 = vrot.slane %v608_v51, 5  ;;  %v614_v61 = vrot.slane %v612_v52, 4  ;;  %v620_v0 = vrot.slane %v618_v4, 5  ;;  %v267_v51 = vld [vmem:[%s14405_s6 + $0x80] sm:$0xf] }
  0x3a   : > { %11802 = vmatprep.mubr.msk.bf16.mxu1 %vm2029_vm2, %v14509_v44  ;;  %v596_v63 = vrot.slane %v595_v54, 4  ;;  %v624_v2 = vrot.slane %v622_v55, 4  ;;  %v628_v3 = vshll.u32 %v259_v43, 16  ;;  %v605_v6 = vor.u32 %v604_v58, %v600_v47  ;;  %v15421_v44 = vld [vmem:[%s14405_s6 + $0x248] sm:$0xf] }
  0x3b   : > { %18418 = vst [vmem:[#allocation6_spill] sm:$0xff] %v14520_v57  ;;  %v615_v7 = vor.u32 %v614_v61, %v610_v59  ;;  %v633_v8 = vshrl.u32 %v260_v56, 16  ;;  %v636_v9 = vshll.u32 %v260_v56, 16  ;;  %v642_v15 = vshll.u32 %v261_v62, 16 }
  0x3c   : > { %12327 = vmatmul.mubr.msk.bf16.gmra.mrb[8].mxu0 %vm2029_vm2, %v14520_v57  ;;  %v601_v10 = vsel %vm14423_vm3, %v596_v63, %v600_v47  ;;  %v625_v11 = vor.u32 %v624_v2, %v620_v0  ;;  %v630_v14 = vrot.slane %v628_v3, 5  ;;  %v606_v16 = vrot.slane %v605_v6, 4  ;;  %v268_v2 = vld [vmem:[%s14405_s6 + $0x84] sm:$0xf]  ;;  %v269_v3 = vld [vmem:[%s14405_s6 + $0x88] sm:$0x1] }
  0x3d   : > { %v616_v17 = vrot.slane %v615_v7, 4  ;;  %v635_v18 = vrot.slane %v633_v8, 4  ;;  %v638_v19 = vrot.slane %v636_v9, 5  ;;  %v644_v21 = vrot.slane %v642_v15, 5 }
  0x3e   : > { %v626_v20 = vrot.slane %v625_v11, 4  ;;  %v646_v22 = vshrl.u32 %v261_v62, 16  ;;  %v652_v23 = vshll.u32 %v262_v5, 16  ;;  %v611_v26 = vsel %vm14423_vm3, %v606_v16, %v610_v59 }
  0x3f   : > { %v621_v27 = vsel %vm14423_vm3, %v616_v17, %v620_v0  ;;  %v639_v28 = vor.u32 %v638_v19, %v635_v18  ;;  %v656_v30 = vshrl.u32 %v262_v5, 16  ;;  %v14537_v33 = vcombine.low %v601_v10, %v611_v26  ;;  %v270_v10 = vld [vmem:[%s14405_s6 + $0x8c] sm:$0xf] }
  0x40   : > { %v631_v34 = vsel %vm14423_vm3, %v626_v20, %v630_v14  ;;  %v648_v35 = vrot.slane %v646_v22, 4  ;;  %v654_v36 = vrot.slane %v652_v23, 5  ;;  %v662_v40 = vshll.u32 %v263_v25, 16 }
  0x41   : > { %18419 = vst [vmem:[#allocation7_spill] sm:$0xff] %v14537_v33  ;;  %11803 = vmatmul.mubr.msk.bf16.gmra.mrb[12].mxu1 %vm2029_vm2, %v14520_v57  ;;  %v14543_v37 = vcombine.low %v621_v27, %v631_v34  ;;  %v640_v38 = vrot.slane %v639_v28, 4  ;;  %v658_v39 = vrot.slane %v656_v30, 4  ;;  %12330 = vmatprep.mubr.msk.bf16.mxu0 %vm2029_vm2, %v14537_v33  ;;  %v666_v42 = vshrl.u32 %v263_v25, 16  ;;  %v271_v25 = vld [vmem:[%s14405_s6 + $0x90] sm:$0xf] }
  0x42   : > { %11806 = vmatprep.mubr.msk.bf16.mxu1 %vm2029_vm2, %v14537_v33  ;;  %v649_v41 = vor.u32 %v648_v35, %v644_v21  ;;  %v672_v43 = vshll.u32 %v264_v29, 16  ;;  %v677_v46 = vshrl.u32 %v265_v32, 16  ;;  %v664_v50 = vrot.slane %v662_v40, 5  ;;  %v15414_v33 = vld [vmem:[%s14405_s6 + $0x244] sm:$0xf] }
  0x43   : > { %18420 = vst [vmem:[#allocation8_spill] sm:$0xff] %v14543_v37  ;;  %v645_v47 = vsel %vm14423_vm3, %v640_v38, %v644_v21  ;;  %v659_v48 = vor.u32 %v658_v39, %v654_v36  ;;  %v680_v52 = vshll.u32 %v265_v32, 16  ;;  %v668_v54 = vrot.slane %v666_v42, 4  ;;  %v272_v32 = vld [vmem:[%s14405_s6 + $0x94] sm:$0xf] }
  0x44   : > { %12331 = vmatmul.mubr.msk.bf16.gmra.mrb[12].mxu0 %vm2029_vm2, %v14543_v37  ;;  %v650_v53 = vrot.slane %v649_v41, 4  ;;  %v674_v4 = vrot.slane %v672_v43, 5  ;;  %v679_v55 = vrot.slane %v677_v46, 4  ;;  %v686_v59 = vshll.u32 %v266_v45, 16  ;;  %v273_v43 = vld [vmem:[%s14405_s6 + $0x98] sm:$0xf] }
  0x45   : > { %v660_v56 = vrot.slane %v659_v48, 4  ;;  %v682_v58 = vrot.slane %v680_v52, 5  ;;  %v690_v61 = vshrl.u32 %v266_v45, 16  ;;  %v669_v63 = vor.u32 %v668_v54, %v664_v50  ;;  %v274_v48 = vld [vmem:[%s14405_s6 + $0x9c] sm:$0x1] }
  0x46   : > { %v655_v62 = vsel %vm14423_vm3, %v650_v53, %v654_v36  ;;  %v696_v0 = vshll.u32 %v267_v51, 16  ;;  %v700_v6 = vshrl.u32 %v267_v51, 16  ;;  %v688_v9 = vrot.slane %v686_v59, 5  ;;  %v275_v59 = vld [vmem:[%s14405_s6 + $0xa0] sm:$0xf] }
  0x47   : > { %v14559_v7 = vcombine.low %v645_v47, %v655_v62  ;;  %v665_v5 = vsel %vm14423_vm3, %v660_v56, %v664_v50  ;;  %v683_v8 = vor.u32 %v682_v58, %v679_v55  ;;  %v670_v11 = vrot.slane %v669_v63, 4 }
  0x48   : > { %v692_v14 = vrot.slane %v690_v61, 4  ;;  %v698_v15 = vrot.slane %v696_v0, 5  ;;  %v702_v16 = vrot.slane %v700_v6, 4  ;;  %v706_v18 = vshll.u32 %v268_v2, 16 }
  0x49   : > { %18421 = vst [vmem:[#allocation9_spill] sm:$0xff] %v14559_v7  ;;  %12334 = vmatprep.mubr.msk.bf16.mxu0 %vm2029_vm2, %v14559_v7  ;;  %11807 = vmatmul.mubr.msk.bf16.gmra.mrb[16].mxu1 %vm2029_vm2, %v14543_v37  ;;  %v684_v17 = vrot.slane %v683_v8, 4  ;;  %v710_v19 = vshrl.u32 %v268_v2, 16  ;;  %v716_v20 = vshll.u32 %v269_v3, 16  ;;  %v675_v21 = vsel %vm14423_vm3, %v670_v11, %v674_v4  ;;  %v276_v2 = vld [vmem:[%s14405_s6 + $0xa4] sm:$0xf] }
  0x4a   : > { %11810 = vmatprep.mubr.msk.bf16.mxu1 %vm2029_vm2, %v14559_v7  ;;  %v693_v22 = vor.u32 %v692_v14, %v688_v9  ;;  %v703_v23 = vor.u32 %v702_v16, %v698_v15  ;;  %v721_v26 = vshrl.u32 %v270_v10, 16  ;;  %v14573_v27 = vcombine.low %v665_v5, %v675_v21 }
  0x4b   : > { %v689_v28 = vsel %vm14423_vm3, %v684_v17, %v688_v9  ;;  %v708_v29 = vrot.slane %v706_v18, 5  ;;  %v712_v30 = vrot.slane %v710_v19, 4  ;;  %v718_v36 = vrot.slane %v716_v20, 5  ;;  %v277_v17 = vld [vmem:[%s14405_s6 + $0xa8] sm:$0xf] }
  0x4c   : > { %18422 = vst [vmem:[#allocation10_spill] sm:$0xff] %v14573_v27  ;;  %v694_v34 = vrot.slane %v693_v22, 4  ;;  %v704_v35 = vrot.slane %v703_v23, 4  ;;  %v723_v38 = vrot.slane %v721_v26, 4  ;;  %12335 = vmatmul.mubr.msk.bf16.gmra.mrb[16].mxu0 %vm2029_vm2, %v14573_v27  ;;  %v724_v40 = vshll.u32 %v270_v10, 16 }
  0x4d   : > { %v713_v39 = vor.u32 %v712_v30, %v708_v29  ;;  %v730_v41 = vshll.u32 %v271_v25, 16  ;;  %v734_v42 = vshrl.u32 %v271_v25, 16  ;;  %v740_v47 = vshll.u32 %v272_v32, 16  ;;  %v278_v25 = vld [vmem:[%s14405_s6 + $0xac] sm:$0xf] }
  0x4e   : > { %v699_v45 = vsel %vm14423_vm3, %v694_v34, %v698_v15  ;;  %v709_v46 = vsel %vm14423_vm3, %v704_v35, %v708_v29  ;;  %v744_v50 = vshrl.u32 %v272_v32, 16  ;;  %v726_v53 = vrot.slane %v724_v40, 5  ;;  %v279_v32 = vld [vmem:[%s14405_s6 + $0xb0] sm:$0x1] }
  0x4f   : > { %v14586_v51 = vcombine.low %v689_v28, %v699_v45  ;;  %v714_v52 = vrot.slane %v713_v39, 4  ;;  %v732_v54 = vrot.slane %v730_v41, 5  ;;  %v736_v4 = vrot.slane %v734_v42, 4 }
  0x50   : > { %v742_v55 = vrot.slane %v740_v47, 5  ;;  %v746_v56 = vrot.slane %v744_v50, 4  ;;  %v750_v58 = vshll.u32 %v273_v43, 16  ;;  %v727_v62 = vor.u32 %v726_v53, %v723_v38  ;;  %v281_v50 = vld [vmem:[%s14405_s6 + $0xb8] sm:$0xf] }
  0x51   : > { %18423 = vst [vmem:[#allocation11_spill] sm:$0xff] %v14586_v51  ;;  %12338 = vmatprep.mubr.msk.bf16.mxu0 %vm2029_vm2, %v14586_v51  ;;  %11811 = vmatmul.mubr.msk.bf16.gmra.mrb[20].mxu1 %vm2029_vm2, %v14573_v27  ;;  %v719_v61 = vsel %vm14423_vm3, %v714_v52, %v718_v36  ;;  %v754_v63 = vshrl.u32 %v273_v43, 16  ;;  %v760_v0 = vshll.u32 %v274_v48, 16  ;;  %v737_v6 = vor.u32 %v736_v4, %v732_v54  ;;  %v280_v43 = vld [vmem:[%s14405_s6 + $0xb4] sm:$0xf] }
  0x52   : > { %v14596_v3 = vcombine.low %v709_v46, %v719_v61  ;;  %11814 = vmatprep.mubr.msk.bf16.mxu1 %vm2029_vm2, %v14586_v51  ;;  %v747_v5 = vor.u32 %v746_v56, %v742_v55  ;;  %v752_v8 = vrot.slane %v750_v58, 5  ;;  %v728_v9 = vrot.slane %v727_v62, 4 }
  0x53   : > { %v756_v10 = vrot.slane %v754_v63, 4  ;;  %v762_v11 = vrot.slane %v760_v0, 5  ;;  %v765_v14 = vshrl.u32 %v275_v59, 16  ;;  %v738_v15 = vrot.slane %v737_v6, 4  ;;  %v282_v63 = vld [vmem:[%s14405_s6 + $0xbc] sm:$0xf] }
  0x54   : > { %18424 = vst [vmem:[#allocation12_spill] sm:$0xff] %v14596_v3  ;;  %v748_v16 = vrot.slane %v747_v5, 4  ;;  %v768_v18 = vshll.u32 %v275_v59, 16  ;;  %v774_v19 = vshll.u32 %v276_v2, 16  ;;  %12339 = vmatmul.mubr.msk.bf16.gmra.mrb[20].mxu0 %vm2029_vm2, %v14596_v3  ;;  %v733_v20 = vsel %vm14423_vm3, %v728_v9, %v732_v54 }
  0x55   : > { %v757_v21 = vor.u32 %v756_v10, %v752_v8  ;;  %v767_v22 = vrot.slane %v765_v14, 4  ;;  %v778_v23 = vshrl.u32 %v276_v2, 16  ;;  %v743_v26 = vsel %vm14423_vm3, %v738_v15, %v742_v55  ;;  %v283_v10 = vld [vmem:[%s14405_s6 + $0xc0] sm:$0xf] }
  0x56   : > { %v753_v28 = vsel %vm14423_vm3, %v748_v16, %v752_v8  ;;  %v770_v29 = vrot.slane %v768_v18, 5  ;;  %v776_v30 = vrot.slane %v774_v19, 5  ;;  %v14611_v34 = vcombine.low %v733_v20, %v743_v26 }
  0x57   : > { %v758_v35 = vrot.slane %v757_v21, 4  ;;  %v780_v36 = vrot.slane %v778_v23, 4  ;;  %v784_v38 = vshll.u32 %v277_v17, 16  ;;  %v788_v40 = vshrl.u32 %v277_v17, 16  ;;  %v284_v23 = vld [vmem:[%s14405_s6 + $0xc4] sm:$0x1] }
  0x58   : > { %18425 = vst [vmem:[#allocation13_spill] sm:$0xff] %v14611_v34  ;;  %v771_v39 = vor.u32 %v770_v29, %v767_v22  ;;  %v794_v41 = vshll.u32 %v278_v25, 16  ;;  %v798_v42 = vshrl.u32 %v278_v25, 16  ;;  %12342 = vmatprep.mubr.msk.bf16.mxu0 %vm2029_vm2, %v14611_v34  ;;  %v804_v48 = vshll.u32 %v279_v32, 16 }
  0x59   : > { %11815 = vmatmul.mubr.msk.bf16.gmra.mrb[24].mxu1 %vm2029_vm2, %v14596_v3  ;;  %v763_v45 = vsel %vm14423_vm3, %v758_v35, %v762_v11  ;;  %v781_v46 = vor.u32 %v780_v36, %v776_v30  ;;  %v786_v47 = vrot.slane %v784_v38, 5  ;;  %v790_v54 = vrot.slane %v788_v40, 4  ;;  %v286_v36 = vld [vmem:[%s14405_s6 + $0xcc] sm:$0xf] }
  0x5a   : > { %v14621_v52 = vcombine.low %v753_v28, %v763_v45  ;;  %11818 = vmatprep.mubr.msk.bf16.mxu1 %vm2029_vm2, %v14611_v34  ;;  %v772_v53 = vrot.slane %v771_v39, 4  ;;  %v796_v4 = vrot.slane %v794_v41, 5  ;;  %v800_v56 = vrot.slane %v798_v42, 4  ;;  %v285_v28 = vld [vmem:[%s14405_s6 + $0xc8] sm:$0xf] }
  0x5b   : > { %v782_v55 = vrot.slane %v781_v46, 4  ;;  %v806_v58 = vrot.slane %v804_v48, 5  ;;  %v809_v59 = vshrl.u32 %v280_v43, 16  ;;  %v791_v62 = vor.u32 %v790_v54, %v786_v47 }
  0x5c   : > { %18426 = vst [vmem:[#allocation14_spill] sm:$0xff] %v14621_v52  ;;  %v777_v61 = vsel %vm14423_vm3, %v772_v53, %v776_v30  ;;  %v812_v0 = vshll.u32 %v280_v43, 16  ;;  %v818_v2 = vshll.u32 %v281_v50, 16  ;;  %12343 = vmatmul.mubr.msk.bf16.gmra.mrb[24].mxu0 %vm2029_vm2, %v14621_v52  ;;  %v801_v5 = vor.u32 %v800_v56, %v796_v4 }
  0x5d   : > { %v787_v6 = vsel %vm14423_vm3, %v782_v55, %v786_v47  ;;  %v811_v8 = vrot.slane %v809_v59, 4  ;;  %v822_v9 = vshrl.u32 %v281_v50, 16  ;;  %v792_v14 = vrot.slane %v791_v62, 4  ;;  %v287_v50 = vld [vmem:[%s14405_s6 + $0xd0] sm:$0xf] }
  0x5e   : > { %v14633_v11 = vcombine.low %v777_v61, %v787_v6  ;;  %v814_v15 = vrot.slane %v812_v0, 5  ;;  %v820_v16 = vrot.slane %v818_v2, 5  ;;  %v802_v17 = vrot.slane %v801_v5, 4  ;;  %v288_v59 = vld [vmem:[%s14405_s6 + $0xd4] sm:$0xf] }
  0x5f   : > { %v824_v18 = vrot.slane %v822_v9, 4  ;;  %v828_v19 = vshll.u32 %v282_v63, 16  ;;  %v832_v20 = vshrl.u32 %v282_v63, 16  ;;  %v797_v21 = vsel %vm14423_vm3, %v792_v14, %v796_v4 }
  0x60   : > { %18427 = vst [vmem:[#allocation15_spill] sm:$0xff] %v14633_v11  ;;  %12346 = vmatprep.mubr.msk.bf16.mxu0 %vm2029_vm2, %v14633_v11  ;;  %v815_v22 = vor.u32 %v814_v15, %v811_v8  ;;  %v838_v25 = vshll.u32 %v283_v10, 16  ;;  %v842_v26 = vshrl.u32 %v283_v10, 16  ;;  %v807_v29 = vsel %vm14423_vm3, %v802_v17, %v806_v58  ;;  %v289_v8 = vld [vmem:[%s14405_s6 + $0xd8] sm:$0x1] }
  0x61   : > { %11819 = vmatmul.mubr.msk.bf16.gmra.mrb[28].mxu1 %vm2029_vm2, %v14621_v52  ;;  %v825_v30 = vor.u32 %v824_v18, %v820_v16  ;;  %v830_v32 = vrot.slane %v828_v19, 5  ;;  %v834_v35 = vrot.slane %v832_v20, 4  ;;  %v14646_v38 = vcombine.low %v797_v21, %v807_v29  ;;  %v290_v17 = vld [vmem:[%s14405_s6 + $0xdc] sm:$0xf] }
  0x62   : > { %11822 = vmatprep.mubr.msk.bf16.mxu1 %vm2029_vm2, %v14633_v11  ;;  %v816_v39 = vrot.slane %v815_v22, 4  ;;  %v840_v40 = vrot.slane %v838_v25, 5  ;;  %v844_v41 = vrot.slane %v842_v26, 4  ;;  %v848_v45 = vshll.u32 %v284_v23, 16  ;;  %v291_v22 = vld [vmem:[%s14405_s6 + $0xe0] sm:$0xf] }
  0x63   : > { %18428 = vst [vmem:[#allocation16_spill] sm:$0xff] %v14646_v38  ;;  %v826_v42 = vrot.slane %v825_v30, 4  ;;  %v835_v43 = vor.u32 %v834_v35, %v830_v32  ;;  %v853_v46 = vshrl.u32 %v285_v28, 16  ;;  %v856_v53 = vshll.u32 %v285_v28, 16  ;;  %v15355_v52 = vld [vmem:[%s14405_s6 + $0xfc] sm:$0xf] }
  0x64   : > { %v821_v47 = vsel %vm14423_vm3, %v816_v39, %v820_v16  ;;  %v845_v48 = vor.u32 %v844_v41, %v840_v40  ;;  %v862_v54 = vshll.u32 %v286_v36, 16  ;;  %12347 = vmatmul.mubr.msk.bf16.gmra.mrb[28].mxu0 %vm2029_vm2, %v14646_v38  ;;  %v850_v56 = vrot.slane %v848_v45, 5 }
  0x65   : > { %v831_v4 = vsel %vm14423_vm3, %v826_v42, %v830_v32  ;;  %v836_v55 = vrot.slane %v835_v43, 4  ;;  %v855_v58 = vrot.slane %v853_v46, 4  ;;  %v858_v63 = vrot.slane %v856_v53, 5  ;;  %v292_v32 = vld [vmem:[%s14405_s6 + $0xe4] sm:$0xf] }
  0x66   : > { %v14658_v61 = vcombine.low %v821_v47, %v831_v4  ;;  %v846_v62 = vrot.slane %v845_v48, 4  ;;  %v864_v0 = vrot.slane %v862_v54, 5  ;;  %v866_v6 = vshrl.u32 %v286_v36, 16  ;;  %v293_v43 = vld [vmem:[%s14405_s6 + $0xe8] sm:$0xf] }
  0x67   : > { %v841_v2 = vsel %vm14423_vm3, %v836_v55, %v840_v40  ;;  %v872_v5 = vshll.u32 %v287_v50, 16  ;;  %v876_v9 = vshrl.u32 %v287_v50, 16  ;;  %v859_v14 = vor.u32 %v858_v63, %v855_v58  ;;  %v294_v50 = vld [vmem:[%s14405_s6 + $0xec] sm:$0x1]  ;;  %v295_v53 = vld [vmem:[%s14405_s6 + $0xf0] sm:$0xf] }
  0x68   : > { %18429 = vst [vmem:[#allocation17_spill] sm:$0xff] %v14658_v61  ;;  %12350 = vmatprep.mubr.msk.bf16.mxu0 %vm2029_vm2, %v14658_v61  ;;  %v851_v10 = vsel %vm14423_vm3, %v846_v62, %v850_v56  ;;  %v882_v15 = vshll.u32 %v288_v59, 16  ;;  %v886_v16 = vshrl.u32 %v288_v59, 16  ;;  %v868_v19 = vrot.slane %v866_v6, 4 }
  0x69   : > { %11823 = vmatmul.mubr.msk.bf16.gmra.mrb[32].mxu1 %vm2029_vm2, %v14646_v38  ;;  %v14670_v18 = vcombine.low %v841_v2, %v851_v10  ;;  %v874_v20 = vrot.slane %v872_v5, 5  ;;  %v878_v21 = vrot.slane %v876_v9, 4  ;;  %v860_v23 = vrot.slane %v859_v14, 4 }
  0x6a   : > { %11826 = vmatprep.mubr.msk.bf16.mxu1 %vm2029_vm2, %v14658_v61  ;;  %v884_v25 = vrot.slane %v882_v15, 5  ;;  %v888_v26 = vrot.slane %v886_v16, 4  ;;  %v892_v28 = vshll.u32 %v289_v8, 16  ;;  %v869_v29 = vor.u32 %v868_v19, %v864_v0  ;;  %v296_v19 = vld [vmem:[%s14405_s6 + $0xf4] sm:$0xf] }
  0x6b   : > { %18430 = vst [vmem:[#allocation18_spill] sm:$0xff] %v14670_v18  ;;  %v879_v30 = vor.u32 %v878_v21, %v874_v20  ;;  %v897_v35 = vshrl.u32 %v290_v17, 16  ;;  %v900_v36 = vshll.u32 %v290_v17, 16  ;;  %v865_v39 = vsel %vm14423_vm3, %v860_v23, %v864_v0  ;;  %v14168_v61 = vld [vmem:[%s14405_s6 + $0xf4] sm:$0xf] }
  0x6c   : > { %v889_v40 = vor.u32 %v888_v26, %v884_v25  ;;  %v894_v41 = vrot.slane %v892_v28, 5  ;;  %v906_v42 = vshll.u32 %v291_v22, 16  ;;  %12351 = vmatmul.mubr.msk.bf16.gmra.mrb[32].mxu0 %vm2029_vm2, %v14670_v18  ;;  %v870_v45 = vrot.slane %v869_v29, 4 }
  0x6d   : > { %v880_v46 = vrot.slane %v879_v30, 4  ;;  %v899_v47 = vrot.slane %v897_v35, 4  ;;  %v902_v48 = vrot.slane %v900_v36, 5  ;;  %v910_v55 = vshrl.u32 %v291_v22, 16  ;;  %v298_v35 = vld [vmem:[%s14405_s6 + $0xfc] sm:$0xf] }
  0x6e   : > { %v890_v54 = vrot.slane %v889_v40, 4  ;;  %v908_v4 = vrot.slane %v906_v42, 5  ;;  %v916_v56 = vshll.u32 %v292_v32, 16  ;;  %v875_v58 = vsel %vm14423_vm3, %v870_v45, %v874_v20  ;;  %v299_v36 = vld [vmem:[%s14405_s6 + $0x100] sm:$0x1] }
  0x6f   : > { %v885_v59 = vsel %vm14423_vm3, %v880_v46, %v884_v25  ;;  %v903_v62 = vor.u32 %v902_v48, %v899_v47  ;;  %v920_v63 = vshrl.u32 %v292_v32, 16  ;;  %v14687_v0 = vcombine.low %v865_v39, %v875_v58  ;;  %v297_v25 = vld [vmem:[%s14405_s6 + $0xf8] sm:$0xf]  ;;  %v300_v48 = vld [vmem:[%s14405_s6 + $0x104] sm:$0xf] }
  0x70   : > { %v895_v2 = vsel %vm14423_vm3, %v890_v54, %v894_v41  ;;  %v912_v6 = vrot.slane %v910_v55, 4  ;;  %v918_v5 = vrot.slane %v916_v56, 5  ;;  %v926_v14 = vshll.u32 %v293_v43, 16 }
  0x71   : > { %18431 = vst [vmem:[#allocation19_spill] sm:$0xff] %v14687_v0  ;;  %11827 = vmatmul.mubr.msk.bf16.gmra.mrb[36].mxu1 %vm2029_vm2, %v14670_v18  ;;  %v14693_v8 = vcombine.low %v885_v59, %v895_v2  ;;  %v904_v9 = vrot.slane %v903_v62, 4  ;;  %v922_v10 = vrot.slane %v920_v63, 4  ;;  %12354 = vmatprep.mubr.msk.bf16.mxu0 %vm2029_vm2, %v14687_v0  ;;  %v930_v16 = vshrl.u32 %v293_v43, 16  ;;  %v301_v62 = vld [vmem:[%s14405_s6 + $0x108] sm:$0xf] }
  0x72   : > { %11830 = vmatprep.mubr.msk.bf16.mxu1 %vm2029_vm2, %v14687_v0  ;;  %v913_v15 = vor.u32 %v912_v6, %v908_v4  ;;  %v936_v17 = vshll.u32 %v294_v50, 16  ;;  %v941_v20 = vshrl.u32 %v295_v53, 16  ;;  %v928_v23 = vrot.slane %v926_v14, 5  ;;  %v15298_v0 = vld [vmem:[%s14405_s6 + $0x224] sm:$0xf] }
  0x73   : > { %18432 = vst [vmem:[#allocation20_spill] sm:$0xff] %v14693_v8  ;;  %v909_v21 = vsel %vm14423_vm3, %v904_v9, %v908_v4  ;;  %v923_v22 = vor.u32 %v922_v10, %v918_v5  ;;  %v944_v26 = vshll.u32 %v295_v53, 16  ;;  %v932_v29 = vrot.slane %v930_v16, 4  ;;  %v302_v9 = vld [vmem:[%s14405_s6 + $0x10c] sm:$0xf] }
  0x74   : > { %v914_v28 = vrot.slane %v913_v15, 4  ;;  %v938_v30 = vrot.slane %v936_v17, 5  ;;  %v943_v32 = vrot.slane %v941_v20, 4  ;;  %12355 = vmatmul.mubr.msk.bf16.gmra.mrb[36].mxu0 %vm2029_vm2, %v14693_v8  ;;  %v950_v41 = vshll.u32 %v296_v19, 16 }
  0x75   : > { %v924_v39 = vrot.slane %v923_v22, 4  ;;  %v946_v40 = vrot.slane %v944_v26, 5  ;;  %v954_v42 = vshrl.u32 %v296_v19, 16  ;;  %v933_v45 = vor.u32 %v932_v29, %v928_v23 }
  0x76   : > { %v919_v43 = vsel %vm14423_vm3, %v914_v28, %v918_v5  ;;  %v960_v46 = vshll.u32 %v297_v25, 16  ;;  %v964_v47 = vshrl.u32 %v297_v25, 16  ;;  %v952_v4 = vrot.slane %v950_v41, 5  ;;  %v304_v41 = vld [vmem:[%s14405_s6 + $0x114] sm:$0x1] }
  0x77   : > { %v14710_v50 = vcombine.low %v909_v21, %v919_v43  ;;  %v929_v53 = vsel %vm14423_vm3, %v924_v39, %v928_v23  ;;  %v947_v54 = vor.u32 %v946_v40, %v943_v32  ;;  %v934_v55 = vrot.slane %v933_v45, 4 }
  0x78   : > { %v956_v56 = vrot.slane %v954_v42, 4  ;;  %v962_v58 = vrot.slane %v960_v46, 5  ;;  %v966_v59 = vrot.slane %v964_v47, 4  ;;  %v970_v2 = vshll.u32 %v298_v35, 16 }
  0x79   : > { %18433 = vst [vmem:[#allocation21_spill] sm:$0xff] %v14710_v50  ;;  %12358 = vmatprep.mubr.msk.bf16.mxu0 %vm2029_vm2, %v14710_v50  ;;  %11831 = vmatmul.mubr.msk.bf16.gmra.mrb[40].mxu1 %vm2029_vm2, %v14693_v8  ;;  %v948_v63 = vrot.slane %v947_v54, 4  ;;  %v974_v6 = vshrl.u32 %v298_v35, 16  ;;  %v980_v5 = vshll.u32 %v299_v36, 16  ;;  %v939_v10 = vsel %vm14423_vm3, %v934_v55, %v938_v30  ;;  %v303_v35 = vld [vmem:[%s14405_s6 + $0x110] sm:$0xf] }
  0x7a   : > { %11834 = vmatprep.mubr.msk.bf16.mxu1 %vm2029_vm2, %v14710_v50  ;;  %v957_v14 = vor.u32 %v956_v56, %v952_v4  ;;  %v967_v15 = vor.u32 %v966_v59, %v962_v58  ;;  %v985_v16 = vshrl.u32 %v300_v48, 16  ;;  %v14724_v17 = vcombine.low %v929_v53, %v939_v10  ;;  %v305_v55 = vld [vmem:[%s14405_s6 + $0x118] sm:$0xf] }
  0x7b   : > { %v953_v19 = vsel %vm14423_vm3, %v948_v63, %v952_v4  ;;  %v972_v20 = vrot.slane %v970_v2, 5  ;;  %v976_v21 = vrot.slane %v974_v6, 4  ;;  %v982_v25 = vrot.slane %v980_v5, 5  ;;  %v306_v63 = vld [vmem:[%s14405_s6 + $0x11c] sm:$0xf] }
  0x7c   : > { %18434 = vst [vmem:[#allocation22_spill] sm:$0xff] %v14724_v17  ;;  %v958_v22 = vrot.slane %v957_v14, 4  ;;  %v968_v23 = vrot.slane %v967_v15, 4  ;;  %v987_v26 = vrot.slane %v985_v16, 4  ;;  %12359 = vmatmul.mubr.msk.bf16.gmra.mrb[40].mxu0 %vm2029_vm2, %v14724_v17  ;;  %v988_v29 = vshll.u32 %v300_v48, 16 }
  0x7d   : > { %v977_v28 = vor.u32 %v976_v21, %v972_v20  ;;  %v994_v30 = vshll.u32 %v301_v62, 16  ;;  %v998_v32 = vshrl.u32 %v301_v62, 16  ;;  %v1004_v40 = vshll.u32 %v302_v9, 16  ;;  %v307_v21 = vld [vmem:[%s14405_s6 + $0x120] sm:$0xf] }
  0x7e   : > { %v963_v36 = vsel %vm14423_vm3, %v958_v22, %v962_v58  ;;  %v973_v39 = vsel %vm14423_vm3, %v968_v23, %v972_v20  ;;  %v1008_v42 = vshrl.u32 %v302_v9, 16  ;;  %v990_v46 = vrot.slane %v988_v29, 5 }
  0x7f   : > { %v14736_v43 = vcombine.low %v953_v19, %v963_v36  ;;  %v978_v45 = vrot.slane %v977_v28, 4  ;;  %v996_v47 = vrot.slane %v994_v30, 5  ;;  %v1000_v48 = vrot.slane %v998_v32, 4  ;;  %v308_v30 = vld [vmem:[%s14405_s6 + $0x124] sm:$0xf] }
  0x80   : > { %v1006_v53 = vrot.slane %v1004_v40, 5  ;;  %v1010_v54 = vrot.slane %v1008_v42, 4  ;;  %v1014_v4 = vshll.u32 %v303_v35, 16  ;;  %v991_v58 = vor.u32 %v990_v46, %v987_v26  ;;  %v309_v40 = vld [vmem:[%s14405_s6 + $0x128] sm:$0x1] }
  0x81   : > { %18435 = vst [vmem:[#allocation23_spill] sm:$0xff] %v14736_v43  ;;  %12362 = vmatprep.mubr.msk.bf16.mxu0 %vm2029_vm2, %v14736_v43  ;;  %11835 = vmatmul.mubr.msk.bf16.gmra.mrb[44].mxu1 %vm2029_vm2, %v14724_v17  ;;  %v983_v56 = vsel %vm14423_vm3, %v978_v45, %v982_v25  ;;  %v1018_v59 = vshrl.u32 %v303_v35, 16  ;;  %v1024_v62 = vshll.u32 %v304_v41, 16  ;;  %v1001_v6 = vor.u32 %v1000_v48, %v996_v47  ;;  %v364_v17 = vld [vmem:[%s14405_s6 + $0x204] sm:$0x1] }
  0x82   : > { %v14746_v2 = vcombine.low %v973_v39, %v983_v56  ;;  %11838 = vmatprep.mubr.msk.bf16.mxu1 %vm2029_vm2, %v14736_v43  ;;  %v1011_v5 = vor.u32 %v1010_v54, %v1006_v53  ;;  %v1016_v9 = vrot.slane %v1014_v4, 5  ;;  %v992_v10 = vrot.slane %v991_v58, 4  ;;  %v14154_v43 = vld [vmem:[%s14405_s6 + $0xbc] sm:$0xf] }
  0x83   : > { %v1020_v14 = vrot.slane %v1018_v59, 4  ;;  %v1026_v15 = vrot.slane %v1024_v62, 5  ;;  %v1029_v16 = vshrl.u32 %v305_v55, 16  ;;  %v1002_v19 = vrot.slane %v1001_v6, 4  ;;  %v311_v62 = vld [vmem:[%s14405_s6 + $0x130] sm:$0xf] }
  0x84   : > { %18436 = vst [vmem:[#allocation24_spill] sm:$0xff] %v14746_v2  ;;  %v1012_v20 = vrot.slane %v1011_v5, 4  ;;  %v1032_v22 = vshll.u32 %v305_v55, 16  ;;  %v1038_v23 = vshll.u32 %v306_v63, 16  ;;  %12363 = vmatmul.mubr.msk.bf16.gmra.mrb[44].mxu0 %vm2029_vm2, %v14746_v2  ;;  %v997_v25 = vsel %vm14423_vm3, %v992_v10, %v996_v47  ;;  %v310_v55 = vld [vmem:[%s14405_s6 + $0x12c] sm:$0xf] }
  0x85   : > { %v1021_v26 = vor.u32 %v1020_v14, %v1016_v9  ;;  %v1031_v28 = vrot.slane %v1029_v16, 4  ;;  %v1042_v29 = vshrl.u32 %v306_v63, 16  ;;  %v1007_v32 = vsel %vm14423_vm3, %v1002_v19, %v1006_v53 }
  0x86   : > { %v1017_v35 = vsel %vm14423_vm3, %v1012_v20, %v1016_v9  ;;  %v1034_v36 = vrot.slane %v1032_v22, 5  ;;  %v1040_v39 = vrot.slane %v1038_v23, 5  ;;  %v14761_v41 = vcombine.low %v997_v25, %v1007_v32 }
  0x87   : > { %v1022_v42 = vrot.slane %v1021_v26, 4  ;;  %v1044_v45 = vrot.slane %v1042_v29, 4  ;;  %v1048_v46 = vshll.u32 %v307_v21, 16  ;;  %v1052_v48 = vshrl.u32 %v307_v21, 16  ;;  %v312_v21 = vld [vmem:[%s14405_s6 + $0x134] sm:$0xf] }
  0x88   : > { %18437 = vst [vmem:[#allocation25_spill] sm:$0xff] %v14761_v41  ;;  %v1035_v47 = vor.u32 %v1034_v36, %v1031_v28  ;;  %v1058_v54 = vshll.u32 %v308_v30, 16  ;;  %v1062_v4 = vshrl.u32 %v308_v30, 16  ;;  %12366 = vmatprep.mubr.msk.bf16.mxu0 %vm2029_vm2, %v14761_v41  ;;  %v1068_v59 = vshll.u32 %v309_v40, 16  ;;  %v313_v30 = vld [vmem:[%s14405_s6 + $0x138] sm:$0xf] }
  0x89   : > { %11839 = vmatmul.mubr.msk.bf16.gmra.mrb[48].mxu1 %vm2029_vm2, %v14746_v2  ;;  %v1027_v53 = vsel %vm14423_vm3, %v1022_v42, %v1026_v15  ;;  %v1045_v56 = vor.u32 %v1044_v45, %v1040_v39  ;;  %v1050_v58 = vrot.slane %v1048_v46, 5  ;;  %v1054_v5 = vrot.slane %v1052_v48, 4 }
  0x8a   : > { %v14771_v63 = vcombine.low %v1017_v35, %v1027_v53  ;;  %11842 = vmatprep.mubr.msk.bf16.mxu1 %vm2029_vm2, %v14761_v41  ;;  %v1036_v6 = vrot.slane %v1035_v47, 4  ;;  %v1060_v9 = vrot.slane %v1058_v54, 5  ;;  %v1064_v14 = vrot.slane %v1062_v4, 4  ;;  %v314_v54 = vld [vmem:[%s14405_s6 + $0x13c] sm:$0x1] }
  0x8b   : > { %v1046_v10 = vrot.slane %v1045_v56, 4  ;;  %v1070_v16 = vrot.slane %v1068_v59, 5  ;;  %v1073_v19 = vshrl.u32 %v310_v55, 16  ;;  %v1055_v20 = vor.u32 %v1054_v5, %v1050_v58  ;;  %v315_v53 = vld [vmem:[%s14405_s6 + $0x140] sm:$0xf] }
  0x8c   : > { %18438 = vst [vmem:[#allocation26_spill] sm:$0xff] %v14771_v63  ;;  %v1041_v15 = vsel %vm14423_vm3, %v1036_v6, %v1040_v39  ;;  %v1076_v22 = vshll.u32 %v310_v55, 16  ;;  %v1082_v23 = vshll.u32 %v311_v62, 16  ;;  %12367 = vmatmul.mubr.msk.bf16.gmra.mrb[48].mxu0 %vm2029_vm2, %v14771_v63  ;;  %v1065_v26 = vor.u32 %v1064_v14, %v1060_v9  ;;  %v316_v6 = vld [vmem:[%s14405_s6 + $0x144] sm:$0xf] }
  0x8d   : > { %v1051_v25 = vsel %vm14423_vm3, %v1046_v10, %v1050_v58  ;;  %v1075_v28 = vrot.slane %v1073_v19, 4  ;;  %v1086_v29 = vshrl.u32 %v311_v62, 16  ;;  %v1056_v35 = vrot.slane %v1055_v20, 4 }
  0x8e   : > { %v14783_v32 = vcombine.low %v1041_v15, %v1051_v25  ;;  %v1078_v36 = vrot.slane %v1076_v22, 5  ;;  %v1084_v39 = vrot.slane %v1082_v23, 5  ;;  %v1066_v40 = vrot.slane %v1065_v26, 4  ;;  %v317_v23 = vld [vmem:[%s14405_s6 + $0x148] sm:$0xf] }
  0x8f   : > { %v1088_v42 = vrot.slane %v1086_v29, 4  ;;  %v1092_v45 = vshll.u32 %v312_v21, 16  ;;  %v1096_v46 = vshrl.u32 %v312_v21, 16  ;;  %v1061_v47 = vsel %vm14423_vm3, %v1056_v35, %v1060_v9 }
  0x90   : > { %18439 = vst [vmem:[#allocation27_spill] sm:$0xff] %v14783_v32  ;;  %12370 = vmatprep.mubr.msk.bf16.mxu0 %vm2029_vm2, %v14783_v32  ;;  %v1079_v48 = vor.u32 %v1078_v36, %v1075_v28  ;;  %v1102_v4 = vshll.u32 %v313_v30, 16  ;;  %v1106_v55 = vshrl.u32 %v313_v30, 16  ;;  %v1071_v56 = vsel %vm14423_vm3, %v1066_v40, %v1070_v16  ;;  %v318_v36 = vld [vmem:[%s14405_s6 + $0x14c] sm:$0xf] }
  0x91   : > { %11843 = vmatmul.mubr.msk.bf16.gmra.mrb[52].mxu1 %vm2029_vm2, %v14771_v63  ;;  %v1089_v58 = vor.u32 %v1088_v42, %v1084_v39  ;;  %v1094_v59 = vrot.slane %v1092_v45, 5  ;;  %v1098_v62 = vrot.slane %v1096_v46, 4  ;;  %v14796_v5 = vcombine.low %v1061_v47, %v1071_v56  ;;  %v354_v63 = vld [vmem:[%s14405_s6 + $0x1dc] sm:$0x1] }
  0x92   : > { %11846 = vmatprep.mubr.msk.bf16.mxu1 %vm2029_vm2, %v14783_v32  ;;  %v1080_v9 = vrot.slane %v1079_v48, 4  ;;  %v1104_v10 = vrot.slane %v1102_v4, 5  ;;  %v1108_v14 = vrot.slane %v1106_v55, 4  ;;  %v1112_v20 = vshll.u32 %v314_v54, 16  ;;  %v319_v54 = vld [vmem:[%s14405_s6 + $0x150] sm:$0x1] }
  0x93   : > { %18440 = vst [vmem:[#allocation28_spill] sm:$0xff] %v14796_v5  ;;  %v1090_v19 = vrot.slane %v1089_v58, 4  ;;  %v1099_v15 = vor.u32 %v1098_v62, %v1094_v59  ;;  %v1117_v21 = vshrl.u32 %v315_v53, 16  ;;  %v1120_v25 = vshll.u32 %v315_v53, 16  ;;  %v14144_v32 = vld [vmem:[%s14405_s6 + $0x94] sm:$0xf] }
  0x94   : > { %v1085_v16 = vsel %vm14423_vm3, %v1080_v9, %v1084_v39  ;;  %v1109_v22 = vor.u32 %v1108_v14, %v1104_v10  ;;  %v1126_v26 = vshll.u32 %v316_v6, 16  ;;  %12371 = vmatmul.mubr.msk.bf16.gmra.mrb[52].mxu0 %vm2029_vm2, %v14796_v5  ;;  %v1114_v30 = vrot.slane %v1112_v20, 5 }
  0x95   : > { %v1095_v28 = vsel %vm14423_vm3, %v1090_v19, %v1094_v59  ;;  %v1100_v29 = vrot.slane %v1099_v15, 4  ;;  %v1119_v35 = vrot.slane %v1117_v21, 4  ;;  %v1122_v45 = vrot.slane %v1120_v25, 5 }
  0x96   : > { %v14808_v40 = vcombine.low %v1085_v16, %v1095_v28  ;;  %v1110_v42 = vrot.slane %v1109_v22, 4  ;;  %v1128_v39 = vrot.slane %v1126_v26, 5  ;;  %v1130_v47 = vshrl.u32 %v316_v6, 16  ;;  %v320_v16 = vld [vmem:[%s14405_s6 + $0x154] sm:$0xf] }
  0x97   : > { %v1105_v46 = vsel %vm14423_vm3, %v1100_v29, %v1104_v10  ;;  %v1136_v48 = vshll.u32 %v317_v23, 16  ;;  %v1140_v4 = vshrl.u32 %v317_v23, 16  ;;  %v1123_v53 = vor.u32 %v1122_v45, %v1119_v35  ;;  %v14113_v28 = vld [vmem:[%s14405_s6 + $0x14] sm:$0xf]  ;;  %v14115_v45 = vld [vmem:[%s14405_s6 + $0x1c] sm:$0xf] }
  0x98   : > { %18441 = vst [vmem:[#allocation29_spill] sm:$0xff] %v14808_v40  ;;  %12374 = vmatprep.mubr.msk.bf16.mxu0 %vm2029_vm2, %v14808_v40  ;;  %v1115_v55 = vsel %vm14423_vm3, %v1110_v42, %v1114_v30  ;;  %v1146_v56 = vshll.u32 %v318_v36, 16  ;;  %v1150_v58 = vshrl.u32 %v318_v36, 16  ;;  %v1132_v62 = vrot.slane %v1130_v47, 4  ;;  %v14114_v36 = vld [vmem:[%s14405_s6 + $0x18] sm:$0xf] }
  0x99   : > { %11847 = vmatmul.mubr.msk.bf16.gmra.mrb[56].mxu1 %vm2029_vm2, %v14796_v5  ;;  %v14819_v59 = vcombine.low %v1105_v46, %v1115_v55  ;;  %v1138_v6 = vrot.slane %v1136_v48, 5  ;;  %v1142_v9 = vrot.slane %v1140_v4, 4  ;;  %v1124_v10 = vrot.slane %v1123_v53, 4 }
  0x9a   : > { %11850 = vmatprep.mubr.msk.bf16.mxu1 %vm2029_vm2, %v14808_v40  ;;  %v1148_v14 = vrot.slane %v1146_v56, 5  ;;  %v1152_v19 = vrot.slane %v1150_v58, 4  ;;  %v1156_v15 = vshll.u32 %v319_v54, 16  ;;  %v1133_v20 = vor.u32 %v1132_v62, %v1128_v39  ;;  %v321_v58 = vld [vmem:[%s14405_s6 + $0x158] sm:$0xf] }
  0x9b   : > { %18442 = vst [vmem:[#allocation30_spill] sm:$0xff] %v14819_v59  ;;  %v1143_v21 = vor.u32 %v1142_v9, %v1138_v6  ;;  %v1129_v22 = vsel %vm14423_vm3, %v1124_v10, %v1128_v39  ;;  %v18443_v26 = vmov 0  ;;  %v10588_v29 = vrot.slane %v14113_v28, 9 }
  0x9c   : > { %v1153_v23 = vor.u32 %v1152_v19, %v1148_v14  ;;  %v1158_v25 = vrot.slane %v1156_v15, 5  ;;  %v18444_v26 = vsel %vm14826_vm6, 4294967295, %v18443_v26  ;;  %12375 = vmatmul.mubr.msk.bf16.gmra.mrb[56].mxu0 %vm2029_vm2, %v14819_v59  ;;  %v1134_v30 = vrot.slane %v1133_v20, 4  ;;  %v322_v19 = vld [vmem:[%s14405_s6 + $0x15c] sm:$0xf] }
  0x9d   : > { %18445 = vst [vmem:[#allocation31_spill] sm:$0xff] %v18444_v26  ;;  %v1144_v35 = vrot.slane %v1143_v21, 4  ;;  %v3886_v42 = vrot.slane %v14114_v36, 5  ;;  %v3889_v46 = vrot.slane %v14115_v45, 5  ;;  %v3894_v47 = vrot.slane %v3892_v12, 4 }
  0x9e   : > { %v1154_v39 = vrot.slane %v1153_v23, 4  ;;  %v1161_v48 = vshrl.u32 %v320_v16, 16  ;;  %v1164_v54 = vshll.u32 %v320_v16, 16  ;;  %v1139_v4 = vsel %vm14423_vm3, %v1134_v30, %v1138_v6  ;;  %v323_v23 = vld [vmem:[%s14405_s6 + $0x160] sm:$0xf] }
  0x9f   : > { %v1149_v55 = vsel %vm14423_vm3, %v1144_v35, %v1148_v14  ;;  %v3887_v53 = vsel %vm14826_vm6, %v10588_v29, %v3886_v42  ;;  %v3888_v56 = vrot.slane %v3886_v42, 4  ;;  %v14844_v62 = vcombine.low %v1129_v22, %v1139_v4  ;;  %v14116_v30 = vld [vmem:[%s14405_s6 + $0x28] sm:$0xf]  ;;  %v14117_v45 = vld [vmem:[%s14405_s6 + $0x2c] sm:$0xf] }
  0xa0   : > { %v1159_v9 = vsel %vm14423_vm3, %v1154_v39, %v1158_v25  ;;  %v3891_v10 = vrot.slane %v3889_v46, 4  ;;  %v3896_v6 = vsel %vm14826_vm6, %v3894_v47, %v3895_v13  ;;  %v1163_v20 = vrot.slane %v1161_v48, 4  ;;  %v14118_v39 = vld [vmem:[%s14405_s6 + $0x30] sm:$0xf] }
  0xa1   : > { %18446 = vst [vmem:[#allocation32_spill] sm:$0xff] %v14844_v62  ;;  %11851 = vmatmul.mubr.msk.bf16.gmra.mrb[60].mxu1 %vm2029_vm2, %v14819_v59  ;;  %v14855_v14 = vcombine.low %v1149_v55, %v1159_v9  ;;  %v3890_v15 = vsel %vm14826_vm6, %v3888_v56, %v3889_v46  ;;  %v1166_v21 = vrot.slane %v1164_v54, 5  ;;  %12378 = vmatprep.mubr.msk.bf16.mxu0 %vm2029_vm2, %v14844_v62  ;;  %v1170_v16 = vshll.u32 %v321_v58, 16  ;;  %v344_v59 = vld [vmem:[%s14405_s6 + $0x1b4] sm:$0x1] }
  0xa2   : > { %11854 = vmatprep.mubr.msk.bf16.mxu1 %vm2029_vm2, %v14844_v62  ;;  %v14863_v60 = vcombine.low %v3887_v53, %v3890_v15  ;;  %v3893_v13 = vsel %vm14826_vm6, %v3891_v10, %v3892_v12  ;;  %v1174_v22 = vshrl.u32 %v321_v58, 16  ;;  %v1180_v29 = vshll.u32 %v322_v19, 16  ;;  %v14134_v62 = vld [vmem:[%s14405_s6 + $0x6c] sm:$0xf] }
  0xa3   : > { %18447 = vst [vmem:[#allocation33_spill] sm:$0xff] %v14855_v14  ;;  %v14870_v25 = vcombine.low %v3893_v13, %v3896_v6  ;;  %v1167_v28 = vor.u32 %v1166_v21, %v1163_v20  ;;  %v10589_v35 = vrot.slane %v14116_v30, 9  ;;  %v1172_v36 = vrot.slane %v1170_v16, 5 }
  0xa4   : > { %18448 = vst [vmem:[#allocation34_spill] sm:$0xff] %v14863_v60  ;;  %v1176_v42 = vrot.slane %v1174_v22, 4  ;;  %v3899_v46 = vrot.slane %v14117_v45, 5  ;;  %v3902_v47 = vrot.slane %v14118_v39, 5  ;;  %12379 = vmatmul.mubr.msk.bf16.gmra.mrb[60].mxu0 %vm2029_vm2, %v14855_v14  ;;  %v1182_v48 = vrot.slane %v1180_v29, 5 }
  0xa5   : > { %18449 = vst [vmem:[#allocation35_spill] sm:$0xff] %v14870_v25  ;;  %v1168_v12 = vrot.slane %v1167_v28, 4  ;;  %v1184_v54 = vshrl.u32 %v322_v19, 16  ;;  %v1190_v4 = vshll.u32 %v323_v23, 16  ;;  %12450 = vmatprep.mubr.msk.bf16.mxu0 %vm2029_vm2, %v14863_v60  ;;  %v1194_v58 = vshrl.u32 %v323_v23, 16 }
  0xa6   : > { %v1177_v55 = vor.u32 %v1176_v42, %v1172_v36  ;;  %v3900_v53 = vsel %vm14826_vm6, %v10589_v35, %v3899_v46  ;;  %v3901_v56 = vrot.slane %v3899_v46, 4  ;;  %v1200_v15 = vshll.u32 %v324_v49, 16  ;;  %v325_v19 = vld [vmem:[%s14405_s6 + $0x168] sm:$0xf]  ;;  %v14119_v29 = vld [vmem:[%s14405_s6 + $0x34] sm:$0xf] }
  0xa7   : > { %v1173_v9 = vsel %vm14423_vm3, %v1168_v12, %v1172_v36  ;;  %v1186_v10 = vrot.slane %v1184_v54, 4  ;;  %v1192_v6 = vrot.slane %v1190_v4, 5  ;;  %v1196_v13 = vrot.slane %v1194_v58, 4  ;;  %v326_v35 = vld [vmem:[%s14405_s6 + $0x16c] sm:$0xf] }
  0xa8   : > { %v1178_v20 = vrot.slane %v1177_v55, 4  ;;  %v3903_v21 = vsel %vm14826_vm6, %v3901_v56, %v3902_v47  ;;  %v3904_v16 = vrot.slane %v3902_v47, 4  ;;  %v1202_v28 = vrot.slane %v1200_v15, 5  ;;  %v14120_v45 = vld [vmem:[%s14405_s6 + $0x38] sm:$0x1] }
  0xa9   : > { %11855 = vmatmul.mubr.msk.bf16.gmra.mrb[64].mxu1 %vm2029_vm2, %v14855_v14  ;;  %v14889_v22 = vcombine.low %v3900_v53, %v3903_v21  ;;  %v1187_v23 = vor.u32 %v1186_v10, %v1182_v48  ;;  %v3905_v30 = vrot.slane %v14119_v29, 5  ;;  %v1197_v42 = vor.u32 %v1196_v13, %v1192_v6  ;;  %v327_v39 = vld [vmem:[%s14405_s6 + $0x170] sm:$0xf] }
  0xaa   : > { %v1183_v36 = vsel %vm14423_vm3, %v1178_v20, %v1182_v48  ;;  %v3908_v46 = vrot.slane %v14120_v45, 5  ;;  %v1205_v49 = vshrl.u32 %v325_v19, 16  ;;  %v1208_v56 = vshll.u32 %v325_v19, 16  ;;  %v14121_v19 = vld [vmem:[%s18096_s1 + $0x60] sm:$0xff]  }
  0xab   : > { %18450 = vst [vmem:[#allocation36_spill] sm:$0xff] %v14889_v22  ;;  %v14897_v12 = vcombine.low %v1173_v9, %v1183_v36  ;;  %v1188_v47 = vrot.slane %v1187_v23, 4  ;;  %v3906_v54 = vsel %vm14826_vm6, %v3904_v16, %v3905_v30  ;;  %v3907_v4 = vrot.slane %v3905_v30, 4  ;;  %v328_v16 = vld [vmem:[%s14405_s6 + $0x174] sm:$0xf] }
  0xac   : > { %v1198_v55 = vrot.slane %v1197_v42, 4  ;;  %v1207_v53 = vrot.slane %v1205_v49, 4  ;;  %v1214_v58 = vshll.u32 %v326_v35, 16  ;;  %12451 = vmatmul.mubr.msk.bf16.vlgmr.msra.gmra.mrb[0].mxu0 %vm2029_vm2, %v14870_v25  ;;  %v1218_v10 = vshrl.u32 %v326_v35, 16  ;;  %v329_v23 = vld [vmem:[%s14405_s6 + $0x178] sm:$0x1] }
  0xad   : > { %18451 = vst [vmem:[#allocation37_spill] sm:$0xff] %v14897_v12  ;;  %11858 = vmatprep.mubr.msk.bf16.mxu1 %vm2029_vm2, %v14897_v12  ;;  %v1193_v48 = vsel %vm14423_vm3, %v1188_v47, %v1192_v6  ;;  %v3909_v9 = vsel %vm14826_vm6, %v3907_v4, %v3908_v46  ;;  %v1224_v15 = vshll.u32 %v327_v39, 16  ;;  %12579 = vmatpush3.bf16.msra.mxu0 %v14121_v19  ;;  %v1210_v21 = vrot.slane %v1208_v56, 5  ;;  %v14122_v36 = vld [vmem:[%s14405_s6 + $0x3c] sm:$0xf] }
  0xae   : > { %12454 = vmatprep.mubr.msk.bf16.mxu0 %vm2029_vm2, %v14889_v22  ;;  %v1203_v20 = vsel %vm14423_vm3, %v1198_v55, %v1202_v28  ;;  %v14916_v6 = vcombine.low %v3906_v54, %v3909_v9  ;;  %v1216_v13 = vrot.slane %v1214_v58, 5  ;;  %v1220_v30 = vrot.slane %v1218_v10, 4  ;;  %v14123_v46 = vld [vmem:[%s14405_s6 + $0x40] sm:$0xf]  ;;  %v14124_v47 = vld [vmem:[%s14405_s6 + $0x44] sm:$0xf] }
  0xaf   : > { %v14920_v29 = vcombine.low %v1193_v48, %v1203_v20  ;;  %v1226_v35 = vrot.slane %v1224_v15, 5  ;;  %v10590_v42 = vrot.slane %v14122_v36, 9  ;;  %v1211_v45 = vor.u32 %v1210_v21, %v1207_v53  ;;  %v330_v21 = vld [vmem:[%s14405_s6 + $0x17c] sm:$0xf] }
  0xb0   : > { %18452 = vst [vmem:[#allocation38_spill] sm:$0xff] %v14916_v6  ;;  %v3912_v49 = vrot.slane %v14123_v46, 5  ;;  %v3915_v4 = vrot.slane %v14124_v47, 5  ;;  %v1228_v19 = vshrl.u32 %v327_v39, 16  ;;  %v1221_v28 = vor.u32 %v1220_v30, %v1216_v13 }
  0xb1   : > { %18453 = vst [vmem:[#allocation39_spill] sm:$0xff] %v14920_v29  ;;  %11859 = vmatmul.mubr.msk.bf16.gmra.mrb[68].mxu1 %vm2029_vm2, %v14920_v29  ;;  %v1234_v54 = vshll.u32 %v328_v16, 16  ;;  %v1238_v55 = vshrl.u32 %v328_v16, 16  ;;  %v1244_v56 = vshll.u32 %v329_v23, 16  ;;  %v1212_v58 = vrot.slane %v1211_v45, 4 }
  0xb2   : > { %v3913_v48 = vsel %vm14826_vm6, %v10590_v42, %v3912_v49  ;;  %v3914_v9 = vrot.slane %v3912_v49, 4  ;;  %v1230_v53 = vrot.slane %v1228_v19, 4  ;;  %v1222_v10 = vrot.slane %v1221_v28, 4  ;;  %v14125_v49 = vld [vmem:[%s14405_s6 + $0x48] sm:$0xf] }
  0xb3   : > { %v1236_v15 = vrot.slane %v1234_v54, 5  ;;  %v1240_v20 = vrot.slane %v1238_v55, 4  ;;  %v1246_v39 = vrot.slane %v1244_v56, 5  ;;  %v1217_v30 = vsel %vm14423_vm3, %v1212_v58, %v1216_v13  ;;  %v331_v19 = vld [vmem:[%s14405_s6 + $0x180] sm:$0xf] }
  0xb4   : > { %v3916_v16 = vsel %vm14826_vm6, %v3914_v9, %v3915_v4  ;;  %v1231_v23 = vor.u32 %v1230_v53, %v1226_v35  ;;  %v3917_v36 = vrot.slane %v3915_v4, 4  ;;  %12455 = vmatmul.mubr.msk.bf16.gmra.mrb[4].mxu0 %vm2029_vm2, %v14916_v6  ;;  %v1227_v42 = vsel %vm14423_vm3, %v1222_v10, %v1226_v35  ;;  %v14126_v54 = vld [vmem:[%s14405_s6 + $0x4c] sm:$0x1]  ;;  %v332_v56 = vld [vmem:[%s14405_s6 + $0x184] sm:$0xf] }
  0xb5   : > { %v14938_v45 = vcombine.low %v3913_v48, %v3916_v16  ;;  %v1241_v46 = vor.u32 %v1240_v20, %v1236_v15  ;;  %v3918_v47 = vrot.slane %v14125_v49, 5  ;;  %v14942_v28 = vcombine.low %v1217_v30, %v1227_v42  ;;  %v333_v42 = vld [vmem:[%s14405_s6 + $0x188] sm:$0xf] }
  0xb6   : > { %v1232_v13 = vrot.slane %v1231_v23, 4  ;;  %v3921_v55 = vrot.slane %v14126_v54, 5  ;;  %v1249_v4 = vshrl.u32 %v330_v21, 16  ;;  %v1252_v9 = vshll.u32 %v330_v21, 16 }
  0xb7   : > { %18454 = vst [vmem:[#allocation40_spill] sm:$0xff] %v14938_v45  ;;  %18455 = vst [vmem:[#allocation41_spill] sm:$0xff] %v14942_v28  ;;  %12458 = vmatprep.mubr.msk.bf16.mxu0 %vm2029_vm2, %v14938_v45  ;;  %v1242_v58 = vrot.slane %v1241_v46, 4  ;;  %v3919_v35 = vsel %vm14826_vm6, %v3917_v36, %v3918_v47  ;;  %v3920_v48 = vrot.slane %v3918_v47, 4  ;;  %11862 = vmatprep.mubr.msk.bf16.mxu1 %vm2029_vm2, %v14942_v28  ;;  %v1258_v20 = vshll.u32 %v331_v19, 16 }
  0xb8   : > { %v1237_v53 = vsel %vm14423_vm3, %v1232_v13, %v1236_v15  ;;  %v1251_v10 = vrot.slane %v1249_v4, 4  ;;  %v1262_v30 = vshrl.u32 %v331_v19, 16  ;;  %v1254_v36 = vrot.slane %v1252_v9, 5  ;;  %v14127_v19 = vld [vmem:[%s14405_s6 + $0x50] sm:$0xf] }
  0xb9   : > { %v1247_v16 = vsel %vm14423_vm3, %v1242_v58, %v1246_v39  ;;  %v3922_v23 = vsel %vm14826_vm6, %v3920_v48, %v3921_v55  ;;  %v1268_v21 = vshll.u32 %v332_v56, 16  ;;  %v1260_v15 = vrot.slane %v1258_v20, 5  ;;  %v14128_v28 = vld [vmem:[%s14405_s6 + $0x54] sm:$0xf]  ;;  %v334_v39 = vld [vmem:[%s14405_s6 + $0x18c] sm:$0x1] }
  0xba   : > { %v14959_v46 = vcombine.low %v1237_v53, %v1247_v16  ;;  %v14961_v49 = vcombine.low %v3919_v35, %v3922_v23  ;;  %v1264_v47 = vrot.slane %v1262_v30, 4  ;;  %v1255_v13 = vor.u32 %v1254_v36, %v1251_v10  ;;  %v14129_v58 = vld [vmem:[%s14405_s6 + $0x58] sm:$0xf] }
  0xbb   : > { %v1270_v54 = vrot.slane %v1268_v21, 5  ;;  %v10591_v4 = vrot.slane %v14127_v19, 9  ;;  %v3925_v29 = vrot.slane %v14128_v28, 5  ;;  %v3928_v48 = vrot.slane %v14129_v58, 5  ;;  %v335_v19 = vld [vmem:[%s14405_s6 + $0x190] sm:$0xf] }
  0xbc   : > { %18456 = vst [vmem:[#allocation42_spill] sm:$0xff] %v14959_v46  ;;  %18457 = vst [vmem:[#allocation43_spill] sm:$0xff] %v14961_v49  ;;  %11863 = vmatmul.mubr.msk.bf16.gmra.mrb[72].mxu1 %vm2029_vm2, %v14959_v46  ;;  %v1265_v55 = vor.u32 %v1264_v47, %v1260_v15  ;;  %v1272_v9 = vshrl.u32 %v332_v56, 16  ;;  %v1278_v35 = vshll.u32 %v333_v42, 16  ;;  %12459 = vmatmul.mubr.msk.bf16.gmra.mrb[8].mxu0 %vm2029_vm2, %v14961_v49  ;;  %v1256_v53 = vrot.slane %v1255_v13, 4 }
  0xbd   : > { %v3926_v10 = vsel %vm14826_vm6, %v10591_v4, %v3925_v29  ;;  %v3927_v20 = vrot.slane %v3925_v29, 4  ;;  %v1282_v28 = vshrl.u32 %v333_v42, 16  ;;  %v1288_v36 = vshll.u32 %v334_v39, 16  ;;  %v336_v58 = vld [vmem:[%s14405_s6 + $0x194] sm:$0xf] }
  0xbe   : > { %v1266_v30 = vrot.slane %v1265_v55, 4  ;;  %v1274_v16 = vrot.slane %v1272_v9, 4  ;;  %v1280_v23 = vrot.slane %v1278_v35, 5  ;;  %v1261_v56 = vsel %vm14423_vm3, %v1256_v53, %v1260_v15  ;;  %v14130_v35 = vld [vmem:[%s14405_s6 + $0x5c] sm:$0xf] }
  0xbf   : > { %v3929_v21 = vsel %vm14826_vm6, %v3927_v20, %v3928_v48  ;;  %v1284_v47 = vrot.slane %v1282_v28, 4  ;;  %v3930_v13 = vrot.slane %v3928_v48, 4  ;;  %v1290_v55 = vrot.slane %v1288_v36, 5  ;;  %v14131_v53 = vld [vmem:[%s14405_s6 + $0x60] sm:$0x1] }
  0xc0   : > { %v1271_v29 = vsel %vm14423_vm3, %v1266_v30, %v1270_v54  ;;  %v14981_v42 = vcombine.low %v3926_v10, %v3929_v21  ;;  %v1275_v4 = vor.u32 %v1274_v16, %v1270_v54  ;;  %v3931_v15 = vrot.slane %v14130_v35, 5  ;;  %v337_v20 = vld [vmem:[%s14405_s6 + $0x198] sm:$0xf] }
  0xc1   : > { %v14983_v9 = vcombine.low %v1261_v56, %v1271_v29  ;;  %v1285_v39 = vor.u32 %v1284_v47, %v1280_v23  ;;  %v3934_v46 = vrot.slane %v14131_v53, 5  ;;  %v1293_v28 = vshrl.u32 %v335_v19, 16  ;;  %v15601_v49 = vld [vmem:[%s14405_s6 + $0x278] sm:$0xf] }
  0xc2   : > { %18458 = vst [vmem:[#allocation44_spill] sm:$0xff] %v14981_v42  ;;  %12462 = vmatprep.mubr.msk.bf16.mxu0 %vm2029_vm2, %v14981_v42  ;;  %v1276_v48 = vrot.slane %v1275_v4, 4  ;;  %v1296_v12 = vshll.u32 %v335_v19, 16  ;;  %v1302_v30 = vshll.u32 %v336_v58, 16  ;;  %v3932_v10 = vsel %vm14826_vm6, %v3930_v13, %v3931_v15  ;;  %v338_v13 = vld [vmem:[%s14405_s6 + $0x19c] sm:$0xf] }
  0xc3   : > { %18459 = vst [vmem:[#allocation45_spill] sm:$0xff] %v14983_v9  ;;  %11866 = vmatprep.mubr.msk.bf16.mxu1 %vm2029_vm2, %v14983_v9  ;;  %v1286_v54 = vrot.slane %v1285_v39, 4  ;;  %v3933_v16 = vrot.slane %v3931_v15, 4  ;;  %v1306_v36 = vshrl.u32 %v336_v58, 16  ;;  %v1295_v21 = vrot.slane %v1293_v28, 4 }
  0xc4   : > { %v1281_v56 = vsel %vm14423_vm3, %v1276_v48, %v1280_v23  ;;  %v1298_v47 = vrot.slane %v1296_v12, 5  ;;  %v1304_v29 = vrot.slane %v1302_v30, 5  ;;  %v1312_v35 = vshll.u32 %v337_v20, 16  ;;  %v14132_v23 = vld [vmem:[%s14405_s6 + $0x64] sm:$0xf] }
  0xc5   : > { %v1291_v19 = vsel %vm14423_vm3, %v1286_v54, %v1290_v55  ;;  %v3935_v4 = vsel %vm14826_vm6, %v3933_v16, %v3934_v46  ;;  %v1308_v39 = vrot.slane %v1306_v36, 4  ;;  %v10592_v48 = vrot.slane %v14132_v23, 9  ;;  %v339_v28 = vld [vmem:[%s14405_s6 + $0x1a0] sm:$0x1]  ;;  %v14133_v9 = vld [vmem:[%s14405_s6 + $0x68] sm:$0xf] }
  0xc6   : > { %v15001_v15 = vcombine.low %v1281_v56, %v1291_v19  ;;  %v15003_v58 = vcombine.low %v3932_v10, %v3935_v4  ;;  %v1299_v53 = vor.u32 %v1298_v47, %v1295_v21  ;;  %v1314_v30 = vrot.slane %v1312_v35, 5  ;;  %v14186_v42 = vld [vmem:[%s14405_s6 + $0x13c] sm:$0x1] }
  0xc7   : > { %v1309_v12 = vor.u32 %v1308_v39, %v1304_v29  ;;  %v3938_v14 = vrot.slane %v14133_v9, 5  ;;  %v3941_v55 = vrot.slane %v14134_v62, 5  ;;  %v1316_v54 = vshrl.u32 %v337_v20, 16  ;;  %v340_v39 = vld [vmem:[%s14405_s6 + $0x1a4] sm:$0xf] }
  0xc8   : > { %18460 = vst [vmem:[#allocation46_spill] sm:$0xff] %v15001_v15  ;;  %18461 = vst [vmem:[#allocation47_spill] sm:$0xff] %v15003_v58  ;;  %11867 = vmatmul.mubr.msk.bf16.gmra.mrb[76].mxu1 %vm2029_vm2, %v15001_v15  ;;  %12463 = vmatmul.mubr.msk.bf16.gmra.mrb[12].mxu0 %vm2029_vm2, %v15003_v58  ;;  %v1300_v46 = vrot.slane %v1299_v53, 4  ;;  %v1322_v10 = vshll.u32 %v338_v13, 16  ;;  %v1326_v16 = vshrl.u32 %v338_v13, 16  ;;  %v1332_v9 = vshll.u32 %v339_v28, 16 }
  0xc9   : > { %v1310_v36 = vrot.slane %v1309_v12, 4  ;;  %v3939_v56 = vsel %vm14826_vm6, %v10592_v48, %v3938_v14  ;;  %v3940_v21 = vrot.slane %v3938_v14, 4  ;;  %v1318_v47 = vrot.slane %v1316_v54, 4  ;;  %v341_v14 = vld [vmem:[%s14405_s6 + $0x1a8] sm:$0xf] }
  0xca   : > { %v1305_v62 = vsel %vm14423_vm3, %v1300_v46, %v1304_v29  ;;  %v1324_v19 = vrot.slane %v1322_v10, 5  ;;  %v1328_v4 = vrot.slane %v1326_v16, 4  ;;  %v1334_v13 = vrot.slane %v1332_v9, 5  ;;  %v14135_v12 = vld [vmem:[%s14405_s6 + $0x70] sm:$0xf] }
  0xcb   : > { %v1315_v20 = vsel %vm14423_vm3, %v1310_v36, %v1314_v30  ;;  %v3942_v35 = vsel %vm14826_vm6, %v3940_v21, %v3941_v55  ;;  %v3943_v53 = vrot.slane %v3941_v55, 4  ;;  %v1319_v29 = vor.u32 %v1318_v47, %v1314_v30  ;;  %v14136_v54 = vld [vmem:[%s14405_s6 + $0x74] sm:$0x1]  ;;  %v342_v21 = vld [vmem:[%s14405_s6 + $0x1ac] sm:$0xf] }
  0xcc   : > { %v15023_v23 = vcombine.low %v1305_v62, %v1315_v20  ;;  %v15025_v48 = vcombine.low %v3939_v56, %v3942_v35  ;;  %v1329_v28 = vor.u32 %v1328_v4, %v1324_v19  ;;  %v3944_v46 = vrot.slane %v14135_v12, 5 }
  0xcd   : > { %v3947_v10 = vrot.slane %v14136_v54, 5  ;;  %v1337_v16 = vshrl.u32 %v340_v39, 16  ;;  %v1340_v15 = vshll.u32 %v340_v39, 16  ;;  %v1320_v55 = vrot.slane %v1319_v29, 4 }
  0xce   : > { %18462 = vst [vmem:[#allocation48_spill] sm:$0xff] %v15023_v23  ;;  %18463 = vst [vmem:[#allocation49_spill] sm:$0xff] %v15025_v48  ;;  %11870 = vmatprep.mubr.msk.bf16.mxu1 %vm2029_vm2, %v15023_v23  ;;  %12466 = vmatprep.mubr.msk.bf16.mxu0 %vm2029_vm2, %v15025_v48  ;;  %v1330_v36 = vrot.slane %v1329_v28, 4  ;;  %v1346_v56 = vshll.u32 %v341_v14, 16  ;;  %v1350_v9 = vshrl.u32 %v341_v14, 16  ;;  %v3945_v30 = vsel %vm14826_vm6, %v3943_v53, %v3944_v46 }
  0xcf   : > { %v3946_v62 = vrot.slane %v3944_v46, 4  ;;  %v1339_v47 = vrot.slane %v1337_v16, 4  ;;  %v1342_v4 = vrot.slane %v1340_v15, 5  ;;  %v1325_v39 = vsel %vm14423_vm3, %v1320_v55, %v1324_v19  ;;  %v343_v46 = vld [vmem:[%s14405_s6 + $0x1b0] sm:$0xf] }
  0xd0   : > { %v1335_v20 = vsel %vm14423_vm3, %v1330_v36, %v1334_v13  ;;  %v1348_v35 = vrot.slane %v1346_v56, 5  ;;  %v1352_v29 = vrot.slane %v1350_v9, 4  ;;  %v1356_v12 = vshll.u32 %v342_v21, 16  ;;  %v14137_v16 = vld [vmem:[%s14405_s6 + $0x78] sm:$0xf] }
  0xd1   : > { %v15040_v28 = vcombine.low %v1325_v39, %v1335_v20  ;;  %v3948_v14 = vsel %vm14826_vm6, %v3946_v62, %v3947_v10  ;;  %v1343_v53 = vor.u32 %v1342_v4, %v1339_v47  ;;  %v10593_v23 = vrot.slane %v14137_v16, 9  ;;  %v14138_v19 = vld [vmem:[%s14405_s6 + $0x7c] sm:$0xf]  ;;  %v14139_v56 = vld [vmem:[%s14405_s6 + $0x80] sm:$0xf]  ;;  %v14039_v62 = vld [vmem:[%s18096_s1 + $0x68] sm:$0xff]  }
  0xd2   : > { %v15045_v54 = vcombine.low %v3945_v30, %v3948_v14  ;;  %v1353_v15 = vor.u32 %v1352_v29, %v1348_v35  ;;  %v3951_v55 = vrot.slane %v14138_v19, 5  ;;  %v1358_v36 = vrot.slane %v1356_v12, 5  ;;  %v14038_v30 = vld [vmem:[%s18096_s1 + $0x20] sm:$0xff]   ;;  %v345_v12 = vld [vmem:[%s14405_s6 + $0x1b8] sm:$0xf]  ;;  %12580 = vmatprep.subr.bf16.mxu0 %v14039_v62 }
  0xd3   : > { %18464 = vst [vmem:[#allocation50_spill] sm:$0xff] %v15040_v28  ;;  %11871 = vmatmul.mubr.msk.bf16.gmra.mrb[80].mxu1 %vm2029_vm2, %v15040_v28  ;;  %v1344_v13 = vrot.slane %v1343_v53, 4  ;;  %v3954_v9 = vrot.slane %v14139_v56, 5  ;;  %v1360_v10 = vshrl.u32 %v342_v21, 16  ;;  %v1366_v20 = vshll.u32 %v343_v46, 16  ;;  %12050 = vmatprep.subr.bf16.mxu1 %v14038_v30 }
  0xd4   : > { %18465 = vst [vmem:[#allocation51_spill] sm:$0xff] %v15045_v54  ;;  %12467 = vmatmul.mubr.msk.bf16.gmra.mrb[16].mxu0 %vm2029_vm2, %v15045_v54  ;;  %v1354_v47 = vrot.slane %v1353_v15, 4  ;;  %v3952_v4 = vsel %vm14826_vm6, %v10593_v23, %v3951_v55  ;;  %v3953_v39 = vrot.slane %v3951_v55, 4  ;;  %v1370_v14 = vshrl.u32 %v343_v46, 16  ;;  %v346_v55 = vld [vmem:[%s14405_s6 + $0x1bc] sm:$0xf] }
  0xd5   : > { %v1349_v21 = vsel %vm14423_vm3, %v1344_v13, %v1348_v35  ;;  %v1362_v29 = vrot.slane %v1360_v10, 4  ;;  %v1376_v53 = vshll.u32 %v344_v59, 16  ;;  %v1368_v23 = vrot.slane %v1366_v20, 5  ;;  %12581 = vmatpush3.bf16.msra.mxu0 %v14039_v62  ;;  %v14140_v10 = vld [vmem:[%s14405_s6 + $0x84] sm:$0xf] }
  0xd6   : > { %v1359_v16 = vsel %vm14423_vm3, %v1354_v47, %v1358_v36  ;;  %v3955_v15 = vsel %vm14826_vm6, %v3953_v39, %v3954_v9  ;;  %v3956_v19 = vrot.slane %v3954_v9, 4  ;;  %v1372_v13 = vrot.slane %v1370_v14, 4  ;;  %v14141_v28 = vld [vmem:[%s14405_s6 + $0x88] sm:$0x1]  ;;  %v347_v39 = vld [vmem:[%s14405_s6 + $0x1c0] sm:$0xf] }
  0xd7   : > { %v15071_v35 = vcombine.low %v1349_v21, %v1359_v16  ;;  %v15073_v46 = vcombine.low %v3952_v4, %v3955_v15  ;;  %v1363_v59 = vor.u32 %v1362_v29, %v1358_v36  ;;  %v1378_v56 = vrot.slane %v1376_v53, 5  ;;  %v15569_v48 = vld [vmem:[%s14405_s6 + $0x270] sm:$0xf] }
  0xd8   : > { %v3957_v30 = vrot.slane %v14140_v10, 5  ;;  %v3960_v40 = vrot.slane %v14141_v28, 5  ;;  %v1381_v47 = vshrl.u32 %v345_v12, 16  ;;  %v1373_v62 = vor.u32 %v1372_v13, %v1368_v23  ;;  %v14142_v10 = vld [vmem:[%s14405_s6 + $0x8c] sm:$0xf] }
  0xd9   : > { %18466 = vst [vmem:[#allocation52_spill] sm:$0xff] %v15071_v35  ;;  %18467 = vst [vmem:[#allocation53_spill] sm:$0xff] %v15073_v46  ;;  %11874 = vmatprep.mubr.msk.bf16.mxu1 %vm2029_vm2, %v15071_v35  ;;  %12470 = vmatprep.mubr.msk.bf16.mxu0 %vm2029_vm2, %v15073_v46  ;;  %v1364_v9 = vrot.slane %v1363_v59, 4  ;;  %v1384_v4 = vshll.u32 %v345_v12, 16  ;;  %v1390_v20 = vshll.u32 %v346_v55, 16  ;;  %v1394_v28 = vshrl.u32 %v346_v55, 16 }
  0xda   : > { %v3958_v36 = vsel %vm14826_vm6, %v3956_v19, %v3957_v30  ;;  %v3959_v21 = vrot.slane %v3957_v30, 4  ;;  %v1383_v29 = vrot.slane %v1381_v47, 4  ;;  %v1374_v53 = vrot.slane %v1373_v62, 4  ;;  %v14143_v35 = vld [vmem:[%s14405_s6 + $0x90] sm:$0xf] }
  0xdb   : > { %v1369_v14 = vsel %vm14423_vm3, %v1364_v9, %v1368_v23  ;;  %v1386_v16 = vrot.slane %v1384_v4, 5  ;;  %v1392_v15 = vrot.slane %v1390_v20, 5  ;;  %v1396_v59 = vrot.slane %v1394_v28, 4  ;;  %v348_v23 = vld [vmem:[%s14405_s6 + $0x1c4] sm:$0xf] }
  0xdc   : > { %v3961_v12 = vsel %vm14826_vm6, %v3959_v21, %v3960_v40  ;;  %v1400_v13 = vshll.u32 %v347_v39, 16  ;;  %v10594_v19 = vrot.slane %v14142_v10, 9  ;;  %v1379_v30 = vsel %vm14423_vm3, %v1374_v53, %v1378_v56  ;;  %v349_v9 = vld [vmem:[%s14405_s6 + $0x1c8] sm:$0x1] }
  0xdd   : > { %v15091_v47 = vcombine.low %v3958_v36, %v3961_v12  ;;  %v1387_v55 = vor.u32 %v1386_v16, %v1383_v29  ;;  %v3964_v5 = vrot.slane %v14143_v35, 5  ;;  %v15096_v62 = vcombine.low %v1369_v14, %v1379_v30  ;;  %v351_v30 = vld [vmem:[%s14405_s6 + $0x1d0] sm:$0xf] }
  0xde   : > { %v1397_v4 = vor.u32 %v1396_v59, %v1392_v15  ;;  %v1402_v20 = vrot.slane %v1400_v13, 5  ;;  %v3967_v40 = vrot.slane %v14144_v32, 5  ;;  %v1404_v29 = vshrl.u32 %v347_v39, 16 }
  0xdf   : > { %18468 = vst [vmem:[#allocation54_spill] sm:$0xff] %v15091_v47  ;;  %18469 = vst [vmem:[#allocation55_spill] sm:$0xff] %v15096_v62  ;;  %12471 = vmatmul.mubr.msk.bf16.gmra.mrb[20].mxu0 %vm2029_vm2, %v15091_v47  ;;  %v1388_v21 = vrot.slane %v1387_v55, 4  ;;  %v3965_v56 = vsel %vm14826_vm6, %v10594_v19, %v3964_v5  ;;  %v3966_v36 = vrot.slane %v3964_v5, 4  ;;  %11875 = vmatmul.mubr.msk.bf16.gmra.mrb[84].mxu1 %vm2029_vm2, %v15096_v62  ;;  %v1410_v28 = vshll.u32 %v348_v23, 16 }
  0xe0   : > { %v1398_v35 = vrot.slane %v1397_v4, 4  ;;  %v1414_v14 = vshrl.u32 %v348_v23, 16  ;;  %v1420_v53 = vshll.u32 %v349_v9, 16  ;;  %v1406_v12 = vrot.slane %v1404_v29, 4  ;;  %v350_v5 = vld [vmem:[%s14405_s6 + $0x1cc] sm:$0xf] }
  0xe1   : > { %v1393_v32 = vsel %vm14423_vm3, %v1388_v21, %v1392_v15  ;;  %v3968_v16 = vsel %vm14826_vm6, %v3966_v36, %v3967_v40  ;;  %v3969_v59 = vrot.slane %v3967_v40, 4  ;;  %v1412_v10 = vrot.slane %v1410_v28, 5  ;;  %v14145_v9 = vld [vmem:[%s14405_s6 + $0x98] sm:$0xf]  ;;  %v14146_v21 = vld [vmem:[%s14405_s6 + $0x9c] sm:$0x1] }
  0xe2   : > { %v1403_v39 = vsel %vm14423_vm3, %v1398_v35, %v1402_v20  ;;  %v15112_v13 = vcombine.low %v3965_v56, %v3968_v16  ;;  %v1416_v19 = vrot.slane %v1414_v14, 4  ;;  %v1407_v23 = vor.u32 %v1406_v12, %v1402_v20  ;;  %v352_v29 = vld [vmem:[%s14405_s6 + $0x1d4] sm:$0xf] }
  0xe3   : > { %v15115_v55 = vcombine.low %v1393_v32, %v1403_v39  ;;  %v1422_v15 = vrot.slane %v1420_v53, 5  ;;  %v3970_v4 = vrot.slane %v14145_v9, 5  ;;  %v3973_v36 = vrot.slane %v14146_v21, 5  ;;  %v15544_v47 = vld [vmem:[%s14405_s6 + $0x134] sm:$0xf] }
  0xe4   : > { %18470 = vst [vmem:[#allocation56_spill] sm:$0xff] %v15112_v13  ;;  %12474 = vmatprep.mubr.msk.bf16.mxu0 %vm2029_vm2, %v15112_v13  ;;  %v1417_v40 = vor.u32 %v1416_v19, %v1412_v10  ;;  %v1425_v62 = vshrl.u32 %v350_v5, 16  ;;  %v1428_v35 = vshll.u32 %v350_v5, 16  ;;  %v1408_v56 = vrot.slane %v1407_v23, 4 }
  0xe5   : > { %18471 = vst [vmem:[#allocation57_spill] sm:$0xff] %v15115_v55  ;;  %11878 = vmatprep.mubr.msk.bf16.mxu1 %vm2029_vm2, %v15115_v55  ;;  %v3971_v20 = vsel %vm14826_vm6, %v3969_v59, %v3970_v4  ;;  %v3972_v28 = vrot.slane %v3970_v4, 4  ;;  %v1434_v14 = vshll.u32 %v351_v30, 16  ;;  %v1438_v12 = vshrl.u32 %v351_v30, 16 }
  0xe6   : > { %v1418_v53 = vrot.slane %v1417_v40, 4  ;;  %v1427_v32 = vrot.slane %v1425_v62, 4  ;;  %v1430_v16 = vrot.slane %v1428_v35, 5  ;;  %v1413_v5 = vsel %vm14423_vm3, %v1408_v56, %v1412_v10  ;;  %v353_v40 = vld [vmem:[%s14405_s6 + $0x1d8] sm:$0xf] }
  0xe7   : > { %v3974_v39 = vsel %vm14826_vm6, %v3972_v28, %v3973_v36  ;;  %v1436_v19 = vrot.slane %v1434_v14, 5  ;;  %v1444_v23 = vshll.u32 %v352_v29, 16  ;;  %v1440_v62 = vrot.slane %v1438_v12, 4  ;;  %v14147_v35 = vld [vmem:[%s14405_s6 + $0xa0] sm:$0xf] }
  0xe8   : > { %v1423_v59 = vsel %vm14423_vm3, %v1418_v53, %v1422_v15  ;;  %v15132_v9 = vcombine.low %v3971_v20, %v3974_v39  ;;  %v1431_v4 = vor.u32 %v1430_v16, %v1427_v32  ;;  %v10595_v55 = vrot.slane %v14147_v35, 9  ;;  %v14148_v10 = vld [vmem:[%s14405_s6 + $0xa4] sm:$0xf]  ;;  %v14149_v15 = vld [vmem:[%s14405_s6 + $0xa8] sm:$0xf] }
  0xe9   : > { %v15135_v21 = vcombine.low %v1413_v5, %v1423_v59  ;;  %v1446_v30 = vrot.slane %v1444_v23, 5  ;;  %v3977_v56 = vrot.slane %v14148_v10, 5  ;;  %v1441_v28 = vor.u32 %v1440_v62, %v1436_v19 }
  0xea   : > { %18472 = vst [vmem:[#allocation58_spill] sm:$0xff] %v15132_v9  ;;  %12475 = vmatmul.mubr.msk.bf16.gmra.mrb[24].mxu0 %vm2029_vm2, %v15132_v9  ;;  %v1432_v36 = vrot.slane %v1431_v4, 4  ;;  %v3980_v20 = vrot.slane %v14149_v15, 5  ;;  %v1448_v14 = vshrl.u32 %v352_v29, 16  ;;  %v1454_v16 = vshll.u32 %v353_v40, 16 }
  0xeb   : > { %18473 = vst [vmem:[#allocation59_spill] sm:$0xff] %v15135_v21  ;;  %11879 = vmatmul.mubr.msk.bf16.gmra.mrb[88].mxu1 %vm2029_vm2, %v15135_v21  ;;  %v3978_v53 = vsel %vm14826_vm6, %v10595_v55, %v3977_v56  ;;  %v3979_v32 = vrot.slane %v3977_v56, 4  ;;  %v1458_v12 = vshrl.u32 %v353_v40, 16  ;;  %v1442_v39 = vrot.slane %v1441_v28, 4  ;;  %v355_v4 = vld [vmem:[%s14405_s6 + $0x1e0] sm:$0xf] }
  0xec   : > { %v1437_v5 = vsel %vm14423_vm3, %v1432_v36, %v1436_v19  ;;  %v1450_v23 = vrot.slane %v1448_v14, 4  ;;  %v1464_v59 = vshll.u32 %v354_v63, 16  ;;  %v1456_v62 = vrot.slane %v1454_v16, 5  ;;  %v356_v55 = vld [vmem:[%s14405_s6 + $0x1e4] sm:$0xf] }
  0xed   : > { %v3981_v29 = vsel %vm14826_vm6, %v3979_v32, %v3980_v20  ;;  %v1460_v35 = vrot.slane %v1458_v12, 4  ;;  %v3982_v10 = vrot.slane %v3980_v20, 4  ;;  %v1447_v40 = vsel %vm14423_vm3, %v1442_v39, %v1446_v30  ;;  %v14150_v63 = vld [vmem:[%s14405_s6 + $0xac] sm:$0xf]  ;;  %v14151_v21 = vld [vmem:[%s14405_s6 + $0xb0] sm:$0x1] }
  0xee   : > { %v15155_v56 = vcombine.low %v3978_v53, %v3981_v29  ;;  %v1451_v19 = vor.u32 %v1450_v23, %v1446_v30  ;;  %v1466_v36 = vrot.slane %v1464_v59, 5  ;;  %v15157_v28 = vcombine.low %v1437_v5, %v1447_v40  ;;  %v357_v20 = vld [vmem:[%s14405_s6 + $0x1e8] sm:$0xf]  ;;  %v15524_v9 = vld [vmem:[%s14405_s6 + $0x12c] sm:$0xf] }
  0xef   : > { %v1461_v15 = vor.u32 %v1460_v35, %v1456_v62  ;;  %v3983_v14 = vrot.slane %v14150_v63, 5  ;;  %v3986_v41 = vrot.slane %v14151_v21, 5  ;;  %v1469_v16 = vshrl.u32 %v355_v4, 16 }
  0xf0   : > { %18474 = vst [vmem:[#allocation60_spill] sm:$0xff] %v15155_v56  ;;  %18475 = vst [vmem:[#allocation61_spill] sm:$0xff] %v15157_v28  ;;  %12478 = vmatprep.mubr.msk.bf16.mxu0 %vm2029_vm2, %v15155_v56  ;;  %v1452_v32 = vrot.slane %v1451_v19, 4  ;;  %v1472_v12 = vshll.u32 %v355_v4, 16  ;;  %v1478_v39 = vshll.u32 %v356_v55, 16  ;;  %11882 = vmatprep.mubr.msk.bf16.mxu1 %vm2029_vm2, %v15157_v28  ;;  %v1482_v21 = vshrl.u32 %v356_v55, 16 }
  0xf1   : > { %v1462_v30 = vrot.slane %v1461_v15, 4  ;;  %v3984_v53 = vsel %vm14826_vm6, %v3982_v10, %v3983_v14  ;;  %v3985_v5 = vrot.slane %v3983_v14, 4  ;;  %v1471_v59 = vrot.slane %v1469_v16, 4  ;;  %v358_v10 = vld [vmem:[%s14405_s6 + $0x1ec] sm:$0xf] }
  0xf2   : > { %v1457_v23 = vsel %vm14423_vm3, %v1452_v32, %v1456_v62  ;;  %v1474_v29 = vrot.slane %v1472_v12, 5  ;;  %v1480_v35 = vrot.slane %v1478_v39, 5  ;;  %v1484_v19 = vrot.slane %v1482_v21, 4  ;;  %v14152_v62 = vld [vmem:[%s14405_s6 + $0xb4] sm:$0xf] }
  0xf3   : > { %v1467_v4 = vsel %vm14423_vm3, %v1462_v30, %v1466_v36  ;;  %v3987_v40 = vsel %vm14826_vm6, %v3985_v5, %v3986_v41  ;;  %v1488_v15 = vshll.u32 %v357_v20, 16  ;;  %v10596_v32 = vrot.slane %v14152_v62, 9  ;;  %v359_v16 = vld [vmem:[%s14405_s6 + $0x1f0] sm:$0x1]  ;;  %v14153_v28 = vld [vmem:[%s14405_s6 + $0xb8] sm:$0xf] }
  0xf4   : > { %v15175_v63 = vcombine.low %v1457_v23, %v1467_v4  ;;  %v15177_v55 = vcombine.low %v3984_v53, %v3987_v40  ;;  %v1475_v14 = vor.u32 %v1474_v29, %v1471_v59  ;;  %v1485_v12 = vor.u32 %v1484_v19, %v1480_v35  ;;  %v360_v19 = vld [vmem:[%s14405_s6 + $0x1f4] sm:$0xf] }
  0xf5   : > { %v1490_v39 = vrot.slane %v1488_v15, 5  ;;  %v3990_v2 = vrot.slane %v14153_v28, 5  ;;  %v3993_v36 = vrot.slane %v14154_v43, 5  ;;  %v1492_v30 = vshrl.u32 %v357_v20, 16 }
  0xf6   : > { %18476 = vst [vmem:[#allocation62_spill] sm:$0xff] %v15175_v63  ;;  %18477 = vst [vmem:[#allocation63_spill] sm:$0xff] %v15177_v55  ;;  %11883 = vmatmul.mubr.msk.bf16.gmra.mrb[92].mxu1 %vm2029_vm2, %v15175_v63  ;;  %12479 = vmatmul.mubr.msk.bf16.gmra.mrb[28].mxu0 %vm2029_vm2, %v15177_v55  ;;  %v1476_v41 = vrot.slane %v1475_v14, 4  ;;  %v1498_v53 = vshll.u32 %v358_v10, 16  ;;  %v1502_v5 = vshrl.u32 %v358_v10, 16  ;;  %v1486_v21 = vrot.slane %v1485_v12, 4 }
  0xf7   : > { %v3991_v23 = vsel %vm14826_vm6, %v10596_v32, %v3990_v2  ;;  %v3992_v59 = vrot.slane %v3990_v2, 4  ;;  %v1508_v28 = vshll.u32 %v359_v16, 16  ;;  %v1494_v29 = vrot.slane %v1492_v30, 4  ;;  %v361_v2 = vld [vmem:[%s14405_s6 + $0x1f8] sm:$0xf] }
  0xf8   : > { %v1481_v43 = vsel %vm14423_vm3, %v1476_v41, %v1480_v35  ;;  %v1500_v4 = vrot.slane %v1498_v53, 5  ;;  %v1504_v40 = vrot.slane %v1502_v5, 4  ;;  %v1491_v20 = vsel %vm14423_vm3, %v1486_v21, %v1490_v39  ;;  %v14155_v12 = vld [vmem:[%s14405_s6 + $0xc0] sm:$0xf]  ;;  %v14156_v30 = vld [vmem:[%s14405_s6 + $0xc4] sm:$0x1] }
  0xf9   : > { %v3994_v15 = vsel %vm14826_vm6, %v3992_v59, %v3993_v36  ;;  %v1510_v10 = vrot.slane %v1508_v28, 5  ;;  %v3995_v14 = vrot.slane %v3993_v36, 4  ;;  %v15197_v62 = vcombine.low %v1481_v43, %v1491_v20  ;;  %v362_v59 = vld [vmem:[%s14405_s6 + $0x1fc] sm:$0xf] }
  0xfa   : > { %v15199_v32 = vcombine.low %v3991_v23, %v3994_v15  ;;  %v1495_v35 = vor.u32 %v1494_v29, %v1490_v39  ;;  %v1505_v16 = vor.u32 %v1504_v40, %v1500_v4  ;;  %v3996_v41 = vrot.slane %v14155_v12, 5 }
  0xfb   : > { %18478 = vst [vmem:[#allocation64_spill] sm:$0xff] %v15197_v62  ;;  %v3999_v53 = vrot.slane %v14156_v30, 5  ;;  %v1513_v5 = vshrl.u32 %v360_v19, 16  ;;  %v1516_v63 = vshll.u32 %v360_v19, 16  ;;  %11886 = vmatprep.mubr.msk.bf16.mxu1 %vm2029_vm2, %v15197_v62  ;;  %v1522_v23 = vshll.u32 %v361_v2, 16 }
  0xfc   : > { %18479 = vst [vmem:[#allocation65_spill] sm:$0xff] %v15199_v32  ;;  %12482 = vmatprep.mubr.msk.bf16.mxu0 %vm2029_vm2, %v15199_v32  ;;  %v1496_v36 = vrot.slane %v1495_v35, 4  ;;  %v1506_v21 = vrot.slane %v1505_v16, 4  ;;  %v1526_v28 = vshrl.u32 %v361_v2, 16  ;;  %v3997_v39 = vsel %vm14826_vm6, %v3995_v14, %v3996_v41  ;;  %v15501_v32 = vld [vmem:[%s14405_s6 + $0x124] sm:$0xf] }
  0xfd   : > { %v3998_v43 = vrot.slane %v3996_v41, 4  ;;  %v1515_v29 = vrot.slane %v1513_v5, 4  ;;  %v1518_v40 = vrot.slane %v1516_v63, 5  ;;  %v1524_v15 = vrot.slane %v1522_v23, 5  ;;  %v363_v41 = vld [vmem:[%s14405_s6 + $0x200] sm:$0xf] }
  0xfe   : > { %v1501_v19 = vsel %vm14423_vm3, %v1496_v36, %v1500_v4  ;;  %v1511_v20 = vsel %vm14423_vm3, %v1506_v21, %v1510_v10  ;;  %v1528_v35 = vrot.slane %v1526_v28, 4  ;;  %v1532_v12 = vshll.u32 %v362_v59, 16  ;;  %v14157_v5 = vld [vmem:[%s14405_s6 + $0xc8] sm:$0xf]  ;;  %v14158_v4 = vld [vmem:[%s14405_s6 + $0xcc] sm:$0xf] }
  0xff   : > { %v15214_v16 = vcombine.low %v1501_v19, %v1511_v20  ;;  %v4000_v2 = vsel %vm14826_vm6, %v3998_v43, %v3999_v53  ;;  %v1519_v14 = vor.u32 %v1518_v40, %v1515_v29  ;;  %v10597_v62 = vrot.slane %v14157_v5, 9  ;;  %v14159_v23 = vld [vmem:[%s14405_s6 + $0xd0] sm:$0xf] }
 0x100   : > { %v15219_v30 = vcombine.low %v3997_v39, %v4000_v2  ;;  %v1529_v63 = vor.u32 %v1528_v35, %v1524_v15  ;;  %v4003_v36 = vrot.slane %v14158_v4, 5  ;;  %v1534_v21 = vrot.slane %v1532_v12, 5 }
 0x101   : > { %18480 = vst [vmem:[#allocation66_spill] sm:$0xff] %v15214_v16  ;;  %11887 = vmatmul.mubr.msk.bf16.gmra.mrb[96].mxu1 %vm2029_vm2, %v15214_v16  ;;  %v1520_v10 = vrot.slane %v1519_v14, 4  ;;  %v4006_v28 = vrot.slane %v14159_v23, 5  ;;  %v1536_v53 = vshrl.u32 %v362_v59, 16  ;;  %v1542_v40 = vshll.u32 %v363_v41, 16 }
 0x102   : > { %18481 = vst [vmem:[#allocation67_spill] sm:$0xff] %v15219_v30  ;;  %12483 = vmatmul.mubr.msk.bf16.gmra.mrb[32].mxu0 %vm2029_vm2, %v15219_v30  ;;  %v1530_v39 = vrot.slane %v1529_v63, 4  ;;  %v4004_v43 = vsel %vm14826_vm6, %v10597_v62, %v4003_v36  ;;  %v4005_v29 = vrot.slane %v4003_v36, 4  ;;  %v1546_v35 = vshrl.u32 %v363_v41, 16  ;;  %v365_v14 = vld [vmem:[%s14405_s6 + $0x208] sm:$0xf] }
 0x103   : > { %v1525_v19 = vsel %vm14423_vm3, %v1520_v10, %v1524_v15  ;;  %v1538_v20 = vrot.slane %v1536_v53, 4  ;;  %v1552_v2 = vshll.u32 %v364_v17, 16  ;;  %v1544_v63 = vrot.slane %v1542_v40, 5  ;;  %v366_v62 = vld [vmem:[%s14405_s6 + $0x20c] sm:$0xf]  ;;  %v18707_v26 = vld [vmem:[#allocation65_spill] sm:$0xff] }
 0x104   : > { %v1535_v59 = vsel %vm14423_vm3, %v1530_v39, %v1534_v21  ;;  %v4007_v12 = vsel %vm14826_vm6, %v4005_v29, %v4006_v28  ;;  %v4008_v5 = vrot.slane %v4006_v28, 4  ;;  %v1548_v10 = vrot.slane %v1546_v35, 4  ;;  %v14160_v41 = vld [vmem:[%s14405_s6 + $0xd4] sm:$0xf]  ;;  %v14161_v53 = vld [vmem:[%s14405_s6 + $0xd8] sm:$0x1] }
 0x105   : > { %v15239_v4 = vcombine.low %v1525_v19, %v1535_v59  ;;  %v15241_v36 = vcombine.low %v4004_v43, %v4007_v12  ;;  %v1539_v15 = vor.u32 %v1538_v20, %v1534_v21  ;;  %v1554_v23 = vrot.slane %v1552_v2, 5  ;;  %v367_v29 = vld [vmem:[%s14405_s6 + $0x210] sm:$0xf] }
 0x106   : > { %v4009_v17 = vrot.slane %v14160_v41, 5  ;;  %v4012_v16 = vrot.slane %v14161_v53, 5  ;;  %v1557_v50 = vshrl.u32 %v365_v14, 16  ;;  %v1549_v39 = vor.u32 %v1548_v10, %v1544_v63  ;;  %v14162_v53 = vld [vmem:[%s14405_s6 + $0xdc] sm:$0xf] }
 0x107   : > { %18482 = vst [vmem:[#allocation68_spill] sm:$0xff] %v15239_v4  ;;  %18483 = vst [vmem:[#allocation69_spill] sm:$0xff] %v15241_v36  ;;  %11890 = vmatprep.mubr.msk.bf16.mxu1 %vm2029_vm2, %v15239_v4  ;;  %12486 = vmatprep.mubr.msk.bf16.mxu0 %vm2029_vm2, %v15241_v36  ;;  %v1540_v28 = vrot.slane %v1539_v15, 4  ;;  %v1560_v43 = vshll.u32 %v365_v14, 16  ;;  %v1566_v40 = vshll.u32 %v366_v62, 16  ;;  %v1570_v35 = vshrl.u32 %v366_v62, 16 }
 0x108   : > { %v4010_v21 = vsel %vm14826_vm6, %v4008_v5, %v4009_v17  ;;  %v4011_v19 = vrot.slane %v4009_v17, 4  ;;  %v1559_v20 = vrot.slane %v1557_v50, 4  ;;  %v1550_v59 = vrot.slane %v1549_v39, 4  ;;  %v14163_v4 = vld [vmem:[%s14405_s6 + $0xe0] sm:$0xf] }
 0x109   : > { %v1545_v2 = vsel %vm14423_vm3, %v1540_v28, %v1544_v63  ;;  %v1562_v12 = vrot.slane %v1560_v43, 5  ;;  %v1568_v15 = vrot.slane %v1566_v40, 5  ;;  %v1572_v10 = vrot.slane %v1570_v35, 4  ;;  %v15263_v63 = vld [vmem:[%s14405_s6 + $0x214] sm:$0xf] }
 0x10a   : > { %v4013_v14 = vsel %vm14826_vm6, %v4011_v19, %v4012_v16  ;;  %v1576_v41 = vshll.u32 %v367_v29, 16  ;;  %v10598_v5 = vrot.slane %v14162_v53, 9  ;;  %v1555_v50 = vsel %vm14423_vm3, %v1550_v59, %v1554_v23  ;;  %v369_v28 = vld [vmem:[%s14405_s6 + $0x218] sm:$0x1]  ;;  %v14164_v16 = vld [vmem:[%s14405_s6 + $0xe4] sm:$0xf] }
 0x10b   : > { %v15259_v17 = vcombine.low %v4010_v21, %v4013_v14  ;;  %v1563_v62 = vor.u32 %v1562_v12, %v1559_v20  ;;  %v4016_v8 = vrot.slane %v14163_v4, 5  ;;  %v15266_v39 = vcombine.low %v1545_v2, %v1555_v50 }
 0x10c   : > { %v1573_v43 = vor.u32 %v1572_v10, %v1568_v15  ;;  %v1578_v40 = vrot.slane %v1576_v41, 5  ;;  %v4019_v19 = vrot.slane %v14164_v16, 5  ;;  %v1580_v4 = vshrl.u32 %v367_v29, 16  ;;  %v15282_v29 = vld [vmem:[%s14405_s6 + $0x21c] sm:$0xf] }
 0x10d   : > { %18484 = vst [vmem:[#allocation70_spill] sm:$0xff] %v15259_v17  ;;  %18485 = vst [vmem:[#allocation71_spill] sm:$0xff] %v15266_v39  ;;  %12487 = vmatmul.mubr.msk.bf16.gmra.mrb[36].mxu0 %vm2029_vm2, %v15259_v17  ;;  %v1564_v35 = vrot.slane %v1563_v62, 4  ;;  %v4017_v23 = vsel %vm14826_vm6, %v10598_v5, %v4016_v8  ;;  %v4018_v21 = vrot.slane %v4016_v8, 4  ;;  %11891 = vmatmul.mubr.msk.bf16.gmra.mrb[100].mxu1 %vm2029_vm2, %v15266_v39  ;;  %v1586_v2 = vshll.u32 %v15263_v63, 16 }
 0x10e   : > { %v1574_v20 = vrot.slane %v1573_v43, 4  ;;  %v1590_v59 = vshrl.u32 %v15263_v63, 16  ;;  %v1596_v12 = vshll.u32 %v369_v28, 16  ;;  %v1582_v8 = vrot.slane %v1580_v4, 4  ;;  %v15289_v28 = vld [vmem:[%s14405_s6 + $0x220] sm:$0xf] }
 0x10f   : > { %v1569_v14 = vsel %vm14423_vm3, %v1564_v35, %v1568_v15  ;;  %v4020_v10 = vsel %vm14826_vm6, %v4018_v21, %v4019_v19  ;;  %v4021_v41 = vrot.slane %v4019_v19, 4  ;;  %v1588_v50 = vrot.slane %v1586_v2, 5  ;;  %v14165_v35 = vld [vmem:[%s14405_s6 + $0xe8] sm:$0xf]  ;;  %v14166_v4 = vld [vmem:[%s14405_s6 + $0xec] sm:$0x1] }
 0x110   : > { %v1579_v53 = vsel %vm14423_vm3, %v1574_v20, %v1578_v40  ;;  %v15286_v5 = vcombine.low %v4017_v23, %v4020_v10  ;;  %v1592_v62 = vrot.slane %v1590_v59, 4  ;;  %v1583_v15 = vor.u32 %v1582_v8, %v1578_v40  ;;  %v15494_v17 = vld [vmem:[%s14405_s6 + $0x25c] sm:$0xf] }
 0x111   : > { %v15291_v43 = vcombine.low %v1569_v14, %v1579_v53  ;;  %v1598_v16 = vrot.slane %v1596_v12, 5  ;;  %v4022_v21 = vrot.slane %v14165_v35, 5  ;;  %v4025_v39 = vrot.slane %v14166_v4, 5 }
 0x112   : > { %18486 = vst [vmem:[#allocation72_spill] sm:$0xff] %v15286_v5  ;;  %12490 = vmatprep.mubr.msk.bf16.mxu0 %vm2029_vm2, %v15286_v5  ;;  %v1593_v19 = vor.u32 %v1592_v62, %v1588_v50  ;;  %v1601_v23 = vshrl.u32 %v15282_v29, 16  ;;  %v1604_v20 = vshll.u32 %v15282_v29, 16  ;;  %v1584_v2 = vrot.slane %v1583_v15, 4  ;;  %v15487_v5 = vld [vmem:[%s14405_s6 + $0x258] sm:$0xf] }
 0x113   : > { %18487 = vst [vmem:[#allocation73_spill] sm:$0xff] %v15291_v43  ;;  %11894 = vmatprep.mubr.msk.bf16.mxu1 %vm2029_vm2, %v15291_v43  ;;  %v4023_v40 = vsel %vm14826_vm6, %v4021_v41, %v4022_v21  ;;  %v4024_v59 = vrot.slane %v4022_v21, 4  ;;  %v1610_v12 = vshll.u32 %v15289_v28, 16  ;;  %v1614_v53 = vshrl.u32 %v15289_v28, 16 }
 0x114   : > { %v1594_v14 = vrot.slane %v1593_v19, 4  ;;  %v1603_v10 = vrot.slane %v1601_v23, 4  ;;  %v1606_v8 = vrot.slane %v1604_v20, 5  ;;  %v1589_v62 = vsel %vm14423_vm3, %v1584_v2, %v1588_v50  ;;  %v15318_v20 = vld [vmem:[%s14405_s6 + $0x228] sm:$0xf] }
 0x115   : > { %v4026_v15 = vsel %vm14826_vm6, %v4024_v59, %v4025_v39  ;;  %v1612_v35 = vrot.slane %v1610_v12, 5  ;;  %v1620_v41 = vshll.u32 %v15298_v0, 16  ;;  %v1616_v23 = vrot.slane %v1614_v53, 4  ;;  %v14167_v50 = vld [vmem:[%s14405_s6 + $0xf0] sm:$0xf] }
 0x116   : > { %v1599_v21 = vsel %vm14423_vm3, %v1594_v14, %v1598_v16  ;;  %v15315_v19 = vcombine.low %v4023_v40, %v4026_v15  ;;  %v1607_v4 = vor.u32 %v1606_v8, %v1603_v10  ;;  %v10599_v2 = vrot.slane %v14167_v50, 9  ;;  %v15325_v59 = vld [vmem:[%s14405_s6 + $0x22c] sm:$0x1]  ;;  %v14169_v12 = vld [vmem:[%s14405_s6 + $0xf8] sm:$0xf] }
 0x117   : > { %v15320_v43 = vcombine.low %v1589_v62, %v1599_v21  ;;  %v1622_v18 = vrot.slane %v1620_v41, 5  ;;  %v4029_v39 = vrot.slane %v14168_v61, 5  ;;  %v1617_v40 = vor.u32 %v1616_v23, %v1612_v35  ;;  %v15341_v23 = vld [vmem:[%s14405_s6 + $0x230] sm:$0xf] }
 0x118   : > { %18488 = vst [vmem:[#allocation74_spill] sm:$0xff] %v15315_v19  ;;  %12491 = vmatmul.mubr.msk.bf16.gmra.mrb[40].mxu0 %vm2029_vm2, %v15315_v19  ;;  %v1608_v16 = vrot.slane %v1607_v4, 4  ;;  %v4032_v14 = vrot.slane %v14169_v12, 5  ;;  %v1624_v10 = vshrl.u32 %v15298_v0, 16  ;;  %v1630_v53 = vshll.u32 %v15318_v20, 16 }
 0x119   : > { %18489 = vst [vmem:[#allocation75_spill] sm:$0xff] %v15320_v43  ;;  %11895 = vmatmul.mubr.msk.bf16.gmra.mrb[104].mxu1 %vm2029_vm2, %v15320_v43  ;;  %v4030_v8 = vsel %vm14826_vm6, %v10599_v2, %v4029_v39  ;;  %v4031_v61 = vrot.slane %v4029_v39, 4  ;;  %v1634_v62 = vshrl.u32 %v15318_v20, 16  ;;  %v1618_v41 = vrot.slane %v1617_v40, 4  ;;  %v15346_v43 = vld [vmem:[%s14405_s6 + $0x234] sm:$0xf] }
 0x11a   : > { %v1613_v15 = vsel %vm14423_vm3, %v1608_v16, %v1612_v35  ;;  %v1626_v21 = vrot.slane %v1624_v10, 4  ;;  %v1640_v4 = vshll.u32 %v15325_v59, 16  ;;  %v1632_v2 = vrot.slane %v1630_v53, 5  ;;  %v14171_v53 = vld [vmem:[%s14405_s6 + $0x100] sm:$0x1] }
 0x11b   : > { %v4033_v50 = vsel %vm14826_vm6, %v4031_v61, %v4032_v14  ;;  %v1636_v39 = vrot.slane %v1634_v62, 4  ;;  %v4034_v12 = vrot.slane %v4032_v14, 4  ;;  %v1623_v35 = vsel %vm14423_vm3, %v1618_v41, %v1622_v18  ;;  %v15362_v62 = vld [vmem:[%s14405_s6 + $0x238] sm:$0xf] }
 0x11c   : > { %v15350_v16 = vcombine.low %v4030_v8, %v4033_v50  ;;  %v1627_v40 = vor.u32 %v1626_v21, %v1622_v18  ;;  %v1642_v10 = vrot.slane %v1640_v4, 5  ;;  %v15352_v38 = vcombine.low %v1613_v15, %v1623_v35 }
 0x11d   : > { %v1637_v11 = vor.u32 %v1636_v39, %v1632_v2  ;;  %v4035_v61 = vrot.slane %v15355_v52, 5  ;;  %v4038_v34 = vrot.slane %v14171_v53, 5  ;;  %v1645_v8 = vshrl.u32 %v15341_v23, 16 }
 0x11e   : > { %18490 = vst [vmem:[#allocation76_spill] sm:$0xff] %v15350_v16  ;;  %18491 = vst [vmem:[#allocation77_spill] sm:$0xff] %v15352_v38  ;;  %12494 = vmatprep.mubr.msk.bf16.mxu0 %vm2029_vm2, %v15350_v16  ;;  %v1628_v14 = vrot.slane %v1627_v40, 4  ;;  %v1648_v18 = vshll.u32 %v15341_v23, 16  ;;  %v1654_v15 = vshll.u32 %v15346_v43, 16  ;;  %11898 = vmatprep.mubr.msk.bf16.mxu1 %vm2029_vm2, %v15352_v38  ;;  %v1658_v50 = vshrl.u32 %v15346_v43, 16 }
 0x11f   : > { %v1638_v41 = vrot.slane %v1637_v11, 4  ;;  %v4036_v21 = vsel %vm14826_vm6, %v4034_v12, %v4035_v61  ;;  %v4037_v4 = vrot.slane %v4035_v61, 4  ;;  %v1647_v35 = vrot.slane %v1645_v8, 4  ;;  %v15380_v61 = vld [vmem:[%s14405_s6 + $0x23c] sm:$0xf] }
 0x120   : > { %v1633_v39 = vsel %vm14423_vm3, %v1628_v14, %v1632_v2  ;;  %v1650_v40 = vrot.slane %v1648_v18, 5  ;;  %v1656_v53 = vrot.slane %v1654_v15, 5  ;;  %v1660_v3 = vrot.slane %v1658_v50, 4  ;;  %v15387_v14 = vld [vmem:[%s14405_s6 + $0x104] sm:$0xf] }
 0x121   : > { %v1643_v38 = vsel %vm14423_vm3, %v1638_v41, %v1642_v10  ;;  %v4039_v11 = vsel %vm14826_vm6, %v4037_v4, %v4038_v34  ;;  %v1664_v12 = vshll.u32 %v15362_v62, 16  ;;  %v10600_v8 = vrot.slane %v15387_v14, 9  ;;  %v15391_v18 = vld [vmem:[%s14405_s6 + $0x240] sm:$0x1]  ;;  %v15394_v41 = vld [vmem:[%s14405_s6 + $0x108] sm:$0xf] }
 0x122   : > { %v15382_v51 = vcombine.low %v1633_v39, %v1643_v38  ;;  %v15384_v27 = vcombine.low %v4036_v21, %v4039_v11  ;;  %v1651_v2 = vor.u32 %v1650_v40, %v1647_v35  ;;  %v1661_v10 = vor.u32 %v1660_v3, %v1656_v53  ;;  %v15398_v4 = vld [vmem:[%s14405_s6 + $0x10c] sm:$0xf] }
 0x123   : > { %v1666_v15 = vrot.slane %v1664_v12, 5  ;;  %v4042_v34 = vrot.slane %v15394_v41, 5  ;;  %v4045_v38 = vrot.slane %v15398_v4, 5  ;;  %v1668_v50 = vshrl.u32 %v15362_v62, 16 }
 0x124   : > { %18492 = vst [vmem:[#allocation78_spill] sm:$0xff] %v15382_v51  ;;  %18493 = vst [vmem:[#allocation79_spill] sm:$0xff] %v15384_v27  ;;  %11899 = vmatmul.mubr.msk.bf16.gmra.mrb[108].mxu1 %vm2029_vm2, %v15382_v51  ;;  %12495 = vmatmul.mubr.msk.bf16.gmra.mrb[44].mxu0 %vm2029_vm2, %v15384_v27  ;;  %v1652_v21 = vrot.slane %v1651_v2, 4  ;;  %v1674_v3 = vshll.u32 %v15380_v61, 16  ;;  %v1678_v39 = vshrl.u32 %v15380_v61, 16  ;;  %v1662_v35 = vrot.slane %v1661_v10, 4 }
 0x125   : > { %v4043_v40 = vsel %vm14826_vm6, %v10600_v8, %v4042_v34  ;;  %v4044_v11 = vrot.slane %v4042_v34, 4  ;;  %v1684_v12 = vshll.u32 %v15391_v18, 16  ;;  %v1670_v2 = vrot.slane %v1668_v50, 4 }
 0x126   : > { %v1657_v51 = vsel %vm14423_vm3, %v1652_v21, %v1656_v53  ;;  %v1676_v7 = vrot.slane %v1674_v3, 5  ;;  %v1680_v37 = vrot.slane %v1678_v39, 4  ;;  %v1667_v57 = vsel %vm14423_vm3, %v1662_v35, %v1666_v15  ;;  %v15428_v3 = vld [vmem:[%s14405_s6 + $0x110] sm:$0xf] }
 0x127   : > { %v4046_v10 = vsel %vm14826_vm6, %v4044_v11, %v4045_v38  ;;  %v1686_v8 = vrot.slane %v1684_v12, 5  ;;  %v4047_v34 = vrot.slane %v4045_v38, 4  ;;  %v15423_v24 = vcombine.low %v1657_v51, %v1667_v57 }
 0x128   : > { %v15425_v53 = vcombine.low %v4043_v40, %v4046_v10  ;;  %v1671_v21 = vor.u32 %v1670_v2, %v1666_v15  ;;  %v1681_v50 = vor.u32 %v1680_v37, %v1676_v7  ;;  %v4048_v39 = vrot.slane %v15428_v3, 5  ;;  %v15439_v37 = vld [vmem:[%s14405_s6 + $0x24c] sm:$0xf] }
 0x129   : > { %18494 = vst [vmem:[#allocation80_spill] sm:$0xff] %v15423_v24  ;;  %v4051_v35 = vrot.slane %v14176_v1, 5  ;;  %v1689_v27 = vshrl.u32 %v15414_v33, 16  ;;  %v1692_v11 = vshll.u32 %v15414_v33, 16  ;;  %11902 = vmatprep.mubr.msk.bf16.mxu1 %vm2029_vm2, %v15423_v24  ;;  %v1698_v15 = vshll.u32 %v15421_v44, 16 }
 0x12a   : > { %18495 = vst [vmem:[#allocation81_spill] sm:$0xff] %v15425_v53  ;;  %12498 = vmatprep.mubr.msk.bf16.mxu0 %vm2029_vm2, %v15425_v53  ;;  %v1672_v57 = vrot.slane %v1671_v21, 4  ;;  %v1682_v51 = vrot.slane %v1681_v50, 4  ;;  %v1702_v38 = vshrl.u32 %v15421_v44, 16  ;;  %v4049_v1 = vsel %vm14826_vm6, %v4047_v34, %v4048_v39 }
 0x12b   : > { %v4050_v40 = vrot.slane %v4048_v39, 4  ;;  %v1691_v12 = vrot.slane %v1689_v27, 4  ;;  %v1694_v2 = vrot.slane %v1692_v11, 5  ;;  %v1700_v50 = vrot.slane %v1698_v15, 5  ;;  %v15455_v27 = vld [vmem:[%s14405_s6 + $0x250] sm:$0xf] }
 0x12c   : > { %v1677_v10 = vsel %vm14423_vm3, %v1672_v57, %v1676_v7  ;;  %v1687_v21 = vsel %vm14423_vm3, %v1682_v51, %v1686_v8  ;;  %v1704_v24 = vrot.slane %v1702_v38, 4  ;;  %v1708_v39 = vshll.u32 %v15439_v37, 16  ;;  %v15460_v7 = vld [vmem:[%s14405_s6 + $0x118] sm:$0xf]  ;;  %v15464_v57 = vld [vmem:[%s14405_s6 + $0x11c] sm:$0xf] }
 0x12d   : > { %v15449_v53 = vcombine.low %v1677_v10, %v1687_v21  ;;  %v4052_v16 = vsel %vm14826_vm6, %v4050_v40, %v4051_v35  ;;  %v1695_v34 = vor.u32 %v1694_v2, %v1691_v12  ;;  %v10601_v8 = vrot.slane %v15460_v7, 9  ;;  %v15468_v15 = vld [vmem:[%s14405_s6 + $0x254] sm:$0x1]  ;;  %v15473_v40 = vld [vmem:[%s14405_s6 + $0x120] sm:$0xf] }
 0x12e   : > { %v15457_v11 = vcombine.low %v4049_v1, %v4052_v16  ;;  %v1705_v19 = vor.u32 %v1704_v24, %v1700_v50  ;;  %v4055_v51 = vrot.slane %v15464_v57, 5  ;;  %v1710_v38 = vrot.slane %v1708_v39, 5 }
 0x12f   : > { %18496 = vst [vmem:[#allocation82_spill] sm:$0xff] %v15449_v53  ;;  %11903 = vmatmul.mubr.msk.bf16.gmra.mrb[112].mxu1 %vm2029_vm2, %v15449_v53  ;;  %v1696_v35 = vrot.slane %v1695_v34, 4  ;;  %v4058_v24 = vrot.slane %v15473_v40, 5  ;;  %v1712_v16 = vshrl.u32 %v15439_v37, 16  ;;  %v1718_v10 = vshll.u32 %v15455_v27, 16 }
 0x130   : > { %18497 = vst [vmem:[#allocation83_spill] sm:$0xff] %v15457_v11  ;;  %12499 = vmatmul.mubr.msk.bf16.gmra.mrb[48].mxu0 %vm2029_vm2, %v15457_v11  ;;  %v1706_v1 = vrot.slane %v1705_v19, 4  ;;  %v4056_v12 = vsel %vm14826_vm6, %v10601_v8, %v4055_v51  ;;  %v4057_v2 = vrot.slane %v4055_v51, 4  ;;  %v1722_v39 = vshrl.u32 %v15455_v27, 16 }
 0x131   : > { %v1701_v21 = vsel %vm14423_vm3, %v1696_v35, %v1700_v50  ;;  %v1714_v34 = vrot.slane %v1712_v16, 4  ;;  %v1728_v53 = vshll.u32 %v15468_v15, 16  ;;  %v1720_v51 = vrot.slane %v1718_v10, 5 }
 0x132   : > { %v1711_v19 = vsel %vm14423_vm3, %v1706_v1, %v1710_v38  ;;  %v4059_v8 = vsel %vm14826_vm6, %v4057_v2, %v4058_v24  ;;  %v4060_v11 = vrot.slane %v4058_v24, 4  ;;  %v1724_v36 = vrot.slane %v1722_v39, 4  ;;  %v14181_v1 = vld [vmem:[%s14405_s6 + $0x128] sm:$0x1] }
 0x133   : > { %v15496_v50 = vcombine.low %v1701_v21, %v1711_v19  ;;  %v15498_v35 = vcombine.low %v4056_v12, %v4059_v8  ;;  %v1715_v16 = vor.u32 %v1714_v34, %v1710_v38  ;;  %v1730_v30 = vrot.slane %v1728_v53, 5  ;;  %v15511_v38 = vld [vmem:[%s14405_s6 + $0x260] sm:$0xf] }
 0x134   : > { %v4061_v55 = vrot.slane %v15501_v32, 5  ;;  %v4064_v56 = vrot.slane %v14181_v1, 5  ;;  %v1733_v2 = vshrl.u32 %v15487_v5, 16  ;;  %v1725_v12 = vor.u32 %v1724_v36, %v1720_v51 }
 0x135   : > { %18498 = vst [vmem:[#allocation84_spill] sm:$0xff] %v15496_v50  ;;  %18499 = vst [vmem:[#allocation85_spill] sm:$0xff] %v15498_v35  ;;  %11906 = vmatprep.mubr.msk.bf16.mxu1 %vm2029_vm2, %v15496_v50  ;;  %12502 = vmatprep.mubr.msk.bf16.mxu0 %vm2029_vm2, %v15498_v35  ;;  %v1716_v24 = vrot.slane %v1715_v16, 4  ;;  %v1736_v53 = vshll.u32 %v15487_v5, 16  ;;  %v1742_v10 = vshll.u32 %v15494_v17, 16  ;;  %v1746_v19 = vshrl.u32 %v15494_v17, 16 }
 0x136   : > { %v4062_v21 = vsel %vm14826_vm6, %v4060_v11, %v4061_v55  ;;  %v4063_v34 = vrot.slane %v4061_v55, 4  ;;  %v1735_v39 = vrot.slane %v1733_v2, 4  ;;  %v1726_v36 = vrot.slane %v1725_v12, 4 }
 0x137   : > { %v1721_v8 = vsel %vm14423_vm3, %v1716_v24, %v1720_v51  ;;  %v1738_v16 = vrot.slane %v1736_v53, 5  ;;  %v1744_v1 = vrot.slane %v1742_v10, 5  ;;  %v1748_v35 = vrot.slane %v1746_v19, 4  ;;  %v15532_v24 = vld [vmem:[%s14405_s6 + $0x130] sm:$0xf] }
 0x138   : > { %v4065_v50 = vsel %vm14826_vm6, %v4063_v34, %v4064_v56  ;;  %v1752_v11 = vshll.u32 %v15511_v38, 16  ;;  %v10602_v55 = vrot.slane %v15524_v9, 9  ;;  %v1731_v2 = vsel %vm14423_vm3, %v1726_v36, %v1730_v30  ;;  %v15536_v53 = vld [vmem:[%s14405_s6 + $0x264] sm:$0xf]  ;;  %v15539_v56 = vld [vmem:[%s14405_s6 + $0x268] sm:$0x1] }
 0x139   : > { %v15529_v13 = vcombine.low %v4062_v21, %v4065_v50  ;;  %v1739_v51 = vor.u32 %v1738_v16, %v1735_v39  ;;  %v4068_v12 = vrot.slane %v15532_v24, 5  ;;  %v15541_v10 = vcombine.low %v1721_v8, %v1731_v2 }
 0x13a   : > { %v1749_v34 = vor.u32 %v1748_v35, %v1744_v1  ;;  %v1754_v19 = vrot.slane %v1752_v11, 5  ;;  %v4071_v30 = vrot.slane %v15544_v47, 5  ;;  %v1756_v36 = vshrl.u32 %v15511_v38, 16 }
 0x13b   : > { %18500 = vst [vmem:[#allocation86_spill] sm:$0xff] %v15529_v13  ;;  %18501 = vst [vmem:[#allocation87_spill] sm:$0xff] %v15541_v10  ;;  %12503 = vmatmul.mubr.msk.bf16.gmra.mrb[52].mxu0 %vm2029_vm2, %v15529_v13  ;;  %v1740_v50 = vrot.slane %v1739_v51, 4  ;;  %v4069_v21 = vsel %vm14826_vm6, %v10602_v55, %v4068_v12  ;;  %v4070_v39 = vrot.slane %v4068_v12, 4  ;;  %11907 = vmatmul.mubr.msk.bf16.gmra.mrb[116].mxu1 %vm2029_vm2, %v15541_v10  ;;  %v1762_v8 = vshll.u32 %v15536_v53, 16 }
 0x13c   : > { %v1750_v35 = vrot.slane %v1749_v34, 4  ;;  %v1766_v16 = vshrl.u32 %v15536_v53, 16  ;;  %v1772_v11 = vshll.u32 %v15539_v56, 16  ;;  %v1758_v51 = vrot.slane %v1756_v36, 4  ;;  %v15562_v13 = vld [vmem:[%s14405_s6 + $0x26c] sm:$0xf] }
 0x13d   : > { %v1745_v2 = vsel %vm14423_vm3, %v1740_v50, %v1744_v1  ;;  %v4072_v55 = vsel %vm14826_vm6, %v4070_v39, %v4071_v30  ;;  %v4073_v12 = vrot.slane %v4071_v30, 4  ;;  %v1764_v46 = vrot.slane %v1762_v8, 5  ;;  %v15574_v39 = vld [vmem:[%s14405_s6 + $0x138] sm:$0xf] }
 0x13e   : > { %v1755_v34 = vsel %vm14423_vm3, %v1750_v35, %v1754_v19  ;;  %v15566_v10 = vcombine.low %v4069_v21, %v4072_v55  ;;  %v1768_v54 = vrot.slane %v1766_v16, 4  ;;  %v1759_v1 = vor.u32 %v1758_v51, %v1754_v19  ;;  %v15581_v21 = vld [vmem:[%s14405_s6 + $0x274] sm:$0xf] }
 0x13f   : > { %v15571_v58 = vcombine.low %v1745_v2, %v1755_v34  ;;  %v1774_v50 = vrot.slane %v1772_v11, 5  ;;  %v4074_v30 = vrot.slane %v15574_v39, 5  ;;  %v4077_v35 = vrot.slane %v14186_v42, 5 }
 0x140   : > { %18502 = vst [vmem:[#allocation88_spill] sm:$0xff] %v15566_v10  ;;  %12506 = vmatprep.mubr.msk.bf16.mxu0 %vm2029_vm2, %v15566_v10  ;;  %v1769_v36 = vor.u32 %v1768_v54, %v1764_v46  ;;  %v1777_v8 = vshrl.u32 %v15562_v13, 16  ;;  %v1780_v16 = vshll.u32 %v15562_v13, 16  ;;  %v1760_v19 = vrot.slane %v1759_v1, 4 }
 0x141   : > { %18503 = vst [vmem:[#allocation89_spill] sm:$0xff] %v15571_v58  ;;  %11910 = vmatprep.mubr.msk.bf16.mxu1 %vm2029_vm2, %v15571_v58  ;;  %v4075_v11 = vsel %vm14826_vm6, %v4073_v12, %v4074_v30  ;;  %v4076_v2 = vrot.slane %v4074_v30, 4  ;;  %v1786_v55 = vshll.u32 %v15569_v48, 16  ;;  %v1790_v34 = vshrl.u32 %v15569_v48, 16 }
 0x142   : > { %v1770_v54 = vrot.slane %v1769_v36, 4  ;;  %v1779_v42 = vrot.slane %v1777_v8, 4  ;;  %v1782_v51 = vrot.slane %v1780_v16, 5  ;;  %v1765_v10 = vsel %vm14423_vm3, %v1760_v19, %v1764_v46  ;;  %v15606_v46 = vld [vmem:[%s14405_s6 + $0x140] sm:$0xf] }
 0x143   : > { %v4078_v1 = vsel %vm14826_vm6, %v4076_v2, %v4077_v35  ;;  %v1788_v58 = vrot.slane %v1786_v55, 5  ;;  %v1796_v12 = vshll.u32 %v15581_v21, 16  ;;  %v1792_v16 = vrot.slane %v1790_v34, 4  ;;  %v15610_v19 = vld [vmem:[%s14405_s6 + $0x144] sm:$0xf] }
 0x144   : > { %v1775_v30 = vsel %vm14423_vm3, %v1770_v54, %v1774_v50  ;;  %v15598_v36 = vcombine.low %v4075_v11, %v4078_v1  ;;  %v1783_v8 = vor.u32 %v1782_v51, %v1779_v42  ;;  %v10603_v35 = vrot.slane %v15606_v46, 9  ;;  %v15614_v55 = vld [vmem:[%s14405_s6 + $0x27c] sm:$0x1]  ;;  %v15619_v54 = vld [vmem:[%s14405_s6 + $0x148] sm:$0xf] }
 0x145   : > { %v15603_v45 = vcombine.low %v1765_v10, %v1775_v30  ;;  %v1798_v6 = vrot.slane %v1796_v12, 5  ;;  %v4081_v2 = vrot.slane %v15610_v19, 5  ;;  %v1793_v11 = vor.u32 %v1792_v16, %v1788_v58  ;;  %18506 = vst [vmem:[#allocation92_spill] sm:$0xff] %v15619_v54 }
 0x146   : > { %18504 = vst [vmem:[#allocation90_spill] sm:$0xff] %v15598_v36  ;;  %12507 = vmatmul.mubr.msk.bf16.gmra.mrb[56].mxu0 %vm2029_vm2, %v15598_v36  ;;  %v1784_v50 = vrot.slane %v1783_v8, 4  ;;  %v4084_v10 = vrot.slane %v15619_v54, 5  ;;  %v1800_v42 = vshrl.u32 %v15581_v21, 16  ;;  %v1806_v1 = vshll.u32 %v15601_v49, 16 }
 0x147   : > { %18505 = vst [vmem:[#allocation91_spill] sm:$0xff] %v15603_v45  ;;  %11911 = vmatmul.mubr.msk.bf16.gmra.mrb[120].mxu1 %vm2029_vm2, %v15603_v45  ;;  %v4082_v51 = vsel %vm14826_vm6, %v10603_v35, %v4081_v2  ;;  %v4083_v34 = vrot.slane %v4081_v2, 4  ;;  %v1810_v12 = vshrl.u32 %v15601_v49, 16  ;;  %v1794_v8 = vrot.slane %v1793_v11, 4  ;;  %v15641_v54 = vld [vmem:[%s14405_s6 + $0x14c] sm:$0xf] }
 0x148   : > { %v1789_v30 = vsel %vm14423_vm3, %v1784_v50, %v1788_v58  ;;  %v1802_v16 = vrot.slane %v1800_v42, 4  ;;  %v1816_v36 = vshll.u32 %v15614_v55, 16  ;;  %v1808_v22 = vrot.slane %v1806_v1, 5  ;;  %18509 = vst [vmem:[#allocation95_spill] sm:$0xff] %v15641_v54  ;;  %v14191_v1 = vld [vmem:[%s14405_s6 + $0x150] sm:$0x1] }
 0x149   : > { %v4085_v45 = vsel %vm14826_vm6, %v4083_v34, %v4084_v10  ;;  %v1812_v35 = vrot.slane %v1810_v12, 4  ;;  %v4086_v2 = vrot.slane %v4084_v10, 4  ;;  %v1799_v25 = vsel %vm14423_vm3, %v1794_v8, %v1798_v6  ;;  %v15648_v8 = vld [vmem:[%s14405_s6] sm:$0xf] }
 0x14a   : > { %v15636_v60 = vcombine.low %v4082_v51, %v4085_v45  ;;  %v1803_v58 = vor.u32 %v1802_v16, %v1798_v6  ;;  %v1818_v50 = vrot.slane %v1816_v36, 5  ;;  %v15638_v11 = vcombine.low %v1789_v30, %v1799_v25  ;;  %18510 = vst [vmem:[#allocation96_spill] sm:$0xff] %v15648_v8  ;;  %v15651_v45 = vld [vmem:[%s14405_s6 + $0x4] sm:$0xf]  ;;  %v15656_v6 = vld [vmem:[%s14405_s6 + $0x154] sm:$0xf] }
 0x14b   : > { %v1813_v42 = vor.u32 %v1812_v35, %v1808_v22  ;;  %v4087_v34 = vrot.slane %v15641_v54, 5  ;;  %v4090_v12 = vrot.slane %v14191_v1, 5  ;;  %18511 = vst [vmem:[#allocation97_spill] sm:$0xff] %v15651_v45  ;;  %v10457_v25 = vcombine.low %v15648_v8, %v15651_v45  ;;  %18512 = vst [vmem:[#allocation98_spill] sm:$0xff] %v15656_v6  ;;  %v15660_v51 = vld [vmem:[%s14405_s6 + $0x158] sm:$0xf] }
 0x14c   : > { %18507 = vst [vmem:[#allocation93_spill] sm:$0xff] %v15636_v60  ;;  %18508 = vst [vmem:[#allocation94_spill] sm:$0xff] %v15638_v11  ;;  %12510 = vmatprep.mubr.msk.bf16.mxu0 %vm2029_vm2, %v15636_v60  ;;  %v1804_v10 = vrot.slane %v1803_v58, 4  ;;  %v10604_v36 = vrot.slane %v15656_v6, 9  ;;  %v4094_v30 = vrot.slane %v15660_v51, 5  ;;  %11914 = vmatprep.mubr.msk.bf16.mxu1 %vm2029_vm2, %v15638_v11 }
 0x14d   : > { %18513 = vst [vmem:[#allocation99_spill] sm:$0xff] %v15660_v51  ;;  %v1814_v16 = vrot.slane %v1813_v42, 4  ;;  %v4088_v35 = vsel %vm14826_vm6, %v4086_v2, %v4087_v34  ;;  %v4089_v58 = vrot.slane %v4087_v34, 4  ;;  %v15668_v1 = vld [vmem:[%s14405_s6 + $0x15c] sm:$0xf] }
 0x14e   : > { %18514 = vst [vmem:[#allocation100_spill] sm:$0xff] %v15668_v1  ;;  %v4097_v60 = vrot.slane %v15668_v1, 5  ;;  %v1809_v8 = vsel %vm14423_vm3, %v1804_v10, %v1808_v22  ;;  %v4095_v45 = vsel %vm14826_vm6, %v10604_v36, %v4094_v30  ;;  %v4096_v6 = vrot.slane %v4094_v30, 4  ;;  %v15676_v51 = vld [vmem:[%s14405_s6 + $0x160] sm:$0xf] }
 0x14f   : > { %18515 = vst [vmem:[#allocation101_spill] sm:$0xff] %v15676_v51  ;;  %v4100_v42 = vrot.slane %v15676_v51, 5  ;;  %v1819_v2 = vsel %vm14423_vm3, %v1814_v16, %v1818_v50  ;;  %v4091_v34 = vsel %vm14826_vm6, %v4089_v58, %v4090_v12  ;;  %v14198_v1 = vld [vmem:[%s14405_s6 + $0x164] sm:$0x1]  ;;  %v10605_v50 = vrot.slane %v15693_v31, 9 }
 0x150   : > { %v4099_v11 = vrot.slane %v4097_v60, 4  ;;  %v4103_v54 = vrot.slane %v14198_v1, 5  ;;  %v15684_v22 = vcombine.low %v1809_v8, %v1819_v2  ;;  %v15686_v10 = vcombine.low %v4088_v35, %v4091_v34  ;;  %v15701_v12 = vld [vmem:[%s14405_s6 + $0x16c] sm:$0xf]  ;;  %v15716_v35 = vld [vmem:[%s14405_s6 + $0x174] sm:$0xf] }
 0x151   : > { %v4098_v36 = vsel %vm14826_vm6, %v4096_v6, %v4097_v60  ;;  %v4102_v30 = vrot.slane %v4100_v42, 4  ;;  %18520 = vst [vmem:[#allocation106_spill] sm:$0xff] %v15701_v12  ;;  %v4107_v8 = vrot.slane %v15701_v12, 5  ;;  %v15705_v60 = vld [vmem:[%s14405_s6 + $0x170] sm:$0xf]  ;;  %18522 = vst [vmem:[#allocation108_spill] sm:$0xff] %v15716_v35 }
 0x152   : > { %18516 = vst [vmem:[#allocation102_spill] sm:$0xff] %v15684_v22  ;;  %18517 = vst [vmem:[#allocation103_spill] sm:$0xff] %v15686_v10  ;;  %v15690_v51 = vcombine.low %v4095_v45, %v4098_v36  ;;  %11915 = vmatmul.mubr.msk.bf16.gmra.mrb[124].mxu1 %vm2029_vm2, %v15684_v22  ;;  %12511 = vmatmul.mubr.msk.bf16.gmra.mrb[60].mxu0 %vm2029_vm2, %v15686_v10  ;;  %v4110_v45 = vrot.slane %v15705_v60, 5  ;;  %v4101_v6 = vsel %vm14826_vm6, %v4099_v11, %v4100_v42  ;;  %v15722_v1 = vld [vmem:[%s18096_s1 + $0x70] sm:$0xff]   ;;  %v15727_v34 = vld [vmem:[%s14405_s6 + $0x180] sm:$0xf] }
 0x153   : > { %18521 = vst [vmem:[#allocation107_spill] sm:$0xff] %v15705_v60  ;;  %11922 = vmatprep.mubr.msk.bf16.mxu1 %vm2029_vm2, %v10457_v25  ;;  %v4104_v16 = vsel %vm14826_vm6, %v4102_v30, %v4103_v54  ;;  %v4113_v58 = vrot.slane %v15716_v35, 5  ;;  %18523 = vst [vmem:[#allocation109_spill] sm:$0xff] %v15722_v1  ;;  %v4109_v25 = vrot.slane %v4107_v8, 4  ;;  %v4108_v2 = vsel %vm14826_vm6, %v10605_v50, %v4107_v8  ;;  %v15732_v54 = vld [vmem:[%s14405_s6 + $0x8] sm:$0xf] }
 0x154   : > { %18518 = vst [vmem:[#allocation104_spill] sm:$0xff] %v15690_v51  ;;  %12514 = vmatprep.mubr.msk.bf16.mxu0 %vm2029_vm2, %v15690_v51  ;;  %18524 = vst [vmem:[#allocation110_spill] sm:$0xff] %v15727_v34  ;;  %v4120_v11 = vrot.slane %v15727_v34, 5  ;;  %12710 = vmatprep.subr.bf16.mxu0 %v15722_v1  ;;  %v15735_v42 = vld [vmem:[%s14405_s6 + $0xc] sm:$0xf]  ;;  %v15739_v30 = vcombine.low %v4101_v6, %v4104_v16  ;;  %v4112_v10 = vrot.slane %v4110_v45, 4 }
 0x155   : > { %18525 = vst [vmem:[#allocation111_spill] sm:$0xff] %v15732_v54  ;;  %18526 = vst [vmem:[#allocation112_spill] sm:$0xff] %v15735_v42  ;;  %v10458_v36 = vcombine.low %v15732_v54, %v15735_v42  ;;  %v4111_v50 = vsel %vm14826_vm6, %v4109_v25, %v4110_v45  ;;  %v14206_v8 = vld [vmem:[%s14405_s6 + $0x14] sm:$0xf]  ;;  %v14207_v22 = vld [vmem:[%s14405_s6 + $0x18] sm:$0xf] }
 0x156   : > { %18527 = vst [vmem:[#allocation113_spill] sm:$0xff] %v15739_v30  ;;  %v15745_v51 = vcombine.low %v14206_v8, %v14207_v22  ;;  %v4115_v34 = vrot.slane %v4113_v58, 4  ;;  %v14208_v60 = vld [vmem:[%s14405_s6 + $0x178] sm:$0x1]  ;;  %v15748_v31 = vcombine.low %v4108_v2, %v4111_v50  ;;  %v15751_v12 = vld [vmem:[%s14405_s6 + $0x17c] sm:$0xf]  ;;  %v4114_v45 = vsel %vm14826_vm6, %v4112_v10, %v4113_v58 }
 0x157   : > { %v4116_v35 = vrot.slane %v14208_v60, 5  ;;  %18530 = vst [vmem:[#allocation116_spill] sm:$0xff] %v15751_v12  ;;  %v10606_v42 = vrot.slane %v15751_v12, 9  ;;  %v4122_v6 = vrot.slane %v4120_v11, 4  ;;  %v15755_v16 = vld [vmem:[%s14405_s6 + $0x184] sm:$0xf] }
 0x158   : > { %18528 = vst [vmem:[#allocation114_spill] sm:$0xff] %v15745_v51  ;;  %18529 = vst [vmem:[#allocation115_spill] sm:$0xff] %v15748_v31  ;;  %v4123_v25 = vrot.slane %v15755_v16, 5  ;;  %v14071_v22 = vld [vmem:[%s18096_s1 + $0x28] sm:$0xff]   ;;  %v14211_v60 = vld [vmem:[%s18096_s1 + $0x20] sm:$0xff]  }
 0x159   : > { %18531 = vst [vmem:[#allocation117_spill] sm:$0xff] %v15755_v16  ;;  %v4117_v2 = vsel %vm14826_vm6, %v4115_v34, %v4116_v35  ;;  %v4121_v8 = vsel %vm14826_vm6, %v10606_v42, %v4120_v11  ;;  %v14214_v35 = vld [vmem:[%s14405_s6 + $0x1c] sm:$0xf]  ;;  %v14215_v58 = vld [vmem:[%s14405_s6 + $0x20] sm:$0xf] }
 0x15a   : > { %11923 = vmatmul.mubr.msk.bf16.vlgmr.msra.gmra.mrb[0].mxu1 %vm2029_vm2, %v10458_v36  ;;  %12515 = vmatmul.mubr.msk.bf16.gmra.mrb[64].mxu0 %vm2029_vm2, %v15739_v30  ;;  %v15774_v36 = vld [vmem:[%s14405_s6 + $0x188] sm:$0xf]  ;;  %v15789_v34 = vcombine.low %v14214_v35, %v14215_v58  ;;  %v15791_v30 = vcombine.low %v4114_v45, %v4117_v2  ;;  %v14217_v54 = vld [vmem:[%s14405_s6 + $0x2c] sm:$0xf]  ;;  %v4125_v42 = vrot.slane %v4123_v25, 4 }
 0x15b   : > { %12051 = vmatpush3.bf16.msra.mxu1 %v14211_v60  ;;  %11926 = vmatprep.mubr.msk.bf16.mxu1 %vm2029_vm2, %v15745_v51  ;;  %18532 = vst [vmem:[#allocation118_spill] sm:$0xff] %v15774_v36  ;;  %v4126_v50 = vrot.slane %v15774_v36, 5  ;;  %v4124_v60 = vsel %vm14826_vm6, %v4122_v6, %v4123_v25  ;;  %v15784_v51 = vld [vmem:[%s14405_s6 + $0x194] sm:$0xf]  ;;  %v14218_v36 = vld [vmem:[%s14405_s6 + $0x18c] sm:$0x1] }
 0x15c   : > { %12518 = vmatprep.mubr.msk.bf16.mxu0 %vm2029_vm2, %v15748_v31  ;;  %18533 = vst [vmem:[#allocation119_spill] sm:$0xff] %v15784_v51  ;;  %v4133_v10 = vrot.slane %v15784_v51, 5  ;;  %12052 = vmatprep.subr.bf16.mxu1 %v14071_v22  ;;  %18534 = vst [vmem:[#allocation120_spill] sm:$0xff] %v15789_v34  ;;  %v14216_v31 = vld [vmem:[%s14405_s6 + $0x28] sm:$0xf]  ;;  %v15797_v11 = vcombine.low %v4121_v8, %v4124_v60  ;;  %v4129_v12 = vrot.slane %v14218_v36, 5 }
 0x15d   : > { %18535 = vst [vmem:[#allocation121_spill] sm:$0xff] %v15791_v30  ;;  %v15795_v16 = vcombine.low %v14216_v31, %v14217_v54  ;;  %v4128_v6 = vrot.slane %v4126_v50, 4  ;;  %v15801_v51 = vld [vmem:[%s14405_s6 + $0x190] sm:$0xf]  ;;  %v15805_v2 = vld [vmem:[%s14405_s6 + $0x198] sm:$0xf]  ;;  %v4127_v54 = vsel %vm14826_vm6, %v4125_v42, %v4126_v50 }
 0x15e   : > { %18537 = vst [vmem:[#allocation123_spill] sm:$0xff] %v15797_v11  ;;  %18538 = vst [vmem:[#allocation124_spill] sm:$0xff] %v15801_v51  ;;  %v10607_v35 = vrot.slane %v15801_v51, 9  ;;  %v4135_v45 = vrot.slane %v4133_v10, 4  ;;  %v4136_v31 = vrot.slane %v15805_v2, 5 }
 0x15f   : > { %18536 = vst [vmem:[#allocation122_spill] sm:$0xff] %v15795_v16  ;;  %12053 = vmatpush3.bf16.msra.mxu1 %v14071_v22  ;;  %18539 = vst [vmem:[#allocation125_spill] sm:$0xff] %v15805_v2  ;;  %v4130_v25 = vsel %vm14826_vm6, %v4128_v6, %v4129_v12  ;;  %v15821_v22 = vld [vmem:[%s14405_s6 + $0x19c] sm:$0xf]  ;;  %v15829_v58 = vld [vmem:[%s14405_s6 + $0x1a8] sm:$0xf] }
 0x160   : > { %18540 = vst [vmem:[#allocation126_spill] sm:$0xff] %v15821_v22  ;;  %v4139_v36 = vrot.slane %v15821_v22, 5  ;;  %v4134_v8 = vsel %vm14826_vm6, %v10607_v35, %v4133_v10  ;;  %v4137_v60 = vsel %vm14826_vm6, %v4135_v45, %v4136_v31  ;;  %18541 = vst [vmem:[#allocation127_spill] sm:$0xff] %v15829_v58  ;;  %v14223_v50 = vld [vmem:[%s14405_s6 + $0x30] sm:$0xf]  ;;  %v15836_v6 = vcombine.low %v4127_v54, %v4130_v25 }
 0x161   : > { %v14224_v42 = vld [vmem:[%s14405_s6 + $0x34] sm:$0xf]  ;;  %v15842_v10 = vcombine.low %v4134_v8, %v4137_v60  ;;  %v4138_v35 = vrot.slane %v4136_v31, 4  ;;  %v14227_v22 = vld [vmem:[%s14405_s6 + $0x1a0] sm:$0x1] }
 0x162   : > { %11927 = vmatmul.mubr.msk.bf16.gmra.mrb[4].mxu1 %vm2029_vm2, %v15789_v34  ;;  %12519 = vmatmul.mubr.msk.bf16.gmra.mrb[68].mxu0 %vm2029_vm2, %v15791_v30  ;;  %v4146_v34 = vrot.slane %v15829_v58, 5  ;;  %v15834_v12 = vcombine.low %v14223_v50, %v14224_v42  ;;  %18543 = vst [vmem:[#allocation129_spill] sm:$0xff] %v15836_v6  ;;  %v14226_v30 = vld [vmem:[%s14405_s6 + $0x40] sm:$0xf]  ;;  %v4141_v45 = vrot.slane %v4139_v36, 4  ;;  %v4142_v51 = vrot.slane %v14227_v22, 5 }
 0x163   : > { %11930 = vmatprep.mubr.msk.bf16.mxu1 %vm2029_vm2, %v15795_v16  ;;  %12522 = vmatprep.mubr.msk.bf16.mxu0 %vm2029_vm2, %v15797_v11  ;;  %v14225_v11 = vld [vmem:[%s14405_s6 + $0x3c] sm:$0xf]  ;;  %18545 = vst [vmem:[#allocation131_spill] sm:$0xff] %v15842_v10  ;;  %v15846_v58 = vld [vmem:[%s14405_s6 + $0x1a4] sm:$0xf] }
 0x164   : > { %18542 = vst [vmem:[#allocation128_spill] sm:$0xff] %v15834_v12  ;;  %v15840_v2 = vcombine.low %v14225_v11, %v14226_v30  ;;  %18546 = vst [vmem:[#allocation132_spill] sm:$0xff] %v15846_v58  ;;  %v10608_v1 = vrot.slane %v15846_v58, 9  ;;  %v4148_v50 = vrot.slane %v4146_v34, 4  ;;  %v15850_v54 = vld [vmem:[%s14405_s6 + $0x1ac] sm:$0xf]  ;;  %v4140_v11 = vsel %vm14826_vm6, %v4138_v35, %v4139_v36 }
 0x165   : > { %18547 = vst [vmem:[#allocation133_spill] sm:$0xff] %v15850_v54  ;;  %v4149_v30 = vrot.slane %v15850_v54, 5  ;;  %v4143_v31 = vsel %vm14826_vm6, %v4141_v45, %v4142_v51  ;;  %v15866_v25 = vld [vmem:[%s14405_s6 + $0x1b0] sm:$0xf]  ;;  %v15874_v42 = vld [vmem:[%s14405_s6 + $0x1bc] sm:$0xf] }
 0x166   : > { %18544 = vst [vmem:[#allocation130_spill] sm:$0xff] %v15840_v2  ;;  %18548 = vst [vmem:[#allocation134_spill] sm:$0xff] %v15866_v25  ;;  %v4152_v22 = vrot.slane %v15866_v25, 5  ;;  %v4147_v8 = vsel %vm14826_vm6, %v10608_v1, %v4146_v34  ;;  %v14232_v36 = vld [vmem:[%s14405_s6 + $0x44] sm:$0xf]  ;;  %v15881_v45 = vcombine.low %v4140_v11, %v4143_v31 }
 0x167   : > { %v4150_v60 = vsel %vm14826_vm6, %v4148_v50, %v4149_v30  ;;  %18549 = vst [vmem:[#allocation135_spill] sm:$0xff] %v15874_v42  ;;  %v14233_v35 = vld [vmem:[%s14405_s6 + $0x48] sm:$0xf]  ;;  %v14235_v54 = vld [vmem:[%s14405_s6 + $0x54] sm:$0xf]  ;;  %v4151_v34 = vrot.slane %v4149_v30, 4 }
 0x168   : > { %v15879_v51 = vcombine.low %v14232_v36, %v14233_v35  ;;  %18551 = vst [vmem:[#allocation137_spill] sm:$0xff] %v15881_v45  ;;  %v15887_v1 = vcombine.low %v4147_v8, %v4150_v60  ;;  %v4154_v50 = vrot.slane %v4152_v22, 4  ;;  %v14236_v58 = vld [vmem:[%s14405_s6 + $0x1b4] sm:$0x1]  ;;  %v15895_v11 = vld [vmem:[%s14405_s6 + $0x1c0] sm:$0xf] }
 0x169   : > { %18555 = vst [vmem:[#allocation141_spill] sm:$0xff] %v15895_v11  ;;  %v15911_v30 = vld [vmem:[%s14405_s6 + $0x1c4] sm:$0xf]  ;;  %v15919_v35 = vld [vmem:[%s14405_s6 + $0x1d0] sm:$0xf] }
 0x16a   : > { %11931 = vmatmul.mubr.msk.bf16.gmra.mrb[8].mxu1 %vm2029_vm2, %v15834_v12  ;;  %12523 = vmatmul.mubr.msk.bf16.gmra.mrb[72].mxu0 %vm2029_vm2, %v15836_v6  ;;  %18550 = vst [vmem:[#allocation136_spill] sm:$0xff] %v15879_v51  ;;  %v14234_v6 = vld [vmem:[%s14405_s6 + $0x50] sm:$0xf]  ;;  %18553 = vst [vmem:[#allocation139_spill] sm:$0xff] %v15887_v1  ;;  %v4165_v31 = vrot.slane %v15911_v30, 5 }
 0x16b   : > { %11934 = vmatprep.mubr.msk.bf16.mxu1 %vm2029_vm2, %v15840_v2  ;;  %12526 = vmatprep.mubr.msk.bf16.mxu0 %vm2029_vm2, %v15842_v10  ;;  %v4159_v10 = vrot.slane %v15874_v42, 5  ;;  %v15885_v25 = vcombine.low %v14234_v6, %v14235_v54  ;;  %v4155_v2 = vrot.slane %v14236_v58, 5  ;;  %v15891_v42 = vld [vmem:[%s14405_s6 + $0x1b8] sm:$0xf]  ;;  %v4162_v6 = vrot.slane %v15895_v11, 5  ;;  %18556 = vst [vmem:[#allocation142_spill] sm:$0xff] %v15911_v30 }
 0x16c   : > { %18554 = vst [vmem:[#allocation140_spill] sm:$0xff] %v15891_v42  ;;  %v10609_v12 = vrot.slane %v15891_v42, 9  ;;  %v4153_v58 = vsel %vm14826_vm6, %v4151_v34, %v4152_v22  ;;  %18557 = vst [vmem:[#allocation143_spill] sm:$0xff] %v15919_v35  ;;  %v14241_v22 = vld [vmem:[%s14405_s6 + $0x58] sm:$0xf] }
 0x16d   : > { %18552 = vst [vmem:[#allocation138_spill] sm:$0xff] %v15885_v25  ;;  %v4161_v36 = vrot.slane %v4159_v10, 4  ;;  %v4156_v54 = vsel %vm14826_vm6, %v4154_v50, %v4155_v2  ;;  %v14242_v34 = vld [vmem:[%s14405_s6 + $0x5c] sm:$0xf]  ;;  %v14244_v11 = vld [vmem:[%s14405_s6 + $0x68] sm:$0xf] }
 0x16e   : > { %v4160_v8 = vsel %vm14826_vm6, %v10609_v12, %v4159_v10  ;;  %v15924_v2 = vcombine.low %v14241_v22, %v14242_v34  ;;  %v15926_v50 = vcombine.low %v4153_v58, %v4156_v54  ;;  %v4164_v10 = vrot.slane %v4162_v6, 4  ;;  %v14245_v42 = vld [vmem:[%s14405_s6 + $0x1c8] sm:$0x1]  ;;  %v15940_v58 = vld [vmem:[%s14405_s6 + $0x1d4] sm:$0xf] }
 0x16f   : > { %v4163_v60 = vsel %vm14826_vm6, %v4161_v36, %v4162_v6  ;;  %v4167_v36 = vrot.slane %v4165_v31, 4  ;;  %18563 = vst [vmem:[#allocation149_spill] sm:$0xff] %v15940_v58  ;;  %v15956_v6 = vld [vmem:[%s14405_s6 + $0x1d8] sm:$0xf]  ;;  %v15964_v34 = vld [vmem:[%s14405_s6 + $0x1e4] sm:$0xf] }
 0x170   : > { %18558 = vst [vmem:[#allocation144_spill] sm:$0xff] %v15924_v2  ;;  %18559 = vst [vmem:[#allocation145_spill] sm:$0xff] %v15926_v50  ;;  %v15932_v12 = vcombine.low %v4160_v8, %v4163_v60  ;;  %v4178_v54 = vrot.slane %v15956_v6, 5 }
 0x171   : > { %18564 = vst [vmem:[#allocation150_spill] sm:$0xff] %v15956_v6  ;;  %18565 = vst [vmem:[#allocation151_spill] sm:$0xff] %v15964_v34 }
 0x172   : > { %11935 = vmatmul.mubr.msk.bf16.gmra.mrb[12].mxu1 %vm2029_vm2, %v15879_v51  ;;  %12527 = vmatmul.mubr.msk.bf16.gmra.mrb[76].mxu0 %vm2029_vm2, %v15881_v45  ;;  %v14243_v45 = vld [vmem:[%s14405_s6 + $0x64] sm:$0xf]  ;;  %18561 = vst [vmem:[#allocation147_spill] sm:$0xff] %v15932_v12 }
 0x173   : > { %11938 = vmatprep.mubr.msk.bf16.mxu1 %vm2029_vm2, %v15885_v25  ;;  %12530 = vmatprep.mubr.msk.bf16.mxu0 %vm2029_vm2, %v15887_v1  ;;  %v4172_v1 = vrot.slane %v15919_v35, 5  ;;  %v15930_v30 = vcombine.low %v14243_v45, %v14244_v11  ;;  %v4168_v25 = vrot.slane %v14245_v42, 5  ;;  %v15936_v35 = vld [vmem:[%s14405_s6 + $0x1cc] sm:$0xf]  ;;  %v4175_v45 = vrot.slane %v15940_v58, 5 }
 0x174   : > { %18562 = vst [vmem:[#allocation148_spill] sm:$0xff] %v15936_v35  ;;  %v10610_v51 = vrot.slane %v15936_v35, 9  ;;  %v4166_v42 = vsel %vm14826_vm6, %v4164_v10, %v4165_v31  ;;  %v14250_v31 = vld [vmem:[%s14405_s6 + $0x6c] sm:$0xf]  ;;  %v14251_v10 = vld [vmem:[%s14405_s6 + $0x70] sm:$0xf] }
 0x175   : > { %18560 = vst [vmem:[#allocation146_spill] sm:$0xff] %v15930_v30  ;;  %v4174_v22 = vrot.slane %v4172_v1, 4  ;;  %v4169_v11 = vsel %vm14826_vm6, %v4167_v36, %v4168_v25  ;;  %v15969_v25 = vcombine.low %v14250_v31, %v14251_v10  ;;  %v14253_v58 = vld [vmem:[%s14405_s6 + $0x7c] sm:$0xf]  ;;  %v16009_v10 = vld [vmem:[%s14405_s6 + $0x1f8] sm:$0xf] }
 0x176   : > { %v4173_v8 = vsel %vm14826_vm6, %v10610_v51, %v4172_v1  ;;  %v15971_v36 = vcombine.low %v4166_v42, %v4169_v11  ;;  %v4177_v1 = vrot.slane %v4175_v45, 4  ;;  %v14254_v35 = vld [vmem:[%s14405_s6 + $0x1dc] sm:$0x1]  ;;  %v15985_v42 = vld [vmem:[%s14405_s6 + $0x1e8] sm:$0xf]  ;;  %18573 = vst [vmem:[#allocation159_spill] sm:$0xff] %v16009_v10 }
 0x177   : > { %v4176_v60 = vsel %vm14826_vm6, %v4174_v22, %v4175_v45  ;;  %18566 = vst [vmem:[#allocation152_spill] sm:$0xff] %v15969_v25  ;;  %v4180_v22 = vrot.slane %v4178_v54, 4  ;;  %18571 = vst [vmem:[#allocation157_spill] sm:$0xff] %v15985_v42  ;;  %v16001_v45 = vld [vmem:[%s14405_s6 + $0x1ec] sm:$0xf] }
 0x178   : > { %18567 = vst [vmem:[#allocation153_spill] sm:$0xff] %v15971_v36  ;;  %v15977_v51 = vcombine.low %v4173_v8, %v4176_v60  ;;  %18572 = vst [vmem:[#allocation158_spill] sm:$0xff] %v16001_v45  ;;  %v4191_v11 = vrot.slane %v16001_v45, 5 }
 0x17a   : > { %11939 = vmatmul.mubr.msk.bf16.gmra.mrb[16].mxu1 %vm2029_vm2, %v15924_v2  ;;  %12531 = vmatmul.mubr.msk.bf16.gmra.mrb[80].mxu0 %vm2029_vm2, %v15926_v50  ;;  %v14252_v50 = vld [vmem:[%s14405_s6 + $0x78] sm:$0xf]  ;;  %18569 = vst [vmem:[#allocation155_spill] sm:$0xff] %v15977_v51 }
 0x17b   : > { %11942 = vmatprep.mubr.msk.bf16.mxu1 %vm2029_vm2, %v15930_v30  ;;  %12534 = vmatprep.mubr.msk.bf16.mxu0 %vm2029_vm2, %v15932_v12  ;;  %v4185_v12 = vrot.slane %v15964_v34, 5  ;;  %v15975_v6 = vcombine.low %v14252_v50, %v14253_v58  ;;  %v4181_v30 = vrot.slane %v14254_v35, 5  ;;  %v15981_v34 = vld [vmem:[%s14405_s6 + $0x1e0] sm:$0xf]  ;;  %v4188_v50 = vrot.slane %v15985_v42, 5 }
 0x17c   : > { %18570 = vst [vmem:[#allocation156_spill] sm:$0xff] %v15981_v34  ;;  %v10611_v2 = vrot.slane %v15981_v34, 9  ;;  %v4179_v35 = vsel %vm14826_vm6, %v4177_v1, %v4178_v54  ;;  %v14259_v54 = vld [vmem:[%s14405_s6 + $0x80] sm:$0xf]  ;;  %v14260_v1 = vld [vmem:[%s14405_s6 + $0x84] sm:$0xf] }
 0x17d   : > { %18568 = vst [vmem:[#allocation154_spill] sm:$0xff] %v15975_v6  ;;  %v4187_v31 = vrot.slane %v4185_v12, 4  ;;  %v4182_v58 = vsel %vm14826_vm6, %v4180_v22, %v4181_v30  ;;  %v16014_v30 = vcombine.low %v14259_v54, %v14260_v1  ;;  %v14262_v42 = vld [vmem:[%s14405_s6 + $0x90] sm:$0xf]  ;;  %v16054_v1 = vld [vmem:[%s14405_s6 + $0x20c] sm:$0xf] }
 0x17e   : > { %v4186_v8 = vsel %vm14826_vm6, %v10611_v2, %v4185_v12  ;;  %v16016_v22 = vcombine.low %v4179_v35, %v4182_v58  ;;  %v4190_v12 = vrot.slane %v4188_v50, 4  ;;  %v14263_v34 = vld [vmem:[%s14405_s6 + $0x1f0] sm:$0x1]  ;;  %v16030_v35 = vld [vmem:[%s14405_s6 + $0x1fc] sm:$0xf]  ;;  %18581 = vst [vmem:[#allocation167_spill] sm:$0xff] %v16054_v1 }
 0x17f   : > { %v4189_v60 = vsel %vm14826_vm6, %v4187_v31, %v4188_v50  ;;  %18574 = vst [vmem:[#allocation160_spill] sm:$0xff] %v16014_v30  ;;  %v4193_v31 = vrot.slane %v4191_v11, 4  ;;  %18579 = vst [vmem:[#allocation165_spill] sm:$0xff] %v16030_v35  ;;  %v16046_v50 = vld [vmem:[%s14405_s6 + $0x200] sm:$0xf] }
 0x180   : > { %18575 = vst [vmem:[#allocation161_spill] sm:$0xff] %v16016_v22  ;;  %v16022_v2 = vcombine.low %v4186_v8, %v4189_v60  ;;  %18580 = vst [vmem:[#allocation166_spill] sm:$0xff] %v16046_v50  ;;  %v4204_v58 = vrot.slane %v16046_v50, 5 }
 0x182   : > { %11943 = vmatmul.mubr.msk.bf16.gmra.mrb[20].mxu1 %vm2029_vm2, %v15969_v25  ;;  %12535 = vmatmul.mubr.msk.bf16.gmra.mrb[84].mxu0 %vm2029_vm2, %v15971_v36  ;;  %v14261_v36 = vld [vmem:[%s14405_s6 + $0x8c] sm:$0xf]  ;;  %18577 = vst [vmem:[#allocation163_spill] sm:$0xff] %v16022_v2 }
 0x183   : > { %11946 = vmatprep.mubr.msk.bf16.mxu1 %vm2029_vm2, %v15975_v6  ;;  %12538 = vmatprep.mubr.msk.bf16.mxu0 %vm2029_vm2, %v15977_v51  ;;  %v4198_v51 = vrot.slane %v16009_v10, 5  ;;  %v16020_v45 = vcombine.low %v14261_v36, %v14262_v42  ;;  %v4194_v6 = vrot.slane %v14263_v34, 5  ;;  %v16026_v10 = vld [vmem:[%s14405_s6 + $0x1f4] sm:$0xf]  ;;  %v4201_v36 = vrot.slane %v16030_v35, 5 }
 0x184   : > { %18578 = vst [vmem:[#allocation164_spill] sm:$0xff] %v16026_v10  ;;  %v10612_v25 = vrot.slane %v16026_v10, 9  ;;  %v4192_v34 = vsel %vm14826_vm6, %v4190_v12, %v4191_v11  ;;  %v14268_v11 = vld [vmem:[%s14405_s6 + $0x94] sm:$0xf]  ;;  %v14269_v12 = vld [vmem:[%s14405_s6 + $0x98] sm:$0xf] }
 0x185   : > { %18576 = vst [vmem:[#allocation162_spill] sm:$0xff] %v16020_v45  ;;  %v4200_v54 = vrot.slane %v4198_v51, 4  ;;  %v4195_v42 = vsel %vm14826_vm6, %v4193_v31, %v4194_v6  ;;  %v16059_v6 = vcombine.low %v14268_v11, %v14269_v12  ;;  %v14271_v35 = vld [vmem:[%s14405_s6 + $0xa4] sm:$0xf]  ;;  %v4206_v10 = vrot.slane %v4204_v58, 4 }
 0x186   : > { %v4199_v8 = vsel %vm14826_vm6, %v10612_v25, %v4198_v51  ;;  %v16061_v31 = vcombine.low %v4192_v34, %v4195_v42  ;;  %v4203_v51 = vrot.slane %v4201_v36, 4  ;;  %v16075_v12 = vld [vmem:[%s14405_s6 + $0x210] sm:$0xf] }
 0x187   : > { %v4202_v60 = vsel %vm14826_vm6, %v4200_v54, %v4201_v36  ;;  %18582 = vst [vmem:[#allocation168_spill] sm:$0xff] %v16059_v6  ;;  %v14272_v54 = vld [vmem:[%s14405_s6 + $0x204] sm:$0x1]  ;;  %18587 = vst [vmem:[#allocation173_spill] sm:$0xff] %v16075_v12  ;;  %v4214_v34 = vrot.slane %v16075_v12, 5  ;;  %v4217_v36 = vrot.slane %v15263_v63, 5 }
 0x188   : > { %18583 = vst [vmem:[#allocation169_spill] sm:$0xff] %v16061_v31  ;;  %v16067_v25 = vcombine.low %v4199_v8, %v4202_v60  ;;  %v4224_v60 = vrot.slane %v15289_v28, 5  ;;  %v10614_v28 = vrot.slane %v15282_v29, 9 }
 0x189   : > { %v4216_v63 = vrot.slane %v4214_v34, 4 }
 0x18a   : > { %11947 = vmatmul.mubr.msk.bf16.gmra.mrb[24].mxu1 %vm2029_vm2, %v16014_v30  ;;  %12539 = vmatmul.mubr.msk.bf16.gmra.mrb[88].mxu0 %vm2029_vm2, %v16016_v22  ;;  %v14270_v22 = vld [vmem:[%s14405_s6 + $0xa0] sm:$0xf]  ;;  %18585 = vst [vmem:[#allocation171_spill] sm:$0xff] %v16067_v25  ;;  %v16071_v30 = vld [vmem:[%s14405_s6 + $0x208] sm:$0xf] }
 0x18b   : > { %11950 = vmatprep.mubr.msk.bf16.mxu1 %vm2029_vm2, %v16020_v45  ;;  %12542 = vmatprep.mubr.msk.bf16.mxu0 %vm2029_vm2, %v16022_v2  ;;  %v4211_v2 = vrot.slane %v16054_v1, 5  ;;  %v16065_v50 = vcombine.low %v14270_v22, %v14271_v35  ;;  %v4207_v45 = vrot.slane %v14272_v54, 5  ;;  %18586 = vst [vmem:[#allocation172_spill] sm:$0xff] %v16071_v30  ;;  %v10613_v1 = vrot.slane %v16071_v30, 9  ;;  %v14275_v54 = vld [vmem:[%s14405_s6 + $0xa8] sm:$0xf] }
 0x18c   : > { %v4205_v22 = vsel %vm14826_vm6, %v4203_v51, %v4204_v58  ;;  %v14277_v58 = vld [vmem:[%s14405_s6 + $0xb4] sm:$0xf]  ;;  %v14278_v51 = vld [vmem:[%s14405_s6 + $0xb8] sm:$0xf]  ;;  %v4218_v29 = vsel %vm14826_vm6, %v4216_v63, %v4217_v36  ;;  %v14283_v63 = vld [vmem:[%s14405_s6 + $0xcc] sm:$0xf] }
 0x18d   : > { %18584 = vst [vmem:[#allocation170_spill] sm:$0xff] %v16065_v50  ;;  %v4213_v11 = vrot.slane %v4211_v2, 4  ;;  %v4208_v35 = vsel %vm14826_vm6, %v4206_v10, %v4207_v45  ;;  %v4212_v42 = vsel %vm14826_vm6, %v10613_v1, %v4211_v2  ;;  %v16104_v30 = vcombine.low %v14277_v58, %v14278_v51  ;;  %v14279_v2 = vld [vmem:[%s14405_s6 + $0x218] sm:$0x1] }
 0x18e   : > { %v16100_v12 = vcombine.low %v4205_v22, %v4208_v35  ;;  %v4219_v10 = vrot.slane %v4217_v36, 4  ;;  %v4220_v1 = vrot.slane %v14279_v2, 5  ;;  %v4225_v22 = vsel %vm14826_vm6, %v10614_v28, %v4224_v60  ;;  %v14282_v36 = vld [vmem:[%s14405_s6 + $0xc8] sm:$0xf] }
 0x18f   : > { %v4215_v8 = vsel %vm14826_vm6, %v4213_v11, %v4214_v34  ;;  %18590 = vst [vmem:[#allocation176_spill] sm:$0xff] %v16104_v30  ;;  %v4226_v11 = vrot.slane %v4224_v60, 4  ;;  %v16137_v2 = vcombine.low %v14282_v36, %v14283_v63  ;;  %v14287_v36 = vld [vmem:[%s14405_s6 + $0xe0] sm:$0xf] }
 0x190   : > { %18589 = vst [vmem:[#allocation175_spill] sm:$0xff] %v16100_v12  ;;  %v16106_v45 = vcombine.low %v4212_v42, %v4215_v8  ;;  %v4221_v34 = vsel %vm14826_vm6, %v4219_v10, %v4220_v1  ;;  %v4237_v42 = vrot.slane %v15346_v43, 5  ;;  %v14280_v8 = vld [vmem:[%s14405_s6 + $0xbc] sm:$0xf]  ;;  %v4233_v1 = vrot.slane %v15325_v59, 5 }
 0x191   : > { %v16133_v51 = vcombine.low %v4218_v29, %v4221_v34  ;;  %18594 = vst [vmem:[#allocation180_spill] sm:$0xff] %v16137_v2  ;;  %v10615_v43 = vrot.slane %v15341_v23, 9  ;;  %v4250_v34 = vrot.slane %v15421_v44, 5  ;;  %v10616_v44 = vrot.slane %v15414_v33, 9 }
 0x192   : > { %11951 = vmatmul.mubr.msk.bf16.gmra.mrb[28].mxu1 %vm2029_vm2, %v16059_v6  ;;  %12543 = vmatmul.mubr.msk.bf16.gmra.mrb[92].mxu0 %vm2029_vm2, %v16061_v31  ;;  %v14276_v31 = vld [vmem:[%s14405_s6 + $0xac] sm:$0xf]  ;;  %18591 = vst [vmem:[#allocation177_spill] sm:$0xff] %v16106_v45  ;;  %v4239_v28 = vrot.slane %v4237_v42, 4 }
 0x193   : > { %11954 = vmatprep.mubr.msk.bf16.mxu1 %vm2029_vm2, %v16065_v50  ;;  %12546 = vmatprep.mubr.msk.bf16.mxu0 %vm2029_vm2, %v16067_v25  ;;  %v16098_v25 = vcombine.low %v14275_v54, %v14276_v31  ;;  %v4227_v31 = vrot.slane %v15298_v0, 5  ;;  %v4230_v0 = vrot.slane %v15318_v20, 5  ;;  %v14281_v54 = vld [vmem:[%s14405_s6 + $0xc0] sm:$0xf]  ;;  %18593 = vst [vmem:[#allocation179_spill] sm:$0xff] %v16133_v51 }
 0x194   : > { %v16131_v58 = vcombine.low %v14280_v8, %v14281_v54 }
 0x195   : > { %18588 = vst [vmem:[#allocation174_spill] sm:$0xff] %v16098_v25  ;;  %v4228_v35 = vsel %vm14826_vm6, %v4226_v11, %v4227_v31  ;;  %v4229_v20 = vrot.slane %v4227_v31, 4  ;;  %v4232_v60 = vrot.slane %v4230_v0, 4  ;;  %v4240_v11 = vrot.slane %v15362_v62, 5 }
 0x196   : > { %18592 = vst [vmem:[#allocation178_spill] sm:$0xff] %v16131_v58  ;;  %v16139_v10 = vcombine.low %v4225_v22, %v4228_v35  ;;  %v4243_v62 = vrot.slane %v15380_v61, 5  ;;  %v4238_v31 = vsel %vm14826_vm6, %v10615_v43, %v4237_v42  ;;  %v14284_v22 = vld [vmem:[%s14405_s6 + $0xd0] sm:$0xf]  ;;  %v14285_v35 = vld [vmem:[%s14405_s6 + $0xd4] sm:$0xf] }
 0x197   : > { %v4231_v59 = vsel %vm14826_vm6, %v4229_v20, %v4230_v0  ;;  %v4234_v23 = vsel %vm14826_vm6, %v4232_v60, %v4233_v1  ;;  %v4241_v29 = vsel %vm14826_vm6, %v4239_v28, %v4240_v11  ;;  %v16164_v8 = vcombine.low %v14284_v22, %v14285_v35  ;;  %v14286_v0 = vld [vmem:[%s14405_s6 + $0xdc] sm:$0xf]  ;;  %v14291_v35 = vld [vmem:[%s14405_s6 + $0xf4] sm:$0xf] }
 0x198   : > { %18595 = vst [vmem:[#allocation181_spill] sm:$0xff] %v16139_v10  ;;  %v16166_v54 = vcombine.low %v4231_v59, %v4234_v23  ;;  %v16170_v63 = vcombine.low %v14286_v0, %v14287_v36  ;;  %v16172_v20 = vcombine.low %v4238_v31, %v4241_v29  ;;  %v4242_v61 = vrot.slane %v4240_v11, 4  ;;  %v14288_v23 = vld [vmem:[%s14405_s6 + $0xe4] sm:$0xf]  ;;  %v14289_v31 = vld [vmem:[%s14405_s6 + $0xe8] sm:$0xf] }
 0x199   : > { %18596 = vst [vmem:[#allocation182_spill] sm:$0xff] %v16164_v8  ;;  %v4245_v42 = vrot.slane %v4243_v62, 4  ;;  %v4246_v60 = vrot.slane %v15391_v18, 5  ;;  %v4252_v1 = vrot.slane %v4250_v34, 4  ;;  %v4253_v43 = vrot.slane %v15439_v37, 5 }
 0x19a   : > { %11955 = vmatmul.mubr.msk.bf16.gmra.mrb[32].mxu1 %vm2029_vm2, %v16098_v25  ;;  %12547 = vmatmul.mubr.msk.bf16.gmra.mrb[96].mxu0 %vm2029_vm2, %v16100_v12  ;;  %18597 = vst [vmem:[#allocation183_spill] sm:$0xff] %v16166_v54  ;;  %18598 = vst [vmem:[#allocation184_spill] sm:$0xff] %v16170_v63  ;;  %v4244_v33 = vsel %vm14826_vm6, %v4242_v61, %v4243_v62  ;;  %v4256_v37 = vrot.slane %v15455_v27, 5  ;;  %v4251_v28 = vsel %vm14826_vm6, %v10616_v44, %v4250_v34  ;;  %v14290_v62 = vld [vmem:[%s14405_s6 + $0xf0] sm:$0xf] }
 0x19b   : > { %11958 = vmatprep.mubr.msk.bf16.mxu1 %vm2029_vm2, %v16104_v30  ;;  %12550 = vmatprep.mubr.msk.bf16.mxu0 %vm2029_vm2, %v16106_v45  ;;  %18599 = vst [vmem:[#allocation185_spill] sm:$0xff] %v16172_v20  ;;  %v4247_v18 = vsel %vm14826_vm6, %v4245_v42, %v4246_v60  ;;  %v4254_v11 = vsel %vm14826_vm6, %v4252_v1, %v4253_v43  ;;  %v4263_v59 = vrot.slane %v15494_v17, 5  ;;  %v4255_v27 = vrot.slane %v4253_v43, 4 }
 0x19c   : > { %v16197_v29 = vcombine.low %v14288_v23, %v14289_v31  ;;  %v16199_v22 = vcombine.low %v4244_v33, %v4247_v18  ;;  %v16203_v0 = vcombine.low %v14290_v62, %v14291_v35  ;;  %v16205_v36 = vcombine.low %v4251_v28, %v4254_v11  ;;  %v14292_v33 = vld [vmem:[%s14405_s6 + $0xf8] sm:$0xf]  ;;  %v16244_v35 = vld [vmem:[%s14405_s6 + $0x284] sm:$0xf] }
 0x19d   : > { %v4258_v34 = vrot.slane %v4256_v37, 4  ;;  %v4259_v61 = vrot.slane %v15468_v15, 5  ;;  %v10617_v42 = vrot.slane %v15487_v5, 9  ;;  %v4265_v17 = vrot.slane %v4263_v59, 4 }
 0x19e   : > { %18600 = vst [vmem:[#allocation186_spill] sm:$0xff] %v16197_v29  ;;  %18601 = vst [vmem:[#allocation187_spill] sm:$0xff] %v16199_v22  ;;  %v4266_v60 = vrot.slane %v15511_v38, 5  ;;  %v4257_v15 = vsel %vm14826_vm6, %v4255_v27, %v4256_v37  ;;  %v4269_v38 = vrot.slane %v15536_v53, 5  ;;  %v4276_v43 = vrot.slane %v15569_v48, 5 }
 0x19f   : > { %18602 = vst [vmem:[#allocation188_spill] sm:$0xff] %v16203_v0  ;;  %18603 = vst [vmem:[#allocation189_spill] sm:$0xff] %v16205_v36  ;;  %v4260_v5 = vsel %vm14826_vm6, %v4258_v34, %v4259_v61  ;;  %v4264_v44 = vsel %vm14826_vm6, %v10617_v42, %v4263_v59  ;;  %v16230_v18 = vcombine.low %v14292_v33, %v15355_v52  ;;  %v4272_v59 = vrot.slane %v15539_v56, 5  ;;  %v16265_v42 = vld [vmem:[%s14405_s6 + $0x280] sm:$0xf] }
 0x1a0   : > { %v4267_v1 = vsel %vm14826_vm6, %v4265_v17, %v4266_v60  ;;  %v16232_v28 = vcombine.low %v4257_v15, %v4260_v5  ;;  %v16236_v37 = vcombine.low %v15387_v14, %v15394_v41  ;;  %v4268_v53 = vrot.slane %v4266_v60, 4  ;;  %v16268_v17 = vld [vmem:[%s14405_s6 + $0x288] sm:$0xf] }
 0x1a1   : > { %18604 = vst [vmem:[#allocation190_spill] sm:$0xff] %v16230_v18  ;;  %v16238_v11 = vcombine.low %v4264_v44, %v4267_v1  ;;  %v4271_v23 = vrot.slane %v4269_v38, 4  ;;  %v10618_v31 = vrot.slane %v15562_v13, 9  ;;  %v4278_v62 = vrot.slane %v4276_v43, 4 }
 0x1a2   : > { %11959 = vmatmul.mubr.msk.bf16.gmra.mrb[36].mxu1 %vm2029_vm2, %v16131_v58  ;;  %12551 = vmatmul.mubr.msk.bf16.gmra.mrb[100].mxu0 %vm2029_vm2, %v16133_v51  ;;  %18605 = vst [vmem:[#allocation191_spill] sm:$0xff] %v16232_v28  ;;  %18606 = vst [vmem:[#allocation192_spill] sm:$0xff] %v16236_v37  ;;  %v4279_v52 = vrot.slane %v15581_v21, 5  ;;  %v4270_v14 = vsel %vm14826_vm6, %v4268_v53, %v4269_v38  ;;  %v4282_v56 = vrot.slane %v15601_v49, 5  ;;  %v6816_v61 = vrot.slane %v16244_v35, 5 }
 0x1a3   : > { %11962 = vmatprep.mubr.msk.bf16.mxu1 %vm2029_vm2, %v16137_v2  ;;  %12554 = vmatprep.mubr.msk.bf16.mxu0 %vm2029_vm2, %v16139_v10  ;;  %18607 = vst [vmem:[#allocation193_spill] sm:$0xff] %v16238_v11  ;;  %v4273_v41 = vsel %vm14826_vm6, %v4271_v23, %v4272_v59  ;;  %v4277_v27 = vsel %vm14826_vm6, %v10618_v31, %v4276_v43  ;;  %v4285_v43 = vrot.slane %v15614_v55, 5  ;;  %v10897_v33 = vrot.slane %v16265_v42, 9  ;;  %v16306_v31 = vld [vmem:[%s14405_s6 + $0x290] sm:$0x1] }
 0x1a4   : > { %v4280_v34 = vsel %vm14826_vm6, %v4278_v62, %v4279_v52  ;;  %v16272_v60 = vcombine.low %v15398_v4, %v15428_v3  ;;  %v16274_v15 = vcombine.low %v4270_v14, %v4273_v41  ;;  %v16278_v5 = vcombine.low %v15460_v7, %v15464_v57  ;;  %v16286_v4 = vld [vmem:[%s14405_s6 + $0x28c] sm:$0xf]  ;;  %18612 = vst [vmem:[#allocation198_spill] sm:$0xff] %v16306_v31 }
 0x1a5   : > { %v16280_v38 = vcombine.low %v4277_v27, %v4280_v34  ;;  %v4281_v44 = vrot.slane %v4279_v52, 4  ;;  %v4284_v1 = vrot.slane %v4282_v56, 4  ;;  %v6818_v53 = vrot.slane %v6816_v61, 4 }
 0x1a6   : > { %18608 = vst [vmem:[#allocation194_spill] sm:$0xff] %v16272_v60  ;;  %18609 = vst [vmem:[#allocation195_spill] sm:$0xff] %v16274_v15  ;;  %v6819_v23 = vrot.slane %v16268_v17, 5  ;;  %v6822_v57 = vrot.slane %v16286_v4, 5  ;;  %v6817_v55 = vsel %vm14826_vm6, %v10897_v33, %v6816_v61  ;;  %v16310_v62 = vcombine.low %v15473_v40, %v15501_v32  ;;  %v14105_v33 = vld [vmem:[%s18096_s1 + $0x78] sm:$0xff]  }
 0x1a7   : > { %18610 = vst [vmem:[#allocation196_spill] sm:$0xff] %v16278_v5  ;;  %18611 = vst [vmem:[#allocation197_spill] sm:$0xff] %v16280_v38  ;;  %v4283_v3 = vsel %vm14826_vm6, %v4281_v44, %v4282_v56  ;;  %v4286_v7 = vsel %vm14826_vm6, %v4284_v1, %v4285_v43  ;;  %v16316_v14 = vcombine.low %v15524_v9, %v15532_v24  ;;  %v6825_v34 = vrot.slane %v16306_v31, 5  ;;  %v18623_v44 = vld [vmem:[#allocation99_spill] sm:$0xff]  ;;  %v18624_v1 = vld [vmem:[#allocation98_spill] sm:$0xff] }
 0x1a8   : > { %v6820_v59 = vsel %vm14826_vm6, %v6818_v53, %v6819_v23  ;;  %18613 = vst [vmem:[#allocation199_spill] sm:$0xff] %v16310_v62  ;;  %v16312_v52 = vcombine.low %v4283_v3, %v4286_v7  ;;  %v6821_v56 = vrot.slane %v6819_v23, 4  ;;  %v6824_v27 = vrot.slane %v6822_v57, 4  ;;  %v18625_v53 = vld [vmem:[#allocation128_spill] sm:$0xff]  ;;  %v18626_v23 = vld [vmem:[#allocation109_spill] sm:$0xff]  ;;  %v18627_v3 = vld [vmem:[#allocation130_spill] sm:$0xff] }
 0x1a9   : > { %18615 = vst [vmem:[#allocation201_spill] sm:$0xff] %v16316_v14  ;;  %v16318_v41 = vcombine.low %v6817_v55, %v6820_v59  ;;  %v16335_v40 = vcombine.low %v15544_v47, %v15574_v39  ;;  %v16341_v61 = vcombine.low %v15606_v46, %v15610_v19  ;;  %v16354_v47 = vld [vmem:[%s18096_s1 + $0x30] sm:$0xff]   ;;  %v18620_v39 = vld [vmem:[#allocation95_spill] sm:$0xff]  ;;  %v16363_v43 = vcombine.low %v18624_v1, %v18623_v44  ;;  %v18628_v7 = vld [vmem:[#allocation101_spill] sm:$0xff] }
 0x1aa   : > { %11963 = vmatmul.mubr.msk.bf16.gmra.mrb[40].mxu1 %vm2029_vm2, %v16164_v8  ;;  %12555 = vmatmul.mubr.msk.bf16.gmra.mrb[104].mxu0 %vm2029_vm2, %v16166_v54  ;;  %18614 = vst [vmem:[#allocation200_spill] sm:$0xff] %v16312_v52  ;;  %v6823_v9 = vsel %vm14826_vm6, %v6821_v56, %v6822_v57  ;;  %v6826_v32 = vsel %vm14826_vm6, %v6824_v27, %v6825_v34  ;;  %v18621_v46 = vld [vmem:[#allocation92_spill] sm:$0xff]  ;;  %v18630_v59 = vld [vmem:[#allocation106_spill] sm:$0xff]  ;;  %v18631_v56 = vld [vmem:[#allocation105_spill] sm:$0xff] }
 0x1ab   : > { %11966 = vmatprep.mubr.msk.bf16.mxu1 %vm2029_vm2, %v16170_v63  ;;  %12558 = vmatprep.mubr.msk.bf16.mxu0 %vm2029_vm2, %v16172_v20  ;;  %18616 = vst [vmem:[#allocation202_spill] sm:$0xff] %v16318_v41  ;;  %18617 = vst [vmem:[#allocation203_spill] sm:$0xff] %v16335_v40  ;;  %v16337_v24 = vcombine.low %v6823_v9, %v6826_v32  ;;  %v16359_v19 = vcombine.low %v18621_v46, %v18620_v39  ;;  %v18629_v57 = vld [vmem:[#allocation100_spill] sm:$0xff]  ;;  %v18633_v9 = vld [vmem:[#allocation138_spill] sm:$0xff] }
 0x1ac   : > { %18619 = vst [vmem:[#allocation205_spill] sm:$0xff] %v16341_v61  ;;  %12182 = vmatprep.subr.bf16.mxu1 %v16354_v47  ;;  %v16379_v55 = vcombine.low %v18629_v57, %v18628_v7  ;;  %v16383_v27 = vcombine.low %v18631_v56, %v18630_v59  ;;  %v18632_v34 = vld [vmem:[#allocation136_spill] sm:$0xff]  ;;  %v18635_v39 = vld [vmem:[#allocation107_spill] sm:$0xff]  ;;  %v18636_v44 = vld [vmem:[#allocation110_spill] sm:$0xff] }
 0x1ad   : > { %18618 = vst [vmem:[#allocation204_spill] sm:$0xff] %v16337_v24  ;;  %18622 = vst [vmem:[#allocation95_spill] sm:$0xff] %v16359_v19  ;;  %v18634_v32 = vld [vmem:[#allocation108_spill] sm:$0xff]  ;;  %v18639_v7 = vld [vmem:[#allocation146_spill] sm:$0xff] }
 0x1ae   : > { %v16395_v46 = vcombine.low %v18635_v39, %v18634_v32  ;;  %v18637_v1 = vld [vmem:[#allocation116_spill] sm:$0xff]  ;;  %v18640_v57 = vld [vmem:[#allocation118_spill] sm:$0xff]  ;;  %v18641_v59 = vld [vmem:[#allocation117_spill] sm:$0xff] }
 0x1af   : > { %v16411_v56 = vcombine.low %v18641_v59, %v18640_v57  ;;  %v18642_v32 = vld [vmem:[#allocation119_spill] sm:$0xff]  ;;  %v18643_v39 = vld [vmem:[#allocation124_spill] sm:$0xff]  ;;  %v18647_v31 = vld [vmem:[#allocation125_spill] sm:$0xff] }
 0x1b0   : > { %v18648_v59 = vld [vmem:[#allocation127_spill] sm:$0xff] }
 0x1b2   : > { %11967 = vmatmul.mubr.msk.bf16.gmra.mrb[44].mxu1 %vm2029_vm2, %v16197_v29  ;;  %12559 = vmatmul.mubr.msk.bf16.gmra.mrb[108].mxu0 %vm2029_vm2, %v16199_v22 }
 0x1b3   : > { %11970 = vmatprep.mubr.msk.bf16.mxu1 %vm2029_vm2, %v16203_v0  ;;  %12562 = vmatprep.mubr.msk.bf16.mxu0 %vm2029_vm2, %v16205_v36 }
 0x1ba   : > { %11971 = vmatmul.mubr.msk.bf16.gmra.mrb[48].mxu1 %vm2029_vm2, %v16230_v18  ;;  %12563 = vmatmul.mubr.msk.bf16.gmra.mrb[112].mxu0 %vm2029_vm2, %v16232_v28 }
 0x1bb   : > { %11974 = vmatprep.mubr.msk.bf16.mxu1 %vm2029_vm2, %v16236_v37  ;;  %12566 = vmatprep.mubr.msk.bf16.mxu0 %vm2029_vm2, %v16238_v11 }
 0x1c2   : > { %11975 = vmatmul.mubr.msk.bf16.gmra.mrb[52].mxu1 %vm2029_vm2, %v16272_v60  ;;  %12567 = vmatmul.mubr.msk.bf16.gmra.mrb[116].mxu0 %vm2029_vm2, %v16274_v15 }
 0x1c3   : > { %11978 = vmatprep.mubr.msk.bf16.mxu1 %vm2029_vm2, %v16278_v5  ;;  %12570 = vmatprep.mubr.msk.bf16.mxu0 %vm2029_vm2, %v16280_v38 }
 0x1ca   : > { %11979 = vmatmul.mubr.msk.bf16.gmra.mrb[56].mxu1 %vm2029_vm2, %v16310_v62  ;;  %12571 = vmatmul.mubr.msk.bf16.gmra.mrb[120].mxu0 %vm2029_vm2, %v16312_v52 }
 0x1cb   : > { %11982 = vmatprep.mubr.msk.bf16.mxu1 %vm2029_vm2, %v16316_v14  ;;  %12574 = vmatprep.mubr.msk.bf16.mxu0 %vm2029_vm2, %v16318_v41  ;;  %v18646_v41 = vld [vmem:[#allocation126_spill] sm:$0xff] }
 0x1cc   : > { %v16427_v57 = vcombine.low %v18647_v31, %v18646_v41  ;;  %v18654_v41 = vld [vmem:[#allocation135_spill] sm:$0xff] }
 0x1d2   : > { %11983 = vmatmul.mubr.msk.bf16.gmra.mrb[60].mxu1 %vm2029_vm2, %v16335_v40  ;;  %12575 = vmatmul.mubr.msk.bf16.gmra.mrb[124].mxu0 %vm2029_vm2, %v16337_v24  ;;  %v18645_v24 = vld [vmem:[#allocation154_spill] sm:$0xff] }
 0x1d3   : > { %11986 = vmatprep.mubr.msk.bf16.mxu1 %vm2029_vm2, %v16341_v61  ;;  %12582 = vmatprep.mubr.msk.bf16.mxu0 %vm2029_vm2, %v15795_v16 }
 0x1da   : > { %11987 = vmatmul.mubr.msk.bf16.gmra.mrb[64].mxu1 %vm2029_vm2, %v16359_v19  ;;  %12583 = vmatmul.mubr.msk.bf16.vlgmr.msra.gmra.mrb[0].mxu0 %vm2029_vm2, %v18625_v53 }
 0x1db   : > { %12711 = vmatpush3.bf16.msra.mxu0 %v18626_v23  ;;  %11990 = vmatprep.mubr.msk.bf16.mxu1 %vm2029_vm2, %v16363_v43  ;;  %v16399_v23 = vcombine.low %v18637_v1, %v18636_v44  ;;  %v16415_v44 = vcombine.low %v18643_v39, %v18642_v32  ;;  %v18644_v1 = vld [vmem:[#allocation152_spill] sm:$0xff] }
 0x1dc   : > { %12586 = vmatprep.mubr.msk.bf16.mxu0 %vm2029_vm2, %v18627_v3  ;;  %12712 = vmatprep.subr.bf16.mxu0 %v14105_v33  ;;  %v18650_v39 = vld [vmem:[#allocation160_spill] sm:$0xff]  ;;  %v18688_v3 = vld [vmem:[#allocation111_spill] sm:$0xff] }
 0x1dd   : > { %v3876_v53 = vrot.slane %v18688_v3, 5 }
 0x1df   : > { %12713 = vmatpush3.bf16.msra.mxu0 %v14105_v33  ;;  %v18638_v33 = vld [vmem:[#allocation144_spill] sm:$0xff] }
 0x1e2   : > { %11991 = vmatmul.mubr.msk.bf16.gmra.mrb[68].mxu1 %vm2029_vm2, %v16379_v55  ;;  %12587 = vmatmul.mubr.msk.bf16.gmra.mrb[4].mxu0 %vm2029_vm2, %v18632_v34 }
 0x1e3   : > { %11994 = vmatprep.mubr.msk.bf16.mxu1 %vm2029_vm2, %v16383_v27  ;;  %12590 = vmatprep.mubr.msk.bf16.mxu0 %vm2029_vm2, %v18633_v9  ;;  %v18655_v9 = vld [vmem:[#allocation140_spill] sm:$0xff] }
 0x1ea   : > { %11995 = vmatmul.mubr.msk.bf16.gmra.mrb[72].mxu1 %vm2029_vm2, %v16395_v46  ;;  %12591 = vmatmul.mubr.msk.bf16.gmra.mrb[8].mxu0 %vm2029_vm2, %v18638_v33  ;;  %v18653_v33 = vld [vmem:[#allocation133_spill] sm:$0xff] }
 0x1eb   : > { %11998 = vmatprep.mubr.msk.bf16.mxu1 %vm2029_vm2, %v16399_v23  ;;  %12594 = vmatprep.mubr.msk.bf16.mxu0 %vm2029_vm2, %v18639_v7  ;;  %v18649_v7 = vld [vmem:[#allocation132_spill] sm:$0xff] }
 0x1ec   : > { %v16431_v32 = vcombine.low %v18649_v7, %v18648_v59  ;;  %v16447_v7 = vcombine.low %v18655_v9, %v18654_v41  ;;  %v18656_v59 = vld [vmem:[#allocation142_spill] sm:$0xff] }
 0x1ed   : > { %v18660_v41 = vld [vmem:[#allocation150_spill] sm:$0xff] }
 0x1f2   : > { %11999 = vmatmul.mubr.msk.bf16.gmra.mrb[76].mxu1 %vm2029_vm2, %v16411_v56  ;;  %12595 = vmatmul.mubr.msk.bf16.gmra.mrb[12].mxu0 %vm2029_vm2, %v18644_v1  ;;  %v18651_v1 = vld [vmem:[#allocation162_spill] sm:$0xff] }
 0x1f3   : > { %12002 = vmatprep.mubr.msk.bf16.mxu1 %vm2029_vm2, %v16415_v44  ;;  %12598 = vmatprep.mubr.msk.bf16.mxu0 %vm2029_vm2, %v18645_v24  ;;  %v18652_v24 = vld [vmem:[#allocation134_spill] sm:$0xff] }
 0x1f4   : > { %v16443_v31 = vcombine.low %v18653_v33, %v18652_v24  ;;  %v18658_v33 = vld [vmem:[#allocation143_spill] sm:$0xff] }
 0x1fa   : > { %12003 = vmatmul.mubr.msk.bf16.gmra.mrb[80].mxu1 %vm2029_vm2, %v16427_v57  ;;  %12599 = vmatmul.mubr.msk.bf16.gmra.mrb[16].mxu0 %vm2029_vm2, %v18650_v39  ;;  %v18659_v39 = vld [vmem:[#allocation148_spill] sm:$0xff] }
 0x1fb   : > { %12006 = vmatprep.mubr.msk.bf16.mxu1 %vm2029_vm2, %v16431_v32  ;;  %12602 = vmatprep.mubr.msk.bf16.mxu0 %vm2029_vm2, %v18651_v1  ;;  %v18657_v1 = vld [vmem:[#allocation141_spill] sm:$0xff]  ;;  %v16463_v9 = vcombine.low %v18659_v39, %v18658_v33 }
 0x1fc   : > { %v16459_v24 = vcombine.low %v18657_v1, %v18656_v59  ;;  %v18662_v59 = vld [vmem:[#allocation151_spill] sm:$0xff]  ;;  %v18665_v33 = vld [vmem:[#allocation157_spill] sm:$0xff] }
 0x202   : > { %12007 = vmatmul.mubr.msk.bf16.gmra.mrb[84].mxu1 %vm2029_vm2, %v16443_v31  ;;  %12603 = vmatmul.mubr.msk.bf16.gmra.mrb[20].mxu0 %vm2029_vm2, %v16059_v6  ;;  %v18663_v6 = vld [vmem:[#allocation156_spill] sm:$0xff] }
 0x203   : > { %12010 = vmatprep.mubr.msk.bf16.mxu1 %vm2029_vm2, %v16447_v7  ;;  %12606 = vmatprep.mubr.msk.bf16.mxu0 %vm2029_vm2, %v16065_v50  ;;  %v18661_v50 = vld [vmem:[#allocation149_spill] sm:$0xff]  ;;  %v16479_v39 = vcombine.low %v18663_v6, %v18662_v59  ;;  %v18666_v6 = vld [vmem:[#allocation159_spill] sm:$0xff]  ;;  %v18667_v59 = vld [vmem:[#allocation164_spill] sm:$0xff] }
 0x204   : > { %v16475_v1 = vcombine.low %v18661_v50, %v18660_v41  ;;  %v18664_v50 = vld [vmem:[#allocation158_spill] sm:$0xff] }
 0x205   : > { %v16491_v41 = vcombine.low %v18665_v33, %v18664_v50  ;;  %v18672_v33 = vld [vmem:[#allocation167_spill] sm:$0xff] }
 0x20a   : > { %12011 = vmatmul.mubr.msk.bf16.gmra.mrb[88].mxu1 %vm2029_vm2, %v16459_v24  ;;  %12607 = vmatmul.mubr.msk.bf16.gmra.mrb[24].mxu0 %vm2029_vm2, %v16098_v25 }
 0x20b   : > { %12014 = vmatprep.mubr.msk.bf16.mxu1 %vm2029_vm2, %v16463_v9  ;;  %12610 = vmatprep.mubr.msk.bf16.mxu0 %vm2029_vm2, %v16104_v30  ;;  %v16495_v30 = vcombine.low %v18667_v59, %v18666_v6  ;;  %v18673_v6 = vld [vmem:[#allocation172_spill] sm:$0xff] }
 0x20c   : > { %v16511_v59 = vcombine.low %v18673_v6, %v18672_v33  ;;  %v14294_v33 = vld [vmem:[%s14405_s6 + $0x21c] sm:$0xf]  ;;  %v14295_v6 = vld [vmem:[%s14405_s6 + $0x220] sm:$0xf] }
 0x20d   : > { %18668 = vst [vmem:[#allocation92_spill] sm:$0xff] %v16495_v30 }
 0x20e   : > { %18674 = vst [vmem:[#allocation98_spill] sm:$0xff] %v16511_v59 }
 0x212   : > { %12015 = vmatmul.mubr.msk.bf16.gmra.mrb[92].mxu1 %vm2029_vm2, %v16475_v1  ;;  %12611 = vmatmul.mubr.msk.bf16.gmra.mrb[28].mxu0 %vm2029_vm2, %v16131_v58  ;;  %v18670_v58 = vld [vmem:[#allocation165_spill] sm:$0xff] }
 0x213   : > { %12018 = vmatprep.mubr.msk.bf16.mxu1 %vm2029_vm2, %v16479_v39  ;;  %12614 = vmatprep.mubr.msk.bf16.mxu0 %vm2029_vm2, %v16137_v2  ;;  %v18669_v2 = vld [vmem:[#allocation166_spill] sm:$0xff] }
 0x214   : > { %v16507_v50 = vcombine.low %v18670_v58, %v18669_v2  ;;  %v14293_v58 = vld [vmem:[%s14405_s6 + $0x214] sm:$0xf]  ;;  %v18675_v2 = vld [vmem:[#allocation173_spill] sm:$0xff] }
 0x216   : > { %18671 = vst [vmem:[#allocation99_spill] sm:$0xff] %v16507_v50 }
 0x21a   : > { %12019 = vmatmul.mubr.msk.bf16.gmra.mrb[96].mxu1 %vm2029_vm2, %v16491_v41  ;;  %12615 = vmatmul.mubr.msk.bf16.gmra.mrb[32].mxu0 %vm2029_vm2, %v16164_v8  ;;  %v16527_v8 = vcombine.low %v14294_v33, %v14295_v6  ;;  %v14298_v33 = vld [vmem:[%s14405_s6 + $0x230] sm:$0xf]  ;;  %v14299_v6 = vld [vmem:[%s14405_s6 + $0x234] sm:$0xf] }
 0x21b   : > { %12022 = vmatprep.mubr.msk.bf16.mxu1 %vm2029_vm2, %v16495_v30  ;;  %12618 = vmatprep.mubr.msk.bf16.mxu0 %vm2029_vm2, %v16170_v63  ;;  %v16523_v63 = vcombine.low %v18675_v2, %v14293_v58  ;;  %v14296_v58 = vld [vmem:[%s14405_s6 + $0x224] sm:$0xf]  ;;  %v14297_v2 = vld [vmem:[%s14405_s6 + $0x228] sm:$0xf] }
 0x21c   : > { %18677 = vst [vmem:[#allocation101_spill] sm:$0xff] %v16527_v8 }
 0x21d   : > { %18676 = vst [vmem:[#allocation109_spill] sm:$0xff] %v16523_v63 }
 0x222   : > { %12023 = vmatmul.mubr.msk.bf16.gmra.mrb[100].mxu1 %vm2029_vm2, %v16507_v50  ;;  %12619 = vmatmul.mubr.msk.bf16.gmra.mrb[36].mxu0 %vm2029_vm2, %v16197_v29  ;;  %v16543_v29 = vcombine.low %v14298_v33, %v14299_v6  ;;  %v14302_v33 = vld [vmem:[%s14405_s6 + $0x244] sm:$0xf]  ;;  %v14303_v6 = vld [vmem:[%s14405_s6 + $0x248] sm:$0xf] }
 0x223   : > { %12026 = vmatprep.mubr.msk.bf16.mxu1 %vm2029_vm2, %v16511_v59  ;;  %12622 = vmatprep.mubr.msk.bf16.mxu0 %vm2029_vm2, %v16203_v0  ;;  %v16539_v0 = vcombine.low %v14296_v58, %v14297_v2  ;;  %v14300_v58 = vld [vmem:[%s14405_s6 + $0x238] sm:$0xf]  ;;  %v14301_v2 = vld [vmem:[%s14405_s6 + $0x23c] sm:$0xf] }
 0x224   : > { %18679 = vst [vmem:[#allocation106_spill] sm:$0xff] %v16543_v29 }
 0x225   : > { %18678 = vst [vmem:[#allocation100_spill] sm:$0xff] %v16539_v0 }
 0x22a   : > { %12027 = vmatmul.mubr.msk.bf16.gmra.mrb[104].mxu1 %vm2029_vm2, %v16523_v63  ;;  %12623 = vmatmul.mubr.msk.bf16.gmra.mrb[40].mxu0 %vm2029_vm2, %v16230_v18  ;;  %v16559_v18 = vcombine.low %v14302_v33, %v14303_v6  ;;  %v14306_v33 = vld [vmem:[%s14405_s6 + $0x258] sm:$0xf]  ;;  %v14307_v6 = vld [vmem:[%s14405_s6 + $0x25c] sm:$0xf] }
 0x22b   : > { %12030 = vmatprep.mubr.msk.bf16.mxu1 %vm2029_vm2, %v16527_v8  ;;  %12626 = vmatprep.mubr.msk.bf16.mxu0 %vm2029_vm2, %v16236_v37  ;;  %v16555_v37 = vcombine.low %v14300_v58, %v14301_v2  ;;  %v14304_v58 = vld [vmem:[%s14405_s6 + $0x24c] sm:$0xf]  ;;  %v14305_v2 = vld [vmem:[%s14405_s6 + $0x250] sm:$0xf] }
 0x22c   : > { %18681 = vst [vmem:[#allocation108_spill] sm:$0xff] %v16559_v18 }
 0x22d   : > { %18680 = vst [vmem:[#allocation105_spill] sm:$0xff] %v16555_v37 }
 0x232   : > { %12031 = vmatmul.mubr.msk.bf16.gmra.mrb[108].mxu1 %vm2029_vm2, %v16539_v0  ;;  %12627 = vmatmul.mubr.msk.bf16.gmra.mrb[44].mxu0 %vm2029_vm2, %v16272_v60  ;;  %v16575_v60 = vcombine.low %v14306_v33, %v14307_v6  ;;  %v16592_v33 = vcombine.low %v15562_v13, %v15569_v48  ;;  %v18687_v6 = vld [vmem:[#allocation96_spill] sm:$0xff] }
 0x233   : > { %12034 = vmatprep.mubr.msk.bf16.mxu1 %vm2029_vm2, %v16543_v29  ;;  %12630 = vmatprep.mubr.msk.bf16.mxu0 %vm2029_vm2, %v16278_v5  ;;  %v16571_v5 = vcombine.low %v14304_v58, %v14305_v2  ;;  %v14308_v58 = vld [vmem:[%s14405_s6 + $0x260] sm:$0xf]  ;;  %v14309_v2 = vld [vmem:[%s14405_s6 + $0x264] sm:$0xf]  ;;  %v10587_v34 = vrot.slane %v18687_v6, 9 }
 0x234   : > { %18683 = vst [vmem:[#allocation110_spill] sm:$0xff] %v16575_v60  ;;  %v16588_v25 = vcombine.low %v14308_v58, %v14309_v2  ;;  %18686 = vst [vmem:[#allocation118_spill] sm:$0xff] %v16592_v33  ;;  %v16611_v58 = vcombine.low %v15581_v21, %v15601_v49  ;;  %v14310_v2 = vld [vmem:[%s14405_s6 + $0x10] sm:$0x1] }
 0x235   : > { %18682 = vst [vmem:[#allocation107_spill] sm:$0xff] %v16571_v5  ;;  %v3882_v6 = vrot.slane %v14310_v2, 5  ;;  %v18699_v2 = vld [vmem:[#allocation49_spill] sm:$0xff] }
 0x236   : > { %18685 = vst [vmem:[#allocation116_spill] sm:$0xff] %v16588_v25  ;;  %18690 = vst [vmem:[#allocation117_spill] sm:$0xff] %v16611_v58 }
 0x23a   : > { %12035 = vmatmul.mubr.msk.bf16.gmra.mrb[112].mxu1 %vm2029_vm2, %v16555_v37  ;;  %12631 = vmatmul.mubr.msk.bf16.gmra.mrb[48].mxu0 %vm2029_vm2, %v16310_v62 }
 0x23b   : > { %12038 = vmatprep.mubr.msk.bf16.mxu1 %vm2029_vm2, %v16559_v18  ;;  %12634 = vmatprep.mubr.msk.bf16.mxu0 %vm2029_vm2, %v16316_v14  ;;  %v18684_v14 = vld [vmem:[#allocation97_spill] sm:$0xff] }
 0x23c   : > { %v3873_v62 = vrot.slane %v18684_v14, 5  ;;  %v18689_v14 = vld [vmem:[#allocation112_spill] sm:$0xff] }
 0x23d   : > { %v3879_v48 = vrot.slane %v18689_v14, 5  ;;  %v18695_v14 = vld [vmem:[#allocation40_spill] sm:$0xff] }
 0x23e   : > { %v3874_v13 = vsel %vm14826_vm6, %v10587_v34, %v3873_v62  ;;  %v18694_v34 = vld [vmem:[#allocation38_spill] sm:$0xff] }
 0x23f   : > { %v3881_v16 = vrot.slane %v3879_v48, 4 }
 0x241   : > { %v3883_v21 = vsel %vm14826_vm6, %v3881_v16, %v3882_v6  ;;  %v18691_v16 = vld [vmem:[#allocation34_spill] sm:$0xff]  ;;  %v18700_v6 = vld [vmem:[#allocation51_spill] sm:$0xff] }
 0x242   : > { %12039 = vmatmul.mubr.msk.bf16.gmra.mrb[116].mxu1 %vm2029_vm2, %v16571_v5  ;;  %12635 = vmatmul.mubr.msk.bf16.gmra.mrb[52].mxu0 %vm2029_vm2, %v16335_v40  ;;  %v3875_v40 = vrot.slane %v3873_v62, 4  ;;  %v16628_v62 = vld [vmem:[%s18096_s1 + $0x80] sm:$0xff]  }
 0x243   : > { %12042 = vmatprep.mubr.msk.bf16.mxu1 %vm2029_vm2, %v16575_v60  ;;  %12638 = vmatprep.mubr.msk.bf16.mxu0 %vm2029_vm2, %v16341_v61 }
 0x244   : > { %v3877_v3 = vsel %vm14826_vm6, %v3875_v40, %v3876_v53  ;;  %12842 = vmatprep.subr.bf16.mxu0 %v16628_v62 }
 0x245   : > { %v10623_v61 = vcombine.low %v3874_v13, %v3877_v3  ;;  %v18697_v13 = vld [vmem:[#allocation44_spill] sm:$0xff]  ;;  %v18698_v3 = vld [vmem:[#allocation47_spill] sm:$0xff] }
 0x24a   : > { %12043 = vmatmul.mubr.msk.bf16.gmra.mrb[120].mxu1 %vm2029_vm2, %v16588_v25  ;;  %12639 = vmatmul.mubr.msk.bf16.gmra.mrb[56].mxu0 %vm2029_vm2, %v16359_v19  ;;  %v3878_v19 = vrot.slane %v3876_v53, 4  ;;  %v18692_v53 = vld [vmem:[#allocation35_spill] sm:$0xff] }
 0x24b   : > { %12046 = vmatprep.mubr.msk.bf16.mxu1 %vm2029_vm2, %v16592_v33  ;;  %12642 = vmatprep.mubr.msk.bf16.mxu0 %vm2029_vm2, %v16363_v43 }
 0x24c   : > { %v3880_v49 = vsel %vm14826_vm6, %v3878_v19, %v3879_v48  ;;  %v16645_v19 = vld [vmem:[%s18096_s1 + $0x40] sm:$0xff]   ;;  %v18696_v48 = vld [vmem:[#allocation43_spill] sm:$0xff] }
 0x24d   : > { %v10624_v40 = vcombine.low %v3880_v49, %v3883_v21  ;;  %v18701_v49 = vld [vmem:[#allocation53_spill] sm:$0xff]  ;;  %v18702_v21 = vld [vmem:[#allocation54_spill] sm:$0xff] }
 0x252   : > { %12047 = vmatmul.mubr.msk.bf16.gmra.mrb[124].mxu1 %vm2029_vm2, %v16611_v58  ;;  %12643 = vmatmul.mubr.msk.bf16.gmra.mrb[60].mxu0 %vm2029_vm2, %v16379_v55 }
 0x253   : > { %12054 = vmatprep.mubr.msk.bf16.mxu1 %vm2029_vm2, %v10623_v61  ;;  %12646 = vmatprep.mubr.msk.bf16.mxu0 %vm2029_vm2, %v16383_v27  ;;  %v14110_v61 = vld [vmem:[%s18096_s1 + $0x38] sm:$0xff]  }
 0x25a   : > { %12055 = vmatmul.mubr.msk.bf16.vlgmr.msra.gmra.mrb[0].mxu1 %vm2029_vm2, %v10624_v40  ;;  %12647 = vmatmul.mubr.msk.bf16.gmra.mrb[64].mxu0 %vm2029_vm2, %v16395_v46  ;;  %v18703_v40 = vld [vmem:[#allocation56_spill] sm:$0xff] }
 0x25b   : > { %12183 = vmatpush3.bf16.msra.mxu1 %v16354_v47  ;;  %12058 = vmatprep.mubr.msk.bf16.mxu1 %vm2029_vm2, %v18691_v16  ;;  %v18693_v47 = vld [vmem:[#allocation36_spill] sm:$0xff] }
 0x25c   : > { %12650 = vmatprep.mubr.msk.bf16.mxu0 %vm2029_vm2, %v16399_v23  ;;  %12184 = vmatprep.subr.bf16.mxu1 %v14110_v61  ;;  %v18705_v16 = vld [vmem:[#allocation60_spill] sm:$0xff] }
 0x25f   : > { %12185 = vmatpush3.bf16.msra.mxu1 %v14110_v61  ;;  %v18704_v61 = vld [vmem:[#allocation58_spill] sm:$0xff] }
 0x260   : > { %12974 = vmatprep.subr.bf16.mxu1 %v16645_v19 }
 0x262   : > { %12059 = vmatmul.mubr.msk.bf16.gmra.mrb[4].mxu1 %vm2029_vm2, %v18692_v53  ;;  %12651 = vmatmul.mubr.msk.bf16.gmra.mrb[68].mxu0 %vm2029_vm2, %v16411_v56  ;;  %v18706_v53 = vld [vmem:[#allocation63_spill] sm:$0xff] }
 0x263   : > { %12062 = vmatprep.mubr.msk.bf16.mxu1 %vm2029_vm2, %v18693_v47  ;;  %12654 = vmatprep.mubr.msk.bf16.mxu0 %vm2029_vm2, %v16415_v44 }
 0x26a   : > { %12063 = vmatmul.mubr.msk.bf16.gmra.mrb[8].mxu1 %vm2029_vm2, %v18694_v34  ;;  %12655 = vmatmul.mubr.msk.bf16.gmra.mrb[72].mxu0 %vm2029_vm2, %v16427_v57 }
 0x26b   : > { %12066 = vmatprep.mubr.msk.bf16.mxu1 %vm2029_vm2, %v18695_v14  ;;  %12658 = vmatprep.mubr.msk.bf16.mxu0 %vm2029_vm2, %v16431_v32 }
 0x272   : > { %12067 = vmatmul.mubr.msk.bf16.gmra.mrb[12].mxu1 %vm2029_vm2, %v18696_v48  ;;  %12659 = vmatmul.mubr.msk.bf16.gmra.mrb[76].mxu0 %vm2029_vm2, %v16443_v31 }
 0x273   : > { %12070 = vmatprep.mubr.msk.bf16.mxu1 %vm2029_vm2, %v18697_v13  ;;  %12662 = vmatprep.mubr.msk.bf16.mxu0 %vm2029_vm2, %v16447_v7 }
 0x27a   : > { %12071 = vmatmul.mubr.msk.bf16.gmra.mrb[16].mxu1 %vm2029_vm2, %v18698_v3  ;;  %12663 = vmatmul.mubr.msk.bf16.gmra.mrb[80].mxu0 %vm2029_vm2, %v16459_v24 }
 0x27b   : > { %12074 = vmatprep.mubr.msk.bf16.mxu1 %vm2029_vm2, %v18699_v2  ;;  %12666 = vmatprep.mubr.msk.bf16.mxu0 %vm2029_vm2, %v16463_v9 }
 0x282   : > { %12075 = vmatmul.mubr.msk.bf16.gmra.mrb[20].mxu1 %vm2029_vm2, %v18700_v6  ;;  %12667 = vmatmul.mubr.msk.bf16.gmra.mrb[84].mxu0 %vm2029_vm2, %v16475_v1 }
 0x283   : > { %12078 = vmatprep.mubr.msk.bf16.mxu1 %vm2029_vm2, %v18701_v49  ;;  %12670 = vmatprep.mubr.msk.bf16.mxu0 %vm2029_vm2, %v16479_v39 }
 0x28a   : > { %12079 = vmatmul.mubr.msk.bf16.gmra.mrb[24].mxu1 %vm2029_vm2, %v18702_v21  ;;  %12671 = vmatmul.mubr.msk.bf16.gmra.mrb[88].mxu0 %vm2029_vm2, %v16491_v41 }
 0x28b   : > { %12082 = vmatprep.mubr.msk.bf16.mxu1 %vm2029_vm2, %v18703_v40  ;;  %12674 = vmatprep.mubr.msk.bf16.mxu0 %vm2029_vm2, %v16495_v30  ;;  %v18708_v30 = vld [vmem:[#allocation67_spill] sm:$0xff] }
 0x292   : > { %12083 = vmatmul.mubr.msk.bf16.gmra.mrb[28].mxu1 %vm2029_vm2, %v18704_v61  ;;  %12675 = vmatmul.mubr.msk.bf16.gmra.mrb[92].mxu0 %vm2029_vm2, %v16507_v50  ;;  %v18709_v50 = vld [vmem:[#allocation69_spill] sm:$0xff] }
 0x293   : > { %12086 = vmatprep.mubr.msk.bf16.mxu1 %vm2029_vm2, %v18705_v16  ;;  %12678 = vmatprep.mubr.msk.bf16.mxu0 %vm2029_vm2, %v16511_v59  ;;  %v18710_v59 = vld [vmem:[#allocation70_spill] sm:$0xff] }
 0x29a   : > { %12087 = vmatmul.mubr.msk.bf16.gmra.mrb[32].mxu1 %vm2029_vm2, %v18706_v53  ;;  %12679 = vmatmul.mubr.msk.bf16.gmra.mrb[96].mxu0 %vm2029_vm2, %v16523_v63  ;;  %v18711_v63 = vld [vmem:[#allocation72_spill] sm:$0xff] }
 0x29b   : > { %12090 = vmatprep.mubr.msk.bf16.mxu1 %vm2029_vm2, %v18707_v26  ;;  %12682 = vmatprep.mubr.msk.bf16.mxu0 %vm2029_vm2, %v16527_v8  ;;  %v18715_v8 = vld [vmem:[#allocation81_spill] sm:$0xff] }
 0x2a2   : > { %12091 = vmatmul.mubr.msk.bf16.gmra.mrb[36].mxu1 %vm2029_vm2, %v18708_v30  ;;  %12683 = vmatmul.mubr.msk.bf16.gmra.mrb[100].mxu0 %vm2029_vm2, %v16539_v0  ;;  %v18712_v0 = vld [vmem:[#allocation74_spill] sm:$0xff] }
 0x2a3   : > { %12094 = vmatprep.mubr.msk.bf16.mxu1 %vm2029_vm2, %v18709_v50  ;;  %12686 = vmatprep.mubr.msk.bf16.mxu0 %vm2029_vm2, %v16543_v29  ;;  %v18713_v29 = vld [vmem:[#allocation76_spill] sm:$0xff]  ;;  %v17054_v50 = vld [vmem:[%s14405_s6 + $0x2a4] sm:$0x1] }
 0x2aa   : > { %12095 = vmatmul.mubr.msk.bf16.gmra.mrb[40].mxu1 %vm2029_vm2, %v18710_v59  ;;  %12687 = vmatmul.mubr.msk.bf16.gmra.mrb[104].mxu0 %vm2029_vm2, %v16555_v37  ;;  %v18714_v37 = vld [vmem:[#allocation79_spill] sm:$0xff] }
 0x2ab   : > { %12098 = vmatprep.mubr.msk.bf16.mxu1 %vm2029_vm2, %v18711_v63  ;;  %12690 = vmatprep.mubr.msk.bf16.mxu0 %vm2029_vm2, %v16559_v18  ;;  %v18717_v18 = vld [vmem:[#allocation83_spill] sm:$0xff]  ;;  %v18728_v63 = vld [vmem:[#allocation4_spill] sm:$0xff] }
 0x2b2   : > { %12099 = vmatmul.mubr.msk.bf16.gmra.mrb[44].mxu1 %vm2029_vm2, %v18712_v0  ;;  %12691 = vmatmul.mubr.msk.bf16.gmra.mrb[108].mxu0 %vm2029_vm2, %v16571_v5  ;;  %v16746_v5 = vcombine.low %v16265_v42, %v16244_v35  ;;  %v18724_v0 = vld [vmem:[#allocation90_spill] sm:$0xff] }
 0x2b3   : > { %12102 = vmatprep.mubr.msk.bf16.mxu1 %vm2029_vm2, %v18713_v29  ;;  %12694 = vmatprep.mubr.msk.bf16.mxu0 %vm2029_vm2, %v16575_v60  ;;  %v18718_v60 = vld [vmem:[#allocation85_spill] sm:$0xff] }
 0x2b4   : > { %18716 = vst [vmem:[#allocation119_spill] sm:$0xff] %v16746_v5 }
 0x2ba   : > { %12103 = vmatmul.mubr.msk.bf16.gmra.mrb[48].mxu1 %vm2029_vm2, %v18714_v37  ;;  %12695 = vmatmul.mubr.msk.bf16.gmra.mrb[112].mxu0 %vm2029_vm2, %v16588_v25  ;;  %v16757_v25 = vld [vmem:[%s14405_s6 + $0x294] sm:$0xf]  ;;  %v18722_v37 = vld [vmem:[#allocation86_spill] sm:$0xff] }
 0x2bb   : > { %12106 = vmatprep.mubr.msk.bf16.mxu1 %vm2029_vm2, %v18715_v8  ;;  %12698 = vmatprep.mubr.msk.bf16.mxu0 %vm2029_vm2, %v16592_v33  ;;  %18719 = vst [vmem:[#allocation124_spill] sm:$0xff] %v16757_v25  ;;  %v16760_v8 = vld [vmem:[%s14405_s6 + $0x298] sm:$0xf]  ;;  %v16764_v33 = vcombine.low %v16268_v17, %v16286_v4 }
 0x2bc   : > { %18720 = vst [vmem:[#allocation126_spill] sm:$0xff] %v16760_v8 }
 0x2bd   : > { %18721 = vst [vmem:[#allocation125_spill] sm:$0xff] %v16764_v33 }
 0x2c2   : > { %12107 = vmatmul.mubr.msk.bf16.gmra.mrb[52].mxu1 %vm2029_vm2, %v18717_v18  ;;  %12699 = vmatmul.mubr.msk.bf16.gmra.mrb[116].mxu0 %vm2029_vm2, %v16611_v58  ;;  %v10974_v18 = vcombine.low %v16757_v25, %v16760_v8  ;;  %v18723_v58 = vld [vmem:[#allocation88_spill] sm:$0xff] }
 0x2c3   : > { %12110 = vmatprep.mubr.msk.bf16.mxu1 %vm2029_vm2, %v18718_v60  ;;  %12702 = vmatprep.mubr.msk.bf16.mxu0 %vm2029_vm2, %v16746_v5  ;;  %v16776_v5 = vld [vmem:[%s14405_s6 + $0x29c] sm:$0xf]  ;;  %v16779_v60 = vld [vmem:[%s14405_s6 + $0x2a0] sm:$0xf] }
 0x2c4   : > { %v10975_v29 = vcombine.low %v16776_v5, %v16779_v60 }
 0x2ca   : > { %12111 = vmatmul.mubr.msk.bf16.gmra.mrb[56].mxu1 %vm2029_vm2, %v18722_v37  ;;  %12703 = vmatmul.mubr.msk.bf16.gmra.mrb[120].mxu0 %vm2029_vm2, %v16764_v33  ;;  %v18725_v37 = vld [vmem:[#allocation93_spill] sm:$0xff]  ;;  %v18726_v33 = vld [vmem:[#allocation3_spill] sm:$0xff] }
 0x2cb   : > { %12114 = vmatprep.mubr.msk.bf16.mxu1 %vm2029_vm2, %v18723_v58  ;;  %12706 = vmatprep.mubr.msk.bf16.mxu0 %vm2029_vm2, %v10974_v18  ;;  %v14112_v18 = vld [vmem:[%s18096_s1 + $0x88] sm:$0xff]  }
 0x2cc   : > { %v18727_v58 = vld [vmem:[#allocation103_spill] sm:$0xff] }
 0x2d2   : > { %12115 = vmatmul.mubr.msk.bf16.gmra.mrb[60].mxu1 %vm2029_vm2, %v18724_v0  ;;  %12707 = vmatmul.mubr.msk.bf16.gmra.mrb[124].mxu0 %vm2029_vm2, %v10975_v29  ;;  %v18729_v0 = vld [vmem:[#allocation104_spill] sm:$0xff]  ;;  %v18730_v29 = vld [vmem:[#allocation5_spill] sm:$0xff] }
 0x2d3   : > { %12118 = vmatprep.mubr.msk.bf16.mxu1 %vm2029_vm2, %v18725_v37  ;;  %12714 = vmatprep.mubr.msk.bf16.mxu0 %vm2029_vm2, %v18726_v33  ;;  %v18731_v33 = vld [vmem:[#allocation113_spill] sm:$0xff]  ;;  %v18732_v37 = vld [vmem:[#allocation6_spill] sm:$0xff] }
 0x2da   : > { %12119 = vmatmul.mubr.msk.bf16.gmra.mrb[64].mxu1 %vm2029_vm2, %v18727_v58  ;;  %12715 = vmatmul.mubr.msk.bf16.vlgmr.msra.gmra.mrb[0].mxu0 %vm2029_vm2, %v18728_v63  ;;  %v18733_v58 = vld [vmem:[#allocation115_spill] sm:$0xff] }
 0x2db   : > { %12843 = vmatpush3.bf16.msra.mxu0 %v16628_v62  ;;  %12122 = vmatprep.mubr.msk.bf16.mxu1 %vm2029_vm2, %v18729_v0  ;;  %v18734_v63 = vld [vmem:[#allocation7_spill] sm:$0xff]  ;;  %v18735_v62 = vld [vmem:[#allocation121_spill] sm:$0xff]  ;;  %v18736_v0 = vld [vmem:[#allocation8_spill] sm:$0xff] }
 0x2dc   : > { %12718 = vmatprep.mubr.msk.bf16.mxu0 %vm2029_vm2, %v18730_v29  ;;  %12844 = vmatprep.subr.bf16.mxu0 %v14112_v18  ;;  %v18737_v29 = vld [vmem:[#allocation123_spill] sm:$0xff] }
 0x2df   : > { %12845 = vmatpush3.bf16.msra.mxu0 %v14112_v18  ;;  %v18738_v18 = vld [vmem:[#allocation9_spill] sm:$0xff] }
 0x2e2   : > { %12123 = vmatmul.mubr.msk.bf16.gmra.mrb[68].mxu1 %vm2029_vm2, %v18731_v33  ;;  %12719 = vmatmul.mubr.msk.bf16.gmra.mrb[4].mxu0 %vm2029_vm2, %v18732_v37  ;;  %v18739_v33 = vld [vmem:[#allocation129_spill] sm:$0xff]  ;;  %v18740_v37 = vld [vmem:[#allocation10_spill] sm:$0xff] }
 0x2e3   : > { %12126 = vmatprep.mubr.msk.bf16.mxu1 %vm2029_vm2, %v18733_v58  ;;  %12722 = vmatprep.mubr.msk.bf16.mxu0 %vm2029_vm2, %v18734_v63  ;;  %v18741_v58 = vld [vmem:[#allocation131_spill] sm:$0xff] }
 0x2e4   : > { %v18742_v63 = vld [vmem:[#allocation11_spill] sm:$0xff] }
 0x2ea   : > { %12127 = vmatmul.mubr.msk.bf16.gmra.mrb[72].mxu1 %vm2029_vm2, %v18735_v62  ;;  %12723 = vmatmul.mubr.msk.bf16.gmra.mrb[8].mxu0 %vm2029_vm2, %v18736_v0  ;;  %v18743_v62 = vld [vmem:[#allocation137_spill] sm:$0xff]  ;;  %v18744_v0 = vld [vmem:[#allocation12_spill] sm:$0xff] }
 0x2eb   : > { %12130 = vmatprep.mubr.msk.bf16.mxu1 %vm2029_vm2, %v18737_v29  ;;  %12726 = vmatprep.mubr.msk.bf16.mxu0 %vm2029_vm2, %v18738_v18  ;;  %v18745_v29 = vld [vmem:[#allocation139_spill] sm:$0xff]  ;;  %v18746_v18 = vld [vmem:[#allocation13_spill] sm:$0xff] }
 0x2f2   : > { %12131 = vmatmul.mubr.msk.bf16.gmra.mrb[76].mxu1 %vm2029_vm2, %v18739_v33  ;;  %12727 = vmatmul.mubr.msk.bf16.gmra.mrb[12].mxu0 %vm2029_vm2, %v18740_v37  ;;  %v18747_v33 = vld [vmem:[#allocation145_spill] sm:$0xff]  ;;  %v18748_v37 = vld [vmem:[#allocation14_spill] sm:$0xff] }
 0x2f3   : > { %12134 = vmatprep.mubr.msk.bf16.mxu1 %vm2029_vm2, %v18741_v58  ;;  %12730 = vmatprep.mubr.msk.bf16.mxu0 %vm2029_vm2, %v18742_v63  ;;  %v18749_v58 = vld [vmem:[#allocation147_spill] sm:$0xff] }
 0x2f4   : > { %v18750_v63 = vld [vmem:[#allocation15_spill] sm:$0xff] }
 0x2fa   : > { %12135 = vmatmul.mubr.msk.bf16.gmra.mrb[80].mxu1 %vm2029_vm2, %v18743_v62  ;;  %12731 = vmatmul.mubr.msk.bf16.gmra.mrb[16].mxu0 %vm2029_vm2, %v18744_v0  ;;  %v18751_v62 = vld [vmem:[#allocation153_spill] sm:$0xff]  ;;  %v18752_v0 = vld [vmem:[#allocation16_spill] sm:$0xff] }
 0x2fb   : > { %12138 = vmatprep.mubr.msk.bf16.mxu1 %vm2029_vm2, %v18745_v29  ;;  %12734 = vmatprep.mubr.msk.bf16.mxu0 %vm2029_vm2, %v18746_v18  ;;  %v18753_v29 = vld [vmem:[#allocation155_spill] sm:$0xff]  ;;  %v18754_v18 = vld [vmem:[#allocation17_spill] sm:$0xff] }
 0x302   : > { %12139 = vmatmul.mubr.msk.bf16.gmra.mrb[84].mxu1 %vm2029_vm2, %v18747_v33  ;;  %12735 = vmatmul.mubr.msk.bf16.gmra.mrb[20].mxu0 %vm2029_vm2, %v18748_v37  ;;  %v18755_v33 = vld [vmem:[#allocation161_spill] sm:$0xff]  ;;  %v18756_v37 = vld [vmem:[#allocation18_spill] sm:$0xff] }
 0x303   : > { %12142 = vmatprep.mubr.msk.bf16.mxu1 %vm2029_vm2, %v18749_v58  ;;  %12738 = vmatprep.mubr.msk.bf16.mxu0 %vm2029_vm2, %v18750_v63  ;;  %v18757_v58 = vld [vmem:[#allocation163_spill] sm:$0xff] }
 0x304   : > { %v18758_v63 = vld [vmem:[#allocation19_spill] sm:$0xff] }
 0x30a   : > { %12143 = vmatmul.mubr.msk.bf16.gmra.mrb[88].mxu1 %vm2029_vm2, %v18751_v62  ;;  %12739 = vmatmul.mubr.msk.bf16.gmra.mrb[24].mxu0 %vm2029_vm2, %v18752_v0  ;;  %v18759_v62 = vld [vmem:[#allocation169_spill] sm:$0xff]  ;;  %v18760_v0 = vld [vmem:[#allocation20_spill] sm:$0xff] }
 0x30b   : > { %12146 = vmatprep.mubr.msk.bf16.mxu1 %vm2029_vm2, %v18753_v29  ;;  %12742 = vmatprep.mubr.msk.bf16.mxu0 %vm2029_vm2, %v18754_v18  ;;  %v18761_v29 = vld [vmem:[#allocation171_spill] sm:$0xff]  ;;  %v18762_v18 = vld [vmem:[#allocation21_spill] sm:$0xff] }
 0x312   : > { %12147 = vmatmul.mubr.msk.bf16.gmra.mrb[92].mxu1 %vm2029_vm2, %v18755_v33  ;;  %12743 = vmatmul.mubr.msk.bf16.gmra.mrb[28].mxu0 %vm2029_vm2, %v18756_v37  ;;  %v18763_v37 = vld [vmem:[#allocation22_spill] sm:$0xff] }
 0x313   : > { %12150 = vmatprep.mubr.msk.bf16.mxu1 %vm2029_vm2, %v18757_v58  ;;  %12746 = vmatprep.mubr.msk.bf16.mxu0 %vm2029_vm2, %v18758_v63  ;;  %v18764_v63 = vld [vmem:[#allocation23_spill] sm:$0xff]  ;;  %v18805_v58 = vld [vmem:[#allocation68_spill] sm:$0xff] }
 0x31a   : > { %12151 = vmatmul.mubr.msk.bf16.gmra.mrb[96].mxu1 %vm2029_vm2, %v18759_v62  ;;  %12747 = vmatmul.mubr.msk.bf16.gmra.mrb[32].mxu0 %vm2029_vm2, %v18760_v0  ;;  %v18765_v0 = vld [vmem:[#allocation24_spill] sm:$0xff]  ;;  %v18803_v62 = vld [vmem:[#allocation66_spill] sm:$0xff] }
 0x31b   : > { %12154 = vmatprep.mubr.msk.bf16.mxu1 %vm2029_vm2, %v18761_v29  ;;  %12750 = vmatprep.mubr.msk.bf16.mxu0 %vm2029_vm2, %v18762_v18  ;;  %v18766_v18 = vld [vmem:[#allocation25_spill] sm:$0xff]  ;;  %v18801_v29 = vld [vmem:[#allocation64_spill] sm:$0xff] }
 0x322   : > { %12155 = vmatmul.mubr.msk.bf16.gmra.mrb[100].mxu1 %vm2029_vm2, %v16100_v12  ;;  %12751 = vmatmul.mubr.msk.bf16.gmra.mrb[36].mxu0 %vm2029_vm2, %v18763_v37  ;;  %v18767_v37 = vld [vmem:[#allocation26_spill] sm:$0xff] }
 0x323   : > { %12158 = vmatprep.mubr.msk.bf16.mxu1 %vm2029_vm2, %v16106_v45  ;;  %12754 = vmatprep.mubr.msk.bf16.mxu0 %vm2029_vm2, %v18764_v63  ;;  %v18768_v63 = vld [vmem:[#allocation27_spill] sm:$0xff]  ;;  %v18797_v45 = vld [vmem:[#allocation61_spill] sm:$0xff]  ;;  %v18799_v12 = vld [vmem:[#allocation62_spill] sm:$0xff] }
 0x32a   : > { %12159 = vmatmul.mubr.msk.bf16.gmra.mrb[104].mxu1 %vm2029_vm2, %v16133_v51  ;;  %12755 = vmatmul.mubr.msk.bf16.gmra.mrb[40].mxu0 %vm2029_vm2, %v18765_v0  ;;  %v18769_v0 = vld [vmem:[#allocation28_spill] sm:$0xff]  ;;  %v18795_v51 = vld [vmem:[#allocation59_spill] sm:$0xff] }
 0x32b   : > { %12162 = vmatprep.mubr.msk.bf16.mxu1 %vm2029_vm2, %v16139_v10  ;;  %12758 = vmatprep.mubr.msk.bf16.mxu0 %vm2029_vm2, %v18766_v18  ;;  %v18770_v18 = vld [vmem:[#allocation29_spill] sm:$0xff] }
 0x32c   : > { %v18793_v10 = vld [vmem:[#allocation57_spill] sm:$0xff] }
 0x332   : > { %12163 = vmatmul.mubr.msk.bf16.gmra.mrb[108].mxu1 %vm2029_vm2, %v16166_v54  ;;  %12759 = vmatmul.mubr.msk.bf16.gmra.mrb[44].mxu0 %vm2029_vm2, %v18767_v37  ;;  %v18771_v37 = vld [vmem:[#allocation30_spill] sm:$0xff]  ;;  %v18791_v54 = vld [vmem:[#allocation55_spill] sm:$0xff] }
 0x333   : > { %12166 = vmatprep.mubr.msk.bf16.mxu1 %vm2029_vm2, %v16172_v20  ;;  %12762 = vmatprep.mubr.msk.bf16.mxu0 %vm2029_vm2, %v18768_v63  ;;  %v18772_v63 = vld [vmem:[#allocation32_spill] sm:$0xff]  ;;  %v18788_v20 = vld [vmem:[#allocation138_spill] sm:$0xff] }
 0x33a   : > { %12167 = vmatmul.mubr.msk.bf16.gmra.mrb[112].mxu1 %vm2029_vm2, %v16199_v22  ;;  %12763 = vmatmul.mubr.msk.bf16.gmra.mrb[48].mxu0 %vm2029_vm2, %v18769_v0  ;;  %v18773_v0 = vld [vmem:[#allocation33_spill] sm:$0xff]  ;;  %v18787_v22 = vld [vmem:[#allocation50_spill] sm:$0xff] }
 0x33b   : > { %12170 = vmatprep.mubr.msk.bf16.mxu1 %vm2029_vm2, %v16205_v36  ;;  %12766 = vmatprep.mubr.msk.bf16.mxu0 %vm2029_vm2, %v18770_v18  ;;  %v18774_v18 = vld [vmem:[#allocation37_spill] sm:$0xff]  ;;  %v18784_v36 = vld [vmem:[#allocation130_spill] sm:$0xff] }
 0x342   : > { %12171 = vmatmul.mubr.msk.bf16.gmra.mrb[116].mxu1 %vm2029_vm2, %v16232_v28  ;;  %12767 = vmatmul.mubr.msk.bf16.gmra.mrb[52].mxu0 %vm2029_vm2, %v18771_v37  ;;  %v18775_v37 = vld [vmem:[#allocation39_spill] sm:$0xff]  ;;  %v18782_v28 = vld [vmem:[#allocation128_spill] sm:$0xff] }
 0x343   : > { %12174 = vmatprep.mubr.msk.bf16.mxu1 %vm2029_vm2, %v16238_v11  ;;  %12770 = vmatprep.mubr.msk.bf16.mxu0 %vm2029_vm2, %v18772_v63  ;;  %v18776_v11 = vld [vmem:[#allocation114_spill] sm:$0xff]  ;;  %v18777_v63 = vld [vmem:[#allocation41_spill] sm:$0xff] }
 0x34a   : > { %12175 = vmatmul.mubr.msk.bf16.gmra.mrb[120].mxu1 %vm2029_vm2, %v16274_v15  ;;  %12771 = vmatmul.mubr.msk.bf16.gmra.mrb[56].mxu0 %vm2029_vm2, %v18773_v0  ;;  %v18778_v15 = vld [vmem:[#allocation120_spill] sm:$0xff]  ;;  %v18779_v0 = vld [vmem:[#allocation42_spill] sm:$0xff] }
 0x34b   : > { %12178 = vmatprep.mubr.msk.bf16.mxu1 %vm2029_vm2, %v16280_v38  ;;  %12774 = vmatprep.mubr.msk.bf16.mxu0 %vm2029_vm2, %v18774_v18  ;;  %v18780_v38 = vld [vmem:[#allocation122_spill] sm:$0xff] }
 0x352   : > { %12179 = vmatmul.mubr.msk.bf16.gmra.mrb[124].mxu1 %vm2029_vm2, %v16312_v52  ;;  %12775 = vmatmul.mubr.msk.bf16.gmra.mrb[60].mxu0 %vm2029_vm2, %v18775_v37  ;;  %v18781_v52 = vld [vmem:[#allocation45_spill] sm:$0xff] }
 0x353   : > { %12186 = vmatprep.mubr.msk.bf16.mxu1 %vm2029_vm2, %v18776_v11  ;;  %12778 = vmatprep.mubr.msk.bf16.mxu0 %vm2029_vm2, %v18777_v63  ;;  %v14312_v11 = vld [vmem:[%s18096_s1 + $0x48] sm:$0xff]  }
 0x35a   : > { %12187 = vmatmul.mubr.msk.bf16.vlgmr.msra.gmra.mrb[0].mxu1 %vm2029_vm2, %v18778_v15  ;;  %12779 = vmatmul.mubr.msk.bf16.gmra.mrb[64].mxu0 %vm2029_vm2, %v18779_v0  ;;  %v18783_v15 = vld [vmem:[#allocation46_spill] sm:$0xff] }
 0x35b   : > { %12976 = vmatpush3.bf16.msra.mxu1 %v16645_v19  ;;  %12190 = vmatprep.mubr.msk.bf16.mxu1 %vm2029_vm2, %v18780_v38  ;;  %v18785_v19 = vld [vmem:[#allocation48_spill] sm:$0xff] }
 0x35c   : > { %12782 = vmatprep.mubr.msk.bf16.mxu0 %vm2029_vm2, %v18781_v52  ;;  %12975 = vmatprep.subr.bf16.mxu1 %v14312_v11  ;;  %v18786_v38 = vld [vmem:[#allocation136_spill] sm:$0xff] }
 0x35f   : > { %12977 = vmatpush3.bf16.msra.mxu1 %v14312_v11  ;;  %v18789_v11 = vld [vmem:[#allocation52_spill] sm:$0xff] }
 0x362   : > { %12191 = vmatmul.mubr.msk.bf16.gmra.mrb[4].mxu1 %vm2029_vm2, %v18782_v28  ;;  %12783 = vmatmul.mubr.msk.bf16.gmra.mrb[68].mxu0 %vm2029_vm2, %v18783_v15  ;;  %v18790_v28 = vld [vmem:[#allocation144_spill] sm:$0xff] }
 0x363   : > { %12194 = vmatprep.mubr.msk.bf16.mxu1 %vm2029_vm2, %v18784_v36  ;;  %12786 = vmatprep.mubr.msk.bf16.mxu0 %vm2029_vm2, %v18785_v19  ;;  %v18792_v36 = vld [vmem:[#allocation146_spill] sm:$0xff] }
 0x36a   : > { %12195 = vmatmul.mubr.msk.bf16.gmra.mrb[8].mxu1 %vm2029_vm2, %v18786_v38  ;;  %12787 = vmatmul.mubr.msk.bf16.gmra.mrb[72].mxu0 %vm2029_vm2, %v18787_v22  ;;  %v18794_v38 = vld [vmem:[#allocation152_spill] sm:$0xff] }
 0x36b   : > { %12198 = vmatprep.mubr.msk.bf16.mxu1 %vm2029_vm2, %v18788_v20  ;;  %12790 = vmatprep.mubr.msk.bf16.mxu0 %vm2029_vm2, %v18789_v11  ;;  %v18796_v20 = vld [vmem:[#allocation154_spill] sm:$0xff]  ;;  %v18824_v11 = vld [vmem:[#allocation192_spill] sm:$0xff] }
 0x372   : > { %12199 = vmatmul.mubr.msk.bf16.gmra.mrb[12].mxu1 %vm2029_vm2, %v18790_v28  ;;  %12791 = vmatmul.mubr.msk.bf16.gmra.mrb[76].mxu0 %vm2029_vm2, %v18791_v54  ;;  %v18798_v28 = vld [vmem:[#allocation160_spill] sm:$0xff]  ;;  %v6101_v54 = vshrl.u32 %v16286_v4, 16 }
 0x373   : > { %12202 = vmatprep.mubr.msk.bf16.mxu1 %vm2029_vm2, %v18792_v36  ;;  %12794 = vmatprep.mubr.msk.bf16.mxu0 %vm2029_vm2, %v18793_v10  ;;  %v18800_v36 = vld [vmem:[#allocation162_spill] sm:$0xff] }
 0x374   : > { %v18822_v10 = vld [vmem:[#allocation190_spill] sm:$0xff] }
 0x37a   : > { %12203 = vmatmul.mubr.msk.bf16.gmra.mrb[16].mxu1 %vm2029_vm2, %v18794_v38  ;;  %12795 = vmatmul.mubr.msk.bf16.gmra.mrb[80].mxu0 %vm2029_vm2, %v18795_v51  ;;  %v18802_v38 = vld [vmem:[#allocation168_spill] sm:$0xff] }
 0x37b   : > { %12206 = vmatprep.mubr.msk.bf16.mxu1 %vm2029_vm2, %v18796_v20  ;;  %12798 = vmatprep.mubr.msk.bf16.mxu0 %vm2029_vm2, %v18797_v45  ;;  %v18804_v20 = vld [vmem:[#allocation170_spill] sm:$0xff] }
 0x382   : > { %12207 = vmatmul.mubr.msk.bf16.gmra.mrb[20].mxu1 %vm2029_vm2, %v18798_v28  ;;  %12799 = vmatmul.mubr.msk.bf16.gmra.mrb[84].mxu0 %vm2029_vm2, %v18799_v12  ;;  %v18806_v28 = vld [vmem:[#allocation174_spill] sm:$0xff]  ;;  %v18807_v12 = vld [vmem:[#allocation71_spill] sm:$0xff] }
 0x383   : > { %12210 = vmatprep.mubr.msk.bf16.mxu1 %vm2029_vm2, %v18800_v36  ;;  %12802 = vmatprep.mubr.msk.bf16.mxu0 %vm2029_vm2, %v18801_v29  ;;  %v18808_v36 = vld [vmem:[#allocation176_spill] sm:$0xff]  ;;  %v18809_v29 = vld [vmem:[#allocation73_spill] sm:$0xff] }
 0x38a   : > { %12211 = vmatmul.mubr.msk.bf16.gmra.mrb[24].mxu1 %vm2029_vm2, %v18802_v38  ;;  %12803 = vmatmul.mubr.msk.bf16.gmra.mrb[88].mxu0 %vm2029_vm2, %v18803_v62  ;;  %v18810_v38 = vld [vmem:[#allocation178_spill] sm:$0xff]  ;;  %v18811_v62 = vld [vmem:[#allocation75_spill] sm:$0xff] }
 0x38b   : > { %12214 = vmatprep.mubr.msk.bf16.mxu1 %vm2029_vm2, %v18804_v20  ;;  %12806 = vmatprep.mubr.msk.bf16.mxu0 %vm2029_vm2, %v18805_v58  ;;  %v18812_v20 = vld [vmem:[#allocation180_spill] sm:$0xff]  ;;  %v18813_v58 = vld [vmem:[#allocation77_spill] sm:$0xff] }
 0x392   : > { %12215 = vmatmul.mubr.msk.bf16.gmra.mrb[28].mxu1 %vm2029_vm2, %v18806_v28  ;;  %12807 = vmatmul.mubr.msk.bf16.gmra.mrb[92].mxu0 %vm2029_vm2, %v18807_v12  ;;  %v18814_v28 = vld [vmem:[#allocation182_spill] sm:$0xff] }
 0x393   : > { %12218 = vmatprep.mubr.msk.bf16.mxu1 %vm2029_vm2, %v18808_v36  ;;  %12810 = vmatprep.mubr.msk.bf16.mxu0 %vm2029_vm2, %v18809_v29  ;;  %v18815_v12 = vld [vmem:[#allocation78_spill] sm:$0xff]  ;;  %v18816_v36 = vld [vmem:[#allocation184_spill] sm:$0xff] }
 0x394   : > { %v18817_v29 = vld [vmem:[#allocation80_spill] sm:$0xff] }
 0x39a   : > { %12219 = vmatmul.mubr.msk.bf16.gmra.mrb[32].mxu1 %vm2029_vm2, %v18810_v38  ;;  %12811 = vmatmul.mubr.msk.bf16.gmra.mrb[96].mxu0 %vm2029_vm2, %v18811_v62  ;;  %v18818_v38 = vld [vmem:[#allocation186_spill] sm:$0xff] }
 0x39b   : > { %12222 = vmatprep.mubr.msk.bf16.mxu1 %vm2029_vm2, %v18812_v20  ;;  %12814 = vmatprep.mubr.msk.bf16.mxu0 %vm2029_vm2, %v18813_v58  ;;  %v18819_v62 = vld [vmem:[#allocation82_spill] sm:$0xff]  ;;  %v18820_v20 = vld [vmem:[#allocation188_spill] sm:$0xff] }
 0x39c   : > { %v18821_v58 = vld [vmem:[#allocation84_spill] sm:$0xff] }
 0x3a2   : > { %12223 = vmatmul.mubr.msk.bf16.gmra.mrb[36].mxu1 %vm2029_vm2, %v18814_v28  ;;  %12815 = vmatmul.mubr.msk.bf16.gmra.mrb[100].mxu0 %vm2029_vm2, %v18815_v12  ;;  %v6068_v28 = vshrl.u32 %v16265_v42, 16  ;;  %v6071_v12 = vshll.u32 %v16265_v42, 16  ;;  %v6097_v42 = vshll.u32 %v16286_v4, 16  ;;  %v6103_v4 = vrot.slane %v6101_v54, 4 }
 0x3a3   : > { %12226 = vmatprep.mubr.msk.bf16.mxu1 %vm2029_vm2, %v18816_v36  ;;  %12818 = vmatprep.mubr.msk.bf16.mxu0 %vm2029_vm2, %v18817_v29  ;;  %v6077_v36 = vshll.u32 %v16244_v35, 16  ;;  %v6081_v29 = vshrl.u32 %v16244_v35, 16 }
 0x3a4   : > { %v6070_v45 = vrot.slane %v6068_v28, 4  ;;  %v6073_v33 = vrot.slane %v6071_v12, 5  ;;  %v18825_v12 = vld [vmem:[#allocation89_spill] sm:$0xff]  ;;  %v8239_v28 = vshll.u32 %v16757_v25, 16  ;;  %v6099_v19 = vrot.slane %v6097_v42, 5  ;;  %v18828_v42 = vld [vmem:[#allocation198_spill] sm:$0xff] }
 0x3a5   : > { %v6083_v51 = vrot.slane %v6081_v29, 4  ;;  %v6107_v54 = vshll.u32 %v18828_v42, 16 }
 0x3a6   : > { %v6074_v35 = vor.u32 %v6073_v33, %v6070_v45  ;;  %v8241_v0 = vrot.slane %v8239_v28, 5  ;;  %v8259_v45 = vshrl.u32 %v16776_v5, 16  ;;  %v18826_v33 = vld [vmem:[#allocation194_spill] sm:$0xff] }
 0x3a8   : > { %v6075_v15 = vrot.slane %v6074_v35, 4  ;;  %v18829_v35 = vld [vmem:[#allocation196_spill] sm:$0xff] }
 0x3aa   : > { %12227 = vmatmul.mubr.msk.bf16.gmra.mrb[40].mxu1 %vm2029_vm2, %v18818_v38  ;;  %12819 = vmatmul.mubr.msk.bf16.gmra.mrb[104].mxu0 %vm2029_vm2, %v18819_v62  ;;  %v6079_v38 = vrot.slane %v6077_v36, 5  ;;  %v18823_v62 = vld [vmem:[#allocation87_spill] sm:$0xff]  ;;  %v8249_v36 = vshrl.u32 %v16760_v8, 16 }
 0x3ab   : > { %12230 = vmatprep.mubr.msk.bf16.mxu1 %vm2029_vm2, %v18820_v20  ;;  %12822 = vmatprep.mubr.msk.bf16.mxu0 %vm2029_vm2, %v18821_v58  ;;  %v6087_v20 = vshll.u32 %v16268_v17, 16  ;;  %v6091_v58 = vshrl.u32 %v16268_v17, 16  ;;  %v8245_v17 = vshll.u32 %v16760_v8, 16  ;;  %v6109_v8 = vrot.slane %v6107_v54, 5 }
 0x3ac   : > { %v6084_v29 = vor.u32 %v6083_v51, %v6079_v38  ;;  %v8269_v51 = vshrl.u32 %v16779_v60, 16  ;;  %v6080_v28 = vsel %vm14423_vm3, %v6075_v15, %v6079_v38 }
 0x3ad   : > { %v6093_v22 = vrot.slane %v6091_v58, 4  ;;  %v8247_v63 = vrot.slane %v8245_v17, 5  ;;  %v6104_v58 = vor.u32 %v6103_v4, %v6099_v19  ;;  %v8255_v17 = vshll.u32 %v16776_v5, 16 }
 0x3ae   : > { %v6085_v52 = vrot.slane %v6084_v29, 4  ;;  %v18830_v29 = vld [vmem:[#allocation94_spill] sm:$0xff]  ;;  %v8271_v59 = vrot.slane %v8269_v51, 4 }
 0x3af   : > { %v8257_v37 = vrot.slane %v8255_v17, 5 }
 0x3b2   : > { %12231 = vmatmul.mubr.msk.bf16.gmra.mrb[44].mxu1 %vm2029_vm2, %v18822_v10  ;;  %12823 = vmatmul.mubr.msk.bf16.gmra.mrb[108].mxu0 %vm2029_vm2, %v18823_v62  ;;  %v8236_v10 = vshrl.u32 %v16757_v25, 16  ;;  %v6089_v62 = vrot.slane %v6087_v20, 5  ;;  %v18827_v25 = vld [vmem:[#allocation91_spill] sm:$0xff] }
 0x3b3   : > { %12234 = vmatprep.mubr.msk.bf16.mxu1 %vm2029_vm2, %v18824_v11  ;;  %12826 = vmatprep.mubr.msk.bf16.mxu0 %vm2029_vm2, %v18825_v12  ;;  %v8251_v12 = vrot.slane %v8249_v36, 4 }
 0x3b4   : > { %v8238_v11 = vrot.slane %v8236_v10, 4  ;;  %v6094_v20 = vor.u32 %v6093_v22, %v6089_v62  ;;  %v6090_v36 = vsel %vm14423_vm3, %v6085_v52, %v6089_v62  ;;  %v8265_v22 = vshll.u32 %v16779_v60, 16  ;;  %v18832_v52 = vld [vmem:[#allocation199_spill] sm:$0xff]  ;;  %v18833_v62 = vld [vmem:[#allocation102_spill] sm:$0xff] }
 0x3b5   : > { %v17051_v42 = vcombine.low %v6080_v28, %v6090_v36 }
 0x3b6   : > { %v8242_v4 = vor.u32 %v8241_v0, %v8238_v11  ;;  %v8267_v18 = vrot.slane %v8265_v22, 5  ;;  %v18835_v22 = vld [vmem:[#allocation203_spill] sm:$0xff] }
 0x3b8   : > { %v8243_v15 = vrot.slane %v8242_v4, 4  ;;  %v8272_v51 = vor.u32 %v8271_v59, %v8267_v18  ;;  %v18860_v4 = vld [vmem:[#allocation116_spill] sm:$0xff] }
 0x3ba   : > { %12235 = vmatmul.mubr.msk.bf16.gmra.mrb[48].mxu1 %vm2029_vm2, %v18826_v33  ;;  %12827 = vmatmul.mubr.msk.bf16.gmra.mrb[112].mxu0 %vm2029_vm2, %v18827_v25  ;;  %v8252_v33 = vor.u32 %v8251_v12, %v8247_v63  ;;  %v6095_v25 = vrot.slane %v6094_v20, 4  ;;  %v18834_v12 = vld [vmem:[#allocation201_spill] sm:$0xff]  ;;  %v8275_v20 = vshll.u32 %v17054_v50, 16  ;;  %v8273_v36 = vrot.slane %v8272_v51, 4  ;;  %v18866_v51 = vld [vmem:[#allocation119_spill] sm:$0xff] }
 0x3bb   : > { %12238 = vmatprep.mubr.msk.bf16.mxu1 %vm2029_vm2, %v18829_v35  ;;  %12830 = vmatprep.mubr.msk.bf16.mxu0 %vm2029_vm2, %v18830_v29  ;;  %v6105_v35 = vrot.slane %v6104_v58, 4  ;;  %v8261_v29 = vrot.slane %v8259_v45, 4  ;;  %v8248_v58 = vsel %vm14423_vm3, %v8243_v15, %v8247_v63  ;;  %v18863_v15 = vld [vmem:[#allocation93_spill] sm:$0xff] }
 0x3bc   : > { %v8253_v38 = vrot.slane %v8252_v33, 4  ;;  %v6100_v0 = vsel %vm14423_vm3, %v6095_v25, %v6099_v19  ;;  %v8277_v17 = vrot.slane %v8275_v20, 5  ;;  %v18861_v33 = vld [vmem:[#allocation90_spill] sm:$0xff]  ;;  %v18867_v20 = vld [vmem:[#allocation104_spill] sm:$0xff] }
 0x3bd   : > { %v6110_v11 = vsel %vm14423_vm3, %v6105_v35, %v6109_v8  ;;  %v8262_v45 = vor.u32 %v8261_v29, %v8257_v37  ;;  %v18836_v8 = vld [vmem:[#allocation205_spill] sm:$0xff]  ;;  %v18837_v29 = vld [vmem:[#allocation95_spill] sm:$0xff]  ;;  %v18862_v35 = vld [vmem:[#allocation118_spill] sm:$0xff] }
 0x3be   : > { %v8258_v54 = vsel %vm14423_vm3, %v8253_v38, %v8257_v37  ;;  %v17073_v25 = vcombine.low %v6100_v0, %v6110_v11  ;;  %v8278_v37 = vsel %vm14423_vm3, %v8273_v36, %v8277_v17  ;;  %v18864_v11 = vld [vmem:[#allocation117_spill] sm:$0xff] }
 0x3bf   : > { %v11046_v19 = vcombine.low %v8248_v58, %v8258_v54  ;;  %v8263_v28 = vrot.slane %v8262_v45, 4  ;;  %v18865_v45 = vld [vmem:[#allocation103_spill] sm:$0xff]  ;;  %v18868_v36 = vld [vmem:[#allocation125_spill] sm:$0xff] }
 0x3c0   : > { %v18869_v17 = vld [vmem:[#allocation113_spill] sm:$0xff] }
 0x3c1   : > { %v8268_v59 = vsel %vm14423_vm3, %v8263_v28, %v8267_v18 }
 0x3c2   : > { %12239 = vmatmul.mubr.msk.bf16.gmra.mrb[52].mxu1 %vm2029_vm2, %v18832_v52  ;;  %12831 = vmatmul.mubr.msk.bf16.gmra.mrb[116].mxu0 %vm2029_vm2, %v18833_v62  ;;  %v11047_v63 = vcombine.low %v8268_v59, %v8278_v37 }
 0x3c3   : > { %12242 = vmatprep.mubr.msk.bf16.mxu1 %vm2029_vm2, %v18834_v12  ;;  %12834 = vmatprep.mubr.msk.bf16.mxu0 %vm2029_vm2, %v17051_v42 }
 0x3ca   : > { %12243 = vmatmul.mubr.msk.bf16.gmra.mrb[56].mxu1 %vm2029_vm2, %v18835_v22  ;;  %12835 = vmatmul.mubr.msk.bf16.gmra.mrb[120].mxu0 %vm2029_vm2, %v17073_v25  ;;  %v18870_v22 = vld [vmem:[#allocation37_spill] sm:$0xff] }
 0x3cb   : > { %12246 = vmatprep.mubr.msk.bf16.mxu1 %vm2029_vm2, %v18836_v8  ;;  %12838 = vmatprep.mubr.msk.bf16.mxu0 %vm2029_vm2, %v11046_v19  ;;  %v18871_v8 = vld [vmem:[#allocation115_spill] sm:$0xff] }
 0x3d2   : > { %12247 = vmatmul.mubr.msk.bf16.gmra.mrb[60].mxu1 %vm2029_vm2, %v18837_v29  ;;  %12839 = vmatmul.mubr.msk.bf16.gmra.mrb[124].mxu0 %vm2029_vm2, %v11047_v63 }
 0x3d3   : > { %12250 = vmatprep.mubr.msk.bf16.mxu1 %vm2029_vm2, %v16363_v43  ;;  %12846 = vmatprep.mubr.msk.bf16.mxu0 %vm2029_vm2, %v18693_v47  ;;  %v18838_v43 = vld [vmem:[#allocation92_spill] sm:$0xff]  ;;  %v18852_v47 = vld [vmem:[#allocation105_spill] sm:$0xff] }
 0x3da   : > { %12251 = vmatmul.mubr.msk.bf16.gmra.mrb[64].mxu1 %vm2029_vm2, %v16379_v55  ;;  %12847 = vmatmul.mubr.msk.bf16.vlgmr.msra.gmra.mrb[0].mxu0 %vm2029_vm2, %v18694_v34  ;;  %v18839_v55 = vld [vmem:[#allocation69_spill] sm:$0xff]  ;;  %v18853_v34 = vld [vmem:[#allocation83_spill] sm:$0xff] }
 0x3db   : > { %12254 = vmatprep.mubr.msk.bf16.mxu1 %vm2029_vm2, %v16383_v27  ;;  %12850 = vmatprep.mubr.msk.bf16.mxu0 %vm2029_vm2, %v18695_v14  ;;  %v18840_v27 = vld [vmem:[#allocation99_spill] sm:$0xff]  ;;  %v18854_v14 = vld [vmem:[#allocation108_spill] sm:$0xff] }
 0x3e2   : > { %12255 = vmatmul.mubr.msk.bf16.gmra.mrb[68].mxu1 %vm2029_vm2, %v16395_v46  ;;  %12851 = vmatmul.mubr.msk.bf16.gmra.mrb[4].mxu0 %vm2029_vm2, %v18696_v48  ;;  %v18841_v46 = vld [vmem:[#allocation70_spill] sm:$0xff]  ;;  %v18855_v48 = vld [vmem:[#allocation85_spill] sm:$0xff] }
 0x3e3   : > { %12258 = vmatprep.mubr.msk.bf16.mxu1 %vm2029_vm2, %v16399_v23  ;;  %12854 = vmatprep.mubr.msk.bf16.mxu0 %vm2029_vm2, %v18697_v13  ;;  %v18842_v23 = vld [vmem:[#allocation98_spill] sm:$0xff] }
 0x3ea   : > { %12259 = vmatmul.mubr.msk.bf16.gmra.mrb[72].mxu1 %vm2029_vm2, %v16411_v56  ;;  %12855 = vmatmul.mubr.msk.bf16.gmra.mrb[8].mxu0 %vm2029_vm2, %v18698_v3  ;;  %v18844_v56 = vld [vmem:[#allocation109_spill] sm:$0xff] }
 0x3eb   : > { %12262 = vmatprep.mubr.msk.bf16.mxu1 %vm2029_vm2, %v16415_v44  ;;  %12858 = vmatprep.mubr.msk.bf16.mxu0 %vm2029_vm2, %v18699_v2  ;;  %v18846_v44 = vld [vmem:[#allocation101_spill] sm:$0xff] }
 0x3f2   : > { %12263 = vmatmul.mubr.msk.bf16.gmra.mrb[76].mxu1 %vm2029_vm2, %v16427_v57  ;;  %12859 = vmatmul.mubr.msk.bf16.gmra.mrb[12].mxu0 %vm2029_vm2, %v18700_v6  ;;  %v18847_v57 = vld [vmem:[#allocation76_spill] sm:$0xff] }
 0x3f3   : > { %12266 = vmatprep.mubr.msk.bf16.mxu1 %vm2029_vm2, %v16431_v32  ;;  %12862 = vmatprep.mubr.msk.bf16.mxu0 %vm2029_vm2, %v18701_v49  ;;  %v18848_v32 = vld [vmem:[#allocation100_spill] sm:$0xff]  ;;  %v18856_v49 = vld [vmem:[#allocation107_spill] sm:$0xff] }
 0x3fa   : > { %12267 = vmatmul.mubr.msk.bf16.gmra.mrb[80].mxu1 %vm2029_vm2, %v16443_v31  ;;  %12863 = vmatmul.mubr.msk.bf16.gmra.mrb[16].mxu0 %vm2029_vm2, %v18702_v21  ;;  %v18849_v31 = vld [vmem:[#allocation79_spill] sm:$0xff]  ;;  %v18857_v21 = vld [vmem:[#allocation86_spill] sm:$0xff] }
 0x3fb   : > { %12270 = vmatprep.mubr.msk.bf16.mxu1 %vm2029_vm2, %v16447_v7  ;;  %12866 = vmatprep.mubr.msk.bf16.mxu0 %vm2029_vm2, %v18703_v40  ;;  %v18850_v7 = vld [vmem:[#allocation106_spill] sm:$0xff] }
 0x3fc   : > { %v18858_v40 = vld [vmem:[#allocation110_spill] sm:$0xff] }
 0x402   : > { %12271 = vmatmul.mubr.msk.bf16.gmra.mrb[84].mxu1 %vm2029_vm2, %v16459_v24  ;;  %12867 = vmatmul.mubr.msk.bf16.gmra.mrb[20].mxu0 %vm2029_vm2, %v18704_v61  ;;  %v18851_v24 = vld [vmem:[#allocation81_spill] sm:$0xff]  ;;  %v18859_v61 = vld [vmem:[#allocation88_spill] sm:$0xff] }
 0x403   : > { %12274 = vmatprep.mubr.msk.bf16.mxu1 %vm2029_vm2, %v16463_v9  ;;  %12870 = vmatprep.mubr.msk.bf16.mxu0 %vm2029_vm2, %v18705_v16 }
 0x40a   : > { %12275 = vmatmul.mubr.msk.bf16.gmra.mrb[88].mxu1 %vm2029_vm2, %v16475_v1  ;;  %12871 = vmatmul.mubr.msk.bf16.gmra.mrb[24].mxu0 %vm2029_vm2, %v18706_v53 }
 0x40b   : > { %12278 = vmatprep.mubr.msk.bf16.mxu1 %vm2029_vm2, %v16479_v39  ;;  %12874 = vmatprep.mubr.msk.bf16.mxu0 %vm2029_vm2, %v18707_v26  ;;  %v18843_v26 = vld [vmem:[#allocation72_spill] sm:$0xff] }
 0x412   : > { %12279 = vmatmul.mubr.msk.bf16.gmra.mrb[92].mxu1 %vm2029_vm2, %v16491_v41  ;;  %12875 = vmatmul.mubr.msk.bf16.gmra.mrb[28].mxu0 %vm2029_vm2, %v18708_v30  ;;  %v18845_v30 = vld [vmem:[#allocation74_spill] sm:$0xff] }
 0x413   : > { %12282 = vmatprep.mubr.msk.bf16.mxu1 %vm2029_vm2, %v18838_v43  ;;  %12878 = vmatprep.mubr.msk.bf16.mxu0 %vm2029_vm2, %v18839_v55  ;;  %v18872_v43 = vld [vmem:[#allocation39_spill] sm:$0xff]  ;;  %v18873_v55 = vld [vmem:[#allocation121_spill] sm:$0xff] }
 0x41a   : > { %12283 = vmatmul.mubr.msk.bf16.gmra.mrb[96].mxu1 %vm2029_vm2, %v18840_v27  ;;  %12879 = vmatmul.mubr.msk.bf16.gmra.mrb[32].mxu0 %vm2029_vm2, %v18841_v46  ;;  %v18874_v27 = vld [vmem:[#allocation41_spill] sm:$0xff]  ;;  %v18875_v46 = vld [vmem:[#allocation123_spill] sm:$0xff] }
 0x41b   : > { %12286 = vmatprep.mubr.msk.bf16.mxu1 %vm2029_vm2, %v18842_v23  ;;  %12882 = vmatprep.mubr.msk.bf16.mxu0 %vm2029_vm2, %v18843_v26 }
 0x422   : > { %12287 = vmatmul.mubr.msk.bf16.gmra.mrb[100].mxu1 %vm2029_vm2, %v18844_v56  ;;  %12883 = vmatmul.mubr.msk.bf16.gmra.mrb[36].mxu0 %vm2029_vm2, %v18845_v30 }
 0x423   : > { %12290 = vmatprep.mubr.msk.bf16.mxu1 %vm2029_vm2, %v18846_v44  ;;  %12886 = vmatprep.mubr.msk.bf16.mxu0 %vm2029_vm2, %v18847_v57  ;;  %v18876_v44 = vld [vmem:[#allocation42_spill] sm:$0xff]  ;;  %v18877_v57 = vld [vmem:[#allocation129_spill] sm:$0xff] }
 0x42a   : > { %12291 = vmatmul.mubr.msk.bf16.gmra.mrb[104].mxu1 %vm2029_vm2, %v18848_v32  ;;  %12887 = vmatmul.mubr.msk.bf16.gmra.mrb[40].mxu0 %vm2029_vm2, %v18849_v31  ;;  %v18878_v32 = vld [vmem:[#allocation45_spill] sm:$0xff]  ;;  %v18879_v31 = vld [vmem:[#allocation131_spill] sm:$0xff] }
 0x42b   : > { %12294 = vmatprep.mubr.msk.bf16.mxu1 %vm2029_vm2, %v18850_v7  ;;  %12890 = vmatprep.mubr.msk.bf16.mxu0 %vm2029_vm2, %v18851_v24 }
 0x42d   : > { %v17181_v9 = vpop.f32.mrb[0].mxu1 }
 0x42e   : > { %v17183_v1 = vpop.f32.mrb[1].mxu1 }
 0x42f   : > { %v17185_v39 = vpop.f32.mrb[2].mxu1 }
 0x430   : > { %v17187_v41 = vpop.f32.mrb[3].mxu1 }
 0x432   : > { %12295 = vmatmul.mubr.msk.bf16.gmra.mrb[108].mxu1 %vm2029_vm2, %v18852_v47  ;;  %12891 = vmatmul.mubr.msk.bf16.gmra.mrb[44].mxu0 %vm2029_vm2, %v18853_v34 }
 0x433   : > { %12298 = vmatprep.mubr.msk.bf16.mxu1 %vm2029_vm2, %v18854_v14  ;;  %12894 = vmatprep.mubr.msk.bf16.mxu0 %vm2029_vm2, %v18855_v48  ;;  %v18880_v14 = vld [vmem:[#allocation46_spill] sm:$0xff]  ;;  %v18881_v48 = vld [vmem:[#allocation137_spill] sm:$0xff] }
 0x435   : > { %v17197_v13 = vpop.f32.mrb[4].mxu1 }
 0x436   : > { %v17199_v3 = vpop.f32.mrb[5].mxu1 }
 0x437   : > { %v17201_v2 = vpop.f32.mrb[6].mxu1 }
 0x438   : > { %v17203_v6 = vpop.f32.mrb[7].mxu1 }
 0x43a   : > { %12299 = vmatmul.mubr.msk.bf16.gmra.mrb[112].mxu1 %vm2029_vm2, %v18856_v49  ;;  %12895 = vmatmul.mubr.msk.bf16.gmra.mrb[48].mxu0 %vm2029_vm2, %v18857_v21  ;;  %v18882_v49 = vld [vmem:[#allocation48_spill] sm:$0xff]  ;;  %v18883_v21 = vld [vmem:[#allocation139_spill] sm:$0xff] }
 0x43b   : > { %12302 = vmatprep.mubr.msk.bf16.mxu1 %vm2029_vm2, %v18858_v40  ;;  %12898 = vmatprep.mubr.msk.bf16.mxu0 %vm2029_vm2, %v18859_v61 }
 0x43d   : > { %v17213_v16 = vpop.f32.mrb[8].mxu1 }
 0x43e   : > { %v17215_v53 = vpop.f32.mrb[9].mxu1 }
 0x43f   : > { %v17217_v18 = vpop.f32.mrb[10].mxu1 }
 0x440   : > { %v17219_v10 = vpop.f32.mrb[11].mxu1 }
 0x442   : > { %12303 = vmatmul.mubr.msk.bf16.gmra.mrb[116].mxu1 %vm2029_vm2, %v18860_v4  ;;  %12899 = vmatmul.mubr.msk.bf16.gmra.mrb[52].mxu0 %vm2029_vm2, %v18861_v33 }
 0x443   : > { %12306 = vmatprep.mubr.msk.bf16.mxu1 %vm2029_vm2, %v18862_v35  ;;  %12902 = vmatprep.mubr.msk.bf16.mxu0 %vm2029_vm2, %v18863_v15  ;;  %v18884_v35 = vld [vmem:[#allocation50_spill] sm:$0xff]  ;;  %v18885_v15 = vld [vmem:[#allocation145_spill] sm:$0xff] }
 0x445   : > { %v17229_v38 = vpop.f32.mrb[12].mxu1 }
 0x446   : > { %v17231_v52 = vpop.f32.mrb[13].mxu1 }
 0x447   : > { %v17233_v0 = vpop.f32.mrb[14].mxu1 }
 0x448   : > { %v17235_v12 = vpop.f32.mrb[15].mxu1 }
 0x44a   : > { %12307 = vmatmul.mubr.msk.bf16.gmra.mrb[120].mxu1 %vm2029_vm2, %v18864_v11  ;;  %12903 = vmatmul.mubr.msk.bf16.gmra.mrb[56].mxu0 %vm2029_vm2, %v18865_v45  ;;  %v18886_v11 = vld [vmem:[#allocation52_spill] sm:$0xff]  ;;  %v18887_v45 = vld [vmem:[#allocation147_spill] sm:$0xff] }
 0x44b   : > { %12310 = vmatprep.mubr.msk.bf16.mxu1 %vm2029_vm2, %v18866_v51  ;;  %12906 = vmatprep.mubr.msk.bf16.mxu0 %vm2029_vm2, %v18867_v20 }
 0x44d   : > { %v17245_v58 = vpop.f32.mrb[16].mxu1 }
 0x44e   : > { %v17247_v54 = vpop.f32.mrb[17].mxu1 }
 0x44f   : > { %v17249_v19 = vpop.f32.mrb[18].mxu1 }
 0x450   : > { %v17251_v28 = vpop.f32.mrb[19].mxu1 }
 0x452   : > { %12311 = vmatmul.mubr.msk.bf16.gmra.mrb[124].mxu1 %vm2029_vm2, %v18868_v36  ;;  %12907 = vmatmul.mubr.msk.bf16.gmra.mrb[60].mxu0 %vm2029_vm2, %v18869_v17 }
 0x453   : > { %12382 = vmatprep.mubr.msk.bf16.mxu1 %vm2029_vm2, %v18870_v22  ;;  %12910 = vmatprep.mubr.msk.bf16.mxu0 %vm2029_vm2, %v18871_v8  ;;  %v18888_v22 = vld [vmem:[#allocation55_spill] sm:$0xff]  ;;  %v18889_v8 = vld [vmem:[#allocation153_spill] sm:$0xff] }
 0x455   : > { %v17261_v59 = vpop.f32.mrb[20].mxu1 }
 0x456   : > { %v17263_v37 = vpop.f32.mrb[21].mxu1 }
 0x457   : > { %v17265_v63 = vpop.f32.mrb[22].mxu1 }
 0x458   : > { %v17267_v29 = vpop.f32.mrb[23].mxu1 }
 0x45a   : > { %12383 = vmatmul.mubr.msk.bf16.vlgmr.msra.gmra.mrb[64].mxu1 %vm2029_vm2, %v18872_v43  ;;  %12911 = vmatmul.mubr.msk.bf16.gmra.mrb[64].mxu0 %vm2029_vm2, %v18873_v55  ;;  %v18890_v43 = vld [vmem:[#allocation57_spill] sm:$0xff]  ;;  %v18891_v55 = vld [vmem:[#allocation155_spill] sm:$0xff] }
 0x45b   : > { %12386 = vmatprep.mubr.msk.bf16.mxu1 %vm2029_vm2, %v18874_v27  ;;  %12914 = vmatprep.mubr.msk.bf16.mxu0 %vm2029_vm2, %v18875_v46 }
 0x45d   : > { %v17277_v23 = vpop.f32.mrb[24].mxu1 }
 0x45e   : > { %v17279_v26 = vpop.f32.mrb[25].mxu1 }
 0x45f   : > { %v17281_v56 = vpop.f32.mrb[26].mxu1 }
 0x460   : > { %v17283_v30 = vpop.f32.mrb[27].mxu1 }
 0x462   : > { %12387 = vmatmul.mubr.msk.bf16.gmra.mrb[68].mxu1 %vm2029_vm2, %v18876_v44  ;;  %12915 = vmatmul.mubr.msk.bf16.gmra.mrb[68].mxu0 %vm2029_vm2, %v18877_v57 }
 0x463   : > { %12390 = vmatprep.mubr.msk.bf16.mxu1 %vm2029_vm2, %v18878_v32  ;;  %12918 = vmatprep.mubr.msk.bf16.mxu0 %vm2029_vm2, %v18879_v31  ;;  %v18892_v32 = vld [vmem:[#allocation59_spill] sm:$0xff]  ;;  %v18893_v31 = vld [vmem:[#allocation161_spill] sm:$0xff] }
 0x465   : > { %v17293_v7 = vpop.f32.mrb[28].mxu1 }
 0x466   : > { %v17295_v24 = vpop.f32.mrb[29].mxu1 }
 0x467   : > { %v17297_v47 = vpop.f32.mrb[30].mxu1 }
 0x468   : > { %v17299_v34 = vpop.f32.mrb[31].mxu1 }
 0x46a   : > { %12391 = vmatmul.mubr.msk.bf16.gmra.mrb[72].mxu1 %vm2029_vm2, %v18880_v14  ;;  %12919 = vmatmul.mubr.msk.bf16.gmra.mrb[72].mxu0 %vm2029_vm2, %v18881_v48  ;;  %v18894_v14 = vld [vmem:[#allocation61_spill] sm:$0xff]  ;;  %v18895_v48 = vld [vmem:[#allocation163_spill] sm:$0xff] }
 0x46b   : > { %12394 = vmatprep.mubr.msk.bf16.mxu1 %vm2029_vm2, %v18882_v49  ;;  %12922 = vmatprep.mubr.msk.bf16.mxu0 %vm2029_vm2, %v18883_v21 }
 0x46d   : > { %v17309_v40 = vpop.f32.mrb[32].mxu1 }
 0x46e   : > { %v17311_v61 = vpop.f32.mrb[33].mxu1 }
 0x46f   : > { %v17313_v4 = vpop.f32.mrb[34].mxu1 }
 0x470   : > { %v17315_v33 = vpop.f32.mrb[35].mxu1 }
 0x472   : > { %12395 = vmatmul.mubr.msk.bf16.gmra.mrb[76].mxu1 %vm2029_vm2, %v18884_v35  ;;  %12923 = vmatmul.mubr.msk.bf16.gmra.mrb[76].mxu0 %vm2029_vm2, %v18885_v15 }
 0x473   : > { %12398 = vmatprep.mubr.msk.bf16.mxu1 %vm2029_vm2, %v18886_v11  ;;  %12926 = vmatprep.mubr.msk.bf16.mxu0 %vm2029_vm2, %v18887_v45  ;;  %v18900_v11 = vld [vmem:[#allocation62_spill] sm:$0xff]  ;;  %v18901_v45 = vld [vmem:[#allocation169_spill] sm:$0xff] }
 0x475   : > { %v17325_v51 = vpop.f32.mrb[36].mxu1 }
 0x476   : > { %v17327_v20 = vpop.f32.mrb[37].mxu1 }
 0x477   : > { %v17329_v36 = vpop.f32.mrb[38].mxu1 }
 0x478   : > { %v17331_v17 = vpop.f32.mrb[39].mxu1 }
 0x47a   : > { %12399 = vmatmul.mubr.msk.bf16.gmra.mrb[80].mxu1 %vm2029_vm2, %v18888_v22  ;;  %12927 = vmatmul.mubr.msk.bf16.gmra.mrb[80].mxu0 %vm2029_vm2, %v18889_v8  ;;  %v18902_v22 = vld [vmem:[#allocation64_spill] sm:$0xff]  ;;  %v18903_v8 = vld [vmem:[#allocation171_spill] sm:$0xff] }
 0x47b   : > { %12402 = vmatprep.mubr.msk.bf16.mxu1 %vm2029_vm2, %v18890_v43  ;;  %12930 = vmatprep.mubr.msk.bf16.mxu0 %vm2029_vm2, %v18891_v55 }
 0x47d   : > { %v17341_v27 = vpop.f32.mrb[40].mxu1 }
 0x47e   : > { %v17343_v46 = vpop.f32.mrb[41].mxu1 }
 0x47f   : > { %v17345_v44 = vpop.f32.mrb[42].mxu1 }
 0x480   : > { %v17347_v57 = vpop.f32.mrb[43].mxu1 }
 0x482   : > { %12403 = vmatmul.mubr.msk.bf16.gmra.mrb[84].mxu1 %vm2029_vm2, %v18892_v32  ;;  %12931 = vmatmul.mubr.msk.bf16.gmra.mrb[84].mxu0 %vm2029_vm2, %v18893_v31 }
 0x483   : > { %12406 = vmatprep.mubr.msk.bf16.mxu1 %vm2029_vm2, %v18894_v14  ;;  %12934 = vmatprep.mubr.msk.bf16.mxu0 %vm2029_vm2, %v18895_v48  ;;  %v18908_v14 = vld [vmem:[#allocation66_spill] sm:$0xff]  ;;  %v18909_v48 = vld [vmem:[#allocation175_spill] sm:$0xff] }
 0x485   : > { %v17357_v49 = vpop.f32.mrb[44].mxu1 }
 0x486   : > { %18896 = vst [vmem:[#allocation127_spill] sm:$0xff] %v17357_v49  ;;  %v17359_v21 = vpop.f32.mrb[45].mxu1  ;;  %v18937_v49 = vld [vmem:[#allocation191_spill] sm:$0xff] }
 0x487   : > { %18897 = vst [vmem:[#allocation132_spill] sm:$0xff] %v17359_v21  ;;  %v17361_v35 = vpop.f32.mrb[46].mxu1  ;;  %v18936_v21 = vld [vmem:[#allocation82_spill] sm:$0xff] }
 0x488   : > { %18898 = vst [vmem:[#allocation134_spill] sm:$0xff] %v17361_v35  ;;  %v17363_v15 = vpop.f32.mrb[47].mxu1 }
 0x489   : > { %18899 = vst [vmem:[#allocation133_spill] sm:$0xff] %v17363_v15 }
 0x48a   : > { %12407 = vmatmul.mubr.msk.bf16.gmra.mrb[88].mxu1 %vm2029_vm2, %v18900_v11  ;;  %12935 = vmatmul.mubr.msk.bf16.gmra.mrb[88].mxu0 %vm2029_vm2, %v18901_v45  ;;  %v18910_v11 = vld [vmem:[#allocation68_spill] sm:$0xff]  ;;  %v18911_v45 = vld [vmem:[#allocation177_spill] sm:$0xff] }
 0x48b   : > { %12410 = vmatprep.mubr.msk.bf16.mxu1 %vm2029_vm2, %v18902_v22  ;;  %12938 = vmatprep.mubr.msk.bf16.mxu0 %vm2029_vm2, %v18903_v8 }
 0x48d   : > { %v17373_v43 = vpop.f32.mrb[48].mxu1 }
 0x48e   : > { %18904 = vst [vmem:[#allocation135_spill] sm:$0xff] %v17373_v43  ;;  %v17375_v55 = vpop.f32.mrb[49].mxu1 }
 0x48f   : > { %18905 = vst [vmem:[#allocation140_spill] sm:$0xff] %v17375_v55  ;;  %v17377_v32 = vpop.f32.mrb[50].mxu1 }
 0x490   : > { %18906 = vst [vmem:[#allocation142_spill] sm:$0xff] %v17377_v32  ;;  %v17379_v31 = vpop.f32.mrb[51].mxu1 }
 0x491   : > { %18907 = vst [vmem:[#allocation141_spill] sm:$0xff] %v17379_v31  ;;  %v18916_v31 = vld [vmem:[#allocation71_spill] sm:$0xff] }
 0x492   : > { %12411 = vmatmul.mubr.msk.bf16.gmra.mrb[92].mxu1 %vm2029_vm2, %v18908_v14  ;;  %12939 = vmatmul.mubr.msk.bf16.gmra.mrb[92].mxu0 %vm2029_vm2, %v18909_v48  ;;  %v18917_v14 = vld [vmem:[#allocation179_spill] sm:$0xff]  ;;  %v18918_v48 = vld [vmem:[#allocation73_spill] sm:$0xff] }
 0x493   : > { %12414 = vmatprep.mubr.msk.bf16.mxu1 %vm2029_vm2, %v18910_v11  ;;  %12942 = vmatprep.mubr.msk.bf16.mxu0 %vm2029_vm2, %v18911_v45  ;;  %v18919_v11 = vld [vmem:[#allocation181_spill] sm:$0xff] }
 0x495   : > { %v17389_v22 = vpop.f32.mrb[52].mxu1 }
 0x496   : > { %18912 = vst [vmem:[#allocation143_spill] sm:$0xff] %v17389_v22  ;;  %v17391_v8 = vpop.f32.mrb[53].mxu1 }
 0x497   : > { %18913 = vst [vmem:[#allocation148_spill] sm:$0xff] %v17391_v8  ;;  %v17393_v55 = vpop.f32.mrb[54].mxu1 }
 0x498   : > { %18914 = vst [vmem:[#allocation150_spill] sm:$0xff] %v17393_v55  ;;  %v17395_v32 = vpop.f32.mrb[55].mxu1 }
 0x499   : > { %18915 = vst [vmem:[#allocation149_spill] sm:$0xff] %v17395_v32  ;;  %v18924_v32 = vld [vmem:[#allocation75_spill] sm:$0xff] }
 0x49a   : > { %12415 = vmatmul.mubr.msk.bf16.gmra.mrb[96].mxu1 %vm2029_vm2, %v18916_v31  ;;  %12943 = vmatmul.mubr.msk.bf16.gmra.mrb[96].mxu0 %vm2029_vm2, %v18917_v14  ;;  %v18925_v31 = vld [vmem:[#allocation183_spill] sm:$0xff]  ;;  %v18926_v14 = vld [vmem:[#allocation77_spill] sm:$0xff] }
 0x49b   : > { %12418 = vmatprep.mubr.msk.bf16.mxu1 %vm2029_vm2, %v18918_v48  ;;  %12946 = vmatprep.mubr.msk.bf16.mxu0 %vm2029_vm2, %v18919_v11  ;;  %v18927_v48 = vld [vmem:[#allocation185_spill] sm:$0xff] }
 0x49d   : > { %v17405_v45 = vpop.f32.mrb[56].mxu1 }
 0x49e   : > { %18920 = vst [vmem:[#allocation151_spill] sm:$0xff] %v17405_v45  ;;  %v17407_v22 = vpop.f32.mrb[57].mxu1  ;;  %v18932_v45 = vld [vmem:[#allocation78_spill] sm:$0xff] }
 0x49f   : > { %18921 = vst [vmem:[#allocation156_spill] sm:$0xff] %v17407_v22  ;;  %v17409_v8 = vpop.f32.mrb[58].mxu1 }
 0x4a0   : > { %18922 = vst [vmem:[#allocation158_spill] sm:$0xff] %v17409_v8  ;;  %v17411_v55 = vpop.f32.mrb[59].mxu1 }
 0x4a1   : > { %18923 = vst [vmem:[#allocation157_spill] sm:$0xff] %v17411_v55 }
 0x4a2   : > { %12419 = vmatmul.mubr.msk.bf16.gmra.mrb[100].mxu1 %vm2029_vm2, %v18924_v32  ;;  %12947 = vmatmul.mubr.msk.bf16.gmra.mrb[100].mxu0 %vm2029_vm2, %v18925_v31  ;;  %v18933_v32 = vld [vmem:[#allocation187_spill] sm:$0xff]  ;;  %v18934_v31 = vld [vmem:[#allocation80_spill] sm:$0xff] }
 0x4a3   : > { %12422 = vmatprep.mubr.msk.bf16.mxu1 %vm2029_vm2, %v18926_v14  ;;  %12950 = vmatprep.mubr.msk.bf16.mxu0 %vm2029_vm2, %v18927_v48  ;;  %v18935_v14 = vld [vmem:[#allocation189_spill] sm:$0xff] }
 0x4a5   : > { %v17421_v11 = vpop.f32.mrb[60].mxu1 }
 0x4a6   : > { %18928 = vst [vmem:[#allocation159_spill] sm:$0xff] %v17421_v11  ;;  %v17423_v22 = vpop.f32.mrb[61].mxu1 }
 0x4a7   : > { %18929 = vst [vmem:[#allocation164_spill] sm:$0xff] %v17423_v22  ;;  %v17425_v8 = vpop.f32.mrb[62].mxu1  ;;  %v17440_v22 = vld [vmem:[%s18097_s2] ss:$0 sm:$0xff] }
 0x4a8   : > { %18930 = vst [vmem:[#allocation166_spill] sm:$0xff] %v17425_v8  ;;  %v17427_v55 = vpop.f32.mrb[63].mxu1 }
 0x4a9   : > { %18931 = vst [vmem:[#allocation165_spill] sm:$0xff] %v17427_v55 }
 0x4aa   : > { %12423 = vmatmul.mubr.msk.bf16.gmra.mrb[104].mxu1 %vm2029_vm2, %v18932_v45  ;;  %12951 = vmatmul.mubr.msk.bf16.gmra.mrb[104].mxu0 %vm2029_vm2, %v18933_v32  ;;  %v17446_v45 = vld [vmem:[%s18098_s3] ss:$0 sm:$0xff] }
 0x4ab   : > { %12426 = vmatprep.mubr.msk.bf16.mxu1 %vm2029_vm2, %v18934_v31  ;;  %12954 = vmatprep.mubr.msk.bf16.mxu0 %vm2029_vm2, %v18935_v14 }
 0x4ad   : > { %v12848_v48 = vpop.f32.mrb[0].mxu0 }
 0x4ae   : > { %v12978_v55 = vadd.f32 %v12848_v48, %v17181_v9  ;;  %v9058_v8 = vpop.f32.mrb[1].mxu0 }
 0x4af   : > { %v12979_v32 = vadd.f32 %v9058_v8, %v17183_v1  ;;  %v12849_v31 = vpop.f32.mrb[2].mxu0 }
 0x4b0   : > { %v9706_v14 = vmul.f32 %v12978_v55, %v17440_v22  ;;  %v12980_v11 = vadd.f32 %v12849_v31, %v17185_v39  ;;  %v9061_v43 = vpop.f32.mrb[3].mxu0 }
 0x4b1   : > { %v9704_v15 = vmul.f32 %v12979_v32, %v17440_v22  ;;  %v12981_v35 = vadd.f32 %v9061_v43, %v17187_v41  ;;  %v18938_v41 = vld [vmem:[#allocation84_spill] sm:$0xff]  ;;  %v18939_v43 = vld [vmem:[#allocation193_spill] sm:$0xff] }
 0x4b2   : > { %v9841_v9 = vadd.f32 %v17446_v45, %v9706_v14  ;;  %v9707_v48 = vmul.f32 %v12980_v11, %v17440_v22  ;;  %12427 = vmatmul.mubr.msk.bf16.gmra.mrb[108].mxu1 %vm2029_vm2, %v18936_v21  ;;  %12955 = vmatmul.mubr.msk.bf16.gmra.mrb[108].mxu0 %vm2029_vm2, %v18937_v49 }
 0x4b3   : > { %v9839_v1 = vadd.f32 %v17446_v45, %v9704_v15  ;;  %v9705_v39 = vmul.f32 %v12981_v35, %v17440_v22  ;;  %12430 = vmatprep.mubr.msk.bf16.mxu1 %vm2029_vm2, %v18938_v41  ;;  %12958 = vmatprep.mubr.msk.bf16.mxu0 %vm2029_vm2, %v18939_v43 }
 0x4b4   : > { %v9969_v21 = vmax.f32 %v9841_v9, 0.0  ;;  %v9842_v49 = vadd.f32 %v17446_v45, %v9707_v48 }
 0x4b5   : > { %v9967_v55 = vmax.f32 %v9839_v1, 0.0  ;;  %v9840_v8 = vadd.f32 %v17446_v45, %v9705_v39  ;;  %v12852_v11 = vpop.f32.mrb[4].mxu0 }
 0x4b6   : > { %10097 = vst.msk [vmem:[%s17463_s29 + $0x10] sm:$0xff] %vm2029_vm2, %v9969_v21  ;;  %v9970_v15 = vmax.f32 %v9842_v49, 0.0  ;;  %v12982_v35 = vadd.f32 %v12852_v11, %v17197_v13  ;;  %v9074_v32 = vpop.f32.mrb[5].mxu0  ;;  %v18941_v49 = vld [vmem:[#allocation195_spill] sm:$0xff]  ;;  %v18943_v11 = vld [vmem:[#allocation197_spill] sm:$0xff] }
 0x4b7   : > { %10095 = vst.msk [vmem:[%s17463_s29] sm:$0xff] %vm2029_vm2, %v9967_v55  ;;  %v9968_v31 = vmax.f32 %v9840_v8, 0.0  ;;  %v12983_v14 = vadd.f32 %v9074_v32, %v17199_v3  ;;  %v12853_v41 = vpop.f32.mrb[6].mxu0  ;;  %v18940_v3 = vld [vmem:[#allocation87_spill] sm:$0xff]  ;;  %v18942_v8 = vld [vmem:[#allocation89_spill] sm:$0xff] }
 0x4b8   : > { %10098 = vst.msk [vmem:[%s17463_s29 + $0x18] sm:$0xff] %vm2029_vm2, %v9970_v15  ;;  %v9710_v9 = vmul.f32 %v12982_v35, %v17440_v22  ;;  %v12984_v48 = vadd.f32 %v12853_v41, %v17201_v2  ;;  %v9077_v1 = vpop.f32.mrb[7].mxu0  ;;  %v18944_v35 = vld [vmem:[#allocation126_spill] sm:$0xff] }
 0x4b9   : > { %10096 = vst.msk [vmem:[%s17463_s29 + $0x8] sm:$0xff] %vm2029_vm2, %v9968_v31  ;;  %v9708_v39 = vmul.f32 %v12983_v14, %v17440_v22  ;;  %v12985_v13 = vadd.f32 %v9077_v1, %v17203_v6  ;;  %v8984_v32 = vrot.slane %v18944_v35, 5  ;;  %v18947_v35 = vld [vmem:[#allocation200_spill] sm:$0xff] }
 0x4ba   : > { %v9845_v43 = vadd.f32 %v17446_v45, %v9710_v9  ;;  %v9711_v21 = vmul.f32 %v12984_v48, %v17440_v22  ;;  %12431 = vmatmul.mubr.msk.bf16.gmra.mrb[112].mxu1 %vm2029_vm2, %v18940_v3  ;;  %12959 = vmatmul.mubr.msk.bf16.gmra.mrb[112].mxu0 %vm2029_vm2, %v18941_v49 }
 0x4bb   : > { %v9843_v2 = vadd.f32 %v17446_v45, %v9708_v39  ;;  %v9709_v55 = vmul.f32 %v12985_v13, %v17440_v22  ;;  %12434 = vmatprep.mubr.msk.bf16.mxu1 %vm2029_vm2, %v18942_v8  ;;  %12962 = vmatprep.mubr.msk.bf16.mxu0 %vm2029_vm2, %v18943_v11  ;;  %v8986_v11 = vrot.slane %v8984_v32, 4 }
 0x4bc   : > { %v9973_v6 = vmax.f32 %v9845_v43, 0.0  ;;  %v9846_v15 = vadd.f32 %v17446_v45, %v9711_v21  ;;  %v8987_v21 = vrot.slane %v16776_v5, 5 }
 0x4bd   : > { %v9971_v31 = vmax.f32 %v9843_v2, 0.0  ;;  %v9844_v14 = vadd.f32 %v17446_v45, %v9709_v55  ;;  %v12856_v41 = vpop.f32.mrb[8].mxu0  ;;  %v18945_v55 = vld [vmem:[#allocation124_spill] sm:$0xff] }
 0x4be   : > { %10101 = vst.msk [vmem:[%s17463_s29 + $0x30] sm:$0xff] %vm2029_vm2, %v9973_v6  ;;  %v9974_v9 = vmax.f32 %v9846_v15, 0.0  ;;  %v12986_v48 = vadd.f32 %v12856_v41, %v17213_v16  ;;  %v9090_v1 = vpop.f32.mrb[9].mxu0  ;;  %v11114_v8 = vrot.slane %v18945_v55, 9  ;;  %v18946_v15 = vld [vmem:[#allocation91_spill] sm:$0xff]  ;;  %v18948_v41 = vld [vmem:[#allocation94_spill] sm:$0xff] }
 0x4bf   : > { %10099 = vst.msk [vmem:[%s17463_s29 + $0x20] sm:$0xff] %vm2029_vm2, %v9971_v31  ;;  %v9972_v39 = vmax.f32 %v9844_v14, 0.0  ;;  %v12987_v13 = vadd.f32 %v9090_v1, %v17215_v53  ;;  %v12857_v43 = vpop.f32.mrb[10].mxu0 }
 0x4c0   : > { %10102 = vst.msk [vmem:[%s17463_s29 + $0x38] sm:$0xff] %vm2029_vm2, %v9974_v9  ;;  %v9714_v3 = vmul.f32 %v12986_v48, %v17440_v22  ;;  %v12988_v49 = vadd.f32 %v12857_v43, %v17217_v18  ;;  %v9093_v2 = vpop.f32.mrb[11].mxu0  ;;  %v8990_v18 = vrot.slane %v16779_v60, 5  ;;  %v8988_v60 = vsel %vm14826_vm6, %v8986_v11, %v8987_v21 }
 0x4c1   : > { %10100 = vst.msk [vmem:[%s17463_s29 + $0x28] sm:$0xff] %vm2029_vm2, %v9972_v39  ;;  %v9712_v16 = vmul.f32 %v12987_v13, %v17440_v22  ;;  %v12989_v6 = vadd.f32 %v9093_v2, %v17219_v10  ;;  %v18949_v10 = vld [vmem:[#allocation202_spill] sm:$0xff]  ;;  %v8985_v39 = vsel %vm14826_vm6, %v11114_v8, %v8984_v32 }
 0x4c2   : > { %v9849_v53 = vadd.f32 %v17446_v45, %v9714_v3  ;;  %v9715_v5 = vmul.f32 %v12988_v49, %v17440_v22  ;;  %12435 = vmatmul.mubr.msk.bf16.gmra.mrb[116].mxu1 %vm2029_vm2, %v18946_v15  ;;  %12963 = vmatmul.mubr.msk.bf16.gmra.mrb[116].mxu0 %vm2029_vm2, %v18947_v35 }
 0x4c3   : > { %v9847_v31 = vadd.f32 %v17446_v45, %v9712_v16  ;;  %v9713_v14 = vmul.f32 %v12989_v6, %v17440_v22  ;;  %12438 = vmatprep.mubr.msk.bf16.mxu1 %vm2029_vm2, %v18948_v41  ;;  %12966 = vmatprep.mubr.msk.bf16.mxu0 %vm2029_vm2, %v18949_v10  ;;  %v8989_v16 = vrot.slane %v8987_v21, 4  ;;  %v8992_v6 = vrot.slane %v8990_v18, 4 }
 0x4c4   : > { %v9977_v9 = vmax.f32 %v9849_v53, 0.0  ;;  %v9850_v48 = vadd.f32 %v17446_v45, %v9715_v5  ;;  %v11119_v53 = vcombine.low %v8985_v39, %v8988_v60  ;;  %v8993_v5 = vrot.slane %v17054_v50, 5  ;;  %v18951_v50 = vld [vmem:[#allocation204_spill] sm:$0xff] }
 0x4c5   : > { %v9975_v13 = vmax.f32 %v9847_v31, 0.0  ;;  %v9848_v43 = vadd.f32 %v17446_v45, %v9713_v14  ;;  %v12860_v3 = vpop.f32.mrb[12].mxu0 }
 0x4c6   : > { %10105 = vst.msk [vmem:[%s17463_s29 + $0x50] sm:$0xff] %vm2029_vm2, %v9977_v9  ;;  %v9978_v49 = vmax.f32 %v9850_v48, 0.0  ;;  %v12990_v2 = vadd.f32 %v12860_v3, %v17229_v38  ;;  %v9106_v55 = vpop.f32.mrb[13].mxu0 }
 0x4c7   : > { %10103 = vst.msk [vmem:[%s17463_s29 + $0x40] sm:$0xff] %vm2029_vm2, %v9975_v13  ;;  %v9976_v32 = vmax.f32 %v9848_v43, 0.0  ;;  %v12991_v8 = vadd.f32 %v9106_v55, %v17231_v52  ;;  %v12861_v11 = vpop.f32.mrb[14].mxu0 }
 0x4c8   : > { %10106 = vst.msk [vmem:[%s17463_s29 + $0x58] sm:$0xff] %vm2029_vm2, %v9978_v49  ;;  %v9718_v15 = vmul.f32 %v12990_v2, %v17440_v22  ;;  %v12992_v35 = vadd.f32 %v12861_v11, %v17233_v0  ;;  %v9109_v31 = vpop.f32.mrb[15].mxu0  ;;  %v8991_v0 = vsel %vm14826_vm6, %v8989_v16, %v8990_v18 }
 0x4c9   : > { %10104 = vst.msk [vmem:[%s17463_s29 + $0x48] sm:$0xff] %vm2029_vm2, %v9976_v32  ;;  %v9716_v38 = vmul.f32 %v12991_v8, %v17440_v22  ;;  %v12993_v21 = vadd.f32 %v9109_v31, %v17235_v12 }
 0x4ca   : > { %v9853_v52 = vadd.f32 %v17446_v45, %v9718_v15  ;;  %v9719_v14 = vmul.f32 %v12992_v35, %v17440_v22  ;;  %12439 = vmatmul.mubr.msk.bf16.gmra.mrb[120].mxu1 %vm2029_vm2, %v18833_v62  ;;  %12967 = vmatmul.mubr.msk.bf16.gmra.mrb[120].mxu0 %vm2029_vm2, %v18951_v50  ;;  %v8994_v62 = vsel %vm14826_vm6, %v8992_v6, %v8993_v5 }
 0x4cb   : > { %v9851_v41 = vadd.f32 %v17446_v45, %v9716_v38  ;;  %v9717_v10 = vmul.f32 %v12993_v21, %v17440_v22  ;;  %12442 = vmatprep.mubr.msk.bf16.mxu1 %vm2029_vm2, %v17051_v42  ;;  %12970 = vmatprep.mubr.msk.bf16.mxu0 %vm2029_vm2, %v11119_v53  ;;  %v11120_v43 = vcombine.low %v8991_v0, %v8994_v62 }
 0x4cc   : > { %v9981_v12 = vmax.f32 %v9853_v52, 0.0  ;;  %v9854_v9 = vadd.f32 %v17446_v45, %v9719_v14 }
 0x4cd   : > { %v9979_v48 = vmax.f32 %v9851_v41, 0.0  ;;  %v9852_v18 = vadd.f32 %v17446_v45, %v9717_v10  ;;  %v12864_v39 = vpop.f32.mrb[16].mxu0 }
 0x4ce   : > { %10109 = vst.msk [vmem:[%s17463_s29 + $0x70] sm:$0xff] %vm2029_vm2, %v9981_v12  ;;  %v9982_v60 = vmax.f32 %v9854_v9, 0.0  ;;  %v12994_v13 = vadd.f32 %v12864_v39, %v17245_v58  ;;  %v9122_v42 = vpop.f32.mrb[17].mxu0 }
 0x4cf   : > { %10107 = vst.msk [vmem:[%s17463_s29 + $0x60] sm:$0xff] %vm2029_vm2, %v9979_v48  ;;  %v9980_v1 = vmax.f32 %v9852_v18, 0.0  ;;  %v12995_v3 = vadd.f32 %v9122_v42, %v17247_v54  ;;  %v12865_v49 = vpop.f32.mrb[18].mxu0 }
 0x4d0   : > { %10110 = vst.msk [vmem:[%s17463_s29 + $0x78] sm:$0xff] %vm2029_vm2, %v9982_v60  ;;  %v9722_v2 = vmul.f32 %v12994_v13, %v17440_v22  ;;  %v12996_v55 = vadd.f32 %v12865_v49, %v17249_v19  ;;  %v9125_v16 = vpop.f32.mrb[19].mxu0 }
 0x4d1   : > { %10108 = vst.msk [vmem:[%s17463_s29 + $0x68] sm:$0xff] %vm2029_vm2, %v9980_v1  ;;  %v9720_v58 = vmul.f32 %v12995_v3, %v17440_v22  ;;  %v12997_v6 = vadd.f32 %v9125_v16, %v17251_v28 }
 0x4d2   : > { %v9857_v32 = vadd.f32 %v17446_v45, %v9722_v2  ;;  %v9723_v54 = vmul.f32 %v12996_v55, %v17440_v22  ;;  %12443 = vmatmul.mubr.msk.bf16.gmra.mrb[124].mxu1 %vm2029_vm2, %v17073_v25  ;;  %12971 = vmatmul.mubr.msk.bf16.gmra.mrb[124].mxu0 %vm2029_vm2, %v11120_v43 }
 0x4d3   : > { %v9855_v19 = vadd.f32 %v17446_v45, %v9720_v58  ;;  %v9721_v8 = vmul.f32 %v12997_v6, %v17440_v22 }
 0x4d4   : > { %v9985_v11 = vmax.f32 %v9857_v32, 0.0  ;;  %v9858_v53 = vadd.f32 %v17446_v45, %v9723_v54 }
 0x4d5   : > { %v9983_v28 = vmax.f32 %v9855_v19, 0.0  ;;  %v9856_v5 = vadd.f32 %v17446_v45, %v9721_v8  ;;  %v12868_v15 = vpop.f32.mrb[20].mxu0 }
 0x4d6   : > { %10113 = vst.msk [vmem:[%s17463_s29 + $0x90] sm:$0xff] %vm2029_vm2, %v9985_v11  ;;  %v9986_v35 = vmax.f32 %v9858_v53, 0.0  ;;  %v12998_v25 = vadd.f32 %v12868_v15, %v17261_v59  ;;  %v9138_v31 = vpop.f32.mrb[21].mxu0 }
 0x4d7   : > { %10111 = vst.msk [vmem:[%s17463_s29 + $0x80] sm:$0xff] %vm2029_vm2, %v9983_v28  ;;  %v9984_v38 = vmax.f32 %v9856_v5, 0.0  ;;  %v12999_v21 = vadd.f32 %v9138_v31, %v17263_v37  ;;  %v12869_v52 = vpop.f32.mrb[22].mxu0 }
 0x4d8   : > { %10114 = vst.msk [vmem:[%s17463_s29 + $0x98] sm:$0xff] %vm2029_vm2, %v9986_v35  ;;  %v9726_v14 = vmul.f32 %v12998_v25, %v17440_v22  ;;  %v13000_v50 = vadd.f32 %v12869_v52, %v17265_v63  ;;  %v9141_v0 = vpop.f32.mrb[23].mxu0 }
 0x4d9   : > { %10112 = vst.msk [vmem:[%s17463_s29 + $0x88] sm:$0xff] %vm2029_vm2, %v9984_v38  ;;  %v9724_v59 = vmul.f32 %v12999_v21, %v17440_v22  ;;  %v13001_v41 = vadd.f32 %v9141_v0, %v17267_v29 }
 0x4da   : > { %v9861_v10 = vadd.f32 %v17446_v45, %v9726_v14  ;;  %v9727_v37 = vmul.f32 %v13000_v50, %v17440_v22 }
 0x4db   : > { %v9859_v62 = vadd.f32 %v17446_v45, %v9724_v59  ;;  %v9725_v12 = vmul.f32 %v13001_v41, %v17440_v22 }
 0x4dc   : > { %v9989_v9 = vmax.f32 %v9861_v10, 0.0  ;;  %v9862_v63 = vadd.f32 %v17446_v45, %v9727_v37 }
 0x4dd   : > { %v9987_v48 = vmax.f32 %v9859_v62, 0.0  ;;  %v9860_v18 = vadd.f32 %v17446_v45, %v9725_v12  ;;  %v12872_v39 = vpop.f32.mrb[24].mxu0 }
 0x4de   : > { %10117 = vst.msk [vmem:[%s17463_s29 + $0xb0] sm:$0xff] %vm2029_vm2, %v9989_v9  ;;  %v9990_v29 = vmax.f32 %v9862_v63, 0.0  ;;  %v13002_v60 = vadd.f32 %v12872_v39, %v17277_v23  ;;  %v9154_v13 = vpop.f32.mrb[25].mxu0 }
 0x4df   : > { %10115 = vst.msk [vmem:[%s17463_s29 + $0xa0] sm:$0xff] %vm2029_vm2, %v9987_v48  ;;  %v9988_v42 = vmax.f32 %v9860_v18, 0.0  ;;  %v13003_v43 = vadd.f32 %v9154_v13, %v17279_v26  ;;  %v12873_v1 = vpop.f32.mrb[26].mxu0 }
 0x4e0   : > { %10118 = vst.msk [vmem:[%s17463_s29 + $0xb8] sm:$0xff] %vm2029_vm2, %v9990_v29  ;;  %v9730_v3 = vmul.f32 %v13002_v60, %v17440_v22  ;;  %v13004_v49 = vadd.f32 %v12873_v1, %v17281_v56  ;;  %v9157_v2 = vpop.f32.mrb[27].mxu0 }
 0x4e1   : > { %10116 = vst.msk [vmem:[%s17463_s29 + $0xa8] sm:$0xff] %vm2029_vm2, %v9988_v42  ;;  %v9728_v23 = vmul.f32 %v13003_v43, %v17440_v22  ;;  %v13005_v55 = vadd.f32 %v9157_v2, %v17283_v30 }
 0x4e2   : > { %v9865_v16 = vadd.f32 %v17446_v45, %v9730_v3  ;;  %v9731_v26 = vmul.f32 %v13004_v49, %v17440_v22 }
 0x4e3   : > { %v9863_v58 = vadd.f32 %v17446_v45, %v9728_v23  ;;  %v9729_v6 = vmul.f32 %v13005_v55, %v17440_v22 }
 0x4e4   : > { %v9993_v32 = vmax.f32 %v9865_v16, 0.0  ;;  %v9866_v56 = vadd.f32 %v17446_v45, %v9731_v26 }
 0x4e5   : > { %v9991_v54 = vmax.f32 %v9863_v58, 0.0  ;;  %v9864_v19 = vadd.f32 %v17446_v45, %v9729_v6  ;;  %v12876_v8 = vpop.f32.mrb[28].mxu0 }
 0x4e6   : > { %10121 = vst.msk [vmem:[%s17463_s29 + $0xd0] sm:$0xff] %vm2029_vm2, %v9993_v32  ;;  %v9994_v30 = vmax.f32 %v9866_v56, 0.0  ;;  %v13006_v11 = vadd.f32 %v12876_v8, %v17293_v7  ;;  %v9170_v53 = vpop.f32.mrb[29].mxu0 }
 0x4e7   : > { %10119 = vst.msk [vmem:[%s17463_s29 + $0xc0] sm:$0xff] %vm2029_vm2, %v9991_v54  ;;  %v9992_v28 = vmax.f32 %v9864_v19, 0.0  ;;  %v13007_v5 = vadd.f32 %v9170_v53, %v17295_v24  ;;  %v12877_v15 = vpop.f32.mrb[30].mxu0 }
 0x4e8   : > { %10122 = vst.msk [vmem:[%s17463_s29 + $0xd8] sm:$0xff] %vm2029_vm2, %v9994_v30  ;;  %v9734_v35 = vmul.f32 %v13006_v11, %v17440_v22  ;;  %v13008_v25 = vadd.f32 %v12877_v15, %v17297_v47  ;;  %v9173_v31 = vpop.f32.mrb[31].mxu0 }
 0x4e9   : > { %10120 = vst.msk [vmem:[%s17463_s29 + $0xc8] sm:$0xff] %vm2029_vm2, %v9992_v28  ;;  %v9732_v7 = vmul.f32 %v13007_v5, %v17440_v22  ;;  %v13009_v38 = vadd.f32 %v9173_v31, %v17299_v34 }
 0x4ea   : > { %v9869_v21 = vadd.f32 %v17446_v45, %v9734_v35  ;;  %v9735_v24 = vmul.f32 %v13008_v25, %v17440_v22 }
 0x4eb   : > { %v9867_v52 = vadd.f32 %v17446_v45, %v9732_v7  ;;  %v9733_v14 = vmul.f32 %v13009_v38, %v17440_v22 }
 0x4ec   : > { %v9997_v50 = vmax.f32 %v9869_v21, 0.0  ;;  %v9870_v47 = vadd.f32 %v17446_v45, %v9735_v24 }
 0x4ed   : > { %v9995_v0 = vmax.f32 %v9867_v52, 0.0  ;;  %v9868_v59 = vadd.f32 %v17446_v45, %v9733_v14  ;;  %v12880_v41 = vpop.f32.mrb[32].mxu0 }
 0x4ee   : > { %10125 = vst.msk [vmem:[%s17463_s29 + $0xf0] sm:$0xff] %vm2029_vm2, %v9997_v50  ;;  %v9998_v34 = vmax.f32 %v9870_v47, 0.0  ;;  %v13010_v10 = vadd.f32 %v12880_v41, %v17309_v40  ;;  %v9186_v37 = vpop.f32.mrb[33].mxu0  ;;  %v18952_v41 = vld [vmem:[#allocation127_spill] sm:$0xff] }
 0x4ef   : > { %10123 = vst.msk [vmem:[%s17463_s29 + $0xe0] sm:$0xff] %vm2029_vm2, %v9995_v0  ;;  %v9996_v62 = vmax.f32 %v9868_v59, 0.0  ;;  %v13011_v12 = vadd.f32 %v9186_v37, %v17311_v61  ;;  %v12881_v9 = vpop.f32.mrb[34].mxu0 }
 0x4f0   : > { %10126 = vst.msk [vmem:[%s17463_s29 + $0xf8] sm:$0xff] %vm2029_vm2, %v9998_v34  ;;  %v9738_v63 = vmul.f32 %v13010_v10, %v17440_v22  ;;  %v13012_v48 = vadd.f32 %v12881_v9, %v17313_v4  ;;  %v9189_v18 = vpop.f32.mrb[35].mxu0 }
 0x4f1   : > { %10124 = vst.msk [vmem:[%s17463_s29 + $0xe8] sm:$0xff] %vm2029_vm2, %v9996_v62  ;;  %v9736_v40 = vmul.f32 %v13011_v12, %v17440_v22  ;;  %v13013_v39 = vadd.f32 %v9189_v18, %v17315_v33  ;;  %v18953_v62 = vld [vmem:[#allocation132_spill] sm:$0xff] }
 0x4f2   : > { %v9873_v29 = vadd.f32 %v17446_v45, %v9738_v63  ;;  %v9739_v61 = vmul.f32 %v13012_v48, %v17440_v22  ;;  %v18954_v48 = vld [vmem:[#allocation134_spill] sm:$0xff] }
 0x4f3   : > { %v9871_v60 = vadd.f32 %v17446_v45, %v9736_v40  ;;  %v9737_v13 = vmul.f32 %v13013_v39, %v17440_v22 }
 0x4f4   : > { %v10001_v42 = vmax.f32 %v9873_v29, 0.0  ;;  %v9874_v4 = vadd.f32 %v17446_v45, %v9739_v61  ;;  %v18955_v29 = vld [vmem:[#allocation133_spill] sm:$0xff] }
 0x4f5   : > { %v9999_v43 = vmax.f32 %v9871_v60, 0.0  ;;  %v9872_v1 = vadd.f32 %v17446_v45, %v9737_v13  ;;  %v12884_v3 = vpop.f32.mrb[36].mxu0 }
 0x4f6   : > { %10129 = vst.msk [vmem:[%s17463_s29 + $0x110] sm:$0xff] %vm2029_vm2, %v10001_v42  ;;  %v10002_v33 = vmax.f32 %v9874_v4, 0.0  ;;  %v13014_v49 = vadd.f32 %v12884_v3, %v17325_v51  ;;  %v9202_v2 = vpop.f32.mrb[37].mxu0 }
 0x4f7   : > { %10127 = vst.msk [vmem:[%s17463_s29 + $0x100] sm:$0xff] %vm2029_vm2, %v9999_v43  ;;  %v10000_v23 = vmax.f32 %v9872_v1, 0.0  ;;  %v13015_v55 = vadd.f32 %v9202_v2, %v17327_v20  ;;  %v12885_v16 = vpop.f32.mrb[38].mxu0 }
 0x4f8   : > { %10130 = vst.msk [vmem:[%s17463_s29 + $0x118] sm:$0xff] %vm2029_vm2, %v10002_v33  ;;  %v9742_v26 = vmul.f32 %v13014_v49, %v17440_v22  ;;  %v13016_v58 = vadd.f32 %v12885_v16, %v17329_v36  ;;  %v9205_v6 = vpop.f32.mrb[39].mxu0 }
 0x4f9   : > { %10128 = vst.msk [vmem:[%s17463_s29 + $0x108] sm:$0xff] %vm2029_vm2, %v10000_v23  ;;  %v9740_v51 = vmul.f32 %v13015_v55, %v17440_v22  ;;  %v13017_v32 = vadd.f32 %v9205_v6, %v17331_v17  ;;  %v18956_v23 = vld [vmem:[#allocation135_spill] sm:$0xff] }
 0x4fa   : > { %v9877_v56 = vadd.f32 %v17446_v45, %v9742_v26  ;;  %v9743_v20 = vmul.f32 %v13016_v58, %v17440_v22  ;;  %v18957_v58 = vld [vmem:[#allocation140_spill] sm:$0xff] }
 0x4fb   : > { %v9875_v54 = vadd.f32 %v17446_v45, %v9740_v51  ;;  %v9741_v19 = vmul.f32 %v13017_v32, %v17440_v22 }
 0x4fc   : > { %v10005_v8 = vmax.f32 %v9877_v56, 0.0  ;;  %v9878_v36 = vadd.f32 %v17446_v45, %v9743_v20  ;;  %v18958_v56 = vld [vmem:[#allocation142_spill] sm:$0xff] }
 0x4fd   : > { %v10003_v30 = vmax.f32 %v9875_v54, 0.0  ;;  %v9876_v11 = vadd.f32 %v17446_v45, %v9741_v19  ;;  %v12888_v53 = vpop.f32.mrb[40].mxu0 }
 0x4fe   : > { %10133 = vst.msk [vmem:[%s17463_s29 + $0x130] sm:$0xff] %vm2029_vm2, %v10005_v8  ;;  %v10006_v17 = vmax.f32 %v9878_v36, 0.0  ;;  %v13018_v28 = vadd.f32 %v12888_v53, %v17341_v27  ;;  %v9218_v5 = vpop.f32.mrb[41].mxu0  ;;  %v18959_v8 = vld [vmem:[#allocation141_spill] sm:$0xff] }
 0x4ff   : > { %10131 = vst.msk [vmem:[%s17463_s29 + $0x120] sm:$0xff] %vm2029_vm2, %v10003_v30  ;;  %v10004_v15 = vmax.f32 %v9876_v11, 0.0  ;;  %v13019_v35 = vadd.f32 %v9218_v5, %v17343_v46  ;;  %v12889_v25 = vpop.f32.mrb[42].mxu0 }
 0x500   : > { %10134 = vst.msk [vmem:[%s17463_s29 + $0x138] sm:$0xff] %vm2029_vm2, %v10006_v17  ;;  %v9746_v31 = vmul.f32 %v13018_v28, %v17440_v22  ;;  %v13020_v7 = vadd.f32 %v12889_v25, %v17345_v44  ;;  %v9221_v38 = vpop.f32.mrb[43].mxu0 }
 0x501   : > { %10132 = vst.msk [vmem:[%s17463_s29 + $0x128] sm:$0xff] %vm2029_vm2, %v10004_v15  ;;  %v9744_v27 = vmul.f32 %v13019_v35, %v17440_v22  ;;  %v13021_v21 = vadd.f32 %v9221_v38, %v17347_v57 }
 0x502   : > { %v9881_v24 = vadd.f32 %v17446_v45, %v9746_v31  ;;  %v9747_v46 = vmul.f32 %v13020_v7, %v17440_v22  ;;  %v18960_v7 = vld [vmem:[#allocation143_spill] sm:$0xff] }
 0x503   : > { %v9879_v52 = vadd.f32 %v17446_v45, %v9744_v27  ;;  %v9745_v14 = vmul.f32 %v13021_v21, %v17440_v22 }
 0x504   : > { %v10009_v50 = vmax.f32 %v9881_v24, 0.0  ;;  %v9882_v44 = vadd.f32 %v17446_v45, %v9747_v46  ;;  %v18961_v24 = vld [vmem:[#allocation148_spill] sm:$0xff] }
 0x505   : > { %v10007_v47 = vmax.f32 %v9879_v52, 0.0  ;;  %v9880_v0 = vadd.f32 %v17446_v45, %v9745_v14  ;;  %v12892_v59 = vpop.f32.mrb[44].mxu0 }
 0x506   : > { %10137 = vst.msk [vmem:[%s17463_s29 + $0x150] sm:$0xff] %vm2029_vm2, %v10009_v50  ;;  %v10010_v57 = vmax.f32 %v9882_v44, 0.0  ;;  %v13022_v34 = vadd.f32 %v12892_v59, %v18952_v41  ;;  %v9234_v10 = vpop.f32.mrb[45].mxu0  ;;  %v18962_v50 = vld [vmem:[#allocation150_spill] sm:$0xff]  ;;  %v18963_v59 = vld [vmem:[#allocation149_spill] sm:$0xff] }
 0x507   : > { %10135 = vst.msk [vmem:[%s17463_s29 + $0x140] sm:$0xff] %vm2029_vm2, %v10007_v47  ;;  %v10008_v37 = vmax.f32 %v9880_v0, 0.0  ;;  %v13023_v12 = vadd.f32 %v9234_v10, %v18953_v62  ;;  %v12893_v9 = vpop.f32.mrb[46].mxu0 }
 0x508   : > { %10138 = vst.msk [vmem:[%s17463_s29 + $0x158] sm:$0xff] %vm2029_vm2, %v10010_v57  ;;  %v9750_v63 = vmul.f32 %v13022_v34, %v17440_v22  ;;  %v13024_v18 = vadd.f32 %v12893_v9, %v18954_v48  ;;  %v9237_v40 = vpop.f32.mrb[47].mxu0 }
 0x509   : > { %10136 = vst.msk [vmem:[%s17463_s29 + $0x148] sm:$0xff] %vm2029_vm2, %v10008_v37  ;;  %v9748_v39 = vmul.f32 %v13023_v12, %v17440_v22  ;;  %v13025_v61 = vadd.f32 %v9237_v40, %v18955_v29  ;;  %v18964_v40 = vld [vmem:[#allocation151_spill] sm:$0xff] }
 0x50a   : > { %v9885_v60 = vadd.f32 %v17446_v45, %v9750_v63  ;;  %v9751_v13 = vmul.f32 %v13024_v18, %v17440_v22 }
 0x50b   : > { %v9883_v42 = vadd.f32 %v17446_v45, %v9748_v39  ;;  %v9749_v4 = vmul.f32 %v13025_v61, %v17440_v22 }
 0x50c   : > { %v10013_v43 = vmax.f32 %v9885_v60, 0.0  ;;  %v9886_v1 = vadd.f32 %v17446_v45, %v9751_v13  ;;  %v18965_v60 = vld [vmem:[#allocation156_spill] sm:$0xff] }
 0x50d   : > { %v10011_v3 = vmax.f32 %v9883_v42, 0.0  ;;  %v9884_v33 = vadd.f32 %v17446_v45, %v9749_v4  ;;  %v12896_v49 = vpop.f32.mrb[48].mxu0 }
 0x50e   : > { %10141 = vst.msk [vmem:[%s17463_s29 + $0x170] sm:$0xff] %vm2029_vm2, %v10013_v43  ;;  %v10014_v2 = vmax.f32 %v9886_v1, 0.0  ;;  %v13026_v55 = vadd.f32 %v12896_v49, %v18956_v23  ;;  %v9250_v16 = vpop.f32.mrb[49].mxu0  ;;  %v18966_v43 = vld [vmem:[#allocation158_spill] sm:$0xff]  ;;  %v18967_v49 = vld [vmem:[#allocation157_spill] sm:$0xff] }
 0x50f   : > { %10139 = vst.msk [vmem:[%s17463_s29 + $0x160] sm:$0xff] %vm2029_vm2, %v10011_v3  ;;  %v10012_v26 = vmax.f32 %v9884_v33, 0.0  ;;  %v13027_v6 = vadd.f32 %v9250_v16, %v18957_v58  ;;  %v12897_v51 = vpop.f32.mrb[50].mxu0 }
 0x510   : > { %10142 = vst.msk [vmem:[%s17463_s29 + $0x178] sm:$0xff] %vm2029_vm2, %v10014_v2  ;;  %v9754_v32 = vmul.f32 %v13026_v55, %v17440_v22  ;;  %v13028_v20 = vadd.f32 %v12897_v51, %v18958_v56  ;;  %v9253_v54 = vpop.f32.mrb[51].mxu0 }
 0x511   : > { %10140 = vst.msk [vmem:[%s17463_s29 + $0x168] sm:$0xff] %vm2029_vm2, %v10012_v26  ;;  %v9752_v19 = vmul.f32 %v13027_v6, %v17440_v22  ;;  %v13029_v36 = vadd.f32 %v9253_v54, %v18959_v8  ;;  %v18968_v54 = vld [vmem:[#allocation159_spill] sm:$0xff] }
 0x512   : > { %v9889_v30 = vadd.f32 %v17446_v45, %v9754_v32  ;;  %v9755_v11 = vmul.f32 %v13028_v20, %v17440_v22 }
 0x513   : > { %v9887_v53 = vadd.f32 %v17446_v45, %v9752_v19  ;;  %v9753_v17 = vmul.f32 %v13029_v36, %v17440_v22 }
 0x514   : > { %v10017_v28 = vmax.f32 %v9889_v30, 0.0  ;;  %v9890_v5 = vadd.f32 %v17446_v45, %v9755_v11  ;;  %v18969_v30 = vld [vmem:[#allocation164_spill] sm:$0xff] }
 0x515   : > { %v10015_v15 = vmax.f32 %v9887_v53, 0.0  ;;  %v9888_v35 = vadd.f32 %v17446_v45, %v9753_v17  ;;  %v12900_v25 = vpop.f32.mrb[52].mxu0 }
 0x516   : > { %10145 = vst.msk [vmem:[%s17463_s29 + $0x190] sm:$0xff] %vm2029_vm2, %v10017_v28  ;;  %v10018_v31 = vmax.f32 %v9890_v5, 0.0  ;;  %v13030_v38 = vadd.f32 %v12900_v25, %v18960_v7  ;;  %v9266_v27 = vpop.f32.mrb[53].mxu0  ;;  %v18970_v28 = vld [vmem:[#allocation166_spill] sm:$0xff]  ;;  %v18971_v25 = vld [vmem:[#allocation165_spill] sm:$0xff] }
 0x517   : > { %10143 = vst.msk [vmem:[%s17463_s29 + $0x180] sm:$0xff] %vm2029_vm2, %v10015_v15  ;;  %v10016_v21 = vmax.f32 %v9888_v35, 0.0  ;;  %v13031_v46 = vadd.f32 %v9266_v27, %v18961_v24  ;;  %v12901_v52 = vpop.f32.mrb[54].mxu0 }
 0x518   : > { %10146 = vst.msk [vmem:[%s17463_s29 + $0x198] sm:$0xff] %vm2029_vm2, %v10018_v31  ;;  %v9758_v14 = vmul.f32 %v13030_v38, %v17440_v22  ;;  %v13032_v44 = vadd.f32 %v12901_v52, %v18962_v50  ;;  %v9269_v47 = vpop.f32.mrb[55].mxu0 }
 0x519   : > { %10144 = vst.msk [vmem:[%s17463_s29 + $0x188] sm:$0xff] %vm2029_vm2, %v10016_v21  ;;  %v9756_v0 = vmul.f32 %v13031_v46, %v17440_v22  ;;  %v13033_v57 = vadd.f32 %v9269_v47, %v18963_v59 }
 0x51a   : > { %v9893_v41 = vadd.f32 %v17446_v45, %v9758_v14  ;;  %v9759_v34 = vmul.f32 %v13032_v44, %v17440_v22 }
 0x51b   : > { %v9891_v10 = vadd.f32 %v17446_v45, %v9756_v0  ;;  %v9757_v37 = vmul.f32 %v13033_v57, %v17440_v22 }
 0x51c   : > { %v10021_v62 = vmax.f32 %v9893_v41, 0.0  ;;  %v9894_v12 = vadd.f32 %v17446_v45, %v9759_v34 }
 0x51d   : > { %v10019_v9 = vmax.f32 %v9891_v10, 0.0  ;;  %v9892_v63 = vadd.f32 %v17446_v45, %v9757_v37  ;;  %v12904_v48 = vpop.f32.mrb[56].mxu0 }
 0x51e   : > { %10149 = vst.msk [vmem:[%s17463_s29 + $0x1b0] sm:$0xff] %vm2029_vm2, %v10021_v62  ;;  %v10022_v18 = vmax.f32 %v9894_v12, 0.0  ;;  %v13034_v39 = vadd.f32 %v12904_v48, %v18964_v40  ;;  %v9282_v29 = vpop.f32.mrb[57].mxu0 }
 0x51f   : > { %10147 = vst.msk [vmem:[%s17463_s29 + $0x1a0] sm:$0xff] %vm2029_vm2, %v10019_v9  ;;  %v10020_v61 = vmax.f32 %v9892_v63, 0.0  ;;  %v13035_v13 = vadd.f32 %v9282_v29, %v18965_v60  ;;  %v12905_v42 = vpop.f32.mrb[58].mxu0 }
 0x520   : > { %10150 = vst.msk [vmem:[%s17463_s29 + $0x1b8] sm:$0xff] %vm2029_vm2, %v10022_v18  ;;  %v9762_v4 = vmul.f32 %v13034_v39, %v17440_v22  ;;  %v13036_v1 = vadd.f32 %v12905_v42, %v18966_v43  ;;  %v9285_v3 = vpop.f32.mrb[59].mxu0 }
 0x521   : > { %10148 = vst.msk [vmem:[%s17463_s29 + $0x1a8] sm:$0xff] %vm2029_vm2, %v10020_v61  ;;  %v9760_v33 = vmul.f32 %v13035_v13, %v17440_v22  ;;  %v13037_v2 = vadd.f32 %v9285_v3, %v18967_v49 }
 0x522   : > { %v9897_v23 = vadd.f32 %v17446_v45, %v9762_v4  ;;  %v9763_v55 = vmul.f32 %v13036_v1, %v17440_v22 }
 0x523   : > { %v9895_v16 = vadd.f32 %v17446_v45, %v9760_v33  ;;  %v9761_v26 = vmul.f32 %v13037_v2, %v17440_v22 }
 0x524   : > { %v10025_v58 = vmax.f32 %v9897_v23, 0.0  ;;  %v9898_v6 = vadd.f32 %v17446_v45, %v9763_v55 }
 0x525   : > { %v10023_v51 = vmax.f32 %v9895_v16, 0.0  ;;  %v9896_v32 = vadd.f32 %v17446_v45, %v9761_v26  ;;  %v12908_v56 = vpop.f32.mrb[60].mxu0 }
 0x526   : > { %10153 = vst.msk [vmem:[%s17463_s29 + $0x1d0] sm:$0xff] %vm2029_vm2, %v10025_v58  ;;  %v10026_v20 = vmax.f32 %v9898_v6, 0.0  ;;  %v13038_v19 = vadd.f32 %v12908_v56, %v18968_v54  ;;  %v9298_v8 = vpop.f32.mrb[61].mxu0 }
 0x527   : > { %10151 = vst.msk [vmem:[%s17463_s29 + $0x1c0] sm:$0xff] %vm2029_vm2, %v10023_v51  ;;  %v10024_v36 = vmax.f32 %v9896_v32, 0.0  ;;  %v13039_v11 = vadd.f32 %v9298_v8, %v18969_v30  ;;  %v12909_v53 = vpop.f32.mrb[62].mxu0 }
 0x528   : > { %10154 = vst.msk [vmem:[%s17463_s29 + $0x1d8] sm:$0xff] %vm2029_vm2, %v10026_v20  ;;  %v9766_v17 = vmul.f32 %v13038_v19, %v17440_v22  ;;  %v13040_v5 = vadd.f32 %v12909_v53, %v18970_v28  ;;  %v9301_v15 = vpop.f32.mrb[63].mxu0 }
 0x529   : > { %10152 = vst.msk [vmem:[%s17463_s29 + $0x1c8] sm:$0xff] %vm2029_vm2, %v10024_v36  ;;  %v9764_v35 = vmul.f32 %v13039_v11, %v17440_v22  ;;  %v13041_v31 = vadd.f32 %v9301_v15, %v18971_v25 }
 0x52a   : > { %v9901_v7 = vadd.f32 %v17446_v45, %v9766_v17  ;;  %v9767_v38 = vmul.f32 %v13040_v5, %v17440_v22 }
 0x52b   : > { %v9899_v27 = vadd.f32 %v17446_v45, %v9764_v35  ;;  %v9765_v21 = vmul.f32 %v13041_v31, %v17440_v22 }
 0x52c   : > { %v10029_v24 = vmax.f32 %v9901_v7, 0.0  ;;  %v9902_v46 = vadd.f32 %v17446_v45, %v9767_v38 }
 0x52d   : > { %v10027_v52 = vmax.f32 %v9899_v27, 0.0  ;;  %v9900_v14 = vadd.f32 %v17446_v45, %v9765_v21  ;;  %v12384_v50 = vpop.f32.mrb[64].mxu1  ;;  %v12912_v44 = vpop.f32.mrb[64].mxu0 }
 0x52e   : > { %10157 = vst.msk [vmem:[%s17463_s29 + $0x1f0] sm:$0xff] %vm2029_vm2, %v10029_v24  ;;  %v10030_v47 = vmax.f32 %v9902_v46, 0.0  ;;  %v13042_v0 = vadd.f32 %v12912_v44, %v12384_v50  ;;  %v6430_v59 = vpop.f32.mrb[65].mxu1  ;;  %v9314_v57 = vpop.f32.mrb[65].mxu0 }
 0x52f   : > { %10155 = vst.msk [vmem:[%s17463_s29 + $0x1e0] sm:$0xff] %vm2029_vm2, %v10027_v52  ;;  %v10028_v41 = vmax.f32 %v9900_v14, 0.0  ;;  %v13043_v34 = vadd.f32 %v9314_v57, %v6430_v59  ;;  %v12385_v10 = vpop.f32.mrb[66].mxu1  ;;  %v12913_v37 = vpop.f32.mrb[66].mxu0 }
 0x530   : > { %10158 = vst.msk [vmem:[%s17463_s29 + $0x1f8] sm:$0xff] %vm2029_vm2, %v10030_v47  ;;  %v9770_v62 = vmul.f32 %v13042_v0, %v17440_v22  ;;  %v13044_v12 = vadd.f32 %v12913_v37, %v12385_v10  ;;  %v6433_v9 = vpop.f32.mrb[67].mxu1  ;;  %v9317_v63 = vpop.f32.mrb[67].mxu0 }
 0x531   : > { %10156 = vst.msk [vmem:[%s17463_s29 + $0x1e8] sm:$0xff] %vm2029_vm2, %v10028_v41  ;;  %v9768_v48 = vmul.f32 %v13043_v34, %v17440_v22  ;;  %v13045_v18 = vadd.f32 %v9317_v63, %v6433_v9 }
 0x532   : > { %v9905_v40 = vadd.f32 %v17446_v45, %v9770_v62  ;;  %v9771_v39 = vmul.f32 %v13044_v12, %v17440_v22 }
 0x533   : > { %v9903_v29 = vadd.f32 %v17446_v45, %v9768_v48  ;;  %v9769_v61 = vmul.f32 %v13045_v18, %v17440_v22 }
 0x534   : > { %v10033_v60 = vmax.f32 %v9905_v40, 0.0  ;;  %v9906_v13 = vadd.f32 %v17446_v45, %v9771_v39 }
 0x535   : > { %v10031_v42 = vmax.f32 %v9903_v29, 0.0  ;;  %v9904_v4 = vadd.f32 %v17446_v45, %v9769_v61  ;;  %v12388_v43 = vpop.f32.mrb[68].mxu1  ;;  %v12916_v1 = vpop.f32.mrb[68].mxu0 }
 0x536   : > { %10161 = vst.msk [vmem:[%s17463_s29 + $0x210] sm:$0xff] %vm2029_vm2, %v10033_v60  ;;  %v10034_v3 = vmax.f32 %v9906_v13, 0.0  ;;  %v13046_v33 = vadd.f32 %v12916_v1, %v12388_v43  ;;  %v6446_v49 = vpop.f32.mrb[69].mxu1  ;;  %v9330_v2 = vpop.f32.mrb[69].mxu0 }
 0x537   : > { %10159 = vst.msk [vmem:[%s17463_s29 + $0x200] sm:$0xff] %vm2029_vm2, %v10031_v42  ;;  %v10032_v23 = vmax.f32 %v9904_v4, 0.0  ;;  %v13047_v55 = vadd.f32 %v9330_v2, %v6446_v49  ;;  %v12389_v16 = vpop.f32.mrb[70].mxu1  ;;  %v12917_v26 = vpop.f32.mrb[70].mxu0  ;;  %v17872_v4 = vld [vmem:[%s18097_s2] ss:$0 sm:$0xff] }
 0x538   : > { %10162 = vst.msk [vmem:[%s17463_s29 + $0x218] sm:$0xff] %vm2029_vm2, %v10034_v3  ;;  %v9774_v58 = vmul.f32 %v13046_v33, %v17440_v22  ;;  %v13048_v6 = vadd.f32 %v12917_v26, %v12389_v16  ;;  %v6449_v51 = vpop.f32.mrb[71].mxu1  ;;  %v9333_v32 = vpop.f32.mrb[71].mxu0  ;;  %v17878_v3 = vld [vmem:[%s18098_s3] ss:$0 sm:$0xff] }
 0x539   : > { %10160 = vst.msk [vmem:[%s17463_s29 + $0x208] sm:$0xff] %vm2029_vm2, %v10032_v23  ;;  %v9772_v56 = vmul.f32 %v13047_v55, %v17440_v22  ;;  %v13049_v20 = vadd.f32 %v9333_v32, %v6449_v51 }
 0x53a   : > { %v9909_v54 = vadd.f32 %v17446_v45, %v9774_v58  ;;  %v9775_v19 = vmul.f32 %v13048_v6, %v17440_v22 }
 0x53b   : > { %v9907_v8 = vadd.f32 %v17446_v45, %v9772_v56  ;;  %v9773_v36 = vmul.f32 %v13049_v20, %v17440_v22 }
 0x53c   : > { %v10037_v30 = vmax.f32 %v9909_v54, 0.0  ;;  %v9910_v11 = vadd.f32 %v17446_v45, %v9775_v19 }
 0x53d   : > { %v10035_v53 = vmax.f32 %v9907_v8, 0.0  ;;  %v9908_v17 = vadd.f32 %v17446_v45, %v9773_v36  ;;  %v12392_v28 = vpop.f32.mrb[72].mxu1  ;;  %v12920_v5 = vpop.f32.mrb[72].mxu0 }
 0x53e   : > { %10165 = vst.msk [vmem:[%s17463_s29 + $0x230] sm:$0xff] %vm2029_vm2, %v10037_v30  ;;  %v10038_v15 = vmax.f32 %v9910_v11, 0.0  ;;  %v13050_v35 = vadd.f32 %v12920_v5, %v12392_v28  ;;  %v6462_v25 = vpop.f32.mrb[73].mxu1  ;;  %v9346_v31 = vpop.f32.mrb[73].mxu0 }
 0x53f   : > { %10163 = vst.msk [vmem:[%s17463_s29 + $0x220] sm:$0xff] %vm2029_vm2, %v10035_v53  ;;  %v10036_v7 = vmax.f32 %v9908_v17, 0.0  ;;  %v13051_v38 = vadd.f32 %v9346_v31, %v6462_v25  ;;  %v12393_v27 = vpop.f32.mrb[74].mxu1  ;;  %v12921_v21 = vpop.f32.mrb[74].mxu0 }
 0x540   : > { %10166 = vst.msk [vmem:[%s17463_s29 + $0x238] sm:$0xff] %vm2029_vm2, %v10038_v15  ;;  %v9778_v24 = vmul.f32 %v13050_v35, %v17440_v22  ;;  %v13052_v46 = vadd.f32 %v12921_v21, %v12393_v27  ;;  %v6465_v52 = vpop.f32.mrb[75].mxu1  ;;  %v9349_v14 = vpop.f32.mrb[75].mxu0 }
 0x541   : > { %10164 = vst.msk [vmem:[%s17463_s29 + $0x228] sm:$0xff] %vm2029_vm2, %v10036_v7  ;;  %v9776_v50 = vmul.f32 %v13051_v38, %v17440_v22  ;;  %v13053_v44 = vadd.f32 %v9349_v14, %v6465_v52 }
 0x542   : > { %v9913_v47 = vadd.f32 %v17446_v45, %v9778_v24  ;;  %v9779_v0 = vmul.f32 %v13052_v46, %v17440_v22 }
 0x543   : > { %v9911_v59 = vadd.f32 %v17446_v45, %v9776_v50  ;;  %v9777_v57 = vmul.f32 %v13053_v44, %v17440_v22 }
 0x544   : > { %v10041_v41 = vmax.f32 %v9913_v47, 0.0  ;;  %v9914_v34 = vadd.f32 %v17446_v45, %v9779_v0 }
 0x545   : > { %v10039_v10 = vmax.f32 %v9911_v59, 0.0  ;;  %v9912_v37 = vadd.f32 %v17446_v45, %v9777_v57  ;;  %v12396_v62 = vpop.f32.mrb[76].mxu1  ;;  %v12924_v12 = vpop.f32.mrb[76].mxu0 }
 0x546   : > { %10169 = vst.msk [vmem:[%s17463_s29 + $0x250] sm:$0xff] %vm2029_vm2, %v10041_v41  ;;  %v10042_v9 = vmax.f32 %v9914_v34, 0.0  ;;  %v13054_v63 = vadd.f32 %v12924_v12, %v12396_v62  ;;  %v6478_v48 = vpop.f32.mrb[77].mxu1  ;;  %v9362_v18 = vpop.f32.mrb[77].mxu0 }
 0x547   : > { %10167 = vst.msk [vmem:[%s17463_s29 + $0x240] sm:$0xff] %vm2029_vm2, %v10039_v10  ;;  %v10040_v40 = vmax.f32 %v9912_v37, 0.0  ;;  %v13055_v39 = vadd.f32 %v9362_v18, %v6478_v48  ;;  %v12397_v29 = vpop.f32.mrb[78].mxu1  ;;  %v12925_v61 = vpop.f32.mrb[78].mxu0 }
 0x548   : > { %10170 = vst.msk [vmem:[%s17463_s29 + $0x258] sm:$0xff] %vm2029_vm2, %v10042_v9  ;;  %v9782_v60 = vmul.f32 %v13054_v63, %v17440_v22  ;;  %v13056_v45 = vadd.f32 %v12925_v61, %v12397_v29  ;;  %v6481_v13 = vpop.f32.mrb[79].mxu1  ;;  %v9365_v42 = vpop.f32.mrb[79].mxu0 }
 0x549   : > { %10168 = vst.msk [vmem:[%s17463_s29 + $0x248] sm:$0xff] %vm2029_vm2, %v10040_v40  ;;  %v9780_v43 = vmul.f32 %v17872_v4, %v13055_v39  ;;  %v13057_v1 = vadd.f32 %v9365_v42, %v6481_v13 }
 0x54a   : > { %v9917_v22 = vadd.f32 %v17878_v3, %v9782_v60  ;;  %v9783_v33 = vmul.f32 %v17872_v4, %v13056_v45 }
 0x54b   : > { %v9915_v49 = vadd.f32 %v17878_v3, %v9780_v43  ;;  %v9781_v2 = vmul.f32 %v17872_v4, %v13057_v1 }
 0x54c   : > { %v10045_v23 = vmax.f32 %v9917_v22, 0.0  ;;  %v9918_v55 = vadd.f32 %v17878_v3, %v9783_v33 }
 0x54d   : > { %v10043_v16 = vmax.f32 %v9915_v49, 0.0  ;;  %v9916_v26 = vadd.f32 %v17878_v3, %v9781_v2  ;;  %v12400_v58 = vpop.f32.mrb[80].mxu1  ;;  %v12928_v6 = vpop.f32.mrb[80].mxu0 }
 0x54e   : > { %10173 = vst.msk [vmem:[%s17463_s29 + $0x270] sm:$0xff] %vm2029_vm2, %v10045_v23  ;;  %v10046_v51 = vmax.f32 %v9918_v55, 0.0  ;;  %v13058_v32 = vadd.f32 %v12928_v6, %v12400_v58  ;;  %v6494_v56 = vpop.f32.mrb[81].mxu1  ;;  %v9378_v20 = vpop.f32.mrb[81].mxu0 }
 0x54f   : > { %10171 = vst.msk [vmem:[%s17463_s29 + $0x260] sm:$0xff] %vm2029_vm2, %v10043_v16  ;;  %v10044_v54 = vmax.f32 %v9916_v26, 0.0  ;;  %v13059_v19 = vadd.f32 %v9378_v20, %v6494_v56  ;;  %v12401_v8 = vpop.f32.mrb[82].mxu1  ;;  %v12929_v36 = vpop.f32.mrb[82].mxu0 }
 0x550   : > { %10174 = vst.msk [vmem:[%s17463_s29 + $0x278] sm:$0xff] %vm2029_vm2, %v10046_v51  ;;  %v9786_v30 = vmul.f32 %v17872_v4, %v13058_v32  ;;  %v13060_v11 = vadd.f32 %v12929_v36, %v12401_v8  ;;  %v6497_v53 = vpop.f32.mrb[83].mxu1  ;;  %v9381_v17 = vpop.f32.mrb[83].mxu0 }
 0x551   : > { %10172 = vst.msk [vmem:[%s17463_s29 + $0x268] sm:$0xff] %vm2029_vm2, %v10044_v54  ;;  %v9784_v28 = vmul.f32 %v17872_v4, %v13059_v19  ;;  %v13061_v5 = vadd.f32 %v9381_v17, %v6497_v53 }
 0x552   : > { %v9921_v15 = vadd.f32 %v17878_v3, %v9786_v30  ;;  %v9787_v35 = vmul.f32 %v17872_v4, %v13060_v11 }
 0x553   : > { %v9919_v25 = vadd.f32 %v17878_v3, %v9784_v28  ;;  %v9785_v31 = vmul.f32 %v17872_v4, %v13061_v5 }
 0x554   : > { %v10049_v7 = vmax.f32 %v9921_v15, 0.0  ;;  %v9922_v38 = vadd.f32 %v17878_v3, %v9787_v35 }
 0x555   : > { %v10047_v27 = vmax.f32 %v9919_v25, 0.0  ;;  %v9920_v21 = vadd.f32 %v17878_v3, %v9785_v31  ;;  %v12404_v24 = vpop.f32.mrb[84].mxu1  ;;  %v12932_v46 = vpop.f32.mrb[84].mxu0 }
 0x556   : > { %10177 = vst.msk [vmem:[%s17463_s29 + $0x290] sm:$0xff] %vm2029_vm2, %v10049_v7  ;;  %v10050_v52 = vmax.f32 %v9922_v38, 0.0  ;;  %v13062_v14 = vadd.f32 %v12932_v46, %v12404_v24  ;;  %v6510_v50 = vpop.f32.mrb[85].mxu1  ;;  %v9394_v44 = vpop.f32.mrb[85].mxu0 }
 0x557   : > { %10175 = vst.msk [vmem:[%s17463_s29 + $0x280] sm:$0xff] %vm2029_vm2, %v10047_v27  ;;  %v10048_v47 = vmax.f32 %v9920_v21, 0.0  ;;  %v13063_v0 = vadd.f32 %v9394_v44, %v6510_v50  ;;  %v12405_v59 = vpop.f32.mrb[86].mxu1  ;;  %v12933_v57 = vpop.f32.mrb[86].mxu0 }
 0x558   : > { %10178 = vst.msk [vmem:[%s17463_s29 + $0x298] sm:$0xff] %vm2029_vm2, %v10050_v52  ;;  %v9790_v41 = vmul.f32 %v17872_v4, %v13062_v14  ;;  %v13064_v34 = vadd.f32 %v12933_v57, %v12405_v59  ;;  %v6513_v10 = vpop.f32.mrb[87].mxu1  ;;  %v9397_v37 = vpop.f32.mrb[87].mxu0 }
 0x559   : > { %10176 = vst.msk [vmem:[%s17463_s29 + $0x288] sm:$0xff] %vm2029_vm2, %v10048_v47  ;;  %v9788_v62 = vmul.f32 %v17872_v4, %v13063_v0  ;;  %v13065_v12 = vadd.f32 %v9397_v37, %v6513_v10 }
 0x55a   : > { %v9925_v9 = vadd.f32 %v17878_v3, %v9790_v41  ;;  %v9791_v63 = vmul.f32 %v17872_v4, %v13064_v34 }
 0x55b   : > { %v9923_v48 = vadd.f32 %v17878_v3, %v9788_v62  ;;  %v9789_v18 = vmul.f32 %v17872_v4, %v13065_v12 }
 0x55c   : > { %v10053_v40 = vmax.f32 %v9925_v9, 0.0  ;;  %v9926_v39 = vadd.f32 %v17878_v3, %v9791_v63 }
 0x55d   : > { %v10051_v29 = vmax.f32 %v9923_v48, 0.0  ;;  %v9924_v61 = vadd.f32 %v17878_v3, %v9789_v18  ;;  %v12408_v60 = vpop.f32.mrb[88].mxu1  ;;  %v12936_v45 = vpop.f32.mrb[88].mxu0 }
 0x55e   : > { %10181 = vst.msk [vmem:[%s17463_s29 + $0x2b0] sm:$0xff] %vm2029_vm2, %v10053_v40  ;;  %v10054_v13 = vmax.f32 %v9926_v39, 0.0  ;;  %v13066_v42 = vadd.f32 %v12936_v45, %v12408_v60  ;;  %v6526_v43 = vpop.f32.mrb[89].mxu1  ;;  %v9410_v1 = vpop.f32.mrb[89].mxu0 }
 0x55f   : > { %10179 = vst.msk [vmem:[%s17463_s29 + $0x2a0] sm:$0xff] %vm2029_vm2, %v10051_v29  ;;  %v10052_v22 = vmax.f32 %v9924_v61, 0.0  ;;  %v13067_v33 = vadd.f32 %v9410_v1, %v6526_v43  ;;  %v12409_v49 = vpop.f32.mrb[90].mxu1  ;;  %v12937_v2 = vpop.f32.mrb[90].mxu0 }
 0x560   : > { %10182 = vst.msk [vmem:[%s17463_s29 + $0x2b8] sm:$0xff] %vm2029_vm2, %v10054_v13  ;;  %v9794_v23 = vmul.f32 %v17872_v4, %v13066_v42  ;;  %v13068_v55 = vadd.f32 %v12937_v2, %v12409_v49  ;;  %v6529_v16 = vpop.f32.mrb[91].mxu1  ;;  %v9413_v26 = vpop.f32.mrb[91].mxu0 }
 0x561   : > { %10180 = vst.msk [vmem:[%s17463_s29 + $0x2a8] sm:$0xff] %vm2029_vm2, %v10052_v22  ;;  %v9792_v58 = vmul.f32 %v17872_v4, %v13067_v33  ;;  %v13069_v6 = vadd.f32 %v9413_v26, %v6529_v16 }
 0x562   : > { %v9929_v51 = vadd.f32 %v17878_v3, %v9794_v23  ;;  %v9795_v32 = vmul.f32 %v17872_v4, %v13068_v55 }
 0x563   : > { %v9927_v56 = vadd.f32 %v17878_v3, %v9792_v58  ;;  %v9793_v20 = vmul.f32 %v17872_v4, %v13069_v6 }
 0x564   : > { %v10057_v54 = vmax.f32 %v9929_v51, 0.0  ;;  %v9930_v19 = vadd.f32 %v17878_v3, %v9795_v32 }
 0x565   : > { %v10055_v8 = vmax.f32 %v9927_v56, 0.0  ;;  %v9928_v36 = vadd.f32 %v17878_v3, %v9793_v20  ;;  %v12412_v30 = vpop.f32.mrb[92].mxu1  ;;  %v12940_v11 = vpop.f32.mrb[92].mxu0 }
 0x566   : > { %10185 = vst.msk [vmem:[%s17463_s29 + $0x2d0] sm:$0xff] %vm2029_vm2, %v10057_v54  ;;  %v10058_v53 = vmax.f32 %v9930_v19, 0.0  ;;  %v13070_v17 = vadd.f32 %v12940_v11, %v12412_v30  ;;  %v6542_v28 = vpop.f32.mrb[93].mxu1  ;;  %v9426_v5 = vpop.f32.mrb[93].mxu0 }
 0x567   : > { %10183 = vst.msk [vmem:[%s17463_s29 + $0x2c0] sm:$0xff] %vm2029_vm2, %v10055_v8  ;;  %v10056_v15 = vmax.f32 %v9928_v36, 0.0  ;;  %v13071_v35 = vadd.f32 %v9426_v5, %v6542_v28  ;;  %v12413_v25 = vpop.f32.mrb[94].mxu1  ;;  %v12941_v31 = vpop.f32.mrb[94].mxu0 }
 0x568   : > { %10186 = vst.msk [vmem:[%s17463_s29 + $0x2d8] sm:$0xff] %vm2029_vm2, %v10058_v53  ;;  %v9798_v7 = vmul.f32 %v17872_v4, %v13070_v17  ;;  %v13072_v38 = vadd.f32 %v12941_v31, %v12413_v25  ;;  %v6545_v27 = vpop.f32.mrb[95].mxu1  ;;  %v9429_v21 = vpop.f32.mrb[95].mxu0 }
 0x569   : > { %10184 = vst.msk [vmem:[%s17463_s29 + $0x2c8] sm:$0xff] %vm2029_vm2, %v10056_v15  ;;  %v9796_v24 = vmul.f32 %v17872_v4, %v13071_v35  ;;  %v13073_v46 = vadd.f32 %v9429_v21, %v6545_v27 }
 0x56a   : > { %v9933_v52 = vadd.f32 %v17878_v3, %v9798_v7  ;;  %v9799_v14 = vmul.f32 %v17872_v4, %v13072_v38 }
 0x56b   : > { %v9931_v50 = vadd.f32 %v17878_v3, %v9796_v24  ;;  %v9797_v44 = vmul.f32 %v17872_v4, %v13073_v46 }
 0x56c   : > { %v10061_v47 = vmax.f32 %v9933_v52, 0.0  ;;  %v9934_v0 = vadd.f32 %v17878_v3, %v9799_v14 }
 0x56d   : > { %v10059_v59 = vmax.f32 %v9931_v50, 0.0  ;;  %v9932_v57 = vadd.f32 %v17878_v3, %v9797_v44  ;;  %v12416_v41 = vpop.f32.mrb[96].mxu1  ;;  %v12944_v34 = vpop.f32.mrb[96].mxu0 }
 0x56e   : > { %10189 = vst.msk [vmem:[%s17463_s29 + $0x2f0] sm:$0xff] %vm2029_vm2, %v10061_v47  ;;  %v10062_v10 = vmax.f32 %v9934_v0, 0.0  ;;  %v13074_v37 = vadd.f32 %v12944_v34, %v12416_v41  ;;  %v6558_v62 = vpop.f32.mrb[97].mxu1  ;;  %v9442_v12 = vpop.f32.mrb[97].mxu0 }
 0x56f   : > { %10187 = vst.msk [vmem:[%s17463_s29 + $0x2e0] sm:$0xff] %vm2029_vm2, %v10059_v59  ;;  %v10060_v9 = vmax.f32 %v9932_v57, 0.0  ;;  %v13075_v63 = vadd.f32 %v9442_v12, %v6558_v62  ;;  %v12417_v48 = vpop.f32.mrb[98].mxu1  ;;  %v12945_v18 = vpop.f32.mrb[98].mxu0 }
 0x570   : > { %10190 = vst.msk [vmem:[%s17463_s29 + $0x2f8] sm:$0xff] %vm2029_vm2, %v10062_v10  ;;  %v9802_v40 = vmul.f32 %v17872_v4, %v13074_v37  ;;  %v13076_v39 = vadd.f32 %v12945_v18, %v12417_v48  ;;  %v6561_v29 = vpop.f32.mrb[99].mxu1  ;;  %v9445_v61 = vpop.f32.mrb[99].mxu0 }
 0x571   : > { %10188 = vst.msk [vmem:[%s17463_s29 + $0x2e8] sm:$0xff] %vm2029_vm2, %v10060_v9  ;;  %v9800_v60 = vmul.f32 %v17872_v4, %v13075_v63  ;;  %v13077_v45 = vadd.f32 %v9445_v61, %v6561_v29 }
 0x572   : > { %v9937_v13 = vadd.f32 %v17878_v3, %v9802_v40  ;;  %v9803_v42 = vmul.f32 %v17872_v4, %v13076_v39 }
 0x573   : > { %v9935_v43 = vadd.f32 %v17878_v3, %v9800_v60  ;;  %v9801_v1 = vmul.f32 %v17872_v4, %v13077_v45 }
 0x574   : > { %v10065_v22 = vmax.f32 %v9937_v13, 0.0  ;;  %v9938_v33 = vadd.f32 %v17878_v3, %v9803_v42 }
 0x575   : > { %v10063_v49 = vmax.f32 %v9935_v43, 0.0  ;;  %v9936_v2 = vadd.f32 %v17878_v3, %v9801_v1  ;;  %v12420_v23 = vpop.f32.mrb[100].mxu1  ;;  %v12948_v55 = vpop.f32.mrb[100].mxu0 }
 0x576   : > { %10193 = vst.msk [vmem:[%s17463_s29 + $0x310] sm:$0xff] %vm2029_vm2, %v10065_v22  ;;  %v10066_v16 = vmax.f32 %v9938_v33, 0.0  ;;  %v13078_v26 = vadd.f32 %v12948_v55, %v12420_v23  ;;  %v6574_v58 = vpop.f32.mrb[101].mxu1  ;;  %v9458_v6 = vpop.f32.mrb[101].mxu0 }
 0x577   : > { %10191 = vst.msk [vmem:[%s17463_s29 + $0x300] sm:$0xff] %vm2029_vm2, %v10063_v49  ;;  %v10064_v51 = vmax.f32 %v9936_v2, 0.0  ;;  %v13079_v32 = vadd.f32 %v9458_v6, %v6574_v58  ;;  %v12421_v56 = vpop.f32.mrb[102].mxu1  ;;  %v12949_v20 = vpop.f32.mrb[102].mxu0 }
 0x578   : > { %10194 = vst.msk [vmem:[%s17463_s29 + $0x318] sm:$0xff] %vm2029_vm2, %v10066_v16  ;;  %v9806_v54 = vmul.f32 %v17872_v4, %v13078_v26  ;;  %v13080_v19 = vadd.f32 %v12949_v20, %v12421_v56  ;;  %v6577_v8 = vpop.f32.mrb[103].mxu1  ;;  %v9461_v36 = vpop.f32.mrb[103].mxu0 }
 0x579   : > { %10192 = vst.msk [vmem:[%s17463_s29 + $0x308] sm:$0xff] %vm2029_vm2, %v10064_v51  ;;  %v9804_v30 = vmul.f32 %v17872_v4, %v13079_v32  ;;  %v13081_v11 = vadd.f32 %v9461_v36, %v6577_v8 }
 0x57a   : > { %v9941_v53 = vadd.f32 %v17878_v3, %v9806_v54  ;;  %v9807_v17 = vmul.f32 %v17872_v4, %v13080_v19 }
 0x57b   : > { %v9939_v28 = vadd.f32 %v17878_v3, %v9804_v30  ;;  %v9805_v5 = vmul.f32 %v17872_v4, %v13081_v11 }
 0x57c   : > { %v10069_v15 = vmax.f32 %v9941_v53, 0.0  ;;  %v9942_v35 = vadd.f32 %v17878_v3, %v9807_v17 }
 0x57d   : > { %v10067_v25 = vmax.f32 %v9939_v28, 0.0  ;;  %v9940_v31 = vadd.f32 %v17878_v3, %v9805_v5  ;;  %v12424_v7 = vpop.f32.mrb[104].mxu1  ;;  %v12952_v38 = vpop.f32.mrb[104].mxu0 }
 0x57e   : > { %10197 = vst.msk [vmem:[%s17463_s29 + $0x330] sm:$0xff] %vm2029_vm2, %v10069_v15  ;;  %v10070_v27 = vmax.f32 %v9942_v35, 0.0  ;;  %v13082_v21 = vadd.f32 %v12952_v38, %v12424_v7  ;;  %v6590_v24 = vpop.f32.mrb[105].mxu1  ;;  %v9474_v46 = vpop.f32.mrb[105].mxu0 }
 0x57f   : > { %10195 = vst.msk [vmem:[%s17463_s29 + $0x320] sm:$0xff] %vm2029_vm2, %v10067_v25  ;;  %v10068_v52 = vmax.f32 %v9940_v31, 0.0  ;;  %v13083_v14 = vadd.f32 %v9474_v46, %v6590_v24  ;;  %v12425_v50 = vpop.f32.mrb[106].mxu1  ;;  %v12953_v44 = vpop.f32.mrb[106].mxu0 }
 0x580   : > { %10198 = vst.msk [vmem:[%s17463_s29 + $0x338] sm:$0xff] %vm2029_vm2, %v10070_v27  ;;  %v9810_v47 = vmul.f32 %v17872_v4, %v13082_v21  ;;  %v13084_v0 = vadd.f32 %v12953_v44, %v12425_v50  ;;  %v6593_v59 = vpop.f32.mrb[107].mxu1  ;;  %v9477_v57 = vpop.f32.mrb[107].mxu0 }
 0x581   : > { %10196 = vst.msk [vmem:[%s17463_s29 + $0x328] sm:$0xff] %vm2029_vm2, %v10068_v52  ;;  %v9808_v41 = vmul.f32 %v17872_v4, %v13083_v14  ;;  %v13085_v34 = vadd.f32 %v9477_v57, %v6593_v59 }
 0x582   : > { %v9945_v10 = vadd.f32 %v17878_v3, %v9810_v47  ;;  %v9811_v37 = vmul.f32 %v17872_v4, %v13084_v0 }
 0x583   : > { %v9943_v62 = vadd.f32 %v17878_v3, %v9808_v41  ;;  %v9809_v12 = vmul.f32 %v17872_v4, %v13085_v34 }
 0x584   : > { %v10073_v9 = vmax.f32 %v9945_v10, 0.0  ;;  %v9946_v63 = vadd.f32 %v17878_v3, %v9811_v37 }
 0x585   : > { %v10071_v48 = vmax.f32 %v9943_v62, 0.0  ;;  %v9944_v18 = vadd.f32 %v17878_v3, %v9809_v12  ;;  %v12428_v40 = vpop.f32.mrb[108].mxu1  ;;  %v12956_v39 = vpop.f32.mrb[108].mxu0 }
 0x586   : > { %10201 = vst.msk [vmem:[%s17463_s29 + $0x350] sm:$0xff] %vm2029_vm2, %v10073_v9  ;;  %v10074_v29 = vmax.f32 %v9946_v63, 0.0  ;;  %v13086_v61 = vadd.f32 %v12956_v39, %v12428_v40  ;;  %v6606_v60 = vpop.f32.mrb[109].mxu1  ;;  %v9490_v45 = vpop.f32.mrb[109].mxu0 }
 0x587   : > { %10199 = vst.msk [vmem:[%s17463_s29 + $0x340] sm:$0xff] %vm2029_vm2, %v10071_v48  ;;  %v10072_v13 = vmax.f32 %v9944_v18, 0.0  ;;  %v13087_v42 = vadd.f32 %v9490_v45, %v6606_v60  ;;  %v12429_v43 = vpop.f32.mrb[110].mxu1  ;;  %v12957_v1 = vpop.f32.mrb[110].mxu0 }
 0x588   : > { %10202 = vst.msk [vmem:[%s17463_s29 + $0x358] sm:$0xff] %vm2029_vm2, %v10074_v29  ;;  %v9814_v22 = vmul.f32 %v17872_v4, %v13086_v61  ;;  %v13088_v33 = vadd.f32 %v12957_v1, %v12429_v43  ;;  %v6609_v49 = vpop.f32.mrb[111].mxu1  ;;  %v9493_v2 = vpop.f32.mrb[111].mxu0 }
 0x589   : > { %10200 = vst.msk [vmem:[%s17463_s29 + $0x348] sm:$0xff] %vm2029_vm2, %v10072_v13  ;;  %v9812_v23 = vmul.f32 %v17872_v4, %v13087_v42  ;;  %v13089_v55 = vadd.f32 %v9493_v2, %v6609_v49 }
 0x58a   : > { %v9949_v16 = vadd.f32 %v17878_v3, %v9814_v22  ;;  %v9815_v26 = vmul.f32 %v17872_v4, %v13088_v33 }
 0x58b   : > { %v9947_v58 = vadd.f32 %v17878_v3, %v9812_v23  ;;  %v9813_v6 = vmul.f32 %v17872_v4, %v13089_v55 }
 0x58c   : > { %v10077_v51 = vmax.f32 %v9949_v16, 0.0  ;;  %v9950_v32 = vadd.f32 %v17878_v3, %v9815_v26 }
 0x58d   : > { %v10075_v56 = vmax.f32 %v9947_v58, 0.0  ;;  %v9948_v20 = vadd.f32 %v17878_v3, %v9813_v6  ;;  %v12432_v54 = vpop.f32.mrb[112].mxu1  ;;  %v12960_v19 = vpop.f32.mrb[112].mxu0 }
 0x58e   : > { %10205 = vst.msk [vmem:[%s17463_s29 + $0x370] sm:$0xff] %vm2029_vm2, %v10077_v51  ;;  %v10078_v8 = vmax.f32 %v9950_v32, 0.0  ;;  %v13090_v36 = vadd.f32 %v12960_v19, %v12432_v54  ;;  %v6622_v30 = vpop.f32.mrb[113].mxu1  ;;  %v9506_v11 = vpop.f32.mrb[113].mxu0 }
 0x58f   : > { %10203 = vst.msk [vmem:[%s17463_s29 + $0x360] sm:$0xff] %vm2029_vm2, %v10075_v56  ;;  %v10076_v53 = vmax.f32 %v9948_v20, 0.0  ;;  %v13091_v17 = vadd.f32 %v9506_v11, %v6622_v30  ;;  %v12433_v28 = vpop.f32.mrb[114].mxu1  ;;  %v12961_v5 = vpop.f32.mrb[114].mxu0 }
 0x590   : > { %10206 = vst.msk [vmem:[%s17463_s29 + $0x378] sm:$0xff] %vm2029_vm2, %v10078_v8  ;;  %v9818_v15 = vmul.f32 %v17872_v4, %v13090_v36  ;;  %v13092_v35 = vadd.f32 %v12961_v5, %v12433_v28  ;;  %v6625_v25 = vpop.f32.mrb[115].mxu1  ;;  %v9509_v31 = vpop.f32.mrb[115].mxu0 }
 0x591   : > { %10204 = vst.msk [vmem:[%s17463_s29 + $0x368] sm:$0xff] %vm2029_vm2, %v10076_v53  ;;  %v9816_v7 = vmul.f32 %v17872_v4, %v13091_v17  ;;  %v13093_v38 = vadd.f32 %v9509_v31, %v6625_v25 }
 0x592   : > { %v9953_v27 = vadd.f32 %v17878_v3, %v9818_v15  ;;  %v9819_v21 = vmul.f32 %v17872_v4, %v13092_v35 }
 0x593   : > { %v9951_v24 = vadd.f32 %v17878_v3, %v9816_v7  ;;  %v9817_v46 = vmul.f32 %v17872_v4, %v13093_v38 }
 0x594   : > { %v10081_v52 = vmax.f32 %v9953_v27, 0.0  ;;  %v9954_v14 = vadd.f32 %v17878_v3, %v9819_v21 }
 0x595   : > { %v10079_v50 = vmax.f32 %v9951_v24, 0.0  ;;  %v9952_v44 = vadd.f32 %v17878_v3, %v9817_v46  ;;  %v12436_v47 = vpop.f32.mrb[116].mxu1  ;;  %v12964_v0 = vpop.f32.mrb[116].mxu0 }
 0x596   : > { %10209 = vst.msk [vmem:[%s17463_s29 + $0x390] sm:$0xff] %vm2029_vm2, %v10081_v52  ;;  %v10082_v59 = vmax.f32 %v9954_v14, 0.0  ;;  %v13094_v57 = vadd.f32 %v12964_v0, %v12436_v47  ;;  %v6638_v41 = vpop.f32.mrb[117].mxu1  ;;  %v9522_v34 = vpop.f32.mrb[117].mxu0 }
 0x597   : > { %10207 = vst.msk [vmem:[%s17463_s29 + $0x380] sm:$0xff] %vm2029_vm2, %v10079_v50  ;;  %v10080_v10 = vmax.f32 %v9952_v44, 0.0  ;;  %v13095_v37 = vadd.f32 %v9522_v34, %v6638_v41  ;;  %v12437_v62 = vpop.f32.mrb[118].mxu1  ;;  %v12965_v12 = vpop.f32.mrb[118].mxu0 }
 0x598   : > { %10210 = vst.msk [vmem:[%s17463_s29 + $0x398] sm:$0xff] %vm2029_vm2, %v10082_v59  ;;  %v9822_v9 = vmul.f32 %v17872_v4, %v13094_v57  ;;  %v13096_v63 = vadd.f32 %v12965_v12, %v12437_v62  ;;  %v6641_v48 = vpop.f32.mrb[119].mxu1  ;;  %v9525_v18 = vpop.f32.mrb[119].mxu0 }
 0x599   : > { %10208 = vst.msk [vmem:[%s17463_s29 + $0x388] sm:$0xff] %vm2029_vm2, %v10080_v10  ;;  %v9820_v40 = vmul.f32 %v17872_v4, %v13095_v37  ;;  %v13097_v39 = vadd.f32 %v9525_v18, %v6641_v48 }
 0x59a   : > { %v9957_v29 = vadd.f32 %v17878_v3, %v9822_v9  ;;  %v9823_v61 = vmul.f32 %v17872_v4, %v13096_v63 }
 0x59b   : > { %v9955_v60 = vadd.f32 %v17878_v3, %v9820_v40  ;;  %v9821_v45 = vmul.f32 %v17872_v4, %v13097_v39 }
 0x59c   : > { %v10085_v13 = vmax.f32 %v9957_v29, 0.0  ;;  %v9958_v42 = vadd.f32 %v17878_v3, %v9823_v61 }
 0x59d   : > { %v10083_v43 = vmax.f32 %v9955_v60, 0.0  ;;  %v9956_v1 = vadd.f32 %v17878_v3, %v9821_v45  ;;  %v12440_v22 = vpop.f32.mrb[120].mxu1  ;;  %v12968_v33 = vpop.f32.mrb[120].mxu0 }
 0x59e   : > { %10213 = vst.msk [vmem:[%s17463_s29 + $0x3b0] sm:$0xff] %vm2029_vm2, %v10085_v13  ;;  %v10086_v49 = vmax.f32 %v9958_v42, 0.0  ;;  %v13098_v2 = vadd.f32 %v12968_v33, %v12440_v22  ;;  %v6654_v23 = vpop.f32.mrb[121].mxu1  ;;  %v9538_v55 = vpop.f32.mrb[121].mxu0 }
 0x59f   : > { %10211 = vst.msk [vmem:[%s17463_s29 + $0x3a0] sm:$0xff] %vm2029_vm2, %v10083_v43  ;;  %v10084_v16 = vmax.f32 %v9956_v1, 0.0  ;;  %v13099_v26 = vadd.f32 %v9538_v55, %v6654_v23  ;;  %v12441_v58 = vpop.f32.mrb[122].mxu1  ;;  %v12969_v6 = vpop.f32.mrb[122].mxu0 }
 0x5a0   : > { %10214 = vst.msk [vmem:[%s17463_s29 + $0x3b8] sm:$0xff] %vm2029_vm2, %v10086_v49  ;;  %v9826_v51 = vmul.f32 %v17872_v4, %v13098_v2  ;;  %v13100_v32 = vadd.f32 %v12969_v6, %v12441_v58  ;;  %v6657_v56 = vpop.f32.mrb[123].mxu1  ;;  %v9541_v20 = vpop.f32.mrb[123].mxu0 }
 0x5a1   : > { %10212 = vst.msk [vmem:[%s17463_s29 + $0x3a8] sm:$0xff] %vm2029_vm2, %v10084_v16  ;;  %v9824_v54 = vmul.f32 %v17872_v4, %v13099_v26  ;;  %v13101_v19 = vadd.f32 %v9541_v20, %v6657_v56 }
 0x5a2   : > { %v9961_v8 = vadd.f32 %v17878_v3, %v9826_v51  ;;  %v9827_v36 = vmul.f32 %v17872_v4, %v13100_v32 }
 0x5a3   : > { %v9959_v30 = vadd.f32 %v17878_v3, %v9824_v54  ;;  %v9825_v11 = vmul.f32 %v17872_v4, %v13101_v19 }
 0x5a4   : > { %v10089_v53 = vmax.f32 %v9961_v8, 0.0  ;;  %v9962_v17 = vadd.f32 %v17878_v3, %v9827_v36 }
 0x5a5   : > { %v10087_v28 = vmax.f32 %v9959_v30, 0.0  ;;  %v9960_v5 = vadd.f32 %v17878_v3, %v9825_v11  ;;  %v12444_v15 = vpop.f32.mrb[124].mxu1  ;;  %v12972_v35 = vpop.f32.mrb[124].mxu0 }
 0x5a6   : > { %10217 = vst.msk [vmem:[%s17463_s29 + $0x3d0] sm:$0xff] %vm2029_vm2, %v10089_v53  ;;  %v10090_v25 = vmax.f32 %v9962_v17, 0.0  ;;  %v13102_v31 = vadd.f32 %v12972_v35, %v12444_v15  ;;  %v6670_v7 = vpop.f32.mrb[125].mxu1  ;;  %v9554_v38 = vpop.f32.mrb[125].mxu0 }
 0x5a7   : > { %10215 = vst.msk [vmem:[%s17463_s29 + $0x3c0] sm:$0xff] %vm2029_vm2, %v10087_v28  ;;  %v10088_v27 = vmax.f32 %v9960_v5, 0.0  ;;  %v13103_v21 = vadd.f32 %v9554_v38, %v6670_v7  ;;  %v12445_v24 = vpop.f32.mrb[126].mxu1  ;;  %v12973_v46 = vpop.f32.mrb[126].mxu0 }
 0x5a8   : > { %10218 = vst.msk [vmem:[%s17463_s29 + $0x3d8] sm:$0xff] %vm2029_vm2, %v10090_v25  ;;  %v9830_v52 = vmul.f32 %v17872_v4, %v13102_v31  ;;  %v13104_v14 = vadd.f32 %v12973_v46, %v12445_v24  ;;  %v6673_v50 = vpop.f32.mrb[127].mxu1  ;;  %v9557_v44 = vpop.f32.mrb[127].mxu0 }
 0x5a9   : > { %10216 = vst.msk [vmem:[%s17463_s29 + $0x3c8] sm:$0xff] %vm2029_vm2, %v10088_v27  ;;  %v9828_v47 = vmul.f32 %v17872_v4, %v13103_v21  ;;  %v13105_v0 = vadd.f32 %v9557_v44, %v6673_v50 }
 0x5aa   : > { %v9965_v59 = vadd.f32 %v17878_v3, %v9830_v52  ;;  %v9831_v57 = vmul.f32 %v17872_v4, %v13104_v14 }
 0x5ab   : > { %v9963_v41 = vadd.f32 %v17878_v3, %v9828_v47  ;;  %v9829_v34 = vmul.f32 %v17872_v4, %v13105_v0 }
 0x5ac   : > { %v10093_v10 = vmax.f32 %v9965_v59, 0.0  ;;  %v9966_v37 = vadd.f32 %v17878_v3, %v9831_v57 }
 0x5ad   : > { %v10091_v62 = vmax.f32 %v9963_v41, 0.0  ;;  %v9964_v12 = vadd.f32 %v17878_v3, %v9829_v34 }
 0x5ae   : > { %10221 = vst.msk [vmem:[%s17463_s29 + $0x3f0] sm:$0xff] %vm2029_vm2, %v10093_v10  ;;  %v10094_v9 = vmax.f32 %v9966_v37, 0.0 }
 0x5af   : > { %10219 = vst.msk [vmem:[%s17463_s29 + $0x3e0] sm:$0xff] %vm2029_vm2, %v10091_v62  ;;  %v10092_v63 = vmax.f32 %v9964_v12, 0.0 }
 0x5b0   : > { %10222 = vst.msk [vmem:[%s17463_s29 + $0x3f8] sm:$0xff] %vm2029_vm2, %v10094_v9 }
 0x5b1   : > { %10220 = vst.msk [vmem:[%s17463_s29 + $0x3e8] sm:$0xff] %vm2029_vm2, %v10092_v63 }
 0x5b2 PF: > { %s14_s17 = sadd.s32 1, %s14337_s17   ;;  %s18972_s15 = smov %s14333_s16 }
 0x5b3   : > { %p11_p5 = scmp.ge.s32.totalorder %s14_s17, 4   ;;  %s18973_s16 = smov %s18975_s18 }
 0x5b5   :  { %13 = sbr.rel (!%p11_p5) target bundleno = 2 (0x2), region = 74 }

</bundles_post_ra>
